<compile_context>
chip_gen: v6e
topology: v6e:2x2x1
jax: 0.10.0
libtpu: 0.0.40
codegen_flags: <defaults>
</compile_context>

<pallas_src>
import math
import functools

import jax
import jax.numpy as jnp
from jax import lax
from jax.experimental import pallas as pl
from jax.experimental.pallas import tpu as pltpu


def _round_up(x, m):
    return ((x + m - 1) // m) * m


def _cdiv(a, b):
    return (a + b - 1) // b


def _vmem_capacity_bytes():
    """Physical VMEM of the attached TPU generation (per TensorCore)."""
    try:
        info = pltpu.get_tpu_info()
        for attr in ("vmem_capacity_bytes", "vmem_size_bytes", "vmem_bytes"):
            v = getattr(info, attr, None)
            if v:
                return int(v)
    except Exception:
        pass
    return 64 * 1024 * 1024  # conservative fallback: v7x per-TC VMEM


def _estimate_vmem_bytes(nb, dim, n_lanes, tb, feat_itemsize):
    """Conservative VMEM footprint: double-buffered feature tiles, resident
    weights/bias, f32 matmul/logit/prob intermediates, double-buffered outputs."""
    feat_stream = 2 * nb * tb * dim * feat_itemsize
    weights = dim * n_lanes * feat_itemsize + n_lanes * 4
    temps = 4 * tb * n_lanes * 4
    outputs = 2 * (tb * nb + tb) * 4
    return feat_stream + weights + temps + outputs


def _pick_batch_tile(nb, dim, n_lanes, bsz, feat_itemsize, vmem_cap):
    """Largest batch tile (multiple of 8 sublanes) fitting ~45% of this
    generation's VMEM; keeps the parallel grid even for v7x megacore."""
    cap = bsz if bsz < 8 else (bsz // 8) * 8
    budget = int(0.45 * vmem_cap)
    cands = sorted({c for c in (4096, 2048, 1024, 512, 256, 128, cap)
                    if 0 < c <= cap}, reverse=True)
    tb = cands[-1]
    for c in cands:
        if _estimate_vmem_bytes(nb, dim, n_lanes, c, feat_itemsize) <= budget:
            tb = c
            break
    nt = _cdiv(bsz, tb)
    if nt == 1 and bsz >= 2048:   # give v7x's second TensorCore something to do
        nt = 2
    if nt > 1 and nt % 2 == 1:    # avoid one TC idling on an odd tile count
        nt += 1
    if nt > 1:
        tb = min(tb, _round_up(_cdiv(bsz, nt), 8))
    return max(tb, 1)


def _hdc_kernel(feat_ref, w_ref, b_ref, out_ref, mean_ref, *,
                adjust: bool, num_block: int, dot_precision):
    # feat_ref: [NB, TB, D]  VMEM  native layout tile (batch on sublanes, dim on lanes)
    # w_ref:    [D, NP]      VMEM  block-n weight in column n, zero-padded; resident
    # b_ref:    [1, NP]      VMEM  block-n bias in column n, zero-padded; resident
    # out_ref:  [TB, NB]     VMEM  per-block probabilities
    # mean_ref: [TB, 1]      VMEM  ensemble (uniform mean over blocks)
    w = w_ref[...]                                       # hoisted once per tile
    n_lanes = w.shape[1]
    tb = out_ref.shape[0]
    lane = lax.broadcasted_iota(jnp.int32, (1, n_lanes), 1)

    logits = jnp.zeros((tb, n_lanes), jnp.float32)
    for n in range(num_block):                           # num_block is small & static
        # [TB, D] @ [D, NP] on the MXU with f32 accumulation. Only column n is
        # block n's real logit; the padded columns are free MXU fill since the
        # kernel is HBM-bound. The lane-mask select parks block n's logits in
        # lane n, so no cross-lane reduce or 1-wide slicing is ever needed.
        s = jnp.dot(feat_ref[n], w,
                    preferred_element_type=jnp.float32,
                    precision=dot_precision)             # [TB, NP]
        logits = jnp.where(lane == n, s, logits)

    logits = logits + b_ref[...]                         # [1, NP] row broadcast
    probs = jax.nn.sigmoid(logits)                       # EUP
    if adjust:
        probs = 1.25 * probs - 0.125

    probs_nb = probs[:, :num_block]                      # [TB, NB]
    out_ref[...] = probs_nb.astype(out_ref.dtype)
    # Default ensembler: uniform mean over blocks (tile-local: every tile holds all blocks).
    mean_ref[...] = (jnp.sum(probs_nb, axis=1, keepdims=True)
                     * (1.0 / num_block)).astype(mean_ref.dtype)


def combined_hdc_v2_forward(features, weights, biases, *, adjust=True, tb=None):
    """features: [num_block, batch, output_dim]  native handler layout (f32 or bf16)
       weights : [num_block, output_dim]         per-block Linear(output_dim, 1) weight
       biases  : [num_block]                     per-block Linear bias
       returns : (per_block_out [num_block, batch] f32, ensemble_out [batch] f32)"""
    nb, bsz, dim = features.shape
    assert weights.shape == (nb, dim) and biases.shape == (nb,)

    n_lanes = _round_up(nb, 128)          # weight columns padded to a full lane tile
    feat_itemsize = jnp.dtype(features.dtype).itemsize

    # Tiny parameter repack (nb*dim + nb elements) — no pass over the features.
    w_pad = jnp.zeros((dim, n_lanes), dtype=features.dtype)
    w_pad = w_pad.at[:, :nb].set(jnp.transpose(weights).astype(features.dtype))
    b_pad = jnp.zeros((1, n_lanes), jnp.float32)
    b_pad = b_pad.at[0, :nb].set(biases.astype(jnp.float32))

    vmem_cap = _vmem_capacity_bytes()
    cap = bsz if bsz < 8 else (bsz // 8) * 8
    if tb is None:
        tb = _pick_batch_tile(nb, dim, n_lanes, bsz, feat_itemsize, vmem_cap)
    else:
        tb = min(max(int(tb), 8), cap)
        tb = (tb // 8) * 8 if bsz >= 8 else bsz
    nt = _cdiv(bsz, tb)                   # ragged last block handled by Pallas masking

    est = _estimate_vmem_bytes(nb, dim, n_lanes, tb, feat_itemsize)
    vmem_limit = min(int(0.9 * vmem_cap), max(2 * est, 32 * 1024 * 1024))

    # f32 inputs: force the accurate multi-pass MXU path (default would truncate
    # operands to bf16). bf16 inputs are MXU-native with f32 accumulation.
    dot_precision = (lax.Precision.HIGHEST if features.dtype == jnp.float32
                     else lax.Precision.DEFAULT)

    kernel = functools.partial(_hdc_kernel, adjust=adjust, num_block=nb,
                               dot_precision=dot_precision)

    cost = pl.CostEstimate(
        flops=int(2 * nb * bsz * dim),
        transcendentals=int(nb * bsz),
        bytes_accessed=int(nb * bsz * dim * feat_itemsize
                           + dim * n_lanes * feat_itemsize
                           + bsz * (nb + 1) * 4),
    )

    out_bn, mean_b1 = pl.pallas_call(
        kernel,
        out_shape=(
            jax.ShapeDtypeStruct((bsz, nb), jnp.float32),
            jax.ShapeDtypeStruct((bsz, 1), jnp.float32),
        ),
        grid_spec=pltpu.PrefetchScalarGridSpec(
            num_scalar_prefetch=0,
            grid=(nt,),
            in_specs=[
                # Feature stream in its NATIVE [nb, batch, dim] layout — the only
                # per-tile HBM traffic (double-buffered by the Pallas pipeline).
                pl.BlockSpec((nb, tb, dim), lambda i: (0, i, 0)),
                # Weights / bias: constant block index -> resident in VMEM.
                pl.BlockSpec((dim, n_lanes), lambda i: (0, 0)),
                pl.BlockSpec((1, n_lanes), lambda i: (0, 0)),
            ],
            out_specs=[
                pl.BlockSpec((tb, nb), lambda i: (i, 0)),
                pl.BlockSpec((tb, 1), lambda i: (i, 0)),
            ],
        ),
        compiler_params=pltpu.CompilerParams(
            # Batch tiles are independent -> shard across v7x's 2 TensorCores.
            dimension_semantics=("parallel",),
            vmem_limit_bytes=int(vmem_limit),
        ),
        cost_estimate=cost,
    )(features, w_pad, b_pad)

    # Only the tiny [batch, num_block] output is relayouted back to [num_block, batch].
    return jnp.transpose(out_bn), mean_b1[:, 0]


def _kaiming_normal_a_sqrt5(key, shape, fan_in):
    # PyTorch kaiming_normal_(a=sqrt(5), mode='fan_in', nonlinearity='leaky_relu')
    gain = math.sqrt(2.0 / (1.0 + 5.0))
    std = gain / math.sqrt(fan_in)
    return std * jax.random.normal(key, shape, dtype=jnp.float32)


if __name__ == "__main__":
    # Small synthetic shapes consistent with the module's forward:
    #   num_block features of shape [batch, output_dim].
    num_block = 4
    batch = 300            # deliberately not tile-aligned -> exercises ragged masking
    output_dim = 256
    adjust = True

    key = jax.random.PRNGKey(0)
    k_feat, k_w, k_b = jax.random.split(key, 3)

    features = jax.random.normal(
        k_feat, (num_block, batch, output_dim), dtype=jnp.float32)

    w_keys = jax.random.split(k_w, num_block)
    weights = jnp.stack(
        [_kaiming_normal_a_sqrt5(w_keys[i], (output_dim,), output_dim)
         for i in range(num_block)],
        axis=0,
    )
    # init_weights() zeroes the biases; use small non-zero values here so the
    # bias path is actually exercised by the numerical check.
    biases = 0.1 * jax.random.normal(k_b, (num_block,), dtype=jnp.float32)

    # Reference in plain JAX (HIGHEST precision so the f32 comparison is meaningful).
    logits_ref = jnp.einsum("nbd,nd->nb", features, weights,
                            precision=lax.Precision.HIGHEST) + biases[:, None]
    probs_ref = jax.nn.sigmoid(logits_ref)
    if adjust:
        probs_ref = 1.25 * probs_ref - 0.125
    mean_ref = probs_ref.mean(axis=0)

    # f32, explicit small tile -> multi-tile grid with a ragged (masked) last block.
    out_blocks, out_ens = combined_hdc_v2_forward(
        features, weights, biases, adjust=adjust, tb=128)
    jax.block_until_ready((out_blocks, out_ens))
    assert out_blocks.shape == (num_block, batch)
    assert out_ens.shape == (batch,)
    assert jnp.allclose(out_blocks, probs_ref, atol=1e-4), "per-block mismatch (f32, tb=128)"
    assert jnp.allclose(out_ens, mean_ref, atol=1e-4), "ensemble mismatch (f32, tb=128)"

    # f32, auto tile (generation-aware VMEM budget + even parallel grid).
    out_blocks2, out_ens2 = combined_hdc_v2_forward(
        features, weights, biases, adjust=adjust)
    jax.block_until_ready((out_blocks2, out_ens2))
    assert jnp.allclose(out_blocks2, probs_ref, atol=1e-4), "per-block mismatch (f32, auto)"
    assert jnp.allclose(out_ens2, mean_ref, atol=1e-4), "ensemble mismatch (f32, auto)"

    # bf16 feature stream (halves HBM traffic for this memory-bound op).
    out_blocks_bf16, out_ens_bf16 = combined_hdc_v2_forward(
        features.astype(jnp.bfloat16), weights, biases, adjust=adjust)
    jax.block_until_ready((out_blocks_bf16, out_ens_bf16))
    assert jnp.allclose(out_blocks_bf16, probs_ref, atol=5e-2), "per-block mismatch (bf16)"
    assert jnp.allclose(out_ens_bf16, mean_ref, atol=5e-2), "ensemble mismatch (bf16)"

    print("KERNEL_OK")
</pallas_src>

<mosaic_0001>
module attributes {stable_mosaic.version = 11 : i64} {
  func.func @_hdc_kernel(%arg0: i32, %arg1: memref<4x128x256xf32, #tpu.memory_space<vmem>>, %arg2: memref<256x128xf32, #tpu.memory_space<vmem>>, %arg3: memref<1x128xf32, #tpu.memory_space<vmem>>, %arg4: memref<128x4xf32, #tpu.memory_space<vmem>>, %arg5: memref<128x1xf32, #tpu.memory_space<vmem>>) attributes {dimension_semantics = [#tpu.dimension_semantics<parallel>], iteration_bounds = array<i64: 3>, scalar_prefetch = 0 : i64, scratch_operands = 0 : i64, tpu.core_type = #tpu.core_type<tc>, window_params = [{transform_indices = @transform_0, window_bounds = array<i64: 4, 128, 256>}, {pipeline_mode = #tpu.pipeline_mode<synchronous>, transform_indices = @transform_1, window_bounds = array<i64: 256, 128>}, {pipeline_mode = #tpu.pipeline_mode<synchronous>, transform_indices = @transform_2, window_bounds = array<i64: 1, 128>}, {transform_indices = @transform_3, window_bounds = array<i64: 128, 4>}, {transform_indices = @transform_4, window_bounds = array<i64: 128, 1>}]} {
    %c0 = arith.constant 0 : index
    %c0_0 = arith.constant 0 : index
    %0 = vector.load %arg2[%c0, %c0_0] : memref<256x128xf32, #tpu.memory_space<vmem>>, vector<256x128xf32>
    %1 = tpu.iota {dimensions = array<i32: 1>} : vector<1x128xi32>
    %cst = arith.constant 0.000000e+00 : f32
    %2 = vector.broadcast %cst : f32 to vector<128x128xf32>
    %c0_1 = arith.constant 0 : index
    %c0_2 = arith.constant 0 : index
    %c0_3 = arith.constant 0 : index
    %3 = vector.load %arg1[%c0_1, %c0_2, %c0_3] : memref<4x128x256xf32, #tpu.memory_space<vmem>>, vector<1x128x256xf32>
    %4 = vector.shape_cast %3 : vector<1x128x256xf32> to vector<128x256xf32>
    %cst_4 = arith.constant dense<0.000000e+00> : vector<128x128xf32>
    %5 = tpu.matmul %4, %0, %cst_4 {dimension_numbers = #tpu.dot_dimension_numbers<[1], [0], [0], [1], [0, 0, 1, 1], [], []>, precision = #tpu.contract_precision<fp32>} : vector<128x256xf32>, vector<256x128xf32>, vector<128x128xf32> -> vector<128x128xf32>
    %c0_i32 = arith.constant 0 : i32
    %6 = vector.broadcast %c0_i32 : i32 to vector<1x128xi32>
    %7 = arith.cmpi eq, %1, %6 : vector<1x128xi32>
    %8 = vector.shape_cast %7 : vector<1x128xi1> to vector<1x128xi1>
    %9 = vector.broadcast %8 : vector<1x128xi1> to vector<128x128xi1>
    %10 = arith.select %9, %5, %2 : vector<128x128xi1>, vector<128x128xf32>
    %c1 = arith.constant 1 : index
    %c0_5 = arith.constant 0 : index
    %c0_6 = arith.constant 0 : index
    %11 = vector.load %arg1[%c1, %c0_5, %c0_6] : memref<4x128x256xf32, #tpu.memory_space<vmem>>, vector<1x128x256xf32>
    %12 = vector.shape_cast %11 : vector<1x128x256xf32> to vector<128x256xf32>
    %cst_7 = arith.constant dense<0.000000e+00> : vector<128x128xf32>
    %13 = tpu.matmul %12, %0, %cst_7 {dimension_numbers = #tpu.dot_dimension_numbers<[1], [0], [0], [1], [0, 0, 1, 1], [], []>, precision = #tpu.contract_precision<fp32>} : vector<128x256xf32>, vector<256x128xf32>, vector<128x128xf32> -> vector<128x128xf32>
    %c1_i32 = arith.constant 1 : i32
    %14 = vector.broadcast %c1_i32 : i32 to vector<1x128xi32>
    %15 = arith.cmpi eq, %1, %14 : vector<1x128xi32>
    %16 = vector.shape_cast %15 : vector<1x128xi1> to vector<1x128xi1>
    %17 = vector.broadcast %16 : vector<1x128xi1> to vector<128x128xi1>
    %18 = arith.select %17, %13, %10 : vector<128x128xi1>, vector<128x128xf32>
    %c2 = arith.constant 2 : index
    %c0_8 = arith.constant 0 : index
    %c0_9 = arith.constant 0 : index
    %19 = vector.load %arg1[%c2, %c0_8, %c0_9] : memref<4x128x256xf32, #tpu.memory_space<vmem>>, vector<1x128x256xf32>
    %20 = vector.shape_cast %19 : vector<1x128x256xf32> to vector<128x256xf32>
    %cst_10 = arith.constant dense<0.000000e+00> : vector<128x128xf32>
    %21 = tpu.matmul %20, %0, %cst_10 {dimension_numbers = #tpu.dot_dimension_numbers<[1], [0], [0], [1], [0, 0, 1, 1], [], []>, precision = #tpu.contract_precision<fp32>} : vector<128x256xf32>, vector<256x128xf32>, vector<128x128xf32> -> vector<128x128xf32>
    %c2_i32 = arith.constant 2 : i32
    %22 = vector.broadcast %c2_i32 : i32 to vector<1x128xi32>
    %23 = arith.cmpi eq, %1, %22 : vector<1x128xi32>
    %24 = vector.shape_cast %23 : vector<1x128xi1> to vector<1x128xi1>
    %25 = vector.broadcast %24 : vector<1x128xi1> to vector<128x128xi1>
    %26 = arith.select %25, %21, %18 : vector<128x128xi1>, vector<128x128xf32>
    %c3 = arith.constant 3 : index
    %c0_11 = arith.constant 0 : index
    %c0_12 = arith.constant 0 : index
    %27 = vector.load %arg1[%c3, %c0_11, %c0_12] : memref<4x128x256xf32, #tpu.memory_space<vmem>>, vector<1x128x256xf32>
    %28 = vector.shape_cast %27 : vector<1x128x256xf32> to vector<128x256xf32>
    %cst_13 = arith.constant dense<0.000000e+00> : vector<128x128xf32>
    %29 = tpu.matmul %28, %0, %cst_13 {dimension_numbers = #tpu.dot_dimension_numbers<[1], [0], [0], [1], [0, 0, 1, 1], [], []>, precision = #tpu.contract_precision<fp32>} : vector<128x256xf32>, vector<256x128xf32>, vector<128x128xf32> -> vector<128x128xf32>
    %c3_i32 = arith.constant 3 : i32
    %30 = vector.broadcast %c3_i32 : i32 to vector<1x128xi32>
    %31 = arith.cmpi eq, %1, %30 : vector<1x128xi32>
    %32 = vector.shape_cast %31 : vector<1x128xi1> to vector<1x128xi1>
    %33 = vector.broadcast %32 : vector<1x128xi1> to vector<128x128xi1>
    %34 = arith.select %33, %29, %26 : vector<128x128xi1>, vector<128x128xf32>
    %c0_14 = arith.constant 0 : index
    %c0_15 = arith.constant 0 : index
    %35 = vector.load %arg3[%c0_14, %c0_15] : memref<1x128xf32, #tpu.memory_space<vmem>>, vector<1x128xf32>
    %36 = vector.broadcast %35 : vector<1x128xf32> to vector<128x128xf32>
    %37 = arith.addf %34, %36 : vector<128x128xf32>
    %38 = arith.negf %37 : vector<128x128xf32>
    %39 = math.exp %38 : vector<128x128xf32>
    %cst_16 = arith.constant 1.000000e+00 : f32
    %40 = vector.broadcast %cst_16 : f32 to vector<128x128xf32>
    %41 = arith.addf %40, %39 : vector<128x128xf32>
    %42 = arith.divf %40, %41 : vector<128x128xf32>
    %cst_17 = arith.constant 1.250000e+00 : f32
    %43 = vector.broadcast %cst_17 : f32 to vector<128x128xf32>
    %44 = arith.mulf %43, %42 : vector<128x128xf32>
    %cst_18 = arith.constant 1.250000e-01 : f32
    %45 = vector.broadcast %cst_18 : f32 to vector<128x128xf32>
    %46 = arith.subf %44, %45 : vector<128x128xf32>
    %47 = vector.extract_strided_slice %46 {offsets = [0, 0], sizes = [128, 4], strides = [1, 1]} : vector<128x128xf32> to vector<128x4xf32>
    %c0_19 = arith.constant 0 : index
    %c0_20 = arith.constant 0 : index
    %48 = vector.load %arg4[%c0_19, %c0_20] : memref<128x4xf32, #tpu.memory_space<vmem>>, vector<128x4xf32>
    tpu.vector_store %arg4[%c0_19, %c0_20], %47 {strides = array<i32>} : memref<128x4xf32, #tpu.memory_space<vmem>>, vector<128x4xf32>,
    %cst_21 = arith.constant dense<0.000000e+00> : vector<128xf32>
    %49 = vector.multi_reduction <add>, %47, %cst_21 [1] : vector<128x4xf32> to vector<128xf32>
    %50 = vector.shape_cast %49 : vector<128xf32> to vector<128x1xf32>
    %cst_22 = arith.constant 2.500000e-01 : f32
    %51 = vector.broadcast %cst_22 : f32 to vector<128x1xf32>
    %52 = arith.mulf %50, %51 : vector<128x1xf32>
    %c0_23 = arith.constant 0 : index
    %c0_24 = arith.constant 0 : index
    %53 = vector.load %arg5[%c0_23, %c0_24] : memref<128x1xf32, #tpu.memory_space<vmem>>, vector<128x1xf32>
    tpu.vector_store %arg5[%c0_23, %c0_24], %52 {strides = array<i32>} : memref<128x1xf32, #tpu.memory_space<vmem>>, vector<128x1xf32>,
    return
  }
  func.func @transform_0(%arg0: i32) -> (i32, i32, i32) {
    %c0_i32 = arith.constant 0 : i32
    %c0_i32_0 = arith.constant 0 : i32
    %c0_i32_1 = arith.constant 0 : i32
    return %c0_i32, %arg0, %c0_i32_0 : i32, i32, i32
  }
  func.func @transform_1(%arg0: i32) -> (i32, i32) {
    %c0_i32 = arith.constant 0 : i32
    %c0_i32_0 = arith.constant 0 : i32
    %c0_i32_1 = arith.constant 0 : i32
    return %c0_i32, %c0_i32_0 : i32, i32
  }
  func.func @transform_2(%arg0: i32) -> (i32, i32) {
    %c0_i32 = arith.constant 0 : i32
    %c0_i32_0 = arith.constant 0 : i32
    %c0_i32_1 = arith.constant 0 : i32
    return %c0_i32, %c0_i32_0 : i32, i32
  }
  func.func @transform_3(%arg0: i32) -> (i32, i32) {
    %c0_i32 = arith.constant 0 : i32
    %c0_i32_0 = arith.constant 0 : i32
    return %arg0, %c0_i32 : i32, i32
  }
  func.func @transform_4(%arg0: i32) -> (i32, i32) {
    %c0_i32 = arith.constant 0 : i32
    %c0_i32_0 = arith.constant 0 : i32
    return %arg0, %c0_i32 : i32, i32
  }
}

</mosaic_0001>

<bundles_post_ra>
// kernel: tpu_custom_call.1
= control target key start
LH: loop header
LB: loop body
LE: loop exit
PB: predicated region body
PF: predicated region fallthrough
CT: control target
= control target key end

     0   :  { %s10923_s15 = smov 0   ;;  %s10925_s16 = smov 0   ;;  %s15710_s0 = inlined_call_operand.vmem [shape: f32[4,300,256], index: 0, kind: input, shape index: {}]   ;;  %s15711_s1 = inlined_call_operand.vmem [shape: f32[256,128], index: 1, kind: input, shape index: {}]   ;;  %s15712_s2 = inlined_call_operand.vmem [shape: f32[1,128], index: 2, kind: input, shape index: {}]   ;;  %s15713_s3 = inlined_call_operand.vmem [shape: f32[300,4], index: 3, kind: output, shape index: {0}]   ;;  %s15714_s4 = inlined_call_operand.vmem [shape: f32[300,1], index: 4, kind: output, shape index: {1}]  }
   0x1   :  { %s10927_s17 = smov 0  }
   0x2 LB: > { %s10939_s18 = sadd.s32 4294967295, %s10800_s17   ;;  %s10942_s19 = sadd.s32 1, %s10800_s17   ;;  %s10800_s17 = sphi %s10927_s17, %s17827_s17   ;;  %s10796_s16 = sphi %s10925_s16, %s17826_s16   ;;  %s10792_s15 = sphi %s10923_s15, %s17825_s15  }
   0x3   : > { %s19_s20 = ssub.s32 %s10800_s17, %s10942_s19  ;;  %s22_s21 = sadd.s32 1, %s10796_s16 }
   0x4   : > { %p20_p0 = scmp.eq.s32.totalorder %s19_s20, 0  ;;  %p29_p1 = scmp.ne.s32.totalorder %s10796_s16, %s10792_s15 }
   0x5   : > { %p30_p2 = scmp.eq.s32.totalorder %s10800_s17, 0  ;;  %p101_p3 = scmp.eq.s32.totalorder %s10939_s18, 2 }
   0x6   : > { %s10952_s22 = scalar_select %p20_p0, %s10796_s16, %s22_s21  }
   0x7   : > { %p31_p4 = por %p30_p2, %p29_p1  ;;  %p10954_p5 = por %p101_p3, %p29_p1 }
   0x8   : > { %p8288_p6 = scmp.ge.s32.totalorder %s10800_s17, 3 }
   0xa   : > { %155 = sbr.rel (%p8288_p6) target bundleno = 84 (0x54), region = 24 }
   0xf   : > { %158 = sbr.rel (!%p31_p4) target bundleno = 84 (0x54), region = 28  ;;  %s160_s24 = sand.u32 (%p31_p4), 1, %s10796_s16  }
  0x10   : > { %s8290_s25 = sshll.u32 (%p31_p4), %s10800_s17, 4  ;;  %s8289_s26 = sshll.u32 (%p31_p4), %s160_s24, 10 }
  0x11   : > { %s164_s27 = ssub.s32 (%p31_p4), 38, %s8290_s25  ;;  %s8473_s28 = sshll.u32 (%p31_p4), %s10800_s17, 8 }
  0x12   : > { %p165_p7 = scmp.lt.s32.totalorder (%p31_p4), %s164_s27, 16  ;;  %s10967_s5 = scalar_lea.vmem (%p31_p4), %s15710_s0, %s8473_s28  }
  0x13   : > { %s10970_s7 = scalar_lea.vmem (%p31_p4), [#allocation2], %s8289_s26  }
  0x14   : > { %s17829_s27 = smov (!%p165_p7, %s164_s27), 16 }
  0x15   : > { %s8471_s6 = sshll.u32 %s17829_s27, 10 }
  0x16   : > { %p8296_p8 = scmp.eq.s32.totalorder %s8471_s6, 0 }
  0x17   : > { %s10973_s8 = sshrl.u32 (!%p8296_p8), %s17829_s27, 3 }
  0x18   : > { %175 = sbr.rel (%p8296_p8) target bundleno = 84 (0x54), region = 32  ;;  %p8297_p9 = scmp.le.s32.totalorder (!%p8296_p8), %s10973_s8, 0 }
  0x1d   : > { %8177 = sbr.rel (%p8297_p9) target bundleno = 67 (0x43), region = 228  ;;  %s16452_s9 = smov (!%p8297_p9), %s10970_s7 }
  0x1e   : > { %s16453_s10 = smov (!%p8297_p9), %s10967_s5  ;;  %s10982_s11 = smov (!%p8297_p9), 0  }
  0x1f   : > { %s10984_s12 = smov (!%p8297_p9), 0  }
  0x22 LB: >> { %v188_v0 = vld [vmem:[%s10808_s10] sm:$0xff]  ;;  %v190_v1 = vld [vmem:[%s10808_s10 + $0x10] sm:$0xff]  ;;  %s316_s13 = sadd.s32 1, %s10812_s11  ;;  %v204_v8 = vld [vmem:[%s10808_s10 + $0x8] sm:$0xff]  ;;  %s182_s12 = sadd.s32 1, %s10816_s12   ;;  %s10816_s12 = sphi %s10984_s12, %s182_s12   ;;  %s10812_s11 = sphi %s10982_s11, %s16456_s11   ;;  %s10808_s10 = sphi %s16453_s10, %s16455_s10   ;;  %s10804_s9 = sphi %s16452_s9, %s16454_s9  }
  0x23   : >> { %v192_v2 = vld [vmem:[%s10808_s10 + $0x20] sm:$0xff]  ;;  %189 = vst [vmem:[%s10804_s9] sm:$0xff] %v188_v0  ;;  %191 = vst [vmem:[%s10804_s9 + $0x10] sm:$0xff] %v190_v1  ;;  %v194_v3 = vld [vmem:[%s10808_s10 + $0x30] sm:$0xff]  ;;  %p317_p10 = scmp.ge.s32.totalorder %s316_s13, %s10973_s8  ;;  %p181_p11 = scmp.ge.s32.totalorder %s182_s12, %s10973_s8 }
  0x24   : >> { %193 = vst [vmem:[%s10804_s9 + $0x20] sm:$0xff] %v192_v2  ;;  %v196_v4 = vld [vmem:[%s10808_s10 + $0x40] sm:$0xff]  ;;  %v198_v5 = vld [vmem:[%s10808_s10 + $0x50] sm:$0xff]  ;;  %195 = vst [vmem:[%s10804_s9 + $0x30] sm:$0xff] %v194_v3 }
  0x25   : >> { %197 = vst [vmem:[%s10804_s9 + $0x40] sm:$0xff] %v196_v4  ;;  %199 = vst [vmem:[%s10804_s9 + $0x50] sm:$0xff] %v198_v5  ;;  %v200_v6 = vld [vmem:[%s10808_s10 + $0x60] sm:$0xff]  ;;  %v202_v7 = vld [vmem:[%s10808_s10 + $0x70] sm:$0xff]  ;;  %s17831_s13 = smov (%p317_p10, %s316_s13), 0 }
  0x26   : >> { %201 = vst [vmem:[%s10804_s9 + $0x60] sm:$0xff] %v200_v6  ;;  %203 = vst [vmem:[%s10804_s9 + $0x70] sm:$0xff] %v202_v7  ;;  %v206_v9 = vld [vmem:[%s10808_s10 + $0x18] sm:$0xff]  ;;  %v208_v10 = vld [vmem:[%s10808_s10 + $0x28] sm:$0xff]  ;;  %s8298_s14 = sshll.u32 %s17831_s13, 7  ;;  %s16456_s11 = smov %s17831_s13 }
  0x27   : >> { %205 = vst [vmem:[%s10804_s9 + $0x8] sm:$0xff] %v204_v8  ;;  %v210_v11 = vld [vmem:[%s10808_s10 + $0x38] sm:$0xff]  ;;  %207 = vst [vmem:[%s10804_s9 + $0x18] sm:$0xff] %v206_v9  ;;  %v212_v12 = vld [vmem:[%s10808_s10 + $0x48] sm:$0xff]  ;;  %s11040_s20 = scalar_lea.vmem %s10967_s5, %s8298_s14   ;;  %s11043_s21 = scalar_lea.vmem %s10970_s7, %s8298_s14 [#allocation2]  }
  0x28   : >> { %209 = vst [vmem:[%s10804_s9 + $0x28] sm:$0xff] %v208_v10  ;;  %211 = vst [vmem:[%s10804_s9 + $0x38] sm:$0xff] %v210_v11  ;;  %v214_v13 = vld [vmem:[%s10808_s10 + $0x58] sm:$0xff]  ;;  %v216_v14 = vld [vmem:[%s10808_s10 + $0x68] sm:$0xff] }
  0x29   : >> { %213 = vst [vmem:[%s10804_s9 + $0x48] sm:$0xff] %v212_v12  ;;  %215 = vst [vmem:[%s10804_s9 + $0x58] sm:$0xff] %v214_v13  ;;  %v218_v15 = vld [vmem:[%s10808_s10 + $0x78] sm:$0xff]  ;;  %v220_v16 = vld [vmem:[%s10808_s10 + $0x260] sm:$0xff] }
  0x2a   : >> { %217 = vst [vmem:[%s10804_s9 + $0x68] sm:$0xff] %v216_v14  ;;  %v222_v17 = vld [vmem:[%s10808_s10 + $0x270] sm:$0xff]  ;;  %219 = vst [vmem:[%s10804_s9 + $0x78] sm:$0xff] %v218_v15  ;;  %v224_v18 = vld [vmem:[%s10808_s10 + $0x280] sm:$0xff] }
  0x2b   : >> { %221 = vst [vmem:[%s10804_s9 + $0x100] sm:$0xff] %v220_v16  ;;  %223 = vst [vmem:[%s10804_s9 + $0x110] sm:$0xff] %v222_v17  ;;  %v226_v19 = vld [vmem:[%s10808_s10 + $0x290] sm:$0xff]  ;;  %v228_v20 = vld [vmem:[%s10808_s10 + $0x2a0] sm:$0xff] }
  0x2c   : >> { %225 = vst [vmem:[%s10804_s9 + $0x120] sm:$0xff] %v224_v18  ;;  %227 = vst [vmem:[%s10804_s9 + $0x130] sm:$0xff] %v226_v19  ;;  %v230_v21 = vld [vmem:[%s10808_s10 + $0x2b0] sm:$0xff]  ;;  %v232_v22 = vld [vmem:[%s10808_s10 + $0x2c0] sm:$0xff] }
  0x2d   : >> { %229 = vst [vmem:[%s10804_s9 + $0x140] sm:$0xff] %v228_v20  ;;  %v234_v23 = vld [vmem:[%s10808_s10 + $0x2d0] sm:$0xff]  ;;  %231 = vst [vmem:[%s10804_s9 + $0x150] sm:$0xff] %v230_v21  ;;  %v236_v24 = vld [vmem:[%s10808_s10 + $0x268] sm:$0xff] }
  0x2e   : >> { %233 = vst [vmem:[%s10804_s9 + $0x160] sm:$0xff] %v232_v22  ;;  %235 = vst [vmem:[%s10804_s9 + $0x170] sm:$0xff] %v234_v23  ;;  %v238_v25 = vld [vmem:[%s10808_s10 + $0x278] sm:$0xff]  ;;  %v240_v26 = vld [vmem:[%s10808_s10 + $0x288] sm:$0xff] }
  0x2f   : >> { %237 = vst [vmem:[%s10804_s9 + $0x108] sm:$0xff] %v236_v24  ;;  %239 = vst [vmem:[%s10804_s9 + $0x118] sm:$0xff] %v238_v25  ;;  %v242_v27 = vld [vmem:[%s10808_s10 + $0x298] sm:$0xff]  ;;  %v244_v28 = vld [vmem:[%s10808_s10 + $0x2a8] sm:$0xff] }
  0x30   : >> { %241 = vst [vmem:[%s10804_s9 + $0x128] sm:$0xff] %v240_v26  ;;  %v246_v29 = vld [vmem:[%s10808_s10 + $0x2b8] sm:$0xff]  ;;  %243 = vst [vmem:[%s10804_s9 + $0x138] sm:$0xff] %v242_v27  ;;  %v248_v30 = vld [vmem:[%s10808_s10 + $0x2c8] sm:$0xff] }
  0x31   : >> { %245 = vst [vmem:[%s10804_s9 + $0x148] sm:$0xff] %v244_v28  ;;  %247 = vst [vmem:[%s10804_s9 + $0x158] sm:$0xff] %v246_v29  ;;  %v250_v31 = vld [vmem:[%s10808_s10 + $0x2d8] sm:$0xff]  ;;  %v252_v32 = vld [vmem:[%s10808_s10 + $0x4c0] sm:$0xff] }
  0x32   : >> { %249 = vst [vmem:[%s10804_s9 + $0x168] sm:$0xff] %v248_v30  ;;  %251 = vst [vmem:[%s10804_s9 + $0x178] sm:$0xff] %v250_v31  ;;  %v254_v33 = vld [vmem:[%s10808_s10 + $0x4d0] sm:$0xff]  ;;  %v256_v34 = vld [vmem:[%s10808_s10 + $0x4e0] sm:$0xff] }
  0x33   : >> { %253 = vst [vmem:[%s10804_s9 + $0x200] sm:$0xff] %v252_v32  ;;  %v258_v35 = vld [vmem:[%s10808_s10 + $0x4f0] sm:$0xff]  ;;  %255 = vst [vmem:[%s10804_s9 + $0x210] sm:$0xff] %v254_v33  ;;  %v260_v36 = vld [vmem:[%s10808_s10 + $0x500] sm:$0xff] }
  0x34   : >> { %257 = vst [vmem:[%s10804_s9 + $0x220] sm:$0xff] %v256_v34  ;;  %259 = vst [vmem:[%s10804_s9 + $0x230] sm:$0xff] %v258_v35  ;;  %v262_v37 = vld [vmem:[%s10808_s10 + $0x510] sm:$0xff]  ;;  %v264_v38 = vld [vmem:[%s10808_s10 + $0x520] sm:$0xff] }
  0x35   : >> { %261 = vst [vmem:[%s10804_s9 + $0x240] sm:$0xff] %v260_v36  ;;  %263 = vst [vmem:[%s10804_s9 + $0x250] sm:$0xff] %v262_v37  ;;  %v266_v39 = vld [vmem:[%s10808_s10 + $0x530] sm:$0xff]  ;;  %v268_v40 = vld [vmem:[%s10808_s10 + $0x4c8] sm:$0xff] }
  0x36   : >> { %265 = vst [vmem:[%s10804_s9 + $0x260] sm:$0xff] %v264_v38  ;;  %v270_v41 = vld [vmem:[%s10808_s10 + $0x4d8] sm:$0xff]  ;;  %267 = vst [vmem:[%s10804_s9 + $0x270] sm:$0xff] %v266_v39  ;;  %v272_v42 = vld [vmem:[%s10808_s10 + $0x4e8] sm:$0xff] }
  0x37   : >> { %269 = vst [vmem:[%s10804_s9 + $0x208] sm:$0xff] %v268_v40  ;;  %271 = vst [vmem:[%s10804_s9 + $0x218] sm:$0xff] %v270_v41  ;;  %v274_v43 = vld [vmem:[%s10808_s10 + $0x4f8] sm:$0xff]  ;;  %v276_v44 = vld [vmem:[%s10808_s10 + $0x508] sm:$0xff] }
  0x38   : >> { %273 = vst [vmem:[%s10804_s9 + $0x228] sm:$0xff] %v272_v42  ;;  %275 = vst [vmem:[%s10804_s9 + $0x238] sm:$0xff] %v274_v43  ;;  %v278_v45 = vld [vmem:[%s10808_s10 + $0x518] sm:$0xff]  ;;  %v280_v46 = vld [vmem:[%s10808_s10 + $0x528] sm:$0xff] }
  0x39   : >> { %277 = vst [vmem:[%s10804_s9 + $0x248] sm:$0xff] %v276_v44  ;;  %v282_v47 = vld [vmem:[%s10808_s10 + $0x538] sm:$0xff]  ;;  %279 = vst [vmem:[%s10804_s9 + $0x258] sm:$0xff] %v278_v45  ;;  %v284_v48 = vld [vmem:[%s10808_s10 + $0x720] sm:$0xff] }
  0x3a   : >> { %281 = vst [vmem:[%s10804_s9 + $0x268] sm:$0xff] %v280_v46  ;;  %283 = vst [vmem:[%s10804_s9 + $0x278] sm:$0xff] %v282_v47  ;;  %v286_v49 = vld [vmem:[%s10808_s10 + $0x730] sm:$0xff]  ;;  %v288_v50 = vld [vmem:[%s10808_s10 + $0x740] sm:$0xff] }
  0x3b   : >> { %285 = vst [vmem:[%s10804_s9 + $0x300] sm:$0xff] %v284_v48  ;;  %287 = vst [vmem:[%s10804_s9 + $0x310] sm:$0xff] %v286_v49  ;;  %v290_v51 = vld [vmem:[%s10808_s10 + $0x750] sm:$0xff]  ;;  %v292_v52 = vld [vmem:[%s10808_s10 + $0x760] sm:$0xff] }
  0x3c   : >> { %289 = vst [vmem:[%s10804_s9 + $0x320] sm:$0xff] %v288_v50  ;;  %v294_v53 = vld [vmem:[%s10808_s10 + $0x770] sm:$0xff]  ;;  %291 = vst [vmem:[%s10804_s9 + $0x330] sm:$0xff] %v290_v51  ;;  %v296_v54 = vld [vmem:[%s10808_s10 + $0x780] sm:$0xff] }
  0x3d   : >> { %293 = vst [vmem:[%s10804_s9 + $0x340] sm:$0xff] %v292_v52  ;;  %295 = vst [vmem:[%s10804_s9 + $0x350] sm:$0xff] %v294_v53  ;;  %v298_v55 = vld [vmem:[%s10808_s10 + $0x790] sm:$0xff]  ;;  %v300_v56 = vld [vmem:[%s10808_s10 + $0x728] sm:$0xff] }
  0x3e   : >> { %297 = vst [vmem:[%s10804_s9 + $0x360] sm:$0xff] %v296_v54  ;;  %299 = vst [vmem:[%s10804_s9 + $0x370] sm:$0xff] %v298_v55  ;;  %v302_v57 = vld [vmem:[%s10808_s10 + $0x738] sm:$0xff]  ;;  %v304_v58 = vld [vmem:[%s10808_s10 + $0x748] sm:$0xff]  ;;  %184 = sbr.rel (!%p181_p11) target bundleno = 34 (0x22), region = 234 }
  0x3f   : >> { %301 = vst [vmem:[%s10804_s9 + $0x308] sm:$0xff] %v300_v56  ;;  %v306_v59 = vld [vmem:[%s10808_s10 + $0x758] sm:$0xff]  ;;  %303 = vst [vmem:[%s10804_s9 + $0x318] sm:$0xff] %v302_v57  ;;  %v308_v60 = vld [vmem:[%s10808_s10 + $0x768] sm:$0xff] }
  0x40   : >> { %305 = vst [vmem:[%s10804_s9 + $0x328] sm:$0xff] %v304_v58  ;;  %307 = vst [vmem:[%s10804_s9 + $0x338] sm:$0xff] %v306_v59  ;;  %v310_v61 = vld [vmem:[%s10808_s10 + $0x778] sm:$0xff]  ;;  %v312_v62 = vld [vmem:[%s10808_s10 + $0x788] sm:$0xff] }
  0x41   : >> { %309 = vst [vmem:[%s10804_s9 + $0x348] sm:$0xff] %v308_v60  ;;  %311 = vst [vmem:[%s10804_s9 + $0x358] sm:$0xff] %v310_v61  ;;  %v314_v63 = vld [vmem:[%s10808_s10 + $0x798] sm:$0xff]  ;;  %s16455_s10 = smov %s11040_s20 }
  0x42   : >> { %313 = vst [vmem:[%s10804_s9 + $0x368] sm:$0xff] %v312_v62  ;;  %315 = vst [vmem:[%s10804_s9 + $0x378] sm:$0xff] %v314_v63  ;;  %s16454_s9 = smov %s11043_s21 }
  0x43 PF: > { %s11148_s24 = sand.u32 7, %s17829_s27   ;;  %s8474_s25 = sshll.u32 %s10973_s8, 7 }
  0x44   : > { %s11152_s26 = scalar_lea.vmem %s10967_s5, %s8474_s25   ;;  %s11155_s28 = scalar_lea.vmem %s10970_s7, %s8474_s25 [#allocation2]  }
  0x45   : > { %p8303_p12 = scmp.le.s32.totalorder %s11148_s24, 0 }
  0x46   : > { %s16457_s29 = smov (!%p8303_p12), %s11155_s28  ;;  %s16458_s30 = smov (!%p8303_p12), %s11152_s26 }
  0x47   : > { %8191 = sbr.rel (%p8303_p12) target bundleno = 84 (0x54), region = 239  ;;  %s11164_s6 = smov (!%p8303_p12), 0  }
  0x48   : > { %s11166_s9 = smov (!%p8303_p12), 0  }
  0x4c LB: >> { %v339_v0 = vld [vmem:[%s10824_s30] sm:$0xff]  ;;  %v341_v1 = vld [vmem:[%s10824_s30 + $0x8] sm:$0xff]  ;;  %s355_s27 = sadd.s32 1, %s10828_s6  ;;  %s333_s9 = sadd.s32 1, %s10832_s9   ;;  %s10832_s9 = sphi %s11166_s9, %s333_s9   ;;  %s10828_s6 = sphi %s11164_s6, %s16459_s6   ;;  %s10824_s30 = sphi %s16458_s30, %s360_s30   ;;  %s10820_s29 = sphi %s16457_s29, %s361_s29  }
  0x4d   : >> { %v343_v2 = vld [vmem:[%s10824_s30 + $0x260] sm:$0xff]  ;;  %340 = vst [vmem:[%s10820_s29] sm:$0xff] %v339_v0  ;;  %342 = vst [vmem:[%s10820_s29 + $0x8] sm:$0xff] %v341_v1  ;;  %v345_v3 = vld [vmem:[%s10824_s30 + $0x268] sm:$0xff]  ;;  %p356_p13 = scmp.ge.s32.totalorder %s355_s27, %s11148_s24  ;;  %p332_p0 = scmp.ge.s32.totalorder %s333_s9, %s11148_s24 }
  0x4e   : >> { %344 = vst [vmem:[%s10820_s29 + $0x100] sm:$0xff] %v343_v2  ;;  %v347_v4 = vld [vmem:[%s10824_s30 + $0x4c0] sm:$0xff]  ;;  %v349_v5 = vld [vmem:[%s10824_s30 + $0x4c8] sm:$0xff]  ;;  %346 = vst [vmem:[%s10820_s29 + $0x108] sm:$0xff] %v345_v3 }
  0x4f   : >> { %348 = vst [vmem:[%s10820_s29 + $0x200] sm:$0xff] %v347_v4  ;;  %350 = vst [vmem:[%s10820_s29 + $0x208] sm:$0xff] %v349_v5  ;;  %v351_v6 = vld [vmem:[%s10824_s30 + $0x720] sm:$0xff]  ;;  %v353_v7 = vld [vmem:[%s10824_s30 + $0x728] sm:$0xff]  ;;  %s17833_s27 = smov (%p356_p13, %s355_s27), 0  ;;  %335 = sbr.rel (!%p332_p0) target bundleno = 76 (0x4c), region = 245 }
  0x50   : >> { %352 = vst [vmem:[%s10820_s29 + $0x300] sm:$0xff] %v351_v6  ;;  %354 = vst [vmem:[%s10820_s29 + $0x308] sm:$0xff] %v353_v7  ;;  %s8304_s5 = sshll.u32 %s17833_s27, 4  ;;  %s16459_s6 = smov %s17833_s27 }
  0x51   : >> { %s360_s30 = scalar_lea.vmem %s11152_s26, %s8304_s5   ;;  %s361_s29 = scalar_lea.vmem %s11155_s28, %s8304_s5 [#allocation2]  }
  0x54 PF: > { %p8306_p1 = scmp.ge.s32.totalorder %s10800_s17, 1  ;;  %p366_p2 = scmp.lt.s32.totalorder %s10800_s17, 4 }
  0x56   : > { %p367_p3 = pnand %p8306_p1, %p366_p2 }
  0x58   : > { %370 = sbr.rel (%p367_p3) target bundleno = 1401 (0x579), region = 58 }
  0x5d   : > { %v448_v8 = vld [vmem:[%s15711_s1 + $0xf8] sm:$0xff]  ;;  %v447_v10 = vld [vmem:[%s15711_s1 + $0xf0] sm:$0xff]  ;;  %v446_v15 = vld [vmem:[%s15711_s1 + $0xe8] sm:$0xff]  ;;  %s373_s24 = sand.u32 1, %s10792_s15   ;;  %vm7617_vm4 = vcmask 31744   ;;  %vm7698_vm5 = vcmask 7168  }
  0x5e   : > { %v432_v9 = vld [vmem:[%s15711_s1 + $0x78] sm:$0xff]  ;;  %v11195_v11 = vand.u32 4294901760, %v448_v8  ;;  %v11199_v13 = vand.u32 4294901760, %v447_v10  ;;  %v431_v14 = vld [vmem:[%s15711_s1 + $0x70] sm:$0xff]  ;;  %v430_v16 = vld [vmem:[%s15711_s1 + $0x68] sm:$0xff]  ;;  %v11212_v18 = vand.u32 4294901760, %v446_v15 }
  0x5f   : > { %v11197_v12 = vand.u32 4294901760, %v432_v9  ;;  %v11210_v17 = vand.u32 4294901760, %v431_v14  ;;  %v11214_v19 = vand.u32 4294901760, %v430_v16  ;;  %v445_v20 = vld [vmem:[%s15711_s1 + $0xe0] sm:$0xff]  ;;  %v444_v22 = vld [vmem:[%s15711_s1 + $0xd8] sm:$0xff]  ;;  %v11243_v28 = vld [vmem:[%s15711_s1 + $0xd0] sm:$0xff] }
  0x60   : > { %16460 = vst [vmem:[#allocation5_spill] sm:$0xff] %v11195_v11  ;;  %16461 = vst [vmem:[#allocation6_spill] sm:$0xff] %v11199_v13  ;;  %v429_v21 = vld [vmem:[%s15711_s1 + $0x60] sm:$0xff]  ;;  %8482 = vmatprep.subr.mxu0 %v11195_v11  ;;  %v11226_v23 = vand.u32 4294901760, %v445_v20  ;;  %v11230_v25 = vand.u32 4294901760, %v444_v22  ;;  %v11233_v26 = vsub.f32 %v448_v8, %v11195_v11  ;;  %v11238_v27 = vld [vmem:[%s15711_s1 + $0x58] sm:$0xff]  ;;  %v11261_v33 = vsub.f32 %v447_v10, %v11199_v13 }
  0x61   : > { %v11228_v24 = vand.u32 4294901760, %v429_v21  ;;  %v11248_v29 = vld [vmem:[%s15711_s1 + $0x50] sm:$0xff]  ;;  %8483 = vmatpush3.msra.mxu0 %v11197_v12  ;;  %v11252_v30 = vand.u32 4294901760, %v11238_v27  ;;  %v11255_v31 = vsub.f32 %v432_v9, %v11197_v12  ;;  %v11258_v32 = vand.u32 4294901760, %v11243_v28  ;;  %v11266_v34 = vld [vmem:[%s15711_s1 + $0xc8] sm:$0xff]  ;;  %v11276_v36 = vld [vmem:[%s15711_s1 + $0xc0] sm:$0xff] }
  0x62   : > { %16462 = vst [vmem:[#allocation7_spill] sm:$0xff] %v11226_v23  ;;  %16464 = vst [vmem:[#allocation9_spill] sm:$0xff] %v11230_v25  ;;  %v11271_v35 = vld [vmem:[%s15711_s1 + $0x48] sm:$0xff]  ;;  %8484 = vmatprep.subr.mxu0 %v11199_v13  ;;  %v11280_v37 = vand.u32 4294901760, %v11233_v26  ;;  %v11283_v38 = vand.u32 4294901760, %v11248_v29  ;;  %v11286_v39 = vsub.f32 %v431_v14, %v11210_v17  ;;  %v11289_v40 = vand.u32 4294901760, %v11266_v34 }
  0x63   : > { %16463 = vst [vmem:[#allocation8_spill] sm:$0xff] %v11228_v24  ;;  %16465 = vst [vmem:[#allocation10_spill] sm:$0xff] %v11233_v26  ;;  %8485 = vmatpush3.msra.mxu0 %v11210_v17  ;;  %v11293_v41 = vand.u32 4294901760, %v11255_v31  ;;  %v11296_v42 = vand.u32 4294901760, %v11261_v33  ;;  %v11299_v43 = vsub.f32 %v446_v15, %v11212_v18  ;;  %v11302_v44 = vand.u32 4294901760, %v11271_v35  ;;  %v11307_v45 = vld [vmem:[%s15711_s1 + $0x40] sm:$0xff] }
  0x64   : > { %16466 = vst [vmem:[#allocation11_spill] sm:$0xff] %v11252_v30  ;;  %16467 = vst [vmem:[#allocation12_spill] sm:$0xff] %v11255_v31  ;;  %8486 = vmatprep.subr.mxu0 %v11212_v18  ;;  %v936_v46 = vsub.f32 %v11233_v26, %v11280_v37  ;;  %v11313_v47 = vand.u32 4294901760, %v11286_v39  ;;  %v11316_v48 = vsub.f32 %v430_v16, %v11214_v19  ;;  %v11319_v49 = vand.u32 4294901760, %v11276_v36  ;;  %v11335_v54 = vld [vmem:[%s15711_s1 + $0xb8] sm:$0xff]  ;;  %v11366_v0 = vld [vmem:[%s15711_s1 + $0xb0] sm:$0xff] }
  0x65   : > { %16468 = vst [vmem:[#allocation13_spill] sm:$0xff] %v11258_v32  ;;  %16469 = vst [vmem:[#allocation14_spill] sm:$0xff] %v11261_v33  ;;  %8487 = vmatpush3.msra.mxu0 %v11214_v19  ;;  %v824_v50 = vsub.f32 %v11255_v31, %v11293_v41  ;;  %v943_v51 = vsub.f32 %v11261_v33, %v11296_v42  ;;  %v11327_v52 = vand.u32 4294901760, %v11299_v43  ;;  %v11346_v58 = vand.u32 4294901760, %v11307_v45  ;;  %v11351_v59 = vld [vmem:[%s15711_s1 + $0x38] sm:$0xff]  ;;  %v11383_v5 = vld [vmem:[%s15711_s1 + $0x30] sm:$0xff] }
  0x66   : > { %16470 = vst [vmem:[#allocation15_spill] sm:$0xff] %v11280_v37  ;;  %16471 = vst [vmem:[#allocation16_spill] sm:$0xff] %v11283_v38  ;;  %v11330_v53 = vsub.f32 %v445_v20, %v11226_v23  ;;  %8488 = vmatprep.subr.mxu0 %v11226_v23  ;;  %v11338_v55 = vand.u32 4294901760, %v936_v46  ;;  %v831_v56 = vsub.f32 %v11286_v39, %v11313_v47  ;;  %v11343_v57 = vand.u32 4294901760, %v11316_v48  ;;  %v11400_v10 = vld [vmem:[%s15711_s1 + $0xa8] sm:$0xff]  ;;  %s11558_s9 = sshll.u32 %s373_s24, 10 }
  0x67   : > { %16472 = vst [vmem:[#allocation17_spill] sm:$0xff] %v11286_v39  ;;  %16473 = vst [vmem:[#allocation18_spill] sm:$0xff] %v11289_v40  ;;  %8489 = vmatpush3.msra.mxu0 %v11228_v24  ;;  %v11354_v60 = vand.u32 4294901760, %v824_v50  ;;  %v11356_v61 = vand.u32 4294901760, %v943_v51  ;;  %v950_v62 = vsub.f32 %v11299_v43, %v11327_v52  ;;  %v11375_v3 = vsub.f32 %v429_v21, %v11228_v24  ;;  %v11419_v21 = vld [vmem:[%s15711_s1 + $0x28] sm:$0xff]  ;;  %s11662_s17 = scalar_lea.vmem [#allocation2], %s11558_s9 }
  0x68   : > { %16474 = vst [vmem:[#allocation19_spill] sm:$0xff] %v11293_v41  ;;  %16475 = vst [vmem:[#allocation20_spill] sm:$0xff] %v11296_v42  ;;  %v11361_v63 = vand.u32 4294901760, %v11330_v53  ;;  %8490 = vmatprep.subr.mxu0 %v11230_v25  ;;  %8562 = vmatprep.subr.mxu1 %v11338_v55  ;;  %v11370_v1 = vand.u32 4294901760, %v831_v56  ;;  %v838_v2 = vsub.f32 %v11316_v48, %v11343_v57  ;;  %v11378_v4 = vand.u32 4294901760, %v11335_v54  ;;  %v11577_v41 = vld [vmem:[%s15711_s1 + $0x88] sm:$0xff] }
  0x69   : > { %16476 = vst [vmem:[#allocation21_spill] sm:$0xff] %v11299_v43  ;;  %16477 = vst [vmem:[#allocation22_spill] sm:$0xff] %v11313_v47  ;;  %8491 = vmatpush3.msra.mxu0 %v11252_v30  ;;  %8563 = vmatpush3.msra.mxu1 %v11354_v60  ;;  %v11387_v6 = vand.u32 4294901760, %v950_v62  ;;  %v11392_v8 = vsub.f32 %v444_v22, %v11230_v25  ;;  %v11395_v9 = vand.u32 4294901760, %v11351_v59  ;;  %v11407_v15 = vand.u32 4294901760, %v11375_v3  ;;  %v11554_v47 = vld [vmem:[%s15711_s1 + $0x10] sm:$0xff] }
  0x6a   : > { %16478 = vst [vmem:[#allocation23_spill] sm:$0xff] %v11316_v48  ;;  %16479 = vst [vmem:[#allocation24_spill] sm:$0xff] %v11319_v49  ;;  %v957_v7 = vsub.f32 %v11330_v53, %v11361_v63  ;;  %8492 = vmatprep.subr.mxu0 %v11258_v32  ;;  %8564 = vmatprep.subr.mxu1 %v11356_v61  ;;  %v11404_v14 = vand.u32 4294901760, %v838_v2  ;;  %v11411_v16 = vsub.f32 %v11238_v27, %v11252_v30  ;;  %v11452_v2 = vld [vmem:[%s15711_s1 + $0xa0] sm:$0xff]  ;;  %s15388_s21 = sshll.u32 %s373_s24, 7  ;;  %s8441_s25 = sshll.u32 (%p10954_p5), %s10939_s18, 4 }
  0x6b   : > { %16480 = vst [vmem:[#allocation25_spill] sm:$0xff] %v11327_v52  ;;  %16481 = vst [vmem:[#allocation26_spill] sm:$0xff] %v11330_v53  ;;  %v11414_v20 = vand.u32 4294901760, %v11366_v0  ;;  %8493 = vmatpush3.msra.mxu0 %v11283_v38  ;;  %8565 = vmatpush3.msra.mxu1 %v11370_v1  ;;  %v11426_v46 = vand.u32 4294901760, %v11392_v8  ;;  %v11430_v27 = vsub.f32 %v11243_v28, %v11258_v32  ;;  %v11433_v50 = vand.u32 4294901760, %v11383_v5  ;;  %v11537_v52 = vld [vmem:[%s15711_s1 + $0x90] sm:$0xff] }
  0x6c   : > { %16482 = vst [vmem:[#allocation27_spill] sm:$0xff] %v11338_v55  ;;  %16483 = vst [vmem:[#allocation28_spill] sm:$0xff] %v11343_v57  ;;  %v11423_v22 = vand.u32 4294901760, %v957_v7  ;;  %8494 = vmatprep.subr.mxu0 %v11289_v40  ;;  %8566 = vmatprep.subr.mxu1 %v11387_v6  ;;  %v845_v51 = vsub.f32 %v11375_v3, %v11407_v15  ;;  %v11440_v56 = vand.u32 4294901760, %v11411_v16  ;;  %v11447_v28 = vand.u32 4294901760, %v11400_v10  ;;  %v11519_v57 = vld [vmem:[%s15711_s1 + $0x18] sm:$0xff] }
  0x6d   : > { %16484 = vst [vmem:[#allocation29_spill] sm:$0xff] %v11346_v58  ;;  %16485 = vst [vmem:[#allocation30_spill] sm:$0xff] %v11354_v60  ;;  %v11444_v62 = vsub.f32 %v11248_v29, %v11283_v38  ;;  %8495 = vmatpush3.msra.mxu0 %v11302_v44  ;;  %8567 = vmatpush3.msra.mxu1 %v11404_v14  ;;  %v964_v7 = vsub.f32 %v11392_v8, %v11426_v46  ;;  %v11572_v42 = vand.u32 4294901760, %v11519_v57  ;;  %s15405_s15 = scalar_lea.vmem [#allocation3], %s15388_s21   ;;  %s15486_s24 = scalar_lea.vmem [#allocation4], %s15388_s21  }
  0x6e   : > { %16486 = vst [vmem:[#allocation31_spill] sm:$0xff] %v11356_v61  ;;  %16487 = vst [vmem:[#allocation32_spill] sm:$0xff] %v11361_v63  ;;  %v11463_v29 = vsub.f32 %v11266_v34, %v11289_v40  ;;  %8496 = vmatprep.subr.mxu0 %v11319_v49  ;;  %8568 = vmatprep.subr.mxu1 %v11423_v22  ;;  %v11470_v61 = vand.u32 4294901760, %v845_v51  ;;  %v11479_v55 = vsub.f32 %v11271_v35, %v11302_v44  ;;  %v11484_v34 = vld [vmem:[%s15711_s1 + $0x20] sm:$0xff]  ;;  %v11500_v35 = vld [vmem:[%s15711_s1 + $0x98] sm:$0xff]  ;;  %s8476_s26 = sshll.u32 (%p10954_p5), %s10939_s18, 7 }
  0x6f   : > { %16488 = vst [vmem:[#allocation33_spill] sm:$0xff] %v11370_v1  ;;  %16489 = vst [vmem:[#allocation34_spill] sm:$0xff] %v11375_v3  ;;  %v11466_v1 = vand.u32 4294901760, %v11419_v21  ;;  %v11475_v60 = vand.u32 4294901760, %v11444_v62  ;;  %8497 = vmatpush3.msra.mxu0 %v11346_v58  ;;  %v11514_v63 = vsub.f32 %v11276_v36, %v11319_v49  ;;  %v11532_v36 = vsub.f32 %v11307_v45, %v11346_v58  ;;  %s7727_s28 = ssub.s32 (%p10954_p5), 38, %s8441_s25  ;;  %s15527_s6 = scalar_lea.vmem (%p10954_p5), %s15713_s3, %s8476_s26  }
  0x70   : > { %16490 = vst [vmem:[#allocation35_spill] sm:$0xff] %v11378_v4  ;;  %16491 = vst [vmem:[#allocation36_spill] sm:$0xff] %v11387_v6  ;;  %v11459_v6 = vand.u32 4294901760, %v11430_v27  ;;  %8569 = vmatpush3.msra.mxu1 %v11470_v61  ;;  %8498 = vmatprep.subr.mxu0 %v11378_v4  ;;  %v11549_v45 = vand.u32 4294901760, %v11500_v35  ;;  %v11590_v37 = vand.u32 4294901760, %v11537_v52  ;;  %p7728_p4 = scmp.lt.s32.totalorder (%p10954_p5), %s7727_s28, 16 }
  0x71   : > { %16492 = vst [vmem:[#allocation37_spill] sm:$0xff] %v11392_v8  ;;  %16493 = vst [vmem:[#allocation38_spill] sm:$0xff] %v11395_v9  ;;  %8499 = vmatpush3.msra.mxu0 %v11395_v9 }
  0x72   : > { %16494 = vst [vmem:[#allocation39_spill] sm:$0xff] %v11404_v14  ;;  %16495 = vst [vmem:[#allocation40_spill] sm:$0xff] %v11407_v15  ;;  %v852_v14 = vsub.f32 %v11411_v16, %v11440_v56  ;;  %v971_v51 = vsub.f32 %v11430_v27, %v11459_v6  ;;  %v11510_v15 = vand.u32 4294901760, %v11479_v55  ;;  %8500 = vmatprep.subr.mxu0 %v11414_v20 }
  0x73   : > { %16496 = vst [vmem:[#allocation41_spill] sm:$0xff] %v11411_v16  ;;  %16497 = vst [vmem:[#allocation42_spill] sm:$0xff] %v11414_v20  ;;  %8501 = vmatpush3.msra.mxu0 %v11433_v50 }
  0x74   : > { %16498 = vst [vmem:[#allocation43_spill] sm:$0xff] %v11423_v22  ;;  %16499 = vst [vmem:[#allocation44_spill] sm:$0xff] %v11426_v46  ;;  %v11487_v22 = vand.u32 4294901760, %v964_v7  ;;  %v11495_v46 = vand.u32 4294901760, %v11452_v2  ;;  %v11505_v7 = vand.u32 4294901760, %v852_v14  ;;  %v11523_v14 = vand.u32 4294901760, %v971_v51  ;;  %8502 = vmatprep.subr.mxu0 %v11447_v28 }
  0x75   : > { %16500 = vst [vmem:[#allocation45_spill] sm:$0xff] %v11430_v27  ;;  %16501 = vst [vmem:[#allocation46_spill] sm:$0xff] %v11433_v50  ;;  %8503 = vmatpush3.msra.mxu0 %v11466_v1 }
  0x76   : > { %16502 = vst [vmem:[#allocation47_spill] sm:$0xff] %v11440_v56  ;;  %16503 = vst [vmem:[#allocation48_spill] sm:$0xff] %v11444_v62  ;;  %v11492_v56 = vand.u32 4294901760, %v11463_v29  ;;  %8570 = vmatprep.subr.mxu1 %v11487_v22  ;;  %8504 = vmatprep.subr.mxu0 %v11495_v46 }
  0x77   : > { %16504 = vst [vmem:[#allocation49_spill] sm:$0xff] %v11447_v28  ;;  %16505 = vst [vmem:[#allocation50_spill] sm:$0xff] %v11459_v6  ;;  %v859_v6 = vsub.f32 %v11444_v62, %v11475_v60  ;;  %8571 = vmatpush3.msra.mxu1 %v11505_v7 }
  0x78   : > { %16506 = vst [vmem:[#allocation51_spill] sm:$0xff] %v11463_v29  ;;  %16507 = vst [vmem:[#allocation52_spill] sm:$0xff] %v11466_v1  ;;  %8572 = vmatprep.subr.mxu1 %v11523_v14 }
  0x79   : > { %16508 = vst [vmem:[#allocation53_spill] sm:$0xff] %v11470_v61  ;;  %16509 = vst [vmem:[#allocation54_spill] sm:$0xff] %v11475_v60  ;;  %v978_v61 = vsub.f32 %v11463_v29, %v11492_v56  ;;  %v11528_v60 = vand.u32 4294901760, %v11484_v34  ;;  %v11541_v51 = vand.u32 4294901760, %v859_v6 }
  0x7a   : > { %16510 = vst [vmem:[#allocation55_spill] sm:$0xff] %v11479_v55  ;;  %16511 = vst [vmem:[#allocation56_spill] sm:$0xff] %v11487_v22  ;;  %v866_v22 = vsub.f32 %v11479_v55, %v11510_v15 }
  0x7b   : > { %16512 = vst [vmem:[#allocation57_spill] sm:$0xff] %v11492_v56  ;;  %16513 = vst [vmem:[#allocation58_spill] sm:$0xff] %v11495_v46  ;;  %v11546_v56 = vand.u32 4294901760, %v11514_v63  ;;  %v11562_v6 = vand.u32 4294901760, %v978_v61  ;;  %8573 = vmatpush3.msra.mxu1 %v11541_v51  ;;  %8505 = vmatpush3.msra.mxu0 %v11528_v60 }
  0x7c   : > { %16514 = vst [vmem:[#allocation59_spill] sm:$0xff] %v11505_v7  ;;  %16515 = vst [vmem:[#allocation60_spill] sm:$0xff] %v11510_v15  ;;  %v11565_v7 = vand.u32 4294901760, %v11532_v36  ;;  %v11569_v15 = vsub.f32 %v11335_v54, %v11378_v4  ;;  %v11581_v61 = vand.u32 4294901760, %v866_v22  ;;  %v11587_v54 = vsub.f32 %v11351_v59, %v11395_v9  ;;  %v11609_v9 = vld [vmem:[%s15711_s1 + $0x8] sm:$0xff]  ;;  %v11628_v4 = vld [vmem:[%s15711_s1 + $0x80] sm:$0xff]  ;;  %8506 = vmatprep.subr.mxu0 %v11549_v45 }
  0x7d   : > { %16516 = vst [vmem:[#allocation61_spill] sm:$0xff] %v11514_v63  ;;  %16517 = vst [vmem:[#allocation62_spill] sm:$0xff] %v11523_v14  ;;  %v985_v14 = vsub.f32 %v11514_v63, %v11546_v56  ;;  %8574 = vmatprep.subr.mxu1 %v11562_v6  ;;  %v11604_v59 = vand.u32 4294901760, %v11554_v47  ;;  %v11650_v58 = vand.u32 4294901760, %v11609_v9  ;;  %8507 = vmatpush3.msra.mxu0 %v11572_v42 }
  0x7e   : > { %16518 = vst [vmem:[#allocation63_spill] sm:$0xff] %v11528_v60  ;;  %16519 = vst [vmem:[#allocation64_spill] sm:$0xff] %v11532_v36  ;;  %v11597_v22 = vand.u32 4294901760, %v11569_v15  ;;  %8575 = vmatpush3.msra.mxu1 %v11581_v61  ;;  %8508 = vmatprep.subr.mxu0 %v11590_v37 }
  0x7f   : > { %16520 = vst [vmem:[#allocation65_spill] sm:$0xff] %v11541_v51  ;;  %16521 = vst [vmem:[#allocation66_spill] sm:$0xff] %v11546_v56  ;;  %v873_v51 = vsub.f32 %v11532_v36, %v11565_v7  ;;  %v11601_v56 = vsub.f32 %v11366_v0, %v11414_v20  ;;  %v11620_v0 = vsub.f32 %v11383_v5, %v11433_v50  ;;  %v11623_v20 = vand.u32 4294901760, %v11577_v41 }
  0x80   : > { %16522 = vst [vmem:[#allocation67_spill] sm:$0xff] %v11549_v45  ;;  %16523 = vst [vmem:[#allocation68_spill] sm:$0xff] %v11562_v6  ;;  %v11613_v6 = vand.u32 4294901760, %v985_v14  ;;  %v11640_v5 = vsub.f32 %v11400_v10, %v11447_v28  ;;  %v11659_v10 = vld [vmem:[%s15711_s1] sm:$0xff]  ;;  %v11675_v28 = vand.u32 4294901760, %v11628_v4  ;;  %8509 = vmatpush3.msra.mxu0 %v11604_v59 }
  0x81   : > { %16524 = vst [vmem:[#allocation69_spill] sm:$0xff] %v11565_v7  ;;  %16525 = vst [vmem:[#allocation70_spill] sm:$0xff] %v11569_v15  ;;  %v11616_v7 = vand.u32 4294901760, %v11587_v54  ;;  %v11631_v14 = vand.u32 4294901760, %v873_v51  ;;  %v11636_v36 = vand.u32 4294901760, %v11601_v56  ;;  %v11647_v51 = vand.u32 4294901760, %v11620_v0  ;;  %8510 = vmatprep.subr.mxu0 %v11623_v20 }
  0x82   : > { %16526 = vst [vmem:[#allocation71_spill] sm:$0xff] %v11572_v42  ;;  %16527 = vst [vmem:[#allocation72_spill] sm:$0xff] %v11581_v61  ;;  %v992_v61 = vsub.f32 %v11569_v15, %v11597_v22  ;;  %8576 = vmatprep.subr.mxu1 %v11613_v6  ;;  %v11687_v15 = vsub.f32 %v11452_v2, %v11495_v46  ;;  %8511 = vmatpush3.msra.mxu0 %v11650_v58 }
  0x83   : > { %16528 = vst [vmem:[#allocation73_spill] sm:$0xff] %v11587_v54  ;;  %16529 = vst [vmem:[#allocation74_spill] sm:$0xff] %v11590_v37  ;;  %v880_v50 = vsub.f32 %v11587_v54, %v11616_v7  ;;  %8577 = vmatpush3.msra.mxu1 %v11631_v14  ;;  %8512 = vmatprep.subr.mxu0 %v11675_v28 }
  0x84   : > { %16530 = vst [vmem:[#allocation75_spill] sm:$0xff] %v11597_v22  ;;  %16531 = vst [vmem:[#allocation76_spill] sm:$0xff] %v11601_v56  ;;  %v11654_v22 = vsub.f32 %v11419_v21, %v11466_v1  ;;  %v999_v21 = vsub.f32 %v11601_v56, %v11636_v36  ;;  %v11672_v1 = vand.u32 4294901760, %v11640_v5 }
  0x85   : > { %16532 = vst [vmem:[#allocation77_spill] sm:$0xff] %v11604_v59  ;;  %16533 = vst [vmem:[#allocation78_spill] sm:$0xff] %v11613_v6  ;;  %v452_v6 = vld [vmem:[%s11662_s17 + $0x8] sm:$0xff]  ;;  %v11677_v54 = vand.u32 4294901760, %v880_v50 }
  0x86   : > { %16534 = vst [vmem:[#allocation79_spill] sm:$0xff] %v11616_v7  ;;  %16535 = vst [vmem:[#allocation80_spill] sm:$0xff] %v11620_v0  ;;  %v11666_v7 = vand.u32 4294901760, %v992_v61  ;;  %v11683_v61 = vand.u32 4294901760, %v11654_v22  ;;  %v11691_v56 = vand.u32 4294901760, %v999_v21  ;;  %v1006_v50 = vsub.f32 %v11640_v5, %v11672_v1 }
  0x87   : > { %16536 = vst [vmem:[#allocation81_spill] sm:$0xff] %v11623_v20  ;;  %16537 = vst [vmem:[#allocation82_spill] sm:$0xff] %v11631_v14  ;;  %v887_v14 = vsub.f32 %v11620_v0, %v11647_v51  ;;  %v11699_v0 = vand.u32 4294901760, %v452_v6 }
  0x88   : > { %16538 = vst [vmem:[#allocation83_spill] sm:$0xff] %v11636_v36  ;;  %16539 = vst [vmem:[#allocation84_spill] sm:$0xff] %v11640_v5  ;;  %v451_v36 = vld [vmem:[%s11662_s17] sm:$0xff]  ;;  %8578 = vmatprep.subr.mxu1 %v11666_v7  ;;  %v894_v21 = vsub.f32 %v11654_v22, %v11683_v61  ;;  %v11715_v46 = vand.u32 4294901760, %v1006_v50 }
  0x89   : > { %16540 = vst [vmem:[#allocation85_spill] sm:$0xff] %v11647_v51  ;;  %16541 = vst [vmem:[#allocation86_spill] sm:$0xff] %v11650_v58  ;;  %v11697_v51 = vand.u32 4294901760, %v11659_v10  ;;  %8579 = vmatpush3.msra.mxu1 %v11677_v54  ;;  %v11702_v2 = vand.u32 4294901760, %v887_v14  ;;  %v11719_v14 = vsub.f32 %v452_v6, %v11699_v0  ;;  %v11739_v6 = vsub.f32 %v11519_v57, %v11572_v42 }
  0x8a   : > { %16542 = vst [vmem:[#allocation87_spill] sm:$0xff] %v11654_v22  ;;  %16543 = vst [vmem:[#allocation88_spill] sm:$0xff] %v11666_v7  ;;  %v11708_v7 = vand.u32 4294901760, %v11687_v15  ;;  %8580 = vmatprep.subr.mxu1 %v11691_v56  ;;  %v454_v22 = vld [vmem:[%s11662_s17 + $0x18] sm:$0xff]  ;;  %1045 = vmatprep.mubr.f32.mxu1 %v11699_v0 }
  0x8b   : > { %16544 = vst [vmem:[#allocation89_spill] sm:$0xff] %v11672_v1  ;;  %16545 = vst [vmem:[#allocation90_spill] sm:$0xff] %v11675_v28  ;;  %v11712_v1 = vsub.f32 %v11484_v34, %v11528_v60  ;;  %8581 = vmatpush3.msra.mxu1 %v11702_v2  ;;  %v11729_v34 = vand.u32 4294901760, %v894_v21  ;;  %8513 = vmatpush3.msra.mxu0 %v11697_v51  ;;  %v11760_v42 = vand.u32 4294901760, %v11739_v6 }
  0x8c   : > { %16546 = vst [vmem:[#allocation91_spill] sm:$0xff] %v11677_v54  ;;  %16547 = vst [vmem:[#allocation92_spill] sm:$0xff] %v11683_v61  ;;  %v11721_v54 = vand.u32 4294901760, %v451_v36  ;;  %v11725_v61 = vsub.f32 %v11500_v35, %v11549_v45  ;;  %v1013_v50 = vsub.f32 %v11687_v15, %v11708_v7  ;;  %8582 = vmatprep.subr.mxu1 %v11715_v46  ;;  %v11762_v35 = vand.u32 4294901760, %v454_v22 }
  0x8d   : > { %16548 = vst [vmem:[#allocation93_spill] sm:$0xff] %v11687_v15  ;;  %16549 = vst [vmem:[#allocation94_spill] sm:$0xff] %v11691_v56  ;;  %v11735_v56 = vand.u32 4294901760, %v11712_v1  ;;  %8583 = vmatpush3.msra.mxu1 %v11729_v34  ;;  %8642 = vmatprep.subr.mxu0 %v11233_v26  ;;  %v908_v26 = vsub.f32 %v11739_v6, %v11760_v42 }
  0x8e   : > { %16550 = vst [vmem:[#allocation95_spill] sm:$0xff] %v11697_v51  ;;  %16551 = vst [vmem:[#allocation96_spill] sm:$0xff] %v11699_v0  ;;  %v11745_v21 = vsub.f32 %v451_v36, %v11721_v54  ;;  %v11755_v57 = vand.u32 4294901760, %v1013_v50  ;;  %v16568_v36 = vand.u32 4294901760, %v11719_v14 }
  0x8f   : > { %16552 = vst [vmem:[#allocation97_spill] sm:$0xff] %v11702_v2  ;;  %16553 = vst [vmem:[#allocation98_spill] sm:$0xff] %v11708_v7  ;;  %v11748_v2 = vand.u32 4294901760, %v11725_v61  ;;  %v11752_v7 = vsub.f32 %v11537_v52, %v11590_v37  ;;  %v11786_v52 = vsub.f32 %v11554_v47, %v11604_v59 }
  0x90   : > { %16554 = vst [vmem:[#allocation99_spill] sm:$0xff] %v11712_v1  ;;  %16555 = vst [vmem:[#allocation100_spill] sm:$0xff] %v11715_v46  ;;  %v901_v46 = vsub.f32 %v11712_v1, %v11735_v56  ;;  %v582_v45 = vsub.f32 %v11719_v14, %v16568_v36  ;;  %8584 = vmatprep.subr.mxu1 %v11755_v57  ;;  %v11782_v36 = vsub.f32 %v454_v22, %v11762_v35 }
  0x91   : > { %16556 = vst [vmem:[#allocation101_spill] sm:$0xff] %v11719_v14  ;;  %16557 = vst [vmem:[#allocation102_spill] sm:$0xff] %v11721_v54  ;;  %v1020_v50 = vsub.f32 %v11725_v61, %v11748_v2  ;;  %v16573_v14 = vand.u32 4294901760, %v11745_v21 }
  0x92   : > { %16558 = vst [vmem:[#allocation103_spill] sm:$0xff] %v11725_v61  ;;  %16559 = vst [vmem:[#allocation104_spill] sm:$0xff] %v11729_v34  ;;  %v11772_v34 = vand.u32 4294901760, %v11752_v7  ;;  %v11777_v37 = vand.u32 4294901760, %v901_v46  ;;  %v15859_v22 = vand.u32 4294901760, %v11782_v36 }
  0x93   : > { %16560 = vst [vmem:[#allocation105_spill] sm:$0xff] %v11735_v56  ;;  %16561 = vst [vmem:[#allocation106_spill] sm:$0xff] %v11739_v6  ;;  %v453_v56 = vld [vmem:[%s11662_s17 + $0x10] sm:$0xff]  ;;  %v588_v61 = vsub.f32 %v11745_v21, %v16573_v14  ;;  %v11791_v0 = vand.u32 4294901760, %v1020_v50  ;;  %v11814_v50 = vsub.f32 %v11609_v9, %v11650_v58 }
  0x94   : > { %16562 = vst [vmem:[#allocation107_spill] sm:$0xff] %v11745_v21  ;;  %16563 = vst [vmem:[#allocation108_spill] sm:$0xff] %v11748_v2  ;;  %v583_v2 = vand.u32 4294901760, %v582_v45  ;;  %v1027_v46 = vsub.f32 %v11752_v7, %v11772_v34  ;;  %8585 = vmatpush3.msra.mxu1 %v11777_v37  ;;  %v11802_v47 = vand.u32 4294901760, %v453_v56  ;;  %v456_v45 = vld [vmem:[%s11662_s17 + $0x28] sm:$0xff] }
  0x95   : > { %16564 = vst [vmem:[#allocation109_spill] sm:$0xff] %v11752_v7  ;;  %16565 = vst [vmem:[#allocation110_spill] sm:$0xff] %v11755_v57  ;;  %v11796_v57 = vand.u32 4294901760, %v908_v26  ;;  %v589_v59 = vand.u32 4294901760, %v588_v61  ;;  %8586 = vmatprep.subr.mxu1 %v11791_v0  ;;  %v11810_v26 = vsub.f32 %v11577_v41, %v11623_v20  ;;  %v597_v61 = vsub.f32 %v11782_v36, %v15859_v22  ;;  %v460_v21 = vld [vmem:[%s11662_s17 + $0x48] sm:$0xff] }
  0x96   : > { %16566 = vst [vmem:[#allocation111_spill] sm:$0xff] %v11760_v42  ;;  %16567 = vst [vmem:[#allocation112_spill] sm:$0xff] %v11762_v35  ;;  %v11800_v42 = vand.u32 4294901760, %v11786_v52  ;;  %584 = vmatprep.mubr.f32.mxu0 %v583_v2  ;;  %v11806_v14 = vand.u32 4294901760, %v1027_v46  ;;  %v11823_v46 = vsub.f32 %v453_v56, %v11802_v47  ;;  %v11827_v41 = vsub.f32 %v11628_v4, %v11675_v28  ;;  %v455_v56 = vld [vmem:[%s11662_s17 + $0x20] sm:$0xff] }
  0x97   : > { %16569 = vst [vmem:[#allocation113_spill] sm:$0xff] %v11772_v34  ;;  %16570 = vst [vmem:[#allocation114_spill] sm:$0xff] %v11777_v37  ;;  %8587 = vmatpush3.msra.mxu1 %v11796_v57  ;;  %590 = vmatmul.mubr.f32.vlgmr.msra.gmra.mxu0 %v589_v59  ;;  %v11831_v9 = vand.u32 4294901760, %v11810_v26  ;;  %v11836_v22 = vand.u32 4294901760, %v456_v45  ;;  %v458_v37 = vld [vmem:[%s11662_s17 + $0x38] sm:$0xff] }
  0x98   : > { %16571 = vst [vmem:[#allocation115_spill] sm:$0xff] %v11782_v36  ;;  %16572 = vst [vmem:[#allocation116_spill] sm:$0xff] %v11786_v52  ;;  %v915_v2 = vsub.f32 %v11786_v52, %v11800_v42  ;;  %8588 = vmatprep.subr.mxu1 %v11806_v14  ;;  %v15886_v59 = vand.u32 4294901760, %v11823_v46  ;;  %8643 = vmatpush3.msra.mxu0 %v11255_v31 }
  0x99   : > { %16574 = vst [vmem:[#allocation117_spill] sm:$0xff] %v11791_v0  ;;  %16575 = vst [vmem:[#allocation118_spill] sm:$0xff] %v11796_v57  ;;  %v11834_v57 = vand.u32 4294901760, %v11814_v50  ;;  %v11840_v0 = vsub.f32 %v11659_v10, %v11697_v51  ;;  %v1034_v34 = vsub.f32 %v11810_v26, %v11831_v9  ;;  %v11856_v36 = vsub.f32 %v456_v45, %v11836_v22 }
  0x9a   : > { %16576 = vst [vmem:[#allocation119_spill] sm:$0xff] %v11800_v42  ;;  %16577 = vst [vmem:[#allocation120_spill] sm:$0xff] %v11802_v47  ;;  %v598_v42 = vand.u32 4294901760, %v597_v61  ;;  %v11844_v4 = vand.u32 4294901760, %v915_v2  ;;  %8644 = vmatprep.subr.mxu0 %v11261_v33  ;;  %v603_v2 = vsub.f32 %v11823_v46, %v15886_v59  ;;  %v11870_v45 = vand.u32 4294901760, %v458_v37  ;;  %v459_v59 = vld [vmem:[%s11662_s17 + $0x40] sm:$0xff] }
  0x9b   : > { %16578 = vst [vmem:[#allocation121_spill] sm:$0xff] %v11806_v14  ;;  %16579 = vst [vmem:[#allocation122_spill] sm:$0xff] %v11810_v26  ;;  %v11848_v14 = vand.u32 4294901760, %v11827_v41  ;;  %v922_v10 = vsub.f32 %v11814_v50, %v11834_v57  ;;  %v11859_v61 = vand.u32 4294901760, %v11840_v0  ;;  %v11874_v51 = vand.u32 4294901760, %v1034_v34  ;;  %8645 = vmatpush3.msra.mxu0 %v11286_v39 }
  0x9c   : > { %16580 = vst [vmem:[#allocation123_spill] sm:$0xff] %v11814_v50  ;;  %16581 = vst [vmem:[#allocation124_spill] sm:$0xff] %v11823_v46  ;;  %599 = vmatprep.mubr.f32.mxu0 %v598_v42  ;;  %8589 = vmatpush3.msra.mxu1 %v11844_v4  ;;  %v15903_v42 = vand.u32 4294901760, %v11856_v36  ;;  %v604_v46 = vand.u32 4294901760, %v603_v2  ;;  %v11890_v34 = vsub.f32 %v458_v37, %v11870_v45  ;;  %v11902_v2 = vand.u32 4294901760, %v460_v21 }
  0x9d   : > { %16582 = vst [vmem:[#allocation125_spill] sm:$0xff] %v11827_v41  ;;  %16583 = vst [vmem:[#allocation126_spill] sm:$0xff] %v11831_v9  ;;  %v1041_v31 = vsub.f32 %v11827_v41, %v11848_v14  ;;  %v457_v9 = vld [vmem:[%s11662_s17 + $0x30] sm:$0xff]  ;;  %v11876_v33 = vand.u32 4294901760, %v922_v10  ;;  %8646 = vmatprep.subr.mxu0 %v11299_v43  ;;  %8590 = vmatprep.subr.mxu1 %v11874_v51  ;;  %v11908_v43 = vand.u32 4294901760, %v459_v59 }
  0x9e   : > { %16584 = vst [vmem:[#allocation127_spill] sm:$0xff] %v11834_v57  ;;  %16585 = vst [vmem:[#allocation128_spill] sm:$0xff] %v11836_v22  ;;  %v11868_v57 = vand.u32 4294901760, %v455_v56  ;;  %v461_v10 = vld [vmem:[%s11662_s17 + $0x50] sm:$0xff]  ;;  %v612_v39 = vsub.f32 %v11856_v36, %v15903_v42  ;;  %8647 = vmatpush3.msra.mxu0 %v11316_v48  ;;  %v464_v42 = vld [vmem:[%s11662_s17 + $0x68] sm:$0xff] }
  0x9f   : > { %16586 = vst [vmem:[#allocation129_spill] sm:$0xff] %v11840_v0  ;;  %16587 = vst [vmem:[#allocation130_spill] sm:$0xff] %v11844_v4  ;;  %v929_v4 = vsub.f32 %v11840_v0, %v11859_v61  ;;  %v11884_v28 = vand.u32 4294901760, %v1041_v31  ;;  %v11900_v31 = vand.u32 4294901760, %v457_v9  ;;  %605 = vmatmul.mubr.f32.gmra.mxu0 %v604_v46  ;;  %8591 = vmatpush3.msra.mxu1 %v11876_v33  ;;  %v11921_v37 = vand.u32 4294901760, %v461_v10 }
  0xa0   : > { %16588 = vst [vmem:[#allocation131_spill] sm:$0xff] %v11848_v14  ;;  %16589 = vst [vmem:[#allocation132_spill] sm:$0xff] %v11856_v36  ;;  %v462_v14 = vld [vmem:[%s11662_s17 + $0x58] sm:$0xff]  ;;  %v11887_v41 = vsub.f32 %v455_v56, %v11868_v57  ;;  %v11918_v46 = vsub.f32 %v460_v21, %v11902_v2  ;;  %8648 = vmatprep.subr.mxu0 %v11330_v53 }
  0xa1   : > { %16590 = vst [vmem:[#allocation133_spill] sm:$0xff] %v11859_v61  ;;  %16591 = vst [vmem:[#allocation134_spill] sm:$0xff] %v11868_v57  ;;  %v11898_v61 = vand.u32 4294901760, %v929_v4  ;;  %8592 = vmatprep.subr.mxu1 %v11884_v28  ;;  %v613_v4 = vand.u32 4294901760, %v612_v39  ;;  %v11915_v36 = vsub.f32 %v457_v9, %v11900_v31  ;;  %v16607_v39 = vand.u32 4294901760, %v11890_v34  ;;  %8649 = vmatpush3.msra.mxu0 %v11375_v3 }
  0xa2   : > { %16592 = vst [vmem:[#allocation135_spill] sm:$0xff] %v11870_v45  ;;  %16593 = vst [vmem:[#allocation136_spill] sm:$0xff] %v11874_v51  ;;  %v11910_v51 = vand.u32 4294901760, %v462_v14  ;;  %v16606_v56 = vand.u32 4294901760, %v11887_v41  ;;  %v11931_v9 = vsub.f32 %v459_v59, %v11908_v43  ;;  %8650 = vmatprep.subr.mxu0 %v11392_v8 }
  0xa3   : > { %16594 = vst [vmem:[#allocation137_spill] sm:$0xff] %v11876_v33  ;;  %16595 = vst [vmem:[#allocation138_spill] sm:$0xff] %v11884_v28  ;;  %8593 = vmatpush3.msra.mxu1 %v11898_v61  ;;  %v627_v28 = vsub.f32 %v11890_v34, %v16607_v39  ;;  %614 = vmatprep.mubr.f32.mxu0 %v613_v4  ;;  %v15922_v53 = vand.u32 4294901760, %v11915_v36  ;;  %v11940_v33 = vsub.f32 %v461_v10, %v11921_v37  ;;  %v466_v39 = vld [vmem:[%s11662_s17 + $0x78] sm:$0xff] }
  0xa4   : > { %16596 = vst [vmem:[#allocation139_spill] sm:$0xff] %v11887_v41  ;;  %16597 = vst [vmem:[#allocation140_spill] sm:$0xff] %v11890_v34  ;;  %v618_v48 = vsub.f32 %v11887_v41, %v16606_v56  ;;  %v11934_v21 = vsub.f32 %v462_v14, %v11910_v51  ;;  %1047 = vmatmul.mubr.f32.vlgmr.msra.gmra.mxu1 %v11721_v54  ;;  %v11942_v56 = vand.u32 4294901760, %v464_v42  ;;  %v463_v41 = vld [vmem:[%s11662_s17 + $0x60] sm:$0xff]  ;;  %8722 = vmatprep.subr.mxu1 %v11195_v11 }
  0xa5   : > { %16598 = vst [vmem:[#allocation141_spill] sm:$0xff] %v11898_v61  ;;  %16599 = vst [vmem:[#allocation142_spill] sm:$0xff] %v11900_v31  ;;  %v15923_v61 = vand.u32 4294901760, %v11918_v46  ;;  %v628_v59 = vand.u32 4294901760, %v627_v28  ;;  %1052 = vmatprep.mubr.f32.mxu1 %v11762_v35  ;;  %v15934_v14 = vand.u32 4294901760, %v11931_v9  ;;  %8723 = vmatpush3.msra.mxu1 %v11197_v12  ;;  %v633_v10 = vsub.f32 %v11915_v36, %v15922_v53  ;;  %v465_v28 = vld [vmem:[%s11662_s17 + $0x70] sm:$0xff] }
  0xa6   : > { %16600 = vst [vmem:[#allocation143_spill] sm:$0xff] %v11902_v2  ;;  %16601 = vst [vmem:[#allocation144_spill] sm:$0xff] %v11908_v43  ;;  %v619_v34 = vand.u32 4294901760, %v618_v48  ;;  %v11960_v35 = vsub.f32 %v464_v42, %v11942_v56  ;;  %8724 = vmatprep.subr.mxu1 %v11199_v13  ;;  %v16613_v53 = vand.u32 4294901760, %v11934_v21  ;;  %v11969_v54 = vand.u32 4294901760, %v463_v41  ;;  %v467_v13 = vld [vmem:[%s11662_s17 + $0x80] sm:$0xff]  ;;  %8651 = vmatpush3.msra.mxu0 %v11411_v16 }
  0xa7   : > { %16602 = vst [vmem:[#allocation145_spill] sm:$0xff] %v11910_v51  ;;  %16603 = vst [vmem:[#allocation146_spill] sm:$0xff] %v11915_v36  ;;  %v642_v48 = vsub.f32 %v11918_v46, %v15923_v61  ;;  %v648_v4 = vsub.f32 %v11931_v9, %v15934_v14  ;;  %v11971_v3 = vand.u32 4294901760, %v466_v39  ;;  %v634_v42 = vand.u32 4294901760, %v633_v10  ;;  %8725 = vmatpush3.msra.mxu1 %v11210_v17 }
  0xa8   : > { %16604 = vst [vmem:[#allocation147_spill] sm:$0xff] %v11918_v46  ;;  %16605 = vst [vmem:[#allocation148_spill] sm:$0xff] %v11921_v37  ;;  %620 = vmatmul.mubr.f32.gmra.mxu0 %v619_v34  ;;  %v657_v61 = vsub.f32 %v11934_v21, %v16613_v53  ;;  %v468_v46 = vld [vmem:[%s11662_s17 + $0x88] sm:$0xff]  ;;  %1054 = vmatmul.mubr.f32.gmra.mxu1 %v11802_v47  ;;  %v11981_v53 = vsub.f32 %v463_v41, %v11969_v54  ;;  %v16617_v10 = vand.u32 4294901760, %v11940_v33 }
  0xa9   : > { %16608 = vst [vmem:[#allocation149_spill] sm:$0xff] %v11931_v9  ;;  %16609 = vst [vmem:[#allocation150_spill] sm:$0xff] %v11934_v21  ;;  %629 = vmatprep.mubr.f32.mxu0 %v628_v59  ;;  %v643_v34 = vand.u32 4294901760, %v642_v48  ;;  %1059 = vmatprep.mubr.f32.mxu1 %v11836_v22  ;;  %v11984_v14 = vsub.f32 %v466_v39, %v11971_v3  ;;  %v470_v21 = vld [vmem:[%s11662_s17 + $0x98] sm:$0xff]  ;;  %v649_v59 = vand.u32 4294901760, %v648_v4  ;;  %v11992_v36 = vand.u32 4294901760, %v465_v28 }
  0xaa   : > { %16610 = vst [vmem:[#allocation151_spill] sm:$0xff] %v11940_v33  ;;  %16611 = vst [vmem:[#allocation152_spill] sm:$0xff] %v11942_v56  ;;  %8726 = vmatprep.subr.mxu1 %v11212_v18  ;;  %v663_v48 = vsub.f32 %v11940_v33, %v16617_v10  ;;  %v11994_v22 = vand.u32 4294901760, %v468_v46  ;;  %v658_v41 = vand.u32 4294901760, %v657_v61  ;;  %v16620_v39 = vand.u32 4294901760, %v11960_v35  ;;  %v469_v10 = vld [vmem:[%s11662_s17 + $0x90] sm:$0xff]  ;;  %8652 = vmatprep.subr.mxu0 %v11430_v27 }
  0xab   : > { %16612 = vst [vmem:[#allocation153_spill] sm:$0xff] %v11960_v35  ;;  %16614 = vst [vmem:[#allocation154_spill] sm:$0xff] %v11969_v54  ;;  %8727 = vmatpush3.msra.mxu1 %v11214_v19  ;;  %v12001_v9 = vand.u32 4294901760, %v467_v13  ;;  %v12007_v33 = vsub.f32 %v465_v28, %v11992_v36  ;;  %v16626_v16 = vand.u32 4294901760, %v11984_v14  ;;  %8653 = vmatpush3.msra.mxu0 %v11444_v62 }
  0xac   : > { %16615 = vst [vmem:[#allocation155_spill] sm:$0xff] %v11971_v3  ;;  %16616 = vst [vmem:[#allocation156_spill] sm:$0xff] %v11981_v53  ;;  %635 = vmatmul.mubr.f32.gmra.mxu0 %v634_v42  ;;  %v672_v4 = vsub.f32 %v11960_v35, %v16620_v39  ;;  %1061 = vmatmul.mubr.f32.gmra.mxu1 %v11868_v57  ;;  %v12010_v61 = vsub.f32 %v468_v46, %v11994_v22  ;;  %v12012_v42 = vand.u32 4294901760, %v470_v21  ;;  %v472_v39 = vld [vmem:[%s11662_s17 + $0xa8] sm:$0xff] }
  0xad   : > { %16618 = vst [vmem:[#allocation157_spill] sm:$0xff] %v11992_v36  ;;  %16619 = vst [vmem:[#allocation158_spill] sm:$0xff] %v11994_v22  ;;  %644 = vmatprep.mubr.f32.mxu0 %v643_v34  ;;  %1066 = vmatprep.mubr.f32.mxu1 %v11870_v45  ;;  %v664_v47 = vand.u32 4294901760, %v663_v48  ;;  %v12019_v34 = vand.u32 4294901760, %v469_v10  ;;  %v16624_v46 = vand.u32 4294901760, %v11981_v53  ;;  %v15963_v45 = vand.u32 4294901760, %v12007_v33 }
  0xae   : > { %16621 = vst [vmem:[#allocation159_spill] sm:$0xff] %v12001_v9  ;;  %16622 = vst [vmem:[#allocation160_spill] sm:$0xff] %v12012_v42  ;;  %8728 = vmatprep.subr.mxu1 %v11226_v23  ;;  %v673_v28 = vand.u32 4294901760, %v672_v4  ;;  %v12027_v57 = vsub.f32 %v467_v13, %v12001_v9  ;;  %v471_v48 = vld [vmem:[%s11662_s17 + $0xa0] sm:$0xff]  ;;  %v12036_v35 = vsub.f32 %v470_v21, %v12012_v42  ;;  %v476_v4 = vld [vmem:[%s11662_s17 + $0xc8] sm:$0xff]  ;;  %8654 = vmatprep.subr.mxu0 %v11463_v29 }
  0xaf   : > { %8729 = vmatpush3.msra.mxu1 %v11228_v24  ;;  %16623 = vst [vmem:[#allocation161_spill] sm:$0xff] %v12019_v34  ;;  %v678_v8 = vsub.f32 %v11981_v53, %v16624_v46  ;;  %v12038_v46 = vand.u32 4294901760, %v472_v39  ;;  %v474_v53 = vld [vmem:[%s11662_s17 + $0xb8] sm:$0xff]  ;;  %v12046_v13 = vsub.f32 %v469_v10, %v12019_v34  ;;  %8655 = vmatpush3.msra.mxu0 %v11479_v55 }
  0xb0   : > { %650 = vmatmul.mubr.f32.gmra.mxu0 %v649_v59  ;;  %8730 = vmatprep.subr.mxu1 %v11230_v25  ;;  %16625 = vst [vmem:[#allocation162_spill] sm:$0xff] %v12027_v57  ;;  %v687_v59 = vsub.f32 %v11984_v14, %v16626_v16  ;;  %16627 = vst [vmem:[#allocation163_spill] sm:$0xff] %v12036_v35  ;;  %v12048_v16 = vand.u32 4294901760, %v471_v48  ;;  %v12055_v27 = vand.u32 4294901760, %v474_v53 }
  0xb1   : > { %659 = vmatprep.mubr.f32.mxu0 %v658_v41  ;;  %1068 = vmatmul.mubr.f32.gmra.mxu1 %v11900_v31  ;;  %16628 = vst [vmem:[#allocation164_spill] sm:$0xff] %v12046_v13  ;;  %v679_v21 = vand.u32 4294901760, %v678_v8  ;;  %v693_v41 = vsub.f32 %v12007_v33, %v15963_v45  ;;  %v473_v45 = vld [vmem:[%s11662_s17 + $0xb0] sm:$0xff] }
  0xb2   : > { %1073 = vmatprep.mubr.f32.mxu1 %v11902_v2  ;;  %8731 = vmatpush3.msra.mxu1 %v11252_v30  ;;  %v688_v10 = vand.u32 4294901760, %v687_v59  ;;  %v16629_v2 = vand.u32 4294901760, %v12010_v61  ;;  %v16632_v59 = vand.u32 4294901760, %v12027_v57  ;;  %v12080_v62 = vsub.f32 %v474_v53, %v12055_v27  ;;  %v478_v53 = vld [vmem:[%s11662_s17 + $0xd8] sm:$0xff] }
  0xb3   : > { %8732 = vmatprep.subr.mxu1 %v11258_v32  ;;  %v12082_v29 = vand.u32 4294901760, %v473_v45  ;;  %8656 = vmatprep.subr.mxu0 %v11514_v63  ;;  %v477_v63 = vld [vmem:[%s11662_s17 + $0xd0] sm:$0xff] }
  0xb4   : > { %665 = vmatmul.mubr.f32.gmra.mxu0 %v664_v47  ;;  %8733 = vmatpush3.msra.mxu1 %v11283_v38  ;;  %v702_v31 = vsub.f32 %v12010_v61, %v16629_v2  ;;  %v12063_v47 = vsub.f32 %v472_v39, %v12038_v46  ;;  %v12073_v2 = vsub.f32 %v471_v48, %v12048_v16  ;;  %v694_v39 = vand.u32 4294901760, %v693_v41 }
  0xb5   : > { %674 = vmatprep.mubr.f32.mxu0 %v673_v28  ;;  %1075 = vmatmul.mubr.f32.gmra.mxu1 %v11908_v43  ;;  %v708_v8 = vsub.f32 %v12027_v57, %v16632_v59  ;;  %16633 = vst [vmem:[#allocation167_spill] sm:$0xff] %v12080_v62  ;;  %v16634_v48 = vand.u32 4294901760, %v12036_v35  ;;  %v475_v59 = vld [vmem:[%s11662_s17 + $0xc0] sm:$0xff]  ;;  %v12104_v55 = vsub.f32 %v473_v45, %v12082_v29  ;;  %v16640_v45 = vld [vmem:[#allocation64_spill] sm:$0xff] }
  0xb6   : > { %16630 = vst [vmem:[#allocation165_spill] sm:$0xff] %v12063_v47  ;;  %1080 = vmatprep.mubr.f32.mxu1 %v11910_v51  ;;  %8734 = vmatprep.subr.mxu1 %v11289_v40  ;;  %16631 = vst [vmem:[#allocation166_spill] sm:$0xff] %v12073_v2  ;;  %v703_v28 = vand.u32 4294901760, %v702_v31  ;;  %v12089_v51 = vand.u32 4294901760, %v476_v4  ;;  %v12106_v43 = vand.u32 4294901760, %v475_v59 }
  0xb7   : > { %8735 = vmatpush3.msra.mxu1 %v11302_v44  ;;  %v709_v41 = vand.u32 4294901760, %v708_v8  ;;  %16637 = vst [vmem:[#allocation168_spill] sm:$0xff] %v12104_v55  ;;  %8657 = vmatpush3.msra.mxu0 %v16640_v45 }
  0xb8   : > { %680 = vmatmul.mubr.f32.gmra.mxu0 %v679_v21  ;;  %v717_v21 = vsub.f32 %v12036_v35, %v16634_v48  ;;  %8736 = vmatprep.subr.mxu1 %v11319_v49  ;;  %v12114_v8 = vsub.f32 %v476_v4, %v12089_v51  ;;  %v16641_v35 = vld [vmem:[#allocation70_spill] sm:$0xff]  ;;  %v12134_v57 = vsub.f32 %v475_v59, %v12106_v43  ;;  %v16647_v59 = vld [vmem:[#allocation76_spill] sm:$0xff] }
  0xb9   : > { %689 = vmatprep.mubr.f32.mxu0 %v688_v10  ;;  %1082 = vmatmul.mubr.f32.gmra.mxu1 %v11921_v37  ;;  %v16635_v10 = vand.u32 4294901760, %v12046_v13  ;;  %v16636_v37 = vld [vmem:[#allocation29_spill] sm:$0xff] }
  0xba   : > { %1087 = vmatprep.mubr.f32.mxu1 %v11942_v56  ;;  %8737 = vmatpush3.msra.mxu1 %v16636_v37  ;;  %16639 = vst [vmem:[#allocation169_spill] sm:$0xff] %v12114_v8  ;;  %v480_v56 = vld [vmem:[%s11662_s17 + $0xe8] sm:$0xff] }
  0xbb   : > { %v723_v31 = vsub.f32 %v12046_v13, %v16635_v10  ;;  %v718_v10 = vand.u32 4294901760, %v717_v21  ;;  %v16638_v13 = vand.u32 4294901760, %v12063_v47  ;;  %8658 = vmatprep.subr.mxu0 %v16641_v35  ;;  %v482_v35 = vld [vmem:[%s11662_s17 + $0xf8] sm:$0xff] }
  0xbc   : > { %695 = vmatmul.mubr.f32.gmra.mxu0 %v694_v39  ;;  %v12116_v39 = vand.u32 4294901760, %v478_v53 }
  0xbd   : > { %704 = vmatprep.mubr.f32.mxu0 %v703_v28  ;;  %1089 = vmatmul.mubr.f32.gmra.mxu1 %v11969_v54  ;;  %v732_v48 = vsub.f32 %v12063_v47, %v16638_v13  ;;  %v16642_v28 = vand.u32 4294901760, %v12073_v2  ;;  %v16643_v54 = vld [vmem:[#allocation35_spill] sm:$0xff]  ;;  %v12126_v13 = vand.u32 4294901760, %v477_v63  ;;  %v724_v4 = vand.u32 4294901760, %v723_v31  ;;  %v16644_v47 = vld [vmem:[#allocation38_spill] sm:$0xff] }
  0xbe   : > { %1094 = vmatprep.mubr.f32.mxu1 %v11971_v3  ;;  %8738 = vmatprep.subr.mxu1 %v16643_v54  ;;  %v16645_v3 = vand.u32 4294901760, %v12080_v62  ;;  %v12141_v31 = vand.u32 4294901760, %v480_v56  ;;  %v16650_v54 = vld [vmem:[#allocation46_spill] sm:$0xff] }
  0xbf   : > { %v738_v21 = vsub.f32 %v12073_v2, %v16642_v28  ;;  %8739 = vmatpush3.msra.mxu1 %v16644_v47  ;;  %v733_v28 = vand.u32 4294901760, %v732_v48  ;;  %v479_v47 = vld [vmem:[%s11662_s17 + $0xe0] sm:$0xff]  ;;  %v12150_v48 = vsub.f32 %v477_v63, %v12126_v13  ;;  %v16649_v2 = vand.u32 4294901760, %v12104_v55 }
  0xc0   : > { %710 = vmatmul.mubr.f32.gmra.mxu0 %v709_v41  ;;  %v747_v45 = vsub.f32 %v12080_v62, %v16645_v3  ;;  %v12139_v41 = vsub.f32 %v478_v53, %v12116_v39  ;;  %v16646_v3 = vld [vmem:[#allocation73_spill] sm:$0xff] }
  0xc1   : > { %719 = vmatprep.mubr.f32.mxu0 %v718_v10  ;;  %1096 = vmatmul.mubr.f32.gmra.mxu1 %v11992_v36  ;;  %v739_v62 = vand.u32 4294901760, %v738_v21  ;;  %v16648_v10 = vld [vmem:[#allocation42_spill] sm:$0xff]  ;;  %v753_v36 = vsub.f32 %v12104_v55, %v16649_v2  ;;  %v16651_v21 = vand.u32 4294901760, %v12114_v8  ;;  %v481_v2 = vld [vmem:[%s11662_s17 + $0xf0] sm:$0xff] }
  0xc2   : > { %1101 = vmatprep.mubr.f32.mxu1 %v11994_v22  ;;  %8659 = vmatpush3.msra.mxu0 %v16646_v3  ;;  %v748_v53 = vand.u32 4294901760, %v747_v45  ;;  %v12157_v22 = vand.u32 4294901760, %v479_v47  ;;  %v12165_v45 = vsub.f32 %v480_v56, %v12141_v31  ;;  %v16652_v3 = vld [vmem:[#allocation80_spill] sm:$0xff] }
  0xc3   : > { %8660 = vmatprep.subr.mxu0 %v16647_v59  ;;  %8740 = vmatprep.subr.mxu1 %v16648_v10  ;;  %v762_v63 = vsub.f32 %v12114_v8, %v16651_v21  ;;  %v12167_v59 = vand.u32 4294901760, %v482_v35  ;;  %v754_v21 = vand.u32 4294901760, %v753_v36  ;;  %v16655_v8 = vld [vmem:[#allocation52_spill] sm:$0xff] }
  0xc4   : > { %725 = vmatmul.mubr.f32.gmra.mxu0 %v724_v4  ;;  %8741 = vmatpush3.msra.mxu1 %v16650_v54  ;;  %v16654_v4 = vand.u32 4294901760, %v12134_v57  ;;  %v12180_v55 = vsub.f32 %v479_v47, %v12157_v22  ;;  %v16658_v47 = vld [vmem:[#allocation58_spill] sm:$0xff] }
  0xc5   : > { %734 = vmatprep.mubr.f32.mxu0 %v733_v28  ;;  %1103 = vmatmul.mubr.f32.gmra.mxu1 %v12001_v9  ;;  %v16653_v28 = vld [vmem:[#allocation49_spill] sm:$0xff]  ;;  %v12190_v9 = vsub.f32 %v482_v35, %v12167_v59 }
  0xc6   : > { %1108 = vmatprep.mubr.f32.mxu1 %v12012_v42  ;;  %8661 = vmatpush3.msra.mxu0 %v16652_v3  ;;  %v768_v56 = vsub.f32 %v12134_v57, %v16654_v4  ;;  %v12182_v42 = vand.u32 4294901760, %v481_v2  ;;  %v16656_v3 = vand.u32 4294901760, %v12139_v41  ;;  %v16657_v4 = vld [vmem:[#allocation87_spill] sm:$0xff] }
  0xc7   : > { %8662 = vmatprep.subr.mxu0 %v11640_v5  ;;  %8742 = vmatprep.subr.mxu1 %v16653_v28  ;;  %v763_v5 = vand.u32 4294901760, %v762_v63  ;;  %v16659_v63 = vand.u32 4294901760, %v12150_v48 }
  0xc8   : > { %740 = vmatmul.mubr.f32.gmra.mxu0 %v739_v62  ;;  %8743 = vmatpush3.msra.mxu1 %v16655_v8  ;;  %v777_v62 = vsub.f32 %v12139_v41, %v16656_v3  ;;  %v12202_v35 = vsub.f32 %v481_v2, %v12182_v42  ;;  %v16662_v3 = vld [vmem:[#allocation67_spill] sm:$0xff] }
  0xc9   : > { %749 = vmatprep.mubr.f32.mxu0 %v748_v53  ;;  %1110 = vmatmul.mubr.f32.gmra.mxu1 %v12019_v34  ;;  %v769_v53 = vand.u32 4294901760, %v768_v56  ;;  %v783_v34 = vsub.f32 %v12150_v48, %v16659_v63  ;;  %v16661_v63 = vld [vmem:[#allocation103_spill] sm:$0xff] }
  0xca   : > { %1115 = vmatprep.mubr.f32.mxu1 %v12038_v46  ;;  %8663 = vmatpush3.msra.mxu0 %v16657_v4  ;;  %v778_v36 = vand.u32 4294901760, %v777_v62  ;;  %v16664_v4 = vld [vmem:[#allocation71_spill] sm:$0xff] }
  0xcb   : > { %8664 = vmatprep.subr.mxu0 %v11687_v15  ;;  %8744 = vmatprep.subr.mxu1 %v16658_v47  ;;  %v16660_v15 = vand.u32 4294901760, %v12165_v45  ;;  %v784_v2 = vand.u32 4294901760, %v783_v34  ;;  %v16666_v34 = vld [vmem:[#allocation74_spill] sm:$0xff] }
  0xcc   : > { %755 = vmatmul.mubr.f32.gmra.mxu0 %v754_v21  ;;  %8745 = vmatpush3.msra.mxu1 %v11528_v60 }
  0xcd   : > { %764 = vmatprep.mubr.f32.mxu0 %v763_v5  ;;  %1117 = vmatmul.mubr.f32.gmra.mxu1 %v12048_v16  ;;  %v792_v21 = vsub.f32 %v12165_v45, %v16660_v15  ;;  %v16663_v5 = vand.u32 4294901760, %v12180_v55  ;;  %v16016_v15 = vand.u32 4294901760, %v12202_v35 }
  0xce   : > { %1122 = vmatprep.mubr.f32.mxu1 %v12055_v27  ;;  %8665 = vmatpush3.msra.mxu0 %v11712_v1  ;;  %v16665_v1 = vand.u32 4294901760, %v12190_v9 }
  0xcf   : > { %8666 = vmatprep.subr.mxu0 %v16661_v63  ;;  %8746 = vmatprep.subr.mxu1 %v16662_v3  ;;  %v798_v62 = vsub.f32 %v12180_v55, %v16663_v5  ;;  %v793_v56 = vand.u32 4294901760, %v792_v21  ;;  %v16667_v5 = vld [vmem:[#allocation77_spill] sm:$0xff] }
  0xd0   : > { %770 = vmatmul.mubr.f32.gmra.mxu0 %v769_v53  ;;  %8747 = vmatpush3.msra.mxu1 %v16664_v4  ;;  %v807_v63 = vsub.f32 %v12190_v9, %v16665_v1 }
  0xd1   : > { %779 = vmatprep.mubr.f32.mxu0 %v778_v36  ;;  %1124 = vmatmul.mubr.f32.gmra.mxu1 %v12082_v29  ;;  %v799_v53 = vand.u32 4294901760, %v798_v62  ;;  %v813_v36 = vsub.f32 %v12202_v35, %v16016_v15  ;;  %v16671_v62 = vld [vmem:[#allocation101_spill] sm:$0xff]  ;;  %v16675_v15 = vld [vmem:[#allocation19_spill] sm:$0xff] }
  0xd2   : > { %1129 = vmatprep.mubr.f32.mxu1 %v12089_v51  ;;  %8667 = vmatpush3.msra.mxu0 %v11739_v6  ;;  %v808_v1 = vand.u32 4294901760, %v807_v63  ;;  %v16669_v63 = vld [vmem:[#allocation90_spill] sm:$0xff] }
  0xd3   : > { %8668 = vmatprep.subr.mxu0 %v11752_v7  ;;  %8748 = vmatprep.subr.mxu1 %v16666_v34  ;;  %v814_v21 = vand.u32 4294901760, %v813_v36  ;;  %v16673_v36 = vld [vmem:[#allocation107_spill] sm:$0xff] }
  0xd4   : > { %785 = vmatmul.mubr.f32.gmra.mxu0 %v784_v2  ;;  %8749 = vmatpush3.msra.mxu1 %v16667_v5  ;;  %v16670_v2 = vld [vmem:[#allocation95_spill] sm:$0xff]  ;;  %v16683_v7 = vand.u32 4294901760, %v16673_v36 }
  0xd5   : > { %794 = vmatprep.mubr.f32.mxu0 %v793_v56  ;;  %1131 = vmatmul.mubr.f32.gmra.mxu1 %v12106_v43  ;;  %v16668_v56 = vld [vmem:[#allocation125_spill] sm:$0xff] }
  0xd6   : > { %1136 = vmatprep.mubr.f32.mxu1 %v12116_v39  ;;  %8669 = vmatpush3.msra.mxu0 %v11786_v52  ;;  %v16682_v52 = vld [vmem:[#allocation28_spill] sm:$0xff] }
  0xd7   : > { %8670 = vmatprep.subr.mxu0 %v11810_v26  ;;  %8750 = vmatprep.subr.mxu1 %v11623_v20  ;;  %v16681_v26 = vld [vmem:[#allocation132_spill] sm:$0xff] }
  0xd8   : > { %800 = vmatmul.mubr.f32.gmra.mxu0 %v799_v53  ;;  %8751 = vmatpush3.msra.mxu1 %v11650_v58  ;;  %v16672_v53 = vld [vmem:[#allocation15_spill] sm:$0xff] }
  0xd9   : > { %809 = vmatprep.mubr.f32.mxu0 %v808_v1  ;;  %1138 = vmatmul.mubr.f32.gmra.mxu1 %v12126_v13  ;;  %v16674_v1 = vld [vmem:[#allocation115_spill] sm:$0xff] }
  0xda   : > { %8671 = vmatpush3.msra.mxu0 %v11814_v50  ;;  %1143 = vmatprep.mubr.f32.mxu1 %v12141_v31  ;;  %v16680_v50 = vld [vmem:[#allocation25_spill] sm:$0xff] }
  0xdb   : > { %8672 = vmatprep.subr.mxu0 %v16668_v56  ;;  %8752 = vmatprep.subr.mxu1 %v16669_v63  ;;  %v16678_v56 = vld [vmem:[#allocation22_spill] sm:$0xff] }
  0xdc   : > { %815 = vmatmul.mubr.f32.gmra.mxu0 %v814_v21  ;;  %8753 = vmatpush3.msra.mxu1 %v16670_v2  ;;  %v16676_v21 = vld [vmem:[#allocation20_spill] sm:$0xff] }
  0xdd   : > { %8673 = vmatpush3.msra.mxu0 %v11840_v0  ;;  %1287 = vmatprep.mubr.f32.mxu0 %v16671_v62  ;;  %v16677_v0 = vand.u32 4294901760, %v16671_v62  ;;  %v16685_v62 = vand.u32 4294901760, %v16674_v1 }
  0xde   : > { %1145 = vmatmul.mubr.f32.gmra.mxu1 %v12157_v22  ;;  %8802 = vmatprep.subr.mxu0 %v16672_v53  ;;  %v16679_v53 = vld [vmem:[#allocation124_spill] sm:$0xff] }
  0xdf   : > { %1150 = vmatprep.mubr.f32.mxu1 %v12167_v59  ;;  %8882 = vmatprep.subr.mxu1 %v11195_v11 }
  0xe0   : > { %1290 = vmatmul.mubr.f32.vlgmr.msra.gmra.mxu0 %v16673_v36  ;;  %v16691_v36 = vld [vmem:[#allocation146_spill] sm:$0xff] }
  0xe1   : > { %1296 = vmatprep.mubr.f32.mxu0 %v16674_v1  ;;  %8803 = vmatpush3.msra.mxu0 %v16675_v15  ;;  %v16684_v15 = vld [vmem:[#allocation32_spill] sm:$0xff]  ;;  %v16692_v1 = vld [vmem:[#allocation147_spill] sm:$0xff] }
  0xe2   : > { %1152 = vmatmul.mubr.f32.gmra.mxu1 %v12182_v42  ;;  %8804 = vmatprep.subr.mxu0 %v16676_v21  ;;  %v16688_v21 = vld [vmem:[#allocation140_spill] sm:$0xff] }
  0xe3   : > { %1529 = vmatprep.mubr.f32.mxu1 %v16677_v0  ;;  %8805 = vmatpush3.msra.mxu0 %v16678_v56  ;;  %v16686_v0 = vld [vmem:[#allocation139_spill] sm:$0xff]  ;;  %v16687_v56 = vld [vmem:[#allocation6_spill] sm:$0xff] }
  0xe4   : > { %1299 = vmatmul.mubr.f32.gmra.mxu0 %v16679_v53  ;;  %8806 = vmatprep.subr.mxu0 %v16680_v50  ;;  %v16699_v50 = vld [vmem:[#allocation47_spill] sm:$0xff] }
  0xe5   : > { %1305 = vmatprep.mubr.f32.mxu0 %v16681_v26  ;;  %8807 = vmatpush3.msra.mxu0 %v16682_v52  ;;  %v16689_v52 = vand.u32 4294901760, %v16679_v53  ;;  %v16695_v53 = vld [vmem:[#allocation44_spill] sm:$0xff] }
  0xe6   : > { %1533 = vmatmul.mubr.f32.vlgmr.msra.gmra.mxu1 %v16683_v7  ;;  %8808 = vmatprep.subr.mxu0 %v16684_v15  ;;  %v16690_v7 = vand.u32 4294901760, %v16681_v26  ;;  %v16694_v15 = vand.u32 4294901760, %v16686_v0  ;;  %v16697_v26 = vld [vmem:[#allocation149_spill] sm:$0xff] }
  0xe7   : > { %8883 = vmatpush3.msra.mxu1 %v11197_v12  ;;  %1540 = vmatprep.mubr.f32.mxu1 %v16685_v62  ;;  %v16693_v62 = vld [vmem:[#allocation40_spill] sm:$0xff] }
  0xe8   : > { %1308 = vmatmul.mubr.f32.gmra.mxu0 %v16686_v0  ;;  %8884 = vmatprep.subr.mxu1 %v16687_v56  ;;  %v16701_v0 = vld [vmem:[#allocation50_spill] sm:$0xff] }
  0xe9   : > { %1314 = vmatprep.mubr.f32.mxu0 %v16688_v21  ;;  %8885 = vmatpush3.msra.mxu1 %v11210_v17 }
  0xea   : > { %1544 = vmatmul.mubr.f32.gmra.mxu1 %v16689_v52  ;;  %8886 = vmatprep.subr.mxu1 %v11212_v18  ;;  %v16696_v52 = vand.u32 4294901760, %v16688_v21  ;;  %v16703_v21 = vld [vmem:[#allocation151_spill] sm:$0xff] }
  0xeb   : > { %1551 = vmatprep.mubr.f32.mxu1 %v16690_v7  ;;  %8887 = vmatpush3.msra.mxu1 %v11214_v19  ;;  %v16698_v7 = vld [vmem:[#allocation150_spill] sm:$0xff] }
  0xec   : > { %1317 = vmatmul.mubr.f32.gmra.mxu0 %v16691_v36  ;;  %8888 = vmatprep.subr.mxu1 %v11226_v23 }
  0xed   : > { %1323 = vmatprep.mubr.f32.mxu0 %v16692_v1  ;;  %8809 = vmatpush3.msra.mxu0 %v16693_v62  ;;  %v16700_v62 = vand.u32 4294901760, %v16691_v36  ;;  %v16707_v36 = vld [vmem:[#allocation57_spill] sm:$0xff] }
  0xee   : > { %1555 = vmatmul.mubr.f32.gmra.mxu1 %v16694_v15  ;;  %8810 = vmatprep.subr.mxu0 %v16695_v53  ;;  %v16702_v15 = vand.u32 4294901760, %v16692_v1  ;;  %v16705_v53 = vld [vmem:[#allocation54_spill] sm:$0xff]  ;;  %v16709_v1 = vld [vmem:[#allocation156_spill] sm:$0xff] }
  0xef   : > { %1562 = vmatprep.mubr.f32.mxu1 %v16696_v52  ;;  %8889 = vmatpush3.msra.mxu1 %v11228_v24  ;;  %v16704_v52 = vld [vmem:[#allocation153_spill] sm:$0xff] }
  0xf0   : > { %1326 = vmatmul.mubr.f32.gmra.mxu0 %v16697_v26  ;;  %8890 = vmatprep.subr.mxu1 %v11230_v25 }
  0xf1   : > { %1332 = vmatprep.mubr.f32.mxu0 %v16698_v7  ;;  %8811 = vmatpush3.msra.mxu0 %v16699_v50  ;;  %v16706_v50 = vand.u32 4294901760, %v16697_v26  ;;  %v16712_v26 = vld [vmem:[#allocation66_spill] sm:$0xff] }
  0xf2   : > { %1566 = vmatmul.mubr.f32.gmra.mxu1 %v16700_v62  ;;  %8812 = vmatprep.subr.mxu0 %v16701_v0  ;;  %v16708_v62 = vand.u32 4294901760, %v16698_v7  ;;  %v16714_v7 = vld [vmem:[#allocation69_spill] sm:$0xff] }
  0xf3   : > { %1573 = vmatprep.mubr.f32.mxu1 %v16702_v15  ;;  %8891 = vmatpush3.msra.mxu1 %v11252_v30  ;;  %v16710_v15 = vld [vmem:[#allocation60_spill] sm:$0xff] }
  0xf4   : > { %1335 = vmatmul.mubr.f32.gmra.mxu0 %v16703_v21  ;;  %8892 = vmatprep.subr.mxu1 %v11258_v32 }
  0xf5   : > { %1341 = vmatprep.mubr.f32.mxu0 %v16704_v52  ;;  %8813 = vmatpush3.msra.mxu0 %v16705_v53  ;;  %v16711_v53 = vand.u32 4294901760, %v16703_v21  ;;  %v16716_v21 = vld [vmem:[#allocation75_spill] sm:$0xff] }
  0xf6   : > { %1577 = vmatmul.mubr.f32.gmra.mxu1 %v16706_v50  ;;  %8814 = vmatprep.subr.mxu0 %v16707_v36  ;;  %v16713_v50 = vand.u32 4294901760, %v16704_v52  ;;  %v16718_v52 = vld [vmem:[#allocation162_spill] sm:$0xff]  ;;  %v16728_v36 = vld [vmem:[#allocation85_spill] sm:$0xff] }
  0xf7   : > { %1584 = vmatprep.mubr.f32.mxu1 %v16708_v62  ;;  %8893 = vmatpush3.msra.mxu1 %v11283_v38  ;;  %v16715_v62 = vand.u32 4294901760, %v16709_v1 }
  0xf8   : > { %1344 = vmatmul.mubr.f32.gmra.mxu0 %v16709_v1  ;;  %8894 = vmatprep.subr.mxu1 %v11289_v40  ;;  %v16723_v1 = vld [vmem:[#allocation83_spill] sm:$0xff] }
  0xf9   : > { %1350 = vmatprep.mubr.f32.mxu0 %v11984_v14  ;;  %8815 = vmatpush3.msra.mxu0 %v16710_v15  ;;  %v16721_v15 = vld [vmem:[#allocation79_spill] sm:$0xff] }
  0xfa   : > { %1588 = vmatmul.mubr.f32.gmra.mxu1 %v16711_v53  ;;  %8816 = vmatprep.subr.mxu0 %v16712_v26  ;;  %v16717_v53 = vand.u32 4294901760, %v11984_v14  ;;  %v16720_v26 = vld [vmem:[#allocation163_spill] sm:$0xff]  ;;  %v16725_v14 = vld [vmem:[#allocation38_spill] sm:$0xff] }
  0xfb   : > { %1595 = vmatprep.mubr.f32.mxu1 %v16713_v50  ;;  %8895 = vmatpush3.msra.mxu1 %v11302_v44  ;;  %v16719_v50 = vld [vmem:[#allocation35_spill] sm:$0xff] }
  0xfc   : > { %1353 = vmatmul.mubr.f32.gmra.mxu0 %v12007_v33  ;;  %8896 = vmatprep.subr.mxu1 %v11319_v49 }
  0xfd   : > { %1359 = vmatprep.mubr.f32.mxu0 %v12010_v61  ;;  %8817 = vmatpush3.msra.mxu0 %v16714_v7  ;;  %v16722_v7 = vand.u32 4294901760, %v12007_v33  ;;  %v16730_v33 = vld [vmem:[#allocation89_spill] sm:$0xff] }
  0xfe   : > { %1599 = vmatmul.mubr.f32.gmra.mxu1 %v16715_v62  ;;  %8818 = vmatprep.subr.mxu0 %v16716_v21  ;;  %v16724_v62 = vand.u32 4294901760, %v12010_v61  ;;  %v16727_v21 = vld [vmem:[#allocation165_spill] sm:$0xff]  ;;  %v16732_v61 = vld [vmem:[#allocation166_spill] sm:$0xff] }
  0xff   : > { %1606 = vmatprep.mubr.f32.mxu1 %v16717_v53  ;;  %8897 = vmatpush3.msra.mxu1 %v16636_v37  ;;  %v16726_v53 = vld [vmem:[#allocation164_spill] sm:$0xff] }
 0x100   : > { %1362 = vmatmul.mubr.f32.gmra.mxu0 %v16718_v52  ;;  %8898 = vmatprep.subr.mxu1 %v16719_v50 }
 0x101   : > { %1368 = vmatprep.mubr.f32.mxu0 %v16720_v26  ;;  %8819 = vmatpush3.msra.mxu0 %v16721_v15  ;;  %v16729_v15 = vand.u32 4294901760, %v16718_v52  ;;  %v16736_v52 = vld [vmem:[#allocation98_spill] sm:$0xff] }
 0x102   : > { %1610 = vmatmul.mubr.f32.gmra.mxu1 %v16722_v7  ;;  %8820 = vmatprep.subr.mxu0 %v16723_v1  ;;  %v16731_v7 = vand.u32 4294901760, %v16720_v26  ;;  %v16734_v1 = vld [vmem:[#allocation92_spill] sm:$0xff] }
 0x103   : > { %1617 = vmatprep.mubr.f32.mxu1 %v16724_v62  ;;  %8899 = vmatpush3.msra.mxu1 %v16725_v14  ;;  %v16733_v62 = vld [vmem:[#allocation167_spill] sm:$0xff]  ;;  %v16738_v26 = vld [vmem:[#allocation168_spill] sm:$0xff] }
 0x104   : > { %1371 = vmatmul.mubr.f32.gmra.mxu0 %v16726_v53  ;;  %8900 = vmatprep.subr.mxu1 %v16648_v10 }
 0x105   : > { %1377 = vmatprep.mubr.f32.mxu0 %v16727_v21  ;;  %8821 = vmatpush3.msra.mxu0 %v16728_v36  ;;  %v16735_v36 = vand.u32 4294901760, %v16726_v53  ;;  %v16742_v53 = vld [vmem:[#allocation108_spill] sm:$0xff] }
 0x106   : > { %1621 = vmatmul.mubr.f32.gmra.mxu1 %v16729_v15  ;;  %8822 = vmatprep.subr.mxu0 %v16730_v33  ;;  %v16737_v15 = vand.u32 4294901760, %v16727_v21  ;;  %v16740_v33 = vld [vmem:[#allocation105_spill] sm:$0xff]  ;;  %v16744_v21 = vld [vmem:[#allocation111_spill] sm:$0xff] }
 0x107   : > { %1628 = vmatprep.mubr.f32.mxu1 %v16731_v7  ;;  %8901 = vmatpush3.msra.mxu1 %v16650_v54  ;;  %v16739_v7 = vld [vmem:[#allocation169_spill] sm:$0xff] }
 0x108   : > { %1380 = vmatmul.mubr.f32.gmra.mxu0 %v16732_v61  ;;  %8902 = vmatprep.subr.mxu1 %v16653_v28 }
 0x109   : > { %1386 = vmatprep.mubr.f32.mxu0 %v16733_v62  ;;  %8823 = vmatpush3.msra.mxu0 %v16734_v1  ;;  %v16741_v1 = vand.u32 4294901760, %v16732_v61  ;;  %v16746_v61 = vld [vmem:[#allocation113_spill] sm:$0xff] }
 0x10a   : > { %1632 = vmatmul.mubr.f32.gmra.mxu1 %v16735_v36  ;;  %8824 = vmatprep.subr.mxu0 %v16736_v52  ;;  %v16743_v36 = vand.u32 4294901760, %v16733_v62  ;;  %v16748_v62 = vld [vmem:[#allocation119_spill] sm:$0xff] }
 0x10b   : > { %1639 = vmatprep.mubr.f32.mxu1 %v16737_v15  ;;  %8903 = vmatpush3.msra.mxu1 %v16655_v8  ;;  %v16745_v15 = vand.u32 4294901760, %v16738_v26 }
 0x10c   : > { %1389 = vmatmul.mubr.f32.gmra.mxu0 %v16738_v26  ;;  %8904 = vmatprep.subr.mxu1 %v16658_v47  ;;  %v16750_v26 = vld [vmem:[#allocation126_spill] sm:$0xff] }
 0x10d   : > { %1395 = vmatprep.mubr.f32.mxu0 %v16739_v7  ;;  %8825 = vmatpush3.msra.mxu0 %v16740_v33 }
 0x10e   : > { %1643 = vmatmul.mubr.f32.gmra.mxu1 %v16741_v1  ;;  %8826 = vmatprep.subr.mxu0 %v16742_v53  ;;  %v16747_v1 = vand.u32 4294901760, %v16739_v7  ;;  %v16752_v7 = vld [vmem:[#allocation127_spill] sm:$0xff] }
 0x10f   : > { %1650 = vmatprep.mubr.f32.mxu1 %v16743_v36  ;;  %8905 = vmatpush3.msra.mxu1 %v11528_v60  ;;  %v16749_v36 = vand.u32 4294901760, %v12134_v57  ;;  %v8316_v53 = vld [vmem:[%s11662_s17 + $0x130] sm:$0xff] }
 0x110   : > { %1398 = vmatmul.mubr.f32.gmra.mxu0 %v12134_v57  ;;  %8906 = vmatprep.subr.mxu1 %v16662_v3  ;;  %v16755_v57 = vld [vmem:[#allocation133_spill] sm:$0xff] }
 0x111   : > { %1404 = vmatprep.mubr.f32.mxu0 %v12139_v41  ;;  %8827 = vmatpush3.msra.mxu0 %v16744_v21 }
 0x112   : > { %1654 = vmatmul.mubr.f32.gmra.mxu1 %v16745_v15  ;;  %8828 = vmatprep.subr.mxu0 %v16746_v61  ;;  %v16751_v15 = vand.u32 4294901760, %v12139_v41  ;;  %v16757_v41 = vld [vmem:[#allocation96_spill] sm:$0xff]  ;;  %v8319_v61 = vld [vmem:[%s11662_s17 + $0x148] sm:$0xff] }
 0x113   : > { %1661 = vmatprep.mubr.f32.mxu1 %v16747_v1  ;;  %8907 = vmatpush3.msra.mxu1 %v16664_v4  ;;  %v16753_v1 = vld [vmem:[#allocation131_spill] sm:$0xff]  ;;  %v12583_v0 = vand.u32 4294901760, %v8319_v61 }
 0x114   : > { %1407 = vmatmul.mubr.f32.gmra.mxu0 %v12150_v48  ;;  %8908 = vmatprep.subr.mxu1 %v16666_v34 }
 0x115   : > { %1413 = vmatprep.mubr.f32.mxu0 %v12165_v45  ;;  %8829 = vmatpush3.msra.mxu0 %v16748_v62  ;;  %v16754_v62 = vand.u32 4294901760, %v12150_v48  ;;  %v16759_v48 = vand.u32 4294901760, %v12190_v9  ;;  %16826 = vst [vmem:[#allocation162_spill] sm:$0xff] %v12583_v0 }
 0x116   : > { %1665 = vmatmul.mubr.f32.gmra.mxu1 %v16749_v36  ;;  %8830 = vmatprep.subr.mxu0 %v16750_v26  ;;  %v16756_v36 = vand.u32 4294901760, %v12165_v45  ;;  %v16760_v45 = vld [vmem:[#allocation102_spill] sm:$0xff]  ;;  %v8317_v26 = vld [vmem:[%s11662_s17 + $0x138] sm:$0xff] }
 0x117   : > { %1672 = vmatprep.mubr.f32.mxu1 %v16751_v15  ;;  %8831 = vmatpush3.msra.mxu0 %v16752_v7  ;;  %v16758_v15 = vand.u32 4294901760, %v12180_v55  ;;  %v8314_v7 = vld [vmem:[%s11662_s17 + $0x120] sm:$0xff]  ;;  %v12546_v21 = vand.u32 4294901760, %v8317_v26 }
 0x118   : > { %1416 = vmatmul.mubr.f32.gmra.mxu0 %v12180_v55  ;;  %8909 = vmatpush3.msra.mxu1 %v16667_v5  ;;  %v16764_v55 = vld [vmem:[#allocation120_spill] sm:$0xff] }
 0x119   : > { %1422 = vmatprep.mubr.f32.mxu0 %v12190_v9  ;;  %8832 = vmatprep.subr.mxu0 %v16753_v1  ;;  %v16765_v9 = vld [vmem:[#allocation128_spill] sm:$0xff]  ;;  %v16773_v1 = vld [vmem:[#allocation142_spill] sm:$0xff]  ;;  %16817 = vst [vmem:[#allocation149_spill] sm:$0xff] %v12546_v21  ;;  %v12573_v33 = vsub.f32 %v8317_v26, %v12546_v21 }
 0x11a   : > { %1676 = vmatmul.mubr.f32.gmra.mxu1 %v16754_v62  ;;  %8833 = vmatpush3.msra.mxu0 %v16755_v57  ;;  %v16761_v62 = vld [vmem:[#allocation27_spill] sm:$0xff]  ;;  %v16763_v57 = vand.u32 4294901760, %v12202_v35  ;;  %v8321_v26 = vld [vmem:[%s11662_s17 + $0x158] sm:$0xff] }
 0x11b   : > { %1683 = vmatprep.mubr.f32.mxu1 %v16756_v36  ;;  %8910 = vmatprep.subr.mxu1 %v11623_v20  ;;  %v16762_v36 = vld [vmem:[#allocation112_spill] sm:$0xff]  ;;  %16823 = vst [vmem:[#allocation153_spill] sm:$0xff] %v12573_v33 }
 0x11c   : > { %1425 = vmatmul.mubr.f32.gmra.mxu0 %v12202_v35  ;;  %8911 = vmatpush3.msra.mxu1 %v11650_v58  ;;  %v16766_v35 = vld [vmem:[#allocation30_spill] sm:$0xff] }
 0x11d   : > { %1864 = vmatprep.mubr.f32.mxu0 %v16757_v41  ;;  %8912 = vmatprep.subr.mxu1 %v16669_v63 }
 0x11e   : > { %1687 = vmatmul.mubr.f32.gmra.mxu1 %v16758_v15  ;;  %8962 = vmatprep.subr.mxu0 %v11195_v11  ;;  %v16769_v15 = vld [vmem:[#allocation135_spill] sm:$0xff] }
 0x11f   : > { %1694 = vmatprep.mubr.f32.mxu1 %v16759_v48  ;;  %8913 = vmatpush3.msra.mxu1 %v16670_v2  ;;  %v16770_v48 = vld [vmem:[#allocation33_spill] sm:$0xff] }
 0x120   : > { %1866 = vmatmul.mubr.f32.vlgmr.msra.gmra.mxu0 %v16760_v45  ;;  %9042 = vmatprep.subr.mxu1 %v16761_v62  ;;  %v16771_v62 = vld [vmem:[#allocation36_spill] sm:$0xff] }
 0x121   : > { %1871 = vmatprep.mubr.f32.mxu0 %v16762_v36  ;;  %8963 = vmatpush3.msra.mxu0 %v11197_v12 }
 0x122   : > { %1698 = vmatmul.mubr.f32.gmra.mxu1 %v16763_v57  ;;  %8964 = vmatprep.subr.mxu0 %v16687_v56  ;;  %v16767_v57 = vld [vmem:[#allocation134_spill] sm:$0xff] }
 0x123   : > { %2073 = vmatprep.mubr.f32.mxu1 %v16757_v41  ;;  %8965 = vmatpush3.msra.mxu0 %v11210_v17  ;;  %v16768_v41 = vld [vmem:[#allocation31_spill] sm:$0xff] }
 0x124   : > { %1873 = vmatmul.mubr.f32.gmra.mxu0 %v16764_v55  ;;  %8966 = vmatprep.subr.mxu0 %v11212_v18 }
 0x125   : > { %1878 = vmatprep.mubr.f32.mxu0 %v16765_v9  ;;  %8967 = vmatpush3.msra.mxu0 %v11214_v19 }
 0x126   : > { %2075 = vmatmul.mubr.f32.vlgmr.msra.gmra.mxu1 %v16760_v45  ;;  %8968 = vmatprep.subr.mxu0 %v11226_v23  ;;  %v16772_v45 = vld [vmem:[#allocation39_spill] sm:$0xff] }
 0x127   : > { %9043 = vmatpush3.msra.mxu1 %v16766_v35  ;;  %2080 = vmatprep.mubr.f32.mxu1 %v16762_v36  ;;  %v16774_v35 = vld [vmem:[#allocation43_spill] sm:$0xff] }
 0x128   : > { %1880 = vmatmul.mubr.f32.gmra.mxu0 %v16767_v57  ;;  %9044 = vmatprep.subr.mxu1 %v16768_v41  ;;  %v16775_v36 = vld [vmem:[#allocation143_spill] sm:$0xff]  ;;  %v16809_v41 = vld [vmem:[#allocation117_spill] sm:$0xff] }
 0x129   : > { %1885 = vmatprep.mubr.f32.mxu0 %v16769_v15  ;;  %9045 = vmatpush3.msra.mxu1 %v16770_v48 }
 0x12a   : > { %2082 = vmatmul.mubr.f32.gmra.mxu1 %v16764_v55  ;;  %9046 = vmatprep.subr.mxu1 %v16771_v62  ;;  %v16776_v55 = vld [vmem:[#allocation53_spill] sm:$0xff]  ;;  %v16777_v62 = vld [vmem:[#allocation144_spill] sm:$0xff] }
 0x12b   : > { %2087 = vmatprep.mubr.f32.mxu1 %v16765_v9  ;;  %9047 = vmatpush3.msra.mxu1 %v16772_v45  ;;  %v16778_v9 = vld [vmem:[#allocation56_spill] sm:$0xff]  ;;  %v16779_v45 = vld [vmem:[#allocation145_spill] sm:$0xff] }
 0x12c   : > { %1887 = vmatmul.mubr.f32.gmra.mxu0 %v16773_v1  ;;  %9048 = vmatprep.subr.mxu1 %v16774_v35  ;;  %v16781_v35 = vld [vmem:[#allocation148_spill] sm:$0xff] }
 0x12d   : > { %1892 = vmatprep.mubr.f32.mxu0 %v16775_v36  ;;  %8969 = vmatpush3.msra.mxu0 %v11228_v24 }
 0x12e   : > { %2089 = vmatmul.mubr.f32.gmra.mxu1 %v16767_v57  ;;  %8970 = vmatprep.subr.mxu0 %v11230_v25  ;;  %v16780_v57 = vld [vmem:[#allocation59_spill] sm:$0xff] }
 0x12f   : > { %2094 = vmatprep.mubr.f32.mxu1 %v16769_v15  ;;  %9049 = vmatpush3.msra.mxu1 %v16776_v55  ;;  %v16782_v15 = vld [vmem:[#allocation62_spill] sm:$0xff]  ;;  %v16783_v55 = vld [vmem:[#allocation152_spill] sm:$0xff] }
 0x130   : > { %1894 = vmatmul.mubr.f32.gmra.mxu0 %v16777_v62  ;;  %9050 = vmatprep.subr.mxu1 %v16778_v9  ;;  %v16785_v9 = vld [vmem:[#allocation154_spill] sm:$0xff] }
 0x131   : > { %1899 = vmatprep.mubr.f32.mxu0 %v16779_v45  ;;  %8971 = vmatpush3.msra.mxu0 %v11252_v30 }
 0x132   : > { %2096 = vmatmul.mubr.f32.gmra.mxu1 %v16773_v1  ;;  %8972 = vmatprep.subr.mxu0 %v11258_v32  ;;  %v16784_v1 = vld [vmem:[#allocation65_spill] sm:$0xff] }
 0x133   : > { %2101 = vmatprep.mubr.f32.mxu1 %v16775_v36  ;;  %9051 = vmatpush3.msra.mxu1 %v16780_v57  ;;  %v16786_v36 = vld [vmem:[#allocation68_spill] sm:$0xff]  ;;  %v16787_v57 = vld [vmem:[#allocation155_spill] sm:$0xff] }
 0x134   : > { %1901 = vmatmul.mubr.f32.gmra.mxu0 %v16781_v35  ;;  %9052 = vmatprep.subr.mxu1 %v16782_v15  ;;  %v16789_v15 = vld [vmem:[#allocation157_spill] sm:$0xff] }
 0x135   : > { %1906 = vmatprep.mubr.f32.mxu0 %v16783_v55  ;;  %8973 = vmatpush3.msra.mxu0 %v11283_v38 }
 0x136   : > { %2103 = vmatmul.mubr.f32.gmra.mxu1 %v16777_v62  ;;  %8974 = vmatprep.subr.mxu0 %v11289_v40  ;;  %v16788_v62 = vld [vmem:[#allocation72_spill] sm:$0xff] }
 0x137   : > { %2108 = vmatprep.mubr.f32.mxu1 %v16779_v45  ;;  %9053 = vmatpush3.msra.mxu1 %v16784_v1  ;;  %v16790_v45 = vld [vmem:[#allocation78_spill] sm:$0xff] }
 0x138   : > { %1908 = vmatmul.mubr.f32.gmra.mxu0 %v16785_v9  ;;  %9054 = vmatprep.subr.mxu1 %v16786_v36  ;;  %v16791_v1 = vld [vmem:[#allocation158_spill] sm:$0xff]  ;;  %v16795_v36 = vld [vmem:[#allocation160_spill] sm:$0xff] }
 0x139   : > { %1913 = vmatprep.mubr.f32.mxu0 %v16787_v57  ;;  %8975 = vmatpush3.msra.mxu0 %v11302_v44 }
 0x13a   : > { %2110 = vmatmul.mubr.f32.gmra.mxu1 %v16781_v35  ;;  %8976 = vmatprep.subr.mxu0 %v11319_v49  ;;  %v16792_v35 = vld [vmem:[#allocation82_spill] sm:$0xff] }
 0x13b   : > { %2115 = vmatprep.mubr.f32.mxu1 %v16783_v55  ;;  %9055 = vmatpush3.msra.mxu1 %v16788_v62  ;;  %v16793_v55 = vld [vmem:[#allocation159_spill] sm:$0xff]  ;;  %v16794_v62 = vld [vmem:[#allocation88_spill] sm:$0xff] }
 0x13c   : > { %1915 = vmatmul.mubr.f32.gmra.mxu0 %v16789_v15  ;;  %9056 = vmatprep.subr.mxu1 %v16790_v45  ;;  %v8312_v45 = vld [vmem:[%s11662_s17 + $0x110] sm:$0xff] }
 0x13d   : > { %1920 = vmatprep.mubr.f32.mxu0 %v16791_v1  ;;  %8977 = vmatpush3.msra.mxu0 %v16636_v37 }
 0x13e   : > { %2117 = vmatmul.mubr.f32.gmra.mxu1 %v16785_v9  ;;  %8978 = vmatprep.subr.mxu0 %v16719_v50  ;;  %v16796_v9 = vld [vmem:[#allocation91_spill] sm:$0xff] }
 0x13f   : > { %2122 = vmatprep.mubr.f32.mxu1 %v16787_v57  ;;  %9057 = vmatpush3.msra.mxu1 %v16792_v35  ;;  %v16797_v57 = vld [vmem:[#allocation161_spill] sm:$0xff]  ;;  %v16798_v35 = vld [vmem:[#allocation94_spill] sm:$0xff] }
 0x140   : > { %1922 = vmatmul.mubr.f32.gmra.mxu0 %v16793_v55  ;;  %9058 = vmatprep.subr.mxu1 %v16794_v62  ;;  %v8310_v62 = vld [vmem:[%s11662_s17 + $0x100] sm:$0xff] }
 0x141   : > { %1927 = vmatprep.mubr.f32.mxu0 %v16795_v36  ;;  %8979 = vmatpush3.msra.mxu0 %v16725_v14 }
 0x142   : > { %2124 = vmatmul.mubr.f32.gmra.mxu1 %v16789_v15  ;;  %8980 = vmatprep.subr.mxu0 %v16648_v10  ;;  %v8311_v15 = vld [vmem:[%s11662_s17 + $0x108] sm:$0xff] }
 0x143   : > { %2129 = vmatprep.mubr.f32.mxu1 %v16791_v1  ;;  %9059 = vmatpush3.msra.mxu1 %v16796_v9  ;;  %v16799_v1 = vld [vmem:[#allocation97_spill] sm:$0xff]  ;;  %v16800_v9 = vld [vmem:[#allocation100_spill] sm:$0xff] }
 0x144   : > { %1929 = vmatmul.mubr.f32.gmra.mxu0 %v16797_v57  ;;  %9060 = vmatprep.subr.mxu1 %v16798_v35  ;;  %v12492_v35 = vand.u32 4294901760, %v8311_v15 }
 0x145   : > { %1934 = vmatprep.mubr.f32.mxu0 %v12038_v46  ;;  %8981 = vmatpush3.msra.mxu0 %v16650_v54 }
 0x146   : > { %2131 = vmatmul.mubr.f32.gmra.mxu1 %v16793_v55  ;;  %8982 = vmatprep.subr.mxu0 %v16653_v28  ;;  %16801 = vst [vmem:[#allocation101_spill] sm:$0xff] %v12492_v35  ;;  %v16802_v55 = vld [vmem:[#allocation104_spill] sm:$0xff] }
 0x147   : > { %2136 = vmatprep.mubr.f32.mxu1 %v16795_v36  ;;  %9061 = vmatpush3.msra.mxu1 %v16799_v1  ;;  %v8313_v36 = vld [vmem:[%s11662_s17 + $0x118] sm:$0xff]  ;;  %v12502_v1 = vand.u32 4294901760, %v8310_v62 }
 0x148   : > { %1936 = vmatmul.mubr.f32.gmra.mxu0 %v12048_v16  ;;  %9062 = vmatprep.subr.mxu1 %v16800_v9  ;;  %v16803_v9 = vld [vmem:[#allocation110_spill] sm:$0xff]  ;;  %v12510_v48 = vand.u32 4294901760, %v8313_v36 }
 0x149   : > { %1941 = vmatprep.mubr.f32.mxu0 %v12055_v27  ;;  %8983 = vmatpush3.msra.mxu0 %v16655_v8  ;;  %16804 = vst [vmem:[#allocation107_spill] sm:$0xff] %v12502_v1 }
 0x14a   : > { %2138 = vmatmul.mubr.f32.gmra.mxu1 %v16797_v57  ;;  %8984 = vmatprep.subr.mxu0 %v16658_v47  ;;  %v12508_v57 = vsub.f32 %v8311_v15, %v12492_v35  ;;  %16806 = vst [vmem:[#allocation124_spill] sm:$0xff] %v12510_v48  ;;  %v12522_v15 = vsub.f32 %v8310_v62, %v12502_v1  ;;  %v16813_v62 = vld [vmem:[#allocation118_spill] sm:$0xff] }
 0x14b   : > { %2143 = vmatprep.mubr.f32.mxu1 %v12038_v46  ;;  %9063 = vmatpush3.msra.mxu1 %v16802_v55  ;;  %v8315_v46 = vld [vmem:[%s11662_s17 + $0x128] sm:$0xff]  ;;  %v12517_v55 = vand.u32 4294901760, %v8312_v45 }
 0x14c   : > { %1943 = vmatmul.mubr.f32.gmra.mxu0 %v12082_v29  ;;  %9064 = vmatprep.subr.mxu1 %v16803_v9  ;;  %16805 = vst [vmem:[#allocation115_spill] sm:$0xff] %v12508_v57  ;;  %v16807_v9 = vld [vmem:[#allocation114_spill] sm:$0xff]  ;;  %16810 = vst [vmem:[#allocation139_spill] sm:$0xff] %v12522_v15 }
 0x14d   : > { %1948 = vmatprep.mubr.f32.mxu0 %v12089_v51  ;;  %8985 = vmatpush3.msra.mxu0 %v11528_v60  ;;  %16808 = vst [vmem:[#allocation132_spill] sm:$0xff] %v12517_v55 }
 0x14e   : > { %2145 = vmatmul.mubr.f32.gmra.mxu1 %v12048_v16  ;;  %8986 = vmatprep.subr.mxu0 %v16662_v3  ;;  %v12541_v16 = vand.u32 4294901760, %v8314_v7 }
 0x14f   : > { %2150 = vmatprep.mubr.f32.mxu1 %v12055_v27  ;;  %9065 = vmatpush3.msra.mxu1 %v16807_v9  ;;  %v12529_v27 = vsub.f32 %v8313_v36, %v12510_v48  ;;  %v12531_v9 = vand.u32 4294901760, %v8315_v46  ;;  %v16816_v36 = vld [vmem:[#allocation121_spill] sm:$0xff] }
 0x150   : > { %1950 = vmatmul.mubr.f32.gmra.mxu0 %v12106_v43  ;;  %9066 = vmatprep.subr.mxu1 %v16809_v41  ;;  %v12539_v41 = vsub.f32 %v8312_v45, %v12517_v55  ;;  %16815 = vst [vmem:[#allocation147_spill] sm:$0xff] %v12541_v16 }
 0x151   : > { %1955 = vmatprep.mubr.f32.mxu0 %v12116_v39  ;;  %8987 = vmatpush3.msra.mxu0 %v16664_v4  ;;  %16811 = vst [vmem:[#allocation6_spill] sm:$0xff] %v12529_v27  ;;  %16812 = vst [vmem:[#allocation140_spill] sm:$0xff] %v12531_v9 }
 0x152   : > { %2152 = vmatmul.mubr.f32.gmra.mxu1 %v12082_v29  ;;  %8988 = vmatprep.subr.mxu0 %v16666_v34  ;;  %16814 = vst [vmem:[#allocation146_spill] sm:$0xff] %v12539_v41  ;;  %v16818_v29 = vand.u32 4294901760, %v12508_v57 }
 0x153   : > { %2157 = vmatprep.mubr.f32.mxu1 %v12089_v51  ;;  %9067 = vmatpush3.msra.mxu1 %v16813_v62  ;;  %v12555_v62 = vsub.f32 %v8315_v46, %v12531_v9  ;;  %v16821_v46 = vld [vmem:[#allocation130_spill] sm:$0xff] }
 0x154   : > { %1957 = vmatmul.mubr.f32.gmra.mxu0 %v12126_v13  ;;  %9068 = vmatprep.subr.mxu1 %v16816_v36  ;;  %v2336_v51 = vsub.f32 %v12508_v57, %v16818_v29  ;;  %v12565_v29 = vsub.f32 %v8314_v7, %v12541_v16  ;;  %v16825_v7 = vand.u32 4294901760, %v12529_v27  ;;  %v16829_v57 = vld [vmem:[#allocation137_spill] sm:$0xff] }
 0x155   : > { %1962 = vmatprep.mubr.f32.mxu0 %v12141_v31  ;;  %8989 = vmatpush3.msra.mxu0 %v16667_v5  ;;  %16819 = vst [vmem:[#allocation150_spill] sm:$0xff] %v12555_v62 }
 0x156   : > { %2159 = vmatmul.mubr.f32.gmra.mxu1 %v12106_v43  ;;  %8990 = vmatprep.subr.mxu0 %v11623_v20  ;;  %16820 = vst [vmem:[#allocation151_spill] sm:$0xff] %v12565_v29  ;;  %v16822_v43 = vand.u32 4294901760, %v12522_v15  ;;  %v2337_v36 = vand.u32 4294901760, %v2336_v51  ;;  %v2351_v52 = vsub.f32 %v12529_v27, %v16825_v7  ;;  %v16828_v51 = vand.u32 4294901760, %v12539_v41 }
 0x157   : > { %2164 = vmatprep.mubr.f32.mxu1 %v12116_v39  ;;  %8991 = vmatpush3.msra.mxu0 %v11650_v58  ;;  %v12575_v39 = vand.u32 4294901760, %v8316_v53 }
 0x158   : > { %1964 = vmatmul.mubr.f32.gmra.mxu0 %v12157_v22  ;;  %9069 = vmatpush3.msra.mxu1 %v16821_v46  ;;  %v2342_v45 = vsub.f32 %v12522_v15, %v16822_v43  ;;  %v8318_v43 = vld [vmem:[%s11662_s17 + $0x140] sm:$0xff]  ;;  %v8514_v15 = vpop.f32.mrf.mxu0  ;;  %v2357_v7 = vsub.f32 %v12539_v41, %v16828_v51  ;;  %v2352_v20 = vand.u32 4294901760, %v2351_v52  ;;  %v16832_v51 = vld [vmem:[#allocation138_spill] sm:$0xff]  ;;  %v16833_v46 = vand.u32 4294901760, %v12555_v62 }
 0x159   : > { %16824 = vst [vmem:[#allocation156_spill] sm:$0xff] %v12575_v39  ;;  %1969 = vmatprep.mubr.f32.mxu0 %v12167_v59  ;;  %8992 = vmatprep.subr.mxu0 %v16669_v63  ;;  %v16827_v63 = vld [vmem:[#allocation136_spill] sm:$0xff] }
 0x15a   : > { %2166 = vmatmul.mubr.f32.gmra.mxu1 %v12126_v13  ;;  %8993 = vmatpush3.msra.mxu0 %v16670_v2  ;;  %v2343_v27 = vand.u32 4294901760, %v2342_v45  ;;  %v12599_v2 = vsub.f32 %v8316_v53, %v12575_v39  ;;  %v8515_v58 = vpop.f32.mrf.mxu0  ;;  %v2366_v41 = vsub.f32 %v12555_v62, %v16833_v46  ;;  %v12609_v45 = vsub.f32 %v8319_v61, %v12583_v0  ;;  %v8323_v53 = vld [vmem:[%s11662_s17 + $0x168] sm:$0xff] }
 0x15b   : > { %2171 = vmatprep.mubr.f32.mxu1 %v12141_v31  ;;  %9070 = vmatprep.subr.mxu1 %v16827_v63  ;;  %v12601_v31 = vand.u32 4294901760, %v8318_v43  ;;  %v8320_v63 = vld [vmem:[%s11662_s17 + $0x150] sm:$0xff]  ;;  %v12615_v13 = vadd.f32 %v8515_v58, %v8514_v15  ;;  %v2358_v52 = vand.u32 4294901760, %v2357_v7  ;;  %v16838_v46 = vand.u32 4294901760, %v12565_v29 }
 0x15c   : > { %1971 = vmatmul.mubr.f32.gmra.mxu0 %v12182_v42  ;;  %9071 = vmatpush3.msra.mxu1 %v16829_v57  ;;  %16830 = vst [vmem:[#allocation163_spill] sm:$0xff] %v12599_v2  ;;  %16834 = vst [vmem:[#allocation165_spill] sm:$0xff] %v12609_v45  ;;  %v12611_v57 = vand.u32 4294901760, %v8321_v26  ;;  %v12623_v62 = vand.u32 4294901760, %v8320_v63  ;;  %v16840_v58 = vand.u32 4294901760, %v12573_v33  ;;  %v12633_v7 = vand.u32 4294901760, %v8323_v53 }
 0x15d   : > { %16831 = vst [vmem:[#allocation164_spill] sm:$0xff] %v12601_v31  ;;  %2338 = vmatprep.mubr.f32.mxu0 %v2337_v36  ;;  %9072 = vmatprep.subr.mxu1 %v16832_v51  ;;  %v16836_v36 = vld [vmem:[#allocation10_spill] sm:$0xff]  ;;  %v16837_v51 = vld [vmem:[#allocation141_spill] sm:$0xff]  ;;  %v2372_v61 = vsub.f32 %v12565_v29, %v16838_v46  ;;  %v2367_v46 = vand.u32 4294901760, %v2366_v41 }
 0x15e   : > { %16835 = vst [vmem:[#allocation166_spill] sm:$0xff] %v12611_v57  ;;  %2173 = vmatmul.mubr.f32.gmra.mxu1 %v12157_v22  ;;  %9122 = vmatprep.subr.mxu0 %v16836_v36  ;;  %16839 = vst [vmem:[#allocation167_spill] sm:$0xff] %v12623_v62  ;;  %v2381_v22 = vsub.f32 %v12573_v33, %v16840_v58  ;;  %v16843_v36 = vld [vmem:[#allocation12_spill] sm:$0xff]  ;;  %v12639_v29 = vsub.f32 %v8321_v26, %v12611_v57  ;;  %v16845_v58 = vld [vmem:[#allocation14_spill] sm:$0xff] }
 0x15f   : > { %2178 = vmatprep.mubr.f32.mxu1 %v12167_v59  ;;  %9073 = vmatpush3.msra.mxu1 %v16837_v51  ;;  %v12631_v59 = vsub.f32 %v8318_v43, %v12601_v31  ;;  %16842 = vst [vmem:[#allocation169_spill] sm:$0xff] %v12633_v7  ;;  %v8322_v51 = vld [vmem:[%s11662_s17 + $0x160] sm:$0xff]  ;;  %v8325_v43 = vld [vmem:[%s11662_s17 + $0x178] sm:$0xff]  ;;  %v2373_v15 = vand.u32 4294901760, %v2372_v61  ;;  %v12657_v61 = vsub.f32 %v8323_v53, %v12633_v7  ;;  %v8327_v53 = vld [vmem:[%s11662_s17 + $0x188] sm:$0xff] }
 0x160   : > { %2344 = vmatmul.mubr.f32.vlgmr.msra.gmra.mxu0 %v2343_v27  ;;  %9202 = vmatprep.subr.mxu1 %v11195_v11  ;;  %16844 = vst [vmem:[#allocation96_spill] sm:$0xff] %v12639_v29  ;;  %v8517_v11 = vpop.f32.mrf.mxu0  ;;  %v16846_v33 = vld [vmem:[#allocation17_spill] sm:$0xff]  ;;  %v12649_v41 = vand.u32 4294901760, %v8322_v51  ;;  %v2382_v27 = vand.u32 4294901760, %v2381_v22  ;;  %v16853_v22 = vld [vmem:[#allocation23_spill] sm:$0xff] }
 0x161   : > { %16841 = vst [vmem:[#allocation168_spill] sm:$0xff] %v12631_v59  ;;  %2353 = vmatprep.mubr.f32.mxu0 %v2352_v20  ;;  %9123 = vmatpush3.msra.mxu0 %v16843_v36  ;;  %v12647_v20 = vsub.f32 %v8320_v63, %v12623_v62  ;;  %v16849_v36 = vand.u32 4294901760, %v12599_v2  ;;  %16851 = vst [vmem:[#allocation120_spill] sm:$0xff] %v12657_v61 }
 0x162   : > { %2180 = vmatmul.mubr.f32.gmra.mxu1 %v12182_v42  ;;  %9124 = vmatprep.subr.mxu0 %v16845_v58  ;;  %16848 = vst [vmem:[#allocation112_spill] sm:$0xff] %v12649_v41  ;;  %v8518_v26 = vpop.f32.mrf.mxu0  ;;  %v16850_v58 = vld [vmem:[#allocation21_spill] sm:$0xff] }
 0x163   : > { %2799 = vmatprep.mubr.f32.mxu1 %v12492_v35  ;;  %9125 = vmatpush3.msra.mxu0 %v16846_v33  ;;  %16847 = vst [vmem:[#allocation102_spill] sm:$0xff] %v12647_v20  ;;  %v2387_v42 = vsub.f32 %v12599_v2, %v16849_v36  ;;  %v8324_v33 = vld [vmem:[%s11662_s17 + $0x170] sm:$0xff]  ;;  %v8519_v63 = vadd.f32 %v8518_v26, %v8517_v11  ;;  %v12665_v36 = vand.u32 4294901760, %v8325_v43  ;;  %v16855_v35 = vld [vmem:[#allocation26_spill] sm:$0xff] }
 0x164   : > { %2359 = vmatmul.mubr.f32.gmra.mxu0 %v2358_v52  ;;  %9126 = vmatprep.subr.mxu0 %v16850_v58  ;;  %v8594_v5 = vpop.f32.mrf.mxu1  ;;  %v16852_v52 = vand.u32 4294901760, %v12609_v45  ;;  %v12674_v26 = vsub.f32 %v8322_v51, %v12649_v41 }
 0x165   : > { %2368 = vmatprep.mubr.f32.mxu0 %v2367_v46  ;;  %9127 = vmatpush3.msra.mxu0 %v16853_v22  ;;  %16854 = vst [vmem:[#allocation128_spill] sm:$0xff] %v12665_v36  ;;  %v2388_v58 = vand.u32 4294901760, %v2387_v42  ;;  %v12690_v42 = vand.u32 4294901760, %v8327_v53 }
 0x166   : > { %v2396_v34 = vsub.f32 %v12609_v45, %v16852_v52  ;;  %2801 = vmatmul.mubr.f32.vlgmr.msra.gmra.mxu1 %v12502_v1  ;;  %9128 = vmatprep.subr.mxu0 %v16855_v35  ;;  %v8595_v11 = vpop.f32.mrf.mxu1  ;;  %16856 = vst [vmem:[#allocation134_spill] sm:$0xff] %v12674_v26  ;;  %v12676_v52 = vand.u32 4294901760, %v8324_v33  ;;  %v16858_v35 = vand.u32 4294901760, %v12631_v59  ;;  %v16859_v45 = vand.u32 4294901760, %v12639_v29 }
 0x167   : > { %9203 = vmatpush3.msra.mxu1 %v11197_v12  ;;  %2806 = vmatprep.mubr.f32.mxu1 %v12510_v48  ;;  %v8596_v22 = vadd.f32 %v8595_v11, %v8594_v5  ;;  %v12688_v5 = vsub.f32 %v8325_v43, %v12665_v36  ;;  %16861 = vst [vmem:[#allocation143_spill] sm:$0xff] %v12690_v42  ;;  %v8326_v11 = vld [vmem:[%s11662_s17 + $0x180] sm:$0xff] }
 0x168   : > { %16857 = vst [vmem:[#allocation135_spill] sm:$0xff] %v12676_v52  ;;  %v8520_v4 = vpop.f32.mrf.mxu0  ;;  %2374 = vmatmul.mubr.f32.gmra.mxu0 %v2373_v15  ;;  %9204 = vmatprep.subr.mxu1 %v16687_v56  ;;  %v2402_v1 = vsub.f32 %v12631_v59, %v16858_v35  ;;  %v8597_v46 = vpop.f32.mrf.mxu1  ;;  %v2397_v51 = vand.u32 4294901760, %v2396_v34  ;;  %v2411_v15 = vsub.f32 %v12639_v29, %v16859_v45  ;;  %v16862_v45 = vand.u32 4294901760, %v12647_v20 }
 0x169   : > { %2383 = vmatprep.mubr.f32.mxu0 %v2382_v27  ;;  %9205 = vmatpush3.msra.mxu1 %v11210_v17  ;;  %16860 = vst [vmem:[#allocation142_spill] sm:$0xff] %v12688_v5  ;;  %v12694_v35 = vadd.f32 %v8596_v22, %v12615_v13  ;;  %v8329_v27 = vld [vmem:[%s11662_s17 + $0x198] sm:$0xff]  ;;  %v12706_v13 = vsub.f32 %v8324_v33, %v12676_v52 }
 0x16a   : > { %v8521_v2 = vpop.f32.mrf.mxu0  ;;  %2808 = vmatmul.mubr.f32.gmra.mxu1 %v12517_v55  ;;  %9206 = vmatprep.subr.mxu1 %v11212_v18  ;;  %v8598_v48 = vpop.f32.mrf.mxu1  ;;  %v2417_v43 = vsub.f32 %v12647_v20, %v16862_v45  ;;  %v2403_v59 = vand.u32 4294901760, %v2402_v1  ;;  %v2412_v29 = vand.u32 4294901760, %v2411_v15  ;;  %v16866_v20 = vld [vmem:[#allocation34_spill] sm:$0xff]  ;;  %v8328_v1 = vld [vmem:[%s11662_s17 + $0x190] sm:$0xff] }
 0x16b   : > { %v8522_v34 = vadd.f32 %v8521_v2, %v8520_v4  ;;  %2813 = vmatprep.mubr.f32.mxu1 %v12531_v9  ;;  %9207 = vmatpush3.msra.mxu1 %v11214_v19  ;;  %16863 = vst [vmem:[#allocation144_spill] sm:$0xff] %v12706_v13  ;;  %v8599_v55 = vadd.f32 %v8598_v48, %v8597_v46  ;;  %v16864_v4 = vand.u32 4294901760, %v12657_v61  ;;  %v12712_v9 = vand.u32 4294901760, %v8326_v11 }
 0x16c   : > { %v8523_v22 = vpop.f32.mrf.mxu0  ;;  %2389 = vmatmul.mubr.f32.gmra.mxu0 %v2388_v58  ;;  %9208 = vmatprep.subr.mxu1 %v11226_v23  ;;  %v8600_v45 = vpop.f32.mrf.mxu1  ;;  %v12717_v58 = vsub.f32 %v8327_v53, %v12690_v42  ;;  %v12719_v48 = vand.u32 4294901760, %v8329_v27  ;;  %v2418_v33 = vand.u32 4294901760, %v2417_v43  ;;  %v16870_v53 = vand.u32 4294901760, %v12674_v26  ;;  %v8330_v43 = vld [vmem:[%s11662_s17 + $0x1a0] sm:$0xff] }
 0x16d   : > { %v2426_v2 = vsub.f32 %v12657_v61, %v16864_v4  ;;  %16865 = vst [vmem:[#allocation145_spill] sm:$0xff] %v12712_v9  ;;  %2398 = vmatprep.mubr.f32.mxu0 %v2397_v51  ;;  %9129 = vmatpush3.msra.mxu0 %v16866_v20  ;;  %v12722_v23 = vadd.f32 %v8599_v55, %v8519_v63  ;;  %v16869_v4 = vld [vmem:[#allocation37_spill] sm:$0xff]  ;;  %v8331_v51 = vld [vmem:[%s11662_s17 + $0x1a8] sm:$0xff] }
 0x16e   : > { %16867 = vst [vmem:[#allocation148_spill] sm:$0xff] %v12717_v58  ;;  %16868 = vst [vmem:[#allocation152_spill] sm:$0xff] %v12719_v48  ;;  %v8524_v46 = vpop.f32.mrf.mxu0  ;;  %2815 = vmatmul.mubr.f32.gmra.mxu1 %v12541_v16  ;;  %9130 = vmatprep.subr.mxu0 %v16869_v4  ;;  %v8601_v61 = vpop.f32.mrf.mxu1  ;;  %v2432_v20 = vsub.f32 %v12674_v26, %v16870_v53  ;;  %v16874_v53 = vand.u32 4294901760, %v12688_v5 }
 0x16f   : > { %v8525_v15 = vadd.f32 %v8524_v46, %v8523_v22  ;;  %2820 = vmatprep.mubr.f32.mxu1 %v12546_v21  ;;  %9209 = vmatpush3.msra.mxu1 %v11228_v24  ;;  %v8602_v16 = vadd.f32 %v8601_v61, %v8600_v45  ;;  %v2427_v4 = vand.u32 4294901760, %v2426_v2  ;;  %v12735_v22 = vsub.f32 %v8326_v11, %v12712_v9  ;;  %v16873_v24 = vld [vmem:[#allocation41_spill] sm:$0xff]  ;;  %v8333_v11 = vld [vmem:[%s11662_s17 + $0x1b8] sm:$0xff] }
 0x170   : > { %v8526_v63 = vpop.f32.mrf.mxu0  ;;  %2404 = vmatmul.mubr.f32.gmra.mxu0 %v2403_v59  ;;  %9210 = vmatprep.subr.mxu1 %v11230_v25  ;;  %v12737_v46 = vand.u32 4294901760, %v8328_v1  ;;  %v2441_v55 = vsub.f32 %v12688_v5, %v16874_v53  ;;  %v12746_v61 = vsub.f32 %v8329_v27, %v12719_v48  ;;  %v12748_v2 = vand.u32 4294901760, %v8331_v51 }
 0x171   : > { %16871 = vst [vmem:[#allocation154_spill] sm:$0xff] %v12735_v22  ;;  %2413 = vmatprep.mubr.f32.mxu0 %v2412_v29  ;;  %v8603_v21 = vpop.f32.mrf.mxu1  ;;  %9131 = vmatpush3.msra.mxu0 %v16873_v24  ;;  %v12751_v26 = vadd.f32 %v8602_v16, %v8522_v34  ;;  %v16877_v29 = vld [vmem:[#allocation45_spill] sm:$0xff]  ;;  %v2433_v53 = vand.u32 4294901760, %v2432_v20  ;;  %v16878_v27 = vand.u32 4294901760, %v12706_v13  ;;  %v12760_v5 = vand.u32 4294901760, %v8330_v43 }
 0x172   : > { %16872 = vst [vmem:[#allocation155_spill] sm:$0xff] %v12737_v46  ;;  %16875 = vst [vmem:[#allocation157_spill] sm:$0xff] %v12746_v61  ;;  %v8527_v45 = vpop.f32.mrf.mxu0  ;;  %2822 = vmatmul.mubr.f32.gmra.mxu1 %v12575_v39  ;;  %9132 = vmatprep.subr.mxu0 %v16877_v29  ;;  %v12767_v20 = vand.u32 4294901760, %v8333_v11  ;;  %v8332_v29 = vld [vmem:[%s11662_s17 + $0x1b0] sm:$0xff]  ;;  %v2442_v39 = vand.u32 4294901760, %v2441_v55 }
 0x173   : > { %16876 = vst [vmem:[#allocation158_spill] sm:$0xff] %v12748_v2  ;;  %v8528_v24 = vadd.f32 %v8527_v45, %v8526_v63  ;;  %v8604_v25 = vpop.f32.mrf.mxu1  ;;  %2827 = vmatprep.mubr.f32.mxu1 %v12583_v0  ;;  %9211 = vmatpush3.msra.mxu1 %v11252_v30  ;;  %v2447_v59 = vsub.f32 %v12706_v13, %v16878_v27  ;;  %16879 = vst [vmem:[#allocation159_spill] sm:$0xff] %v12760_v5  ;;  %v16882_v27 = vld [vmem:[#allocation48_spill] sm:$0xff]  ;;  %v16883_v13 = vand.u32 4294901760, %v12717_v58 }
 0x174   : > { %v8529_v16 = vpop.f32.mrf.mxu0  ;;  %2419 = vmatmul.mubr.f32.gmra.mxu0 %v2418_v33  ;;  %v8605_v34 = vadd.f32 %v8604_v25, %v8603_v21  ;;  %9212 = vmatprep.subr.mxu1 %v11258_v32  ;;  %v12765_v45 = vsub.f32 %v8328_v1, %v12737_v46  ;;  %16881 = vst [vmem:[#allocation161_spill] sm:$0xff] %v12767_v20  ;;  %v16885_v32 = vld [vmem:[#allocation51_spill] sm:$0xff]  ;;  %v16888_v21 = vand.u32 4294901760, %v12735_v22 }
 0x175   : > { %2428 = vmatprep.mubr.f32.mxu0 %v2427_v4  ;;  %v8606_v0 = vpop.f32.mrf.mxu1  ;;  %9133 = vmatpush3.msra.mxu0 %v16882_v27  ;;  %v2456_v25 = vsub.f32 %v12717_v58, %v16883_v13  ;;  %v12776_v33 = vsub.f32 %v8331_v51, %v12748_v2  ;;  %v8335_v4 = vld [vmem:[%s11662_s17 + $0x1c8] sm:$0xff]  ;;  %v2448_v30 = vand.u32 4294901760, %v2447_v59  ;;  %v12786_v13 = vsub.f32 %v8330_v43, %v12760_v5 }
 0x176   : > { %16880 = vst [vmem:[#allocation160_spill] sm:$0xff] %v12765_v45  ;;  %v8530_v63 = vpop.f32.mrf.mxu0  ;;  %v12778_v1 = vadd.f32 %v8605_v34, %v8525_v15  ;;  %2829 = vmatmul.mubr.f32.gmra.mxu1 %v12601_v31  ;;  %9134 = vmatprep.subr.mxu0 %v16885_v32  ;;  %v12788_v51 = vand.u32 4294901760, %v8332_v29  ;;  %v2462_v32 = vsub.f32 %v12735_v22, %v16888_v21  ;;  %v16890_v31 = vld [vmem:[#allocation55_spill] sm:$0xff]  ;;  %v12804_v21 = vand.u32 4294901760, %v8335_v4 }
 0x177   : > { %16884 = vst [vmem:[#allocation170_spill] sm:$0xff] %v12776_v33  ;;  %v8531_v55 = vadd.f32 %v8530_v63, %v8529_v16  ;;  %v8607_v27 = vpop.f32.mrf.mxu1  ;;  %2834 = vmatprep.mubr.f32.mxu1 %v12611_v57  ;;  %9213 = vmatpush3.msra.mxu1 %v11283_v38  ;;  %16886 = vst [vmem:[#allocation171_spill] sm:$0xff] %v12786_v13  ;;  %v12796_v59 = vsub.f32 %v8333_v11, %v12767_v20  ;;  %v8334_v63 = vld [vmem:[%s11662_s17 + $0x1c0] sm:$0xff]  ;;  %v2457_v57 = vand.u32 4294901760, %v2456_v25 }
 0x178   : > { %16887 = vst [vmem:[#allocation172_spill] sm:$0xff] %v12788_v51  ;;  %v8532_v15 = vpop.f32.mrf.mxu0  ;;  %2434 = vmatmul.mubr.f32.gmra.mxu0 %v2433_v53  ;;  %v8608_v34 = vadd.f32 %v8607_v27, %v8606_v0  ;;  %9214 = vmatprep.subr.mxu1 %v11289_v40  ;;  %v16891_v0 = vand.u32 4294901760, %v12746_v61  ;;  %16892 = vst [vmem:[#allocation174_spill] sm:$0xff] %v12804_v21  ;;  %v16893_v11 = vld [vmem:[#allocation61_spill] sm:$0xff]  ;;  %v12815_v27 = vsub.f32 %v8332_v29, %v12788_v51 }
 0x179   : > { %16889 = vst [vmem:[#allocation173_spill] sm:$0xff] %v12796_v59  ;;  %2443 = vmatprep.mubr.f32.mxu0 %v2442_v39  ;;  %v8609_v43 = vpop.f32.mrf.mxu1  ;;  %9135 = vmatpush3.msra.mxu0 %v16890_v31  ;;  %v8337_v39 = vld [vmem:[%s11662_s17 + $0x1d8] sm:$0xff]  ;;  %v12817_v31 = vand.u32 4294901760, %v8334_v63 }
 0x17a   : > { %v2471_v53 = vsub.f32 %v12746_v61, %v16891_v0  ;;  %v8533_v22 = vpop.f32.mrf.mxu0  ;;  %v12806_v58 = vadd.f32 %v8608_v34, %v8528_v24  ;;  %2836 = vmatmul.mubr.f32.gmra.mxu1 %v12623_v62  ;;  %9136 = vmatprep.subr.mxu0 %v16893_v11  ;;  %16894 = vst [vmem:[#allocation175_spill] sm:$0xff] %v12815_v27  ;;  %v2463_v62 = vand.u32 4294901760, %v2462_v32  ;;  %v16896_v11 = vand.u32 4294901760, %v12765_v45 }
 0x17b   : > { %v8534_v16 = vadd.f32 %v8533_v22, %v8532_v15  ;;  %v8610_v25 = vpop.f32.mrf.mxu1  ;;  %2841 = vmatprep.mubr.f32.mxu1 %v12633_v7  ;;  %9215 = vmatpush3.msra.mxu1 %v11302_v44  ;;  %16895 = vst [vmem:[#allocation176_spill] sm:$0xff] %v12817_v31  ;;  %v16897_v7 = vld [vmem:[#allocation64_spill] sm:$0xff]  ;;  %v16898_v61 = vand.u32 4294901760, %v12776_v33  ;;  %v12829_v32 = vsub.f32 %v8335_v4, %v12804_v21 }
 0x17c   : > { %v8535_v24 = vpop.f32.mrf.mxu0  ;;  %2449 = vmatmul.mubr.f32.gmra.mxu0 %v2448_v30  ;;  %v8611_v34 = vadd.f32 %v8610_v25, %v8609_v43  ;;  %v2477_v22 = vsub.f32 %v12765_v45, %v16896_v11  ;;  %9216 = vmatprep.subr.mxu1 %v11319_v49  ;;  %v2472_v29 = vand.u32 4294901760, %v2471_v53  ;;  %v12831_v43 = vand.u32 4294901760, %v8337_v39  ;;  %v8336_v25 = vld [vmem:[%s11662_s17 + $0x1d0] sm:$0xff]  ;;  %v8339_v53 = vld [vmem:[%s11662_s17 + $0x1e8] sm:$0xff] }
 0x17d   : > { %2458 = vmatprep.mubr.f32.mxu0 %v2457_v57  ;;  %v8612_v0 = vpop.f32.mrf.mxu1  ;;  %9137 = vmatpush3.msra.mxu0 %v16897_v7  ;;  %v2486_v30 = vsub.f32 %v12776_v33, %v16898_v61  ;;  %16899 = vst [vmem:[#allocation177_spill] sm:$0xff] %v12829_v32  ;;  %v16901_v57 = vld [vmem:[#allocation70_spill] sm:$0xff]  ;;  %v16902_v61 = vand.u32 4294901760, %v12786_v13 }
 0x17e   : > { %16900 = vst [vmem:[#allocation178_spill] sm:$0xff] %v12831_v43  ;;  %v8536_v11 = vpop.f32.mrf.mxu0  ;;  %v12834_v45 = vadd.f32 %v8611_v34, %v8531_v55  ;;  %2843 = vmatmul.mubr.f32.gmra.mxu1 %v12649_v41  ;;  %9138 = vmatprep.subr.mxu0 %v16901_v57  ;;  %v12846_v55 = vsub.f32 %v8334_v63, %v12817_v31  ;;  %v2478_v41 = vand.u32 4294901760, %v2477_v22 }
 0x17f   : > { %v8537_v15 = vadd.f32 %v8536_v11, %v8535_v24  ;;  %v8613_v7 = vpop.f32.mrf.mxu1  ;;  %2848 = vmatprep.mubr.f32.mxu1 %v12665_v36  ;;  %9217 = vmatpush3.msra.mxu1 %v16636_v37  ;;  %v2492_v4 = vsub.f32 %v12786_v13, %v16902_v61  ;;  %v16903_v24 = vand.u32 4294901760, %v12796_v59  ;;  %v12852_v36 = vand.u32 4294901760, %v8336_v25  ;;  %v16905_v13 = vld [vmem:[#allocation73_spill] sm:$0xff] }
 0x180   : > { %v8538_v34 = vpop.f32.mrf.mxu0  ;;  %2464 = vmatmul.mubr.f32.gmra.mxu0 %v2463_v62  ;;  %v8614_v57 = vadd.f32 %v8613_v7, %v8612_v0  ;;  %9218 = vmatprep.subr.mxu1 %v16719_v50  ;;  %v2487_v33 = vand.u32 4294901760, %v2486_v30  ;;  %v12857_v62 = vsub.f32 %v8337_v39, %v12831_v43  ;;  %v12859_v7 = vand.u32 4294901760, %v8339_v53  ;;  %v8338_v0 = vld [vmem:[%s11662_s17 + $0x1e0] sm:$0xff] }
 0x181   : > { %v2501_v11 = vsub.f32 %v12796_v59, %v16903_v24  ;;  %16904 = vst [vmem:[#allocation179_spill] sm:$0xff] %v12852_v36  ;;  %2473 = vmatprep.mubr.f32.mxu0 %v2472_v29  ;;  %v8615_v61 = vpop.f32.mrf.mxu1  ;;  %9139 = vmatpush3.msra.mxu0 %v16905_v13  ;;  %v16907_v24 = vld [vmem:[#allocation76_spill] sm:$0xff]  ;;  %v2493_v13 = vand.u32 4294901760, %v2492_v4  ;;  %v16908_v39 = vand.u32 4294901760, %v12815_v27 }
 0x182   : > { %16906 = vst [vmem:[#allocation180_spill] sm:$0xff] %v12859_v7  ;;  %v8539_v22 = vpop.f32.mrf.mxu0  ;;  %v12862_v50 = vadd.f32 %v8614_v57, %v8534_v16  ;;  %2850 = vmatmul.mubr.f32.gmra.mxu1 %v12676_v52  ;;  %9140 = vmatprep.subr.mxu0 %v16907_v24  ;;  %v8341_v29 = vld [vmem:[%s11662_s17 + $0x1f8] sm:$0xff] }
 0x183   : > { %v8540_v59 = vadd.f32 %v8539_v22, %v8538_v34  ;;  %v8616_v30 = vpop.f32.mrf.mxu1  ;;  %2855 = vmatprep.mubr.f32.mxu1 %v12690_v42  ;;  %9219 = vmatpush3.msra.mxu1 %v16725_v14  ;;  %v2507_v63 = vsub.f32 %v12815_v27, %v16908_v39  ;;  %v2502_v37 = vand.u32 4294901760, %v2501_v11  ;;  %v12875_v34 = vsub.f32 %v8336_v25, %v12852_v36  ;;  %v16910_v24 = vld [vmem:[#allocation80_spill] sm:$0xff] }
 0x184   : > { %v8541_v57 = vpop.f32.mrf.mxu0  ;;  %2479 = vmatmul.mubr.f32.gmra.mxu0 %v2478_v41  ;;  %v8617_v52 = vadd.f32 %v8616_v30, %v8615_v61  ;;  %9220 = vmatprep.subr.mxu1 %v16648_v10  ;;  %v12877_v22 = vand.u32 4294901760, %v8338_v0  ;;  %v16911_v39 = vand.u32 4294901760, %v12829_v32  ;;  %v12885_v41 = vsub.f32 %v8339_v53, %v12859_v7  ;;  %v8340_v61 = vld [vmem:[%s11662_s17 + $0x1f0] sm:$0xff] }
 0x185   : > { %2488 = vmatprep.mubr.f32.mxu0 %v2487_v33  ;;  %v8618_v4 = vpop.f32.mrf.mxu1  ;;  %9141 = vmatpush3.msra.mxu0 %v16910_v24  ;;  %v12887_v11 = vand.u32 4294901760, %v8341_v29  ;;  %v16913_v33 = vld [vmem:[#allocation84_spill] sm:$0xff]  ;;  %v16914_v53 = vand.u32 4294901760, %v12846_v55 }
 0x186   : > { %16909 = vst [vmem:[#allocation181_spill] sm:$0xff] %v12877_v22  ;;  %v2516_v42 = vsub.f32 %v12829_v32, %v16911_v39  ;;  %v8542_v25 = vpop.f32.mrf.mxu0  ;;  %v12890_v30 = vadd.f32 %v8617_v52, %v8537_v15  ;;  %2857 = vmatmul.mubr.f32.gmra.mxu1 %v12712_v9  ;;  %9142 = vmatprep.subr.mxu0 %v16913_v33  ;;  %v2508_v39 = vand.u32 4294901760, %v2507_v63  ;;  %v16916_v33 = vld [vmem:[#allocation87_spill] sm:$0xff] }
 0x187   : > { %16912 = vst [vmem:[#allocation182_spill] sm:$0xff] %v12887_v11  ;;  %v8543_v24 = vadd.f32 %v8542_v25, %v8541_v57  ;;  %v8619_v27 = vpop.f32.mrf.mxu1  ;;  %2862 = vmatprep.mubr.f32.mxu1 %v12719_v48  ;;  %9221 = vmatpush3.msra.mxu1 %v16650_v54  ;;  %v2522_v16 = vsub.f32 %v12846_v55, %v16914_v53  ;;  %v12904_v57 = vand.u32 4294901760, %v8340_v61  ;;  %v16917_v48 = vand.u32 4294901760, %v12857_v62 }
 0x188   : > { %v8544_v32 = vpop.f32.mrf.mxu0  ;;  %2494 = vmatmul.mubr.f32.gmra.mxu0 %v2493_v13  ;;  %v8620_v10 = vadd.f32 %v8619_v27, %v8618_v4  ;;  %9222 = vmatprep.subr.mxu1 %v16653_v28  ;;  %v12902_v15 = vsub.f32 %v8338_v0, %v12877_v22  ;;  %v2517_v25 = vand.u32 4294901760, %v2516_v42  ;;  %v12912_v27 = vsub.f32 %v8341_v29, %v12887_v11  ;;  %v16918_v0 = vld [vmem:[#allocation93_spill] sm:$0xff] }
 0x189   : > { %16915 = vst [vmem:[#allocation183_spill] sm:$0xff] %v12904_v57  ;;  %2503 = vmatprep.mubr.f32.mxu0 %v2502_v37  ;;  %v8621_v63 = vpop.f32.mrf.mxu1  ;;  %9143 = vmatpush3.msra.mxu0 %v16916_v33  ;;  %v2531_v53 = vsub.f32 %v12857_v62, %v16917_v48  ;;  %v2523_v33 = vand.u32 4294901760, %v2522_v16  ;;  %v16919_v29 = vand.u32 4294901760, %v12875_v34  ;;  %v16920_v16 = vld [vmem:[#allocation99_spill] sm:$0xff] }
 0x18a   : > { %v8545_v4 = vpop.f32.mrf.mxu0  ;;  %v12914_v52 = vadd.f32 %v8620_v10, %v8540_v59  ;;  %2864 = vmatmul.mubr.f32.gmra.mxu1 %v12737_v46  ;;  %9144 = vmatprep.subr.mxu0 %v16918_v0  ;;  %v12926_v59 = vsub.f32 %v8340_v61, %v12904_v57  ;;  %v16921_v0 = vand.u32 4294901760, %v12885_v41  ;;  %v16922_v10 = vld [vmem:[#allocation103_spill] sm:$0xff] }
 0x18b   : > { %v8546_v37 = vadd.f32 %v8545_v4, %v8544_v32  ;;  %v8622_v42 = vpop.f32.mrf.mxu1  ;;  %2869 = vmatprep.mubr.f32.mxu1 %v12748_v2  ;;  %9223 = vmatpush3.msra.mxu1 %v16655_v8  ;;  %v2537_v9 = vsub.f32 %v12875_v34, %v16919_v29  ;;  %v2532_v4 = vand.u32 4294901760, %v2531_v53 }
 0x18c   : > { %v8547_v48 = vpop.f32.mrf.mxu0  ;;  %2509 = vmatmul.mubr.f32.gmra.mxu0 %v2508_v39  ;;  %v8623_v13 = vadd.f32 %v8622_v42, %v8621_v63  ;;  %9224 = vmatprep.subr.mxu1 %v16658_v47  ;;  %v2546_v39 = vsub.f32 %v12885_v41, %v16921_v0  ;;  %v16923_v0 = vand.u32 4294901760, %v12902_v15 }
 0x18d   : > { %2518 = vmatprep.mubr.f32.mxu0 %v2517_v25  ;;  %v8624_v32 = vpop.f32.mrf.mxu1  ;;  %9145 = vmatpush3.msra.mxu0 %v16920_v16  ;;  %v2538_v16 = vand.u32 4294901760, %v2537_v9  ;;  %v16925_v9 = vld [vmem:[#allocation109_spill] sm:$0xff] }
 0x18e   : > { %v8548_v42 = vpop.f32.mrf.mxu0  ;;  %v12933_v29 = vadd.f32 %v8623_v13, %v8543_v24  ;;  %2871 = vmatmul.mubr.f32.gmra.mxu1 %v12760_v5  ;;  %9146 = vmatprep.subr.mxu0 %v16922_v10  ;;  %v2552_v63 = vsub.f32 %v12902_v15, %v16923_v0  ;;  %v16947_v5 = vld [vmem:[#allocation22_spill] sm:$0xff] }
 0x18f   : > { %v8549_v61 = vadd.f32 %v8548_v42, %v8547_v48  ;;  %v8625_v2 = vpop.f32.mrf.mxu1  ;;  %2876 = vmatprep.mubr.f32.mxu1 %v12767_v20  ;;  %9225 = vmatpush3.msra.mxu1 %v11528_v60  ;;  %v2547_v48 = vand.u32 4294901760, %v2546_v39  ;;  %v16924_v42 = vand.u32 4294901760, %v12912_v27  ;;  %v16927_v20 = vand.u32 4294901760, %v12926_v59 }
 0x190   : > { %v8550_v25 = vpop.f32.mrf.mxu0  ;;  %2524 = vmatmul.mubr.f32.gmra.mxu0 %v2523_v33  ;;  %v8626_v53 = vadd.f32 %v8625_v2, %v8624_v32  ;;  %9226 = vmatprep.subr.mxu1 %v16662_v3 }
 0x191   : > { %2533 = vmatprep.mubr.f32.mxu0 %v2532_v4  ;;  %v8627_v13 = vpop.f32.mrf.mxu1  ;;  %9147 = vmatpush3.msra.mxu0 %v11739_v6  ;;  %v2561_v10 = vsub.f32 %v12912_v27, %v16924_v42  ;;  %v16926_v4 = vld [vmem:[#allocation71_spill] sm:$0xff]  ;;  %v2553_v6 = vand.u32 4294901760, %v2552_v63  ;;  %v2567_v42 = vsub.f32 %v12926_v59, %v16927_v20 }
 0x192   : > { %v8551_v33 = vpop.f32.mrf.mxu0  ;;  %v12948_v2 = vadd.f32 %v8626_v53, %v8546_v37  ;;  %2878 = vmatmul.mubr.f32.gmra.mxu1 %v12788_v51  ;;  %9148 = vmatprep.subr.mxu0 %v16925_v9  ;;  %v16928_v37 = vld [vmem:[#allocation74_spill] sm:$0xff]  ;;  %v16929_v9 = vld [vmem:[#allocation116_spill] sm:$0xff] }
 0x193   : > { %v8552_v32 = vadd.f32 %v8551_v33, %v8550_v25  ;;  %v8628_v0 = vpop.f32.mrf.mxu1  ;;  %2883 = vmatprep.mubr.f32.mxu1 %v12804_v21  ;;  %9227 = vmatpush3.msra.mxu1 %v16926_v4  ;;  %v2562_v51 = vand.u32 4294901760, %v2561_v10  ;;  %v16930_v21 = vld [vmem:[#allocation122_spill] sm:$0xff]  ;;  %v16932_v10 = vld [vmem:[#allocation77_spill] sm:$0xff] }
 0x194   : > { %v8553_v39 = vpop.f32.mrf.mxu0  ;;  %2539 = vmatmul.mubr.f32.gmra.mxu0 %v2538_v16  ;;  %v8629_v24 = vadd.f32 %v8628_v0, %v8627_v13  ;;  %9228 = vmatprep.subr.mxu1 %v16928_v37  ;;  %v16931_v13 = vld [vmem:[#allocation123_spill] sm:$0xff]  ;;  %v2568_v0 = vand.u32 4294901760, %v2567_v42 }
 0x195   : > { %2548 = vmatprep.mubr.f32.mxu0 %v2547_v48  ;;  %v8630_v53 = vpop.f32.mrf.mxu1  ;;  %9149 = vmatpush3.msra.mxu0 %v16929_v9 }
 0x196   : > { %v8554_v25 = vpop.f32.mrf.mxu0  ;;  %v12959_v33 = vadd.f32 %v8629_v24, %v8549_v61  ;;  %2885 = vmatmul.mubr.f32.gmra.mxu1 %v12817_v31  ;;  %9150 = vmatprep.subr.mxu0 %v16930_v21  ;;  %v16933_v61 = vld [vmem:[#allocation125_spill] sm:$0xff] }
 0x197   : > { %v8555_v16 = vadd.f32 %v8554_v25, %v8553_v39  ;;  %v8631_v63 = vpop.f32.mrf.mxu1  ;;  %2890 = vmatprep.mubr.f32.mxu1 %v12831_v43  ;;  %9151 = vmatpush3.msra.mxu0 %v16931_v13  ;;  %v16934_v39 = vld [vmem:[#allocation129_spill] sm:$0xff]  ;;  %v16943_v43 = vld [vmem:[#allocation6_spill] sm:$0xff] }
 0x198   : > { %v8556_v20 = vpop.f32.mrf.mxu0  ;;  %2554 = vmatmul.mubr.f32.gmra.mxu0 %v2553_v6  ;;  %v8632_v48 = vadd.f32 %v8631_v63, %v8630_v53  ;;  %9229 = vmatpush3.msra.mxu1 %v16932_v10  ;;  %v16935_v6 = vld [vmem:[#allocation81_spill] sm:$0xff]  ;;  %v16937_v63 = vld [vmem:[#allocation115_spill] sm:$0xff] }
 0x199   : > { %2563 = vmatprep.mubr.f32.mxu0 %v2562_v51  ;;  %v8633_v9 = vpop.f32.mrf.mxu1  ;;  %9152 = vmatprep.subr.mxu0 %v16933_v61  ;;  %v16936_v51 = vld [vmem:[#allocation86_spill] sm:$0xff] }
 0x19a   : > { %v8557_v24 = vpop.f32.mrf.mxu0  ;;  %v12967_v31 = vadd.f32 %v8632_v48, %v8552_v32  ;;  %2892 = vmatmul.mubr.f32.gmra.mxu1 %v12852_v36  ;;  %9153 = vmatpush3.msra.mxu0 %v16934_v39  ;;  %v16938_v61 = vld [vmem:[#allocation90_spill] sm:$0xff]  ;;  %v16940_v39 = vld [vmem:[#allocation95_spill] sm:$0xff] }
 0x19b   : > { %v8558_v25 = vadd.f32 %v8557_v24, %v8556_v20  ;;  %v8634_v21 = vpop.f32.mrf.mxu1  ;;  %2897 = vmatprep.mubr.f32.mxu1 %v12859_v7  ;;  %9230 = vmatprep.subr.mxu1 %v16935_v6  ;;  %v16939_v20 = vld [vmem:[#allocation15_spill] sm:$0xff]  ;;  %v16942_v7 = vld [vmem:[#allocation5_spill] sm:$0xff] }
 0x19c   : > { %v8559_v42 = vpop.f32.mrf.mxu0  ;;  %2569 = vmatmul.mubr.f32.gmra.mxu0 %v2568_v0  ;;  %v8635_v53 = vadd.f32 %v8634_v21, %v8633_v9  ;;  %9231 = vmatpush3.msra.mxu1 %v16936_v51  ;;  %v16941_v9 = vld [vmem:[#allocation139_spill] sm:$0xff] }
 0x19d   : > { %3041 = vmatprep.mubr.f32.mxu0 %v16937_v63  ;;  %9232 = vmatprep.subr.mxu1 %v16938_v61 }
 0x19e   : > { %v8560_v32 = vpop.f32.mrf.mxu0  ;;  %v12976_v48 = vadd.f32 %v8635_v53, %v8555_v16  ;;  %v8636_v13 = vpop.f32.mrf.mxu1  ;;  %2899 = vmatmul.mubr.f32.gmra.mxu1 %v12877_v22  ;;  %9282 = vmatprep.subr.mxu0 %v16939_v20  ;;  %v16944_v16 = vld [vmem:[#allocation19_spill] sm:$0xff] }
 0x19f   : > { %v8561_v24 = vadd.f32 %v8560_v32, %v8559_v42  ;;  %2904 = vmatprep.mubr.f32.mxu1 %v12887_v11  ;;  %9233 = vmatpush3.msra.mxu1 %v16940_v39  ;;  %v16945_v42 = vld [vmem:[#allocation20_spill] sm:$0xff]  ;;  %v16946_v11 = vand.u32 4294901760, %v16937_v63  ;;  %v16949_v39 = vld [vmem:[#allocation25_spill] sm:$0xff]  ;;  %v16952_v63 = vand.u32 4294901760, %v16941_v9 }
 0x1a0   : > { %v8674_v21 = vpop.f32.mrf.mxu0  ;;  %3044 = vmatmul.mubr.f32.vlgmr.msra.gmra.mxu0 %v16941_v9  ;;  %v8637_v0 = vpop.f32.mrf.mxu1  ;;  %9362 = vmatprep.subr.mxu1 %v16942_v7 }
 0x1a1   : > { %v8638_v36 = vadd.f32 %v8637_v0, %v8636_v13  ;;  %3050 = vmatprep.mubr.f32.mxu0 %v16943_v43  ;;  %9283 = vmatpush3.msra.mxu0 %v16944_v16  ;;  %v16948_v13 = vld [vmem:[#allocation146_spill] sm:$0xff] }
 0x1a2   : > { %v8675_v53 = vpop.f32.mrf.mxu0  ;;  %v8639_v22 = vpop.f32.mrf.mxu1  ;;  %2906 = vmatmul.mubr.f32.gmra.mxu1 %v12904_v57  ;;  %9284 = vmatprep.subr.mxu0 %v16945_v42  ;;  %v16950_v57 = vld [vmem:[#allocation150_spill] sm:$0xff]  ;;  %v16951_v42 = vld [vmem:[#allocation28_spill] sm:$0xff] }
 0x1a3   : > { %v12988_v32 = vadd.f32 %v8638_v36, %v8558_v25  ;;  %v8676_v20 = vadd.f32 %v8675_v53, %v8674_v21  ;;  %3283 = vmatprep.mubr.f32.mxu1 %v16946_v11  ;;  %9285 = vmatpush3.msra.mxu0 %v16947_v5  ;;  %v16953_v11 = vld [vmem:[#allocation32_spill] sm:$0xff] }
 0x1a4   : > { %v8677_v46 = vpop.f32.mrf.mxu0  ;;  %3053 = vmatmul.mubr.f32.gmra.mxu0 %v16948_v13  ;;  %v8640_v0 = vpop.f32.mrf.mxu1  ;;  %9286 = vmatprep.subr.mxu0 %v16949_v39  ;;  %v16954_v39 = vand.u32 4294901760, %v16943_v43 }
 0x1a5   : > { %v1292_v16 = vadd.f32 %v8676_v20, %v12694_v35  ;;  %v8641_v7 = vadd.f32 %v8640_v0, %v8639_v22  ;;  %3059 = vmatprep.mubr.f32.mxu0 %v16950_v57  ;;  %9287 = vmatpush3.msra.mxu0 %v16951_v42  ;;  %v16955_v22 = vld [vmem:[#allocation151_spill] sm:$0xff]  ;;  %v16962_v42 = vld [vmem:[#allocation40_spill] sm:$0xff] }
 0x1a6   : > { %v8678_v36 = vpop.f32.mrf.mxu0  ;;  %v8754_v25 = vpop.f32.mrf.mxu1  ;;  %3287 = vmatmul.mubr.f32.vlgmr.msra.gmra.mxu1 %v16952_v63  ;;  %9288 = vmatprep.subr.mxu0 %v16953_v11  ;;  %v16956_v63 = vld [vmem:[#allocation153_spill] sm:$0xff] }
 0x1a7   : > { %v13001_v21 = vadd.f32 %v8641_v7, %v8561_v24  ;;  %v8679_v53 = vadd.f32 %v8678_v36, %v8677_v46  ;;  %9363 = vmatpush3.msra.mxu1 %v11197_v12  ;;  %3294 = vmatprep.mubr.f32.mxu1 %v16954_v39  ;;  %v16957_v24 = vand.u32 4294901760, %v16948_v13  ;;  %v16958_v36 = vand.u32 4294901760, %v16950_v57 }
 0x1a8   : > { %v8680_v35 = vpop.f32.mrf.mxu0  ;;  %3062 = vmatmul.mubr.f32.gmra.mxu0 %v16955_v22  ;;  %v8755_v20 = vpop.f32.mrf.mxu1  ;;  %9364 = vmatprep.subr.mxu1 %v16687_v56  ;;  %v16963_v57 = vand.u32 4294901760, %v16955_v22  ;;  %v16965_v5 = vand.u32 4294901760, %v16956_v63 }
 0x1a9   : > { %v1301_v0 = vadd.f32 %v8679_v53, %v12722_v23  ;;  %v8756_v9 = vadd.f32 %v8755_v20, %v8754_v25  ;;  %3068 = vmatprep.mubr.f32.mxu0 %v16956_v63  ;;  %9365 = vmatpush3.msra.mxu1 %v11210_v17  ;;  %v16959_v25 = vld [vmem:[#allocation163_spill] sm:$0xff] }
 0x1aa   : > { %v8681_v7 = vpop.f32.mrf.mxu0  ;;  %v8757_v46 = vpop.f32.mrf.mxu1  ;;  %3298 = vmatmul.mubr.f32.gmra.mxu1 %v16957_v24  ;;  %9366 = vmatprep.subr.mxu1 %v11212_v18  ;;  %v16960_v20 = vld [vmem:[#allocation7_spill] sm:$0xff]  ;;  %v16961_v24 = vld [vmem:[#allocation165_spill] sm:$0xff]  ;;  %v16971_v63 = vand.u32 4294901760, %v16959_v25 }
 0x1ab   : > { %v8682_v43 = vadd.f32 %v8681_v7, %v8680_v35  ;;  %v13014_v39 = vadd.f32 %v8756_v9, %v1292_v16  ;;  %3305 = vmatprep.mubr.f32.mxu1 %v16958_v36  ;;  %9367 = vmatpush3.msra.mxu1 %v11214_v19  ;;  %v16964_v9 = vld [vmem:[#allocation44_spill] sm:$0xff] }
 0x1ac   : > { %v8683_v23 = vpop.f32.mrf.mxu0  ;;  %3071 = vmatmul.mubr.f32.gmra.mxu0 %v16959_v25  ;;  %v8758_v53 = vpop.f32.mrf.mxu1  ;;  %9368 = vmatprep.subr.mxu1 %v16960_v20  ;;  %v16966_v20 = vld [vmem:[#allocation8_spill] sm:$0xff] }
 0x1ad   : > { %v1310_v11 = vadd.f32 %v8682_v43, %v12751_v26  ;;  %v8759_v13 = vadd.f32 %v8758_v53, %v8757_v46  ;;  %3077 = vmatprep.mubr.f32.mxu0 %v16961_v24  ;;  %9289 = vmatpush3.msra.mxu0 %v16962_v42  ;;  %v16967_v46 = vld [vmem:[#allocation168_spill] sm:$0xff]  ;;  %v16968_v53 = vld [vmem:[#allocation9_spill] sm:$0xff] }
 0x1ae   : > { %v8684_v16 = vpop.f32.mrf.mxu0  ;;  %v8760_v35 = vpop.f32.mrf.mxu1  ;;  %3309 = vmatmul.mubr.f32.gmra.mxu1 %v16963_v57  ;;  %9290 = vmatprep.subr.mxu0 %v16964_v9  ;;  %v16969_v57 = vld [vmem:[#allocation96_spill] sm:$0xff]  ;;  %v16970_v9 = vld [vmem:[#allocation47_spill] sm:$0xff] }
 0x1af   : > { %v8685_v7 = vadd.f32 %v8684_v16, %v8683_v23  ;;  %v13027_v36 = vadd.f32 %v8759_v13, %v1301_v0  ;;  %3316 = vmatprep.mubr.f32.mxu1 %v16965_v5  ;;  %9369 = vmatpush3.msra.mxu1 %v16966_v20  ;;  %v16972_v5 = vld [vmem:[#allocation50_spill] sm:$0xff]  ;;  %v16973_v20 = vand.u32 4294901760, %v16961_v24  ;;  %v16979_v24 = vand.u32 4294901760, %v16967_v46 }
 0x1b0   : > { %v8686_v26 = vpop.f32.mrf.mxu0  ;;  %3080 = vmatmul.mubr.f32.gmra.mxu0 %v16967_v46  ;;  %v8761_v43 = vpop.f32.mrf.mxu1  ;;  %9370 = vmatprep.subr.mxu1 %v16968_v53  ;;  %v16974_v53 = vld [vmem:[#allocation11_spill] sm:$0xff] }
 0x1b1   : > { %v1319_v42 = vadd.f32 %v8685_v7, %v12778_v1  ;;  %v8762_v22 = vadd.f32 %v8761_v43, %v8760_v35  ;;  %3086 = vmatprep.mubr.f32.mxu0 %v16969_v57  ;;  %9291 = vmatpush3.msra.mxu0 %v16970_v9  ;;  %v16975_v35 = vld [vmem:[#allocation102_spill] sm:$0xff]  ;;  %v16976_v43 = vld [vmem:[#allocation13_spill] sm:$0xff] }
 0x1b2   : > { %v8687_v0 = vpop.f32.mrf.mxu0  ;;  %v8763_v23 = vpop.f32.mrf.mxu1  ;;  %3320 = vmatmul.mubr.f32.gmra.mxu1 %v16971_v63  ;;  %9292 = vmatprep.subr.mxu0 %v16972_v5  ;;  %v16977_v63 = vld [vmem:[#allocation120_spill] sm:$0xff]  ;;  %v16978_v5 = vld [vmem:[#allocation54_spill] sm:$0xff] }
 0x1b3   : > { %v8688_v13 = vadd.f32 %v8687_v0, %v8686_v26  ;;  %v13040_v16 = vadd.f32 %v8762_v22, %v1310_v11  ;;  %3327 = vmatprep.mubr.f32.mxu1 %v16973_v20  ;;  %9371 = vmatpush3.msra.mxu1 %v16974_v53  ;;  %v16980_v20 = vld [vmem:[#allocation57_spill] sm:$0xff]  ;;  %v16981_v53 = vand.u32 4294901760, %v16969_v57  ;;  %v16985_v57 = vand.u32 4294901760, %v16975_v35 }
 0x1b4   : > { %v8689_v1 = vpop.f32.mrf.mxu0  ;;  %3089 = vmatmul.mubr.f32.gmra.mxu0 %v16975_v35  ;;  %v8764_v7 = vpop.f32.mrf.mxu1  ;;  %9372 = vmatprep.subr.mxu1 %v16976_v43 }
 0x1b5   : > { %v1328_v9 = vadd.f32 %v8688_v13, %v12806_v58  ;;  %v8765_v25 = vadd.f32 %v8764_v7, %v8763_v23  ;;  %3095 = vmatprep.mubr.f32.mxu0 %v16977_v63  ;;  %9293 = vmatpush3.msra.mxu0 %v16978_v5  ;;  %v16982_v23 = vld [vmem:[#allocation134_spill] sm:$0xff]  ;;  %v16987_v5 = vand.u32 4294901760, %v16977_v63 }
 0x1b6   : > { %v8690_v11 = vpop.f32.mrf.mxu0  ;;  %v8766_v26 = vpop.f32.mrf.mxu1  ;;  %3331 = vmatmul.mubr.f32.gmra.mxu1 %v16979_v24  ;;  %9294 = vmatprep.subr.mxu0 %v16980_v20  ;;  %v16983_v24 = vld [vmem:[#allocation142_spill] sm:$0xff]  ;;  %v16984_v20 = vld [vmem:[#allocation60_spill] sm:$0xff]  ;;  %v16991_v63 = vand.u32 4294901760, %v16982_v23 }
 0x1b7   : > { %v8691_v22 = vadd.f32 %v8690_v11, %v8689_v1  ;;  %v13053_v0 = vadd.f32 %v8765_v25, %v1319_v42  ;;  %3338 = vmatprep.mubr.f32.mxu1 %v16981_v53  ;;  %9373 = vmatpush3.msra.mxu1 %v11283_v38  ;;  %v16986_v53 = vld [vmem:[#allocation66_spill] sm:$0xff] }
 0x1b8   : > { %v8692_v58 = vpop.f32.mrf.mxu0  ;;  %3098 = vmatmul.mubr.f32.gmra.mxu0 %v16982_v23  ;;  %v8767_v13 = vpop.f32.mrf.mxu1  ;;  %9374 = vmatprep.subr.mxu1 %v11289_v40 }
 0x1b9   : > { %v1337_v7 = vadd.f32 %v8691_v22, %v12834_v45  ;;  %v8768_v46 = vadd.f32 %v8767_v13, %v8766_v26  ;;  %3104 = vmatprep.mubr.f32.mxu0 %v16983_v24  ;;  %9295 = vmatpush3.msra.mxu0 %v16984_v20  ;;  %v16988_v26 = vld [vmem:[#allocation144_spill] sm:$0xff]  ;;  %v16993_v20 = vand.u32 4294901760, %v16983_v24 }
 0x1ba   : > { %v8693_v42 = vpop.f32.mrf.mxu0  ;;  %v8769_v1 = vpop.f32.mrf.mxu1  ;;  %3342 = vmatmul.mubr.f32.gmra.mxu1 %v16985_v57  ;;  %9296 = vmatprep.subr.mxu0 %v16986_v53  ;;  %v16989_v57 = vld [vmem:[#allocation148_spill] sm:$0xff]  ;;  %v16990_v53 = vld [vmem:[#allocation69_spill] sm:$0xff]  ;;  %v16999_v24 = vand.u32 4294901760, %v16988_v26 }
 0x1bb   : > { %v8694_v25 = vadd.f32 %v8693_v42, %v8692_v58  ;;  %v13066_v11 = vadd.f32 %v8768_v46, %v1328_v9  ;;  %3349 = vmatprep.mubr.f32.mxu1 %v16987_v5  ;;  %9375 = vmatpush3.msra.mxu1 %v11302_v44  ;;  %v16992_v5 = vld [vmem:[#allocation75_spill] sm:$0xff] }
 0x1bc   : > { %v8695_v45 = vpop.f32.mrf.mxu0  ;;  %3107 = vmatmul.mubr.f32.gmra.mxu0 %v16988_v26  ;;  %v8770_v22 = vpop.f32.mrf.mxu1  ;;  %9376 = vmatprep.subr.mxu1 %v11319_v49  ;;  %v16994_v49 = vld [vmem:[#allocation29_spill] sm:$0xff] }
 0x1bd   : > { %v1346_v13 = vadd.f32 %v8694_v25, %v12862_v50  ;;  %v8771_v35 = vadd.f32 %v8770_v22, %v8769_v1  ;;  %3113 = vmatprep.mubr.f32.mxu0 %v16989_v57  ;;  %9297 = vmatpush3.msra.mxu0 %v16990_v53  ;;  %v16995_v1 = vld [vmem:[#allocation154_spill] sm:$0xff]  ;;  %v16996_v22 = vld [vmem:[#allocation35_spill] sm:$0xff] }
 0x1be   : > { %v8696_v9 = vpop.f32.mrf.mxu0  ;;  %v8772_v58 = vpop.f32.mrf.mxu1  ;;  %3353 = vmatmul.mubr.f32.gmra.mxu1 %v16991_v63  ;;  %9298 = vmatprep.subr.mxu0 %v16992_v5  ;;  %v16997_v63 = vld [vmem:[#allocation157_spill] sm:$0xff]  ;;  %v16998_v5 = vld [vmem:[#allocation79_spill] sm:$0xff] }
 0x1bf   : > { %v8697_v46 = vadd.f32 %v8696_v9, %v8695_v45  ;;  %v13079_v42 = vadd.f32 %v8771_v35, %v1337_v7  ;;  %3360 = vmatprep.mubr.f32.mxu1 %v16993_v20  ;;  %9377 = vmatpush3.msra.mxu1 %v16994_v49  ;;  %v17000_v20 = vld [vmem:[#allocation83_spill] sm:$0xff]  ;;  %v17001_v49 = vand.u32 4294901760, %v16989_v57  ;;  %v17006_v57 = vand.u32 4294901760, %v16995_v1 }
 0x1c0   : > { %v8698_v50 = vpop.f32.mrf.mxu0  ;;  %3116 = vmatmul.mubr.f32.gmra.mxu0 %v16995_v1  ;;  %v8773_v25 = vpop.f32.mrf.mxu1  ;;  %9378 = vmatprep.subr.mxu1 %v16996_v22 }
 0x1c1   : > { %v1355_v53 = vadd.f32 %v8697_v46, %v12890_v30  ;;  %v8774_v23 = vadd.f32 %v8773_v25, %v8772_v58  ;;  %3122 = vmatprep.mubr.f32.mxu0 %v16997_v63  ;;  %9299 = vmatpush3.msra.mxu0 %v16998_v5  ;;  %v17002_v58 = vld [vmem:[#allocation160_spill] sm:$0xff]  ;;  %v17003_v25 = vld [vmem:[#allocation42_spill] sm:$0xff] }
 0x1c2   : > { %v8699_v7 = vpop.f32.mrf.mxu0  ;;  %v8775_v45 = vpop.f32.mrf.mxu1  ;;  %3364 = vmatmul.mubr.f32.gmra.mxu1 %v16999_v24  ;;  %9300 = vmatprep.subr.mxu0 %v17000_v20  ;;  %v17004_v24 = vld [vmem:[#allocation170_spill] sm:$0xff]  ;;  %v17005_v20 = vld [vmem:[#allocation85_spill] sm:$0xff] }
 0x1c3   : > { %v8700_v35 = vadd.f32 %v8699_v7, %v8698_v50  ;;  %v13092_v9 = vadd.f32 %v8774_v23, %v1346_v13  ;;  %3371 = vmatprep.mubr.f32.mxu1 %v17001_v49  ;;  %9379 = vmatpush3.msra.mxu1 %v16725_v14  ;;  %v17007_v49 = vld [vmem:[#allocation89_spill] sm:$0xff]  ;;  %v17008_v14 = vand.u32 4294901760, %v16997_v63  ;;  %v17012_v63 = vand.u32 4294901760, %v17002_v58 }
 0x1c4   : > { %v8701_v30 = vpop.f32.mrf.mxu0  ;;  %3125 = vmatmul.mubr.f32.gmra.mxu0 %v17002_v58  ;;  %v8776_v46 = vpop.f32.mrf.mxu1  ;;  %9380 = vmatprep.subr.mxu1 %v17003_v25 }
 0x1c5   : > { %v1364_v5 = vadd.f32 %v8700_v35, %v12914_v52  ;;  %v8777_v26 = vadd.f32 %v8776_v46, %v8775_v45  ;;  %3131 = vmatprep.mubr.f32.mxu0 %v17004_v24  ;;  %9301 = vmatpush3.msra.mxu0 %v17005_v20  ;;  %v17009_v45 = vld [vmem:[#allocation171_spill] sm:$0xff]  ;;  %v17014_v20 = vand.u32 4294901760, %v17004_v24 }
 0x1c6   : > { %v8702_v13 = vpop.f32.mrf.mxu0  ;;  %v8778_v50 = vpop.f32.mrf.mxu1  ;;  %3375 = vmatmul.mubr.f32.gmra.mxu1 %v17006_v57  ;;  %9302 = vmatprep.subr.mxu0 %v17007_v49  ;;  %v17010_v57 = vld [vmem:[#allocation173_spill] sm:$0xff]  ;;  %v17011_v49 = vld [vmem:[#allocation92_spill] sm:$0xff]  ;;  %v17018_v24 = vand.u32 4294901760, %v17009_v45 }
 0x1c7   : > { %v8703_v23 = vadd.f32 %v8702_v13, %v8701_v30  ;;  %v13105_v7 = vadd.f32 %v8777_v26, %v1355_v53  ;;  %3382 = vmatprep.mubr.f32.mxu1 %v17008_v14  ;;  %9381 = vmatpush3.msra.mxu1 %v16650_v54  ;;  %v17013_v14 = vld [vmem:[#allocation98_spill] sm:$0xff] }
 0x1c8   : > { %v8704_v52 = vpop.f32.mrf.mxu0  ;;  %3134 = vmatmul.mubr.f32.gmra.mxu0 %v17009_v45  ;;  %v8779_v35 = vpop.f32.mrf.mxu1  ;;  %9382 = vmatprep.subr.mxu1 %v16653_v28 }
 0x1c9   : > { %v1373_v46 = vadd.f32 %v8703_v23, %v12933_v29  ;;  %v8780_v1 = vadd.f32 %v8779_v35, %v8778_v50  ;;  %3140 = vmatprep.mubr.f32.mxu0 %v17010_v57  ;;  %9303 = vmatpush3.msra.mxu0 %v17011_v49  ;;  %v17015_v50 = vld [vmem:[#allocation175_spill] sm:$0xff]  ;;  %v17020_v49 = vand.u32 4294901760, %v17010_v57 }
 0x1ca   : > { %v8705_v53 = vpop.f32.mrf.mxu0  ;;  %v8781_v30 = vpop.f32.mrf.mxu1  ;;  %3386 = vmatmul.mubr.f32.gmra.mxu1 %v17012_v63  ;;  %9304 = vmatprep.subr.mxu0 %v17013_v14  ;;  %v17016_v63 = vld [vmem:[#allocation177_spill] sm:$0xff]  ;;  %v17022_v57 = vand.u32 4294901760, %v17015_v50 }
 0x1cb   : > { %v8706_v26 = vadd.f32 %v8705_v53, %v8704_v52  ;;  %v13118_v13 = vadd.f32 %v8780_v1, %v1364_v5  ;;  %3393 = vmatprep.mubr.f32.mxu1 %v17014_v20  ;;  %9383 = vmatpush3.msra.mxu1 %v16655_v8  ;;  %v17017_v14 = vld [vmem:[#allocation105_spill] sm:$0xff]  ;;  %v17019_v20 = vld [vmem:[#allocation108_spill] sm:$0xff] }
 0x1cc   : > { %v8707_v29 = vpop.f32.mrf.mxu0  ;;  %3143 = vmatmul.mubr.f32.gmra.mxu0 %v17015_v50  ;;  %v8782_v23 = vpop.f32.mrf.mxu1  ;;  %9384 = vmatprep.subr.mxu1 %v16658_v47 }
 0x1cd   : > { %v1382_v35 = vadd.f32 %v8706_v26, %v12948_v2  ;;  %v8783_v58 = vadd.f32 %v8782_v23, %v8781_v30  ;;  %3149 = vmatprep.mubr.f32.mxu0 %v17016_v63  ;;  %9305 = vmatpush3.msra.mxu0 %v17017_v14  ;;  %v17021_v23 = vld [vmem:[#allocation111_spill] sm:$0xff] }
 0x1ce   : > { %v8708_v5 = vpop.f32.mrf.mxu0  ;;  %v8784_v52 = vpop.f32.mrf.mxu1  ;;  %3397 = vmatmul.mubr.f32.gmra.mxu1 %v17018_v24  ;;  %9306 = vmatprep.subr.mxu0 %v17019_v20  ;;  %v17024_v24 = vand.u32 4294901760, %v17016_v63  ;;  %v17026_v63 = vand.u32 4294901760, %v12846_v55 }
 0x1cf   : > { %v8709_v1 = vadd.f32 %v8708_v5, %v8707_v29  ;;  %v13131_v53 = vadd.f32 %v8783_v58, %v1373_v46  ;;  %3404 = vmatprep.mubr.f32.mxu1 %v17020_v49  ;;  %9385 = vmatpush3.msra.mxu1 %v11528_v60  ;;  %v17023_v49 = vld [vmem:[#allocation113_spill] sm:$0xff] }
 0x1d0   : > { %v8710_v2 = vpop.f32.mrf.mxu0  ;;  %3152 = vmatmul.mubr.f32.gmra.mxu0 %v12846_v55  ;;  %v8785_v30 = vpop.f32.mrf.mxu1  ;;  %9386 = vmatprep.subr.mxu1 %v16662_v3 }
 0x1d1   : > { %v1391_v26 = vadd.f32 %v8709_v1, %v12959_v33  ;;  %v8786_v45 = vadd.f32 %v8785_v30, %v8784_v52  ;;  %3158 = vmatprep.mubr.f32.mxu0 %v12857_v62  ;;  %9307 = vmatpush3.msra.mxu0 %v17021_v23  ;;  %v17025_v30 = vld [vmem:[#allocation119_spill] sm:$0xff] }
 0x1d2   : > { %v8711_v46 = vpop.f32.mrf.mxu0  ;;  %v8787_v29 = vpop.f32.mrf.mxu1  ;;  %3408 = vmatmul.mubr.f32.gmra.mxu1 %v17022_v57  ;;  %9308 = vmatprep.subr.mxu0 %v17023_v49  ;;  %v17029_v49 = vld [vmem:[#allocation127_spill] sm:$0xff] }
 0x1d3   : > { %v8712_v58 = vadd.f32 %v8711_v46, %v8710_v2  ;;  %v13144_v5 = vadd.f32 %v8786_v45, %v1382_v35  ;;  %3415 = vmatprep.mubr.f32.mxu1 %v17024_v24  ;;  %9387 = vmatpush3.msra.mxu1 %v16926_v4  ;;  %v17027_v45 = vld [vmem:[#allocation126_spill] sm:$0xff]  ;;  %v17028_v24 = vand.u32 4294901760, %v12857_v62  ;;  %v17031_v62 = vand.u32 4294901760, %v12875_v34 }
 0x1d4   : > { %v8713_v33 = vpop.f32.mrf.mxu0  ;;  %3161 = vmatmul.mubr.f32.gmra.mxu0 %v12875_v34  ;;  %v8788_v52 = vpop.f32.mrf.mxu1  ;;  %9388 = vmatprep.subr.mxu1 %v16928_v37 }
 0x1d5   : > { %v1400_v1 = vadd.f32 %v8712_v58, %v12967_v31  ;;  %v8789_v50 = vadd.f32 %v8788_v52, %v8787_v29  ;;  %3167 = vmatprep.mubr.f32.mxu0 %v12885_v41  ;;  %9309 = vmatpush3.msra.mxu0 %v17025_v30  ;;  %v17030_v52 = vld [vmem:[#allocation131_spill] sm:$0xff]  ;;  %v17056_v30 = vld [vmem:[#allocation162_spill] sm:$0xff] }
 0x1d6   : > { %v8714_v35 = vpop.f32.mrf.mxu0  ;;  %v8790_v2 = vpop.f32.mrf.mxu1  ;;  %3419 = vmatmul.mubr.f32.gmra.mxu1 %v17026_v63  ;;  %9310 = vmatprep.subr.mxu0 %v17027_v45  ;;  %v17049_v45 = vld [vmem:[#allocation149_spill] sm:$0xff] }
 0x1d7   : > { %v8715_v46 = vadd.f32 %v8714_v35, %v8713_v33  ;;  %v13157_v57 = vadd.f32 %v8789_v50, %v1391_v26  ;;  %3426 = vmatprep.mubr.f32.mxu1 %v17028_v24  ;;  %9311 = vmatpush3.msra.mxu0 %v17029_v49  ;;  %v17032_v50 = vld [vmem:[#allocation133_spill] sm:$0xff]  ;;  %v17033_v24 = vand.u32 4294901760, %v12885_v41  ;;  %v17035_v41 = vand.u32 4294901760, %v12902_v15 }
 0x1d8   : > { %v8716_v31 = vpop.f32.mrf.mxu0  ;;  %3170 = vmatmul.mubr.f32.gmra.mxu0 %v12902_v15  ;;  %v8791_v29 = vpop.f32.mrf.mxu1  ;;  %9389 = vmatpush3.msra.mxu1 %v16932_v10 }
 0x1d9   : > { %v1409_v58 = vadd.f32 %v8715_v46, %v12976_v48  ;;  %v8792_v55 = vadd.f32 %v8791_v29, %v8790_v2  ;;  %3176 = vmatprep.mubr.f32.mxu0 %v12912_v27  ;;  %9312 = vmatprep.subr.mxu0 %v17030_v52  ;;  %v17034_v29 = vld [vmem:[#allocation101_spill] sm:$0xff] }
 0x1da   : > { %v8717_v26 = vpop.f32.mrf.mxu0  ;;  %v8793_v33 = vpop.f32.mrf.mxu1  ;;  %3430 = vmatmul.mubr.f32.gmra.mxu1 %v17031_v62  ;;  %9313 = vmatpush3.msra.mxu0 %v17032_v50  ;;  %v17038_v50 = vld [vmem:[#allocation95_spill] sm:$0xff] }
 0x1db   : > { %v8718_v35 = vadd.f32 %v8717_v26, %v8716_v31  ;;  %v13170_v63 = vadd.f32 %v8792_v55, %v1400_v1  ;;  %3437 = vmatprep.mubr.f32.mxu1 %v17033_v24  ;;  %9390 = vmatprep.subr.mxu1 %v16935_v6  ;;  %v17036_v55 = vld [vmem:[#allocation5_spill] sm:$0xff]  ;;  %v17037_v24 = vand.u32 4294901760, %v12912_v27  ;;  %v17042_v27 = vand.u32 4294901760, %v12926_v59 }
 0x1dc   : > { %v8719_v48 = vpop.f32.mrf.mxu0  ;;  %3179 = vmatmul.mubr.f32.gmra.mxu0 %v12926_v59  ;;  %v8794_v2 = vpop.f32.mrf.mxu1  ;;  %9391 = vmatpush3.msra.mxu1 %v16936_v51  ;;  %v17044_v59 = vld [vmem:[#allocation140_spill] sm:$0xff] }
 0x1dd   : > { %v1418_v46 = vadd.f32 %v8718_v35, %v12988_v32  ;;  %v8795_v34 = vadd.f32 %v8794_v2, %v8793_v33  ;;  %3618 = vmatprep.mubr.f32.mxu0 %v17034_v29  ;;  %9392 = vmatprep.subr.mxu1 %v16938_v61  ;;  %v17039_v33 = vld [vmem:[#allocation107_spill] sm:$0xff] }
 0x1de   : > { %v8720_v1 = vpop.f32.mrf.mxu0  ;;  %v8796_v31 = vpop.f32.mrf.mxu1  ;;  %3441 = vmatmul.mubr.f32.gmra.mxu1 %v17035_v41  ;;  %9442 = vmatprep.subr.mxu0 %v17036_v55  ;;  %v17040_v2 = vld [vmem:[#allocation27_spill] sm:$0xff]  ;;  %v17041_v41 = vld [vmem:[#allocation124_spill] sm:$0xff] }
 0x1df   : > { %v8721_v26 = vadd.f32 %v8720_v1, %v8719_v48  ;;  %v13183_v62 = vadd.f32 %v8795_v34, %v1409_v58  ;;  %3448 = vmatprep.mubr.f32.mxu1 %v17037_v24  ;;  %9393 = vmatpush3.msra.mxu1 %v17038_v50 }
 0x1e0   : > { %v8834_v32 = vpop.f32.mrf.mxu0  ;;  %3620 = vmatmul.mubr.f32.vlgmr.msra.gmra.mxu0 %v17039_v33  ;;  %v8797_v35 = vpop.f32.mrf.mxu1  ;;  %9522 = vmatprep.subr.mxu1 %v17040_v2 }
 0x1e1   : > { %v1427_v52 = vadd.f32 %v8721_v26, %v13001_v21  ;;  %v8798_v15 = vadd.f32 %v8797_v35, %v8796_v31  ;;  %3625 = vmatprep.mubr.f32.mxu0 %v17041_v41  ;;  %9443 = vmatpush3.msra.mxu0 %v11197_v12  ;;  %v17043_v31 = vld [vmem:[#allocation132_spill] sm:$0xff] }
 0x1e2   : > { %v8835_v58 = vpop.f32.mrf.mxu0  ;;  %v8799_v48 = vpop.f32.mrf.mxu1  ;;  %3452 = vmatmul.mubr.f32.gmra.mxu1 %v17042_v27  ;;  %9444 = vmatprep.subr.mxu0 %v16687_v56  ;;  %v17046_v27 = vld [vmem:[#allocation30_spill] sm:$0xff] }
 0x1e3   : > { %v13196_v34 = vadd.f32 %v8798_v15, %v1418_v46  ;;  %v8836_v1 = vadd.f32 %v8835_v58, %v8834_v32  ;;  %3827 = vmatprep.mubr.f32.mxu1 %v17034_v29  ;;  %9445 = vmatpush3.msra.mxu0 %v11210_v17  ;;  %v17045_v29 = vld [vmem:[#allocation7_spill] sm:$0xff] }
 0x1e4   : > { %v8837_v21 = vpop.f32.mrf.mxu0  ;;  %3627 = vmatmul.mubr.f32.gmra.mxu0 %v17043_v31  ;;  %v8800_v26 = vpop.f32.mrf.mxu1  ;;  %9446 = vmatprep.subr.mxu0 %v11212_v18 }
 0x1e5   : > { %v1868_v24 = vadd.f32 %v8836_v1, %v13014_v39  ;;  %v8801_v35 = vadd.f32 %v8800_v26, %v8799_v48  ;;  %3632 = vmatprep.mubr.f32.mxu0 %v17044_v59  ;;  %9447 = vmatpush3.msra.mxu0 %v11214_v19  ;;  %v17047_v39 = vld [vmem:[#allocation147_spill] sm:$0xff] }
 0x1e6   : > { %v8838_v46 = vpop.f32.mrf.mxu0  ;;  %v8914_v15 = vpop.f32.mrf.mxu1  ;;  %3829 = vmatmul.mubr.f32.vlgmr.msra.gmra.mxu1 %v17039_v33  ;;  %9448 = vmatprep.subr.mxu0 %v17045_v29  ;;  %v17048_v1 = vld [vmem:[#allocation31_spill] sm:$0xff]  ;;  %v17050_v33 = vld [vmem:[#allocation33_spill] sm:$0xff] }
 0x1e7   : > { %v13207_v32 = vadd.f32 %v8801_v35, %v1427_v52  ;;  %v8839_v58 = vadd.f32 %v8838_v46, %v8837_v21  ;;  %9523 = vmatpush3.msra.mxu1 %v17046_v27  ;;  %3834 = vmatprep.mubr.f32.mxu1 %v17041_v41  ;;  %v17051_v21 = vld [vmem:[#allocation36_spill] sm:$0xff]  ;;  %v17053_v27 = vld [vmem:[#allocation39_spill] sm:$0xff] }
 0x1e8   : > { %v8840_v2 = vpop.f32.mrf.mxu0  ;;  %3634 = vmatmul.mubr.f32.gmra.mxu0 %v17047_v39  ;;  %v8915_v48 = vpop.f32.mrf.mxu1  ;;  %9524 = vmatprep.subr.mxu1 %v17048_v1 }
 0x1e9   : > { %v1875_v26 = vadd.f32 %v8839_v58, %v13027_v36  ;;  %v8916_v49 = vadd.f32 %v8915_v48, %v8914_v15  ;;  %3639 = vmatprep.mubr.f32.mxu0 %v17049_v45  ;;  %9525 = vmatpush3.msra.mxu1 %v17050_v33  ;;  %v17054_v36 = vld [vmem:[#allocation156_spill] sm:$0xff]  ;;  %v17055_v58 = vld [vmem:[#allocation43_spill] sm:$0xff] }
 0x1ea   : > { %v8841_v52 = vpop.f32.mrf.mxu0  ;;  %v8917_v35 = vpop.f32.mrf.mxu1  ;;  %3836 = vmatmul.mubr.f32.gmra.mxu1 %v17043_v31  ;;  %9526 = vmatprep.subr.mxu1 %v17051_v21  ;;  %v17057_v31 = vld [vmem:[#allocation8_spill] sm:$0xff]  ;;  %v17063_v21 = vld [vmem:[#allocation166_spill] sm:$0xff] }
 0x1eb   : > { %v8842_v41 = vadd.f32 %v8841_v52, %v8840_v2  ;;  %v13218_v46 = vadd.f32 %v8916_v49, %v1868_v24  ;;  %3841 = vmatprep.mubr.f32.mxu1 %v17044_v59  ;;  %9527 = vmatpush3.msra.mxu1 %v17053_v27  ;;  %v17058_v24 = vld [vmem:[#allocation9_spill] sm:$0xff] }
 0x1ec   : > { %v8843_v1 = vpop.f32.mrf.mxu0  ;;  %3641 = vmatmul.mubr.f32.gmra.mxu0 %v17054_v36  ;;  %v8918_v15 = vpop.f32.mrf.mxu1  ;;  %9528 = vmatprep.subr.mxu1 %v17055_v58 }
 0x1ed   : > { %17052 = vst [vmem:[#allocation115_spill] sm:$0xff] %v13218_v46  ;;  %v1882_v48 = vadd.f32 %v8842_v41, %v13040_v16  ;;  %v8919_v33 = vadd.f32 %v8918_v15, %v8917_v35  ;;  %3646 = vmatprep.mubr.f32.mxu0 %v17056_v30  ;;  %9449 = vmatpush3.msra.mxu0 %v17057_v31  ;;  %v17060_v46 = vld [vmem:[#allocation53_spill] sm:$0xff]  ;;  %v17061_v16 = vld [vmem:[#allocation164_spill] sm:$0xff] }
 0x1ee   : > { %v8844_v2 = vpop.f32.mrf.mxu0  ;;  %v8920_v49 = vpop.f32.mrf.mxu1  ;;  %3843 = vmatmul.mubr.f32.gmra.mxu1 %v17047_v39  ;;  %9450 = vmatprep.subr.mxu0 %v17058_v24  ;;  %v17062_v41 = vld [vmem:[#allocation56_spill] sm:$0xff]  ;;  %v17064_v39 = vld [vmem:[#allocation11_spill] sm:$0xff] }
 0x1ef   : > { %v8845_v59 = vadd.f32 %v8844_v2, %v8843_v1  ;;  %v13229_v52 = vadd.f32 %v8919_v33, %v1875_v26  ;;  %3848 = vmatprep.mubr.f32.mxu1 %v17049_v45  ;;  %9529 = vmatpush3.msra.mxu1 %v17060_v46  ;;  %v17066_v2 = vld [vmem:[#allocation59_spill] sm:$0xff]  ;;  %v17069_v46 = vld [vmem:[#allocation169_spill] sm:$0xff] }
 0x1f0   : > { %v8846_v58 = vpop.f32.mrf.mxu0  ;;  %3648 = vmatmul.mubr.f32.gmra.mxu0 %v17061_v16  ;;  %v8921_v35 = vpop.f32.mrf.mxu1  ;;  %9530 = vmatprep.subr.mxu1 %v17062_v41 }
 0x1f1   : > { %17059 = vst [vmem:[#allocation139_spill] sm:$0xff] %v13229_v52  ;;  %v1889_v15 = vadd.f32 %v8845_v59, %v13053_v0  ;;  %v8922_v27 = vadd.f32 %v8921_v35, %v8920_v49  ;;  %3653 = vmatprep.mubr.f32.mxu0 %v17063_v21  ;;  %9451 = vmatpush3.msra.mxu0 %v17064_v39  ;;  %v17067_v0 = vld [vmem:[#allocation167_spill] sm:$0xff]  ;;  %v17068_v59 = vld [vmem:[#allocation62_spill] sm:$0xff] }
 0x1f2   : > { %v8847_v1 = vpop.f32.mrf.mxu0  ;;  %v8923_v26 = vpop.f32.mrf.mxu1  ;;  %3850 = vmatmul.mubr.f32.gmra.mxu1 %v17054_v36  ;;  %9452 = vmatprep.subr.mxu0 %v16976_v43 }
 0x1f3   : > { %v8848_v45 = vadd.f32 %v8847_v1, %v8846_v58  ;;  %v13240_v33 = vadd.f32 %v8922_v27, %v1882_v48  ;;  %3855 = vmatprep.mubr.f32.mxu1 %v17056_v30  ;;  %9531 = vmatpush3.msra.mxu1 %v17066_v2  ;;  %v17071_v48 = vld [vmem:[#allocation65_spill] sm:$0xff]  ;;  %v17103_v2 = vld [vmem:[#allocation110_spill] sm:$0xff] }
 0x1f4   : > { %v8849_v41 = vpop.f32.mrf.mxu0  ;;  %3655 = vmatmul.mubr.f32.gmra.mxu0 %v17067_v0  ;;  %v8924_v49 = vpop.f32.mrf.mxu1  ;;  %9532 = vmatprep.subr.mxu1 %v17068_v59 }
 0x1f5   : > { %17065 = vst [vmem:[#allocation6_spill] sm:$0xff] %v13240_v33  ;;  %v1896_v35 = vadd.f32 %v8848_v45, %v13066_v11  ;;  %v8925_v52 = vadd.f32 %v8924_v49, %v8923_v26  ;;  %3660 = vmatprep.mubr.f32.mxu0 %v17069_v46  ;;  %9453 = vmatpush3.msra.mxu0 %v11283_v38  ;;  %v17072_v11 = vld [vmem:[#allocation112_spill] sm:$0xff] }
 0x1f6   : > { %v8850_v36 = vpop.f32.mrf.mxu0  ;;  %v8926_v27 = vpop.f32.mrf.mxu1  ;;  %3857 = vmatmul.mubr.f32.gmra.mxu1 %v17061_v16  ;;  %9454 = vmatprep.subr.mxu0 %v11289_v40  ;;  %v17073_v45 = vld [vmem:[#allocation68_spill] sm:$0xff] }
 0x1f7   : > { %v8851_v30 = vadd.f32 %v8850_v36, %v8849_v41  ;;  %v13251_v58 = vadd.f32 %v8925_v52, %v1889_v15  ;;  %3862 = vmatprep.mubr.f32.mxu1 %v17063_v21  ;;  %9533 = vmatpush3.msra.mxu1 %v17071_v48  ;;  %v17074_v33 = vld [vmem:[#allocation128_spill] sm:$0xff]  ;;  %v17080_v48 = vld [vmem:[#allocation143_spill] sm:$0xff] }
 0x1f8   : > { %v8852_v1 = vpop.f32.mrf.mxu0  ;;  %3662 = vmatmul.mubr.f32.gmra.mxu0 %v17072_v11  ;;  %v8927_v26 = vpop.f32.mrf.mxu1  ;;  %9534 = vmatprep.subr.mxu1 %v17073_v45  ;;  %v17075_v21 = vld [vmem:[#allocation24_spill] sm:$0xff] }
 0x1f9   : > { %17070 = vst [vmem:[#allocation146_spill] sm:$0xff] %v13251_v58  ;;  %v1903_v49 = vadd.f32 %v8851_v30, %v13079_v42  ;;  %v8928_v59 = vadd.f32 %v8927_v26, %v8926_v27  ;;  %3667 = vmatprep.mubr.f32.mxu0 %v17074_v33  ;;  %9455 = vmatpush3.msra.mxu0 %v11302_v44  ;;  %v17077_v36 = vld [vmem:[#allocation72_spill] sm:$0xff]  ;;  %v17078_v42 = vld [vmem:[#allocation135_spill] sm:$0xff]  ;;  %v17079_v30 = vld [vmem:[#allocation78_spill] sm:$0xff] }
 0x1fa   : > { %v8853_v16 = vpop.f32.mrf.mxu0  ;;  %v8929_v52 = vpop.f32.mrf.mxu1  ;;  %3864 = vmatmul.mubr.f32.gmra.mxu1 %v17067_v0  ;;  %9456 = vmatprep.subr.mxu0 %v17075_v21  ;;  %v17081_v0 = vld [vmem:[#allocation29_spill] sm:$0xff] }
 0x1fb   : > { %v8854_v41 = vadd.f32 %v8853_v16, %v8852_v1  ;;  %v13262_v15 = vadd.f32 %v8928_v59, %v1896_v35  ;;  %3869 = vmatprep.mubr.f32.mxu1 %v17069_v46  ;;  %9535 = vmatpush3.msra.mxu1 %v17077_v36  ;;  %v17083_v16 = vld [vmem:[#allocation82_spill] sm:$0xff]  ;;  %v17086_v36 = vld [vmem:[#allocation152_spill] sm:$0xff] }
 0x1fc   : > { %v8855_v45 = vpop.f32.mrf.mxu0  ;;  %3669 = vmatmul.mubr.f32.gmra.mxu0 %v17078_v42  ;;  %v8930_v27 = vpop.f32.mrf.mxu1  ;;  %9536 = vmatprep.subr.mxu1 %v17079_v30 }
 0x1fd   : > { %17076 = vst [vmem:[#allocation150_spill] sm:$0xff] %v13262_v15  ;;  %v1910_v26 = vadd.f32 %v8854_v41, %v13092_v9  ;;  %v8931_v58 = vadd.f32 %v8930_v27, %v8929_v52  ;;  %3674 = vmatprep.mubr.f32.mxu0 %v17080_v48  ;;  %9457 = vmatpush3.msra.mxu0 %v17081_v0  ;;  %v17084_v9 = vld [vmem:[#allocation145_spill] sm:$0xff]  ;;  %v17085_v41 = vld [vmem:[#allocation88_spill] sm:$0xff] }
 0x1fe   : > { %v8856_v1 = vpop.f32.mrf.mxu0  ;;  %v8932_v59 = vpop.f32.mrf.mxu1  ;;  %3871 = vmatmul.mubr.f32.gmra.mxu1 %v17072_v11  ;;  %9458 = vmatprep.subr.mxu0 %v16996_v22  ;;  %v17087_v11 = vld [vmem:[#allocation38_spill] sm:$0xff] }
 0x1ff   : > { %v8857_v46 = vadd.f32 %v8856_v1, %v8855_v45  ;;  %v13273_v35 = vadd.f32 %v8931_v58, %v1903_v49  ;;  %3876 = vmatprep.mubr.f32.mxu1 %v17074_v33  ;;  %9537 = vmatpush3.msra.mxu1 %v17083_v16  ;;  %v17089_v1 = vld [vmem:[#allocation91_spill] sm:$0xff]  ;;  %v17097_v16 = vld [vmem:[#allocation161_spill] sm:$0xff] }
 0x200   : > { %v8858_v30 = vpop.f32.mrf.mxu0  ;;  %3676 = vmatmul.mubr.f32.gmra.mxu0 %v17084_v9  ;;  %v8933_v52 = vpop.f32.mrf.mxu1  ;;  %9538 = vmatprep.subr.mxu1 %v17085_v41 }
 0x201   : > { %17082 = vst [vmem:[#allocation151_spill] sm:$0xff] %v13273_v35  ;;  %v1917_v27 = vadd.f32 %v8857_v46, %v13105_v7  ;;  %v8934_v15 = vadd.f32 %v8933_v52, %v8932_v59  ;;  %3681 = vmatprep.mubr.f32.mxu0 %v17086_v36  ;;  %9459 = vmatpush3.msra.mxu0 %v17087_v11  ;;  %v17090_v59 = vld [vmem:[#allocation155_spill] sm:$0xff]  ;;  %v17091_v52 = vld [vmem:[#allocation94_spill] sm:$0xff] }
 0x202   : > { %v8859_v45 = vpop.f32.mrf.mxu0  ;;  %v8935_v58 = vpop.f32.mrf.mxu1  ;;  %3878 = vmatmul.mubr.f32.gmra.mxu1 %v17078_v42  ;;  %9460 = vmatprep.subr.mxu0 %v17003_v25  ;;  %v17092_v35 = vld [vmem:[#allocation158_spill] sm:$0xff] }
 0x203   : > { %v8860_v33 = vadd.f32 %v8859_v45, %v8858_v30  ;;  %v13284_v49 = vadd.f32 %v8934_v15, %v1910_v26  ;;  %3883 = vmatprep.mubr.f32.mxu1 %v17080_v48  ;;  %9539 = vmatpush3.msra.mxu1 %v17089_v1  ;;  %v8343_v48 = vld [vmem:[%s11662_s17 + $0x208] sm:$0xff] }
 0x204   : > { %v8861_v7 = vpop.f32.mrf.mxu0  ;;  %3683 = vmatmul.mubr.f32.gmra.mxu0 %v17090_v59  ;;  %v8936_v46 = vpop.f32.mrf.mxu1  ;;  %9540 = vmatprep.subr.mxu1 %v17091_v52  ;;  %v17094_v52 = vld [vmem:[#allocation97_spill] sm:$0xff] }
 0x205   : > { %17088 = vst [vmem:[#allocation153_spill] sm:$0xff] %v13284_v49  ;;  %v1924_v41 = vadd.f32 %v8860_v33, %v13118_v13  ;;  %v8937_v42 = vadd.f32 %v8936_v46, %v8935_v58  ;;  %3688 = vmatprep.mubr.f32.mxu0 %v17092_v35  ;;  %9461 = vmatpush3.msra.mxu0 %v16650_v54  ;;  %v8342_v13 = vld [vmem:[%s11662_s17 + $0x200] sm:$0xff]  ;;  %v17095_v33 = vld [vmem:[#allocation159_spill] sm:$0xff]  ;;  %v17096_v49 = vld [vmem:[#allocation100_spill] sm:$0xff] }
 0x206   : > { %v8862_v15 = vpop.f32.mrf.mxu0  ;;  %v8938_v30 = vpop.f32.mrf.mxu1  ;;  %3885 = vmatmul.mubr.f32.gmra.mxu1 %v17084_v9  ;;  %9462 = vmatprep.subr.mxu0 %v16653_v28 }
 0x207   : > { %v8863_v26 = vadd.f32 %v8862_v15, %v8861_v7  ;;  %v13296_v45 = vadd.f32 %v8937_v42, %v1917_v27  ;;  %3890 = vmatprep.mubr.f32.mxu1 %v17086_v36  ;;  %9541 = vmatpush3.msra.mxu1 %v17094_v52  ;;  %v13306_v27 = vand.u32 4294901760, %v8343_v48  ;;  %v8345_v36 = vld [vmem:[%s11662_s17 + $0x218] sm:$0xff]  ;;  %v13311_v15 = vand.u32 4294901760, %v8342_v13 }
 0x208   : > { %v8864_v58 = vpop.f32.mrf.mxu0  ;;  %3690 = vmatmul.mubr.f32.gmra.mxu0 %v17095_v33  ;;  %v8939_v46 = vpop.f32.mrf.mxu1  ;;  %9542 = vmatprep.subr.mxu1 %v17096_v49  ;;  %v13320_v23 = vand.u32 4294901760, %v8345_v36 }
 0x209   : > { %17093 = vst [vmem:[#allocation163_spill] sm:$0xff] %v13296_v45  ;;  %v1931_v9 = vadd.f32 %v8863_v26, %v13131_v53  ;;  %v8940_v1 = vadd.f32 %v8939_v46, %v8938_v30  ;;  %3695 = vmatprep.mubr.f32.mxu0 %v17097_v16  ;;  %9463 = vmatpush3.msra.mxu0 %v16655_v8  ;;  %17098 = vst [vmem:[#allocation165_spill] sm:$0xff] %v13306_v27  ;;  %v17101_v53 = vld [vmem:[#allocation104_spill] sm:$0xff]  ;;  %v8344_v30 = vld [vmem:[%s11662_s17 + $0x210] sm:$0xff] }
 0x20a   : > { %v8865_v7 = vpop.f32.mrf.mxu0  ;;  %v8941_v42 = vpop.f32.mrf.mxu1  ;;  %3892 = vmatmul.mubr.f32.gmra.mxu1 %v17090_v59  ;;  %9464 = vmatprep.subr.mxu0 %v16658_v47  ;;  %17099 = vst [vmem:[#allocation168_spill] sm:$0xff] %v13311_v15  ;;  %v17102_v46 = vld [vmem:[#allocation172_spill] sm:$0xff]  ;;  %17104 = vst [vmem:[#allocation102_spill] sm:$0xff] %v13320_v23  ;;  %v8347_v59 = vld [vmem:[%s11662_s17 + $0x228] sm:$0xff] }
 0x20b   : > { %v8866_v49 = vadd.f32 %v8865_v7, %v8864_v58  ;;  %v13313_v45 = vadd.f32 %v8940_v1, %v1924_v41  ;;  %3897 = vmatprep.mubr.f32.mxu1 %v17092_v35  ;;  %9543 = vmatpush3.msra.mxu1 %v17101_v53  ;;  %v17105_v58 = vld [vmem:[#allocation174_spill] sm:$0xff]  ;;  %v13327_v35 = vsub.f32 %v8343_v48, %v13306_v27  ;;  %v13340_v48 = vand.u32 4294901760, %v8347_v59  ;;  %v17113_v53 = vld [vmem:[#allocation117_spill] sm:$0xff] }
 0x20c   : > { %v8867_v26 = vpop.f32.mrf.mxu0  ;;  %3697 = vmatmul.mubr.f32.gmra.mxu0 %v17102_v46  ;;  %v8942_v52 = vpop.f32.mrf.mxu1  ;;  %9544 = vmatprep.subr.mxu1 %v17103_v2  ;;  %v13332_v7 = vsub.f32 %v8342_v13, %v13311_v15  ;;  %v13334_v2 = vand.u32 4294901760, %v8344_v30  ;;  %v13345_v13 = vsub.f32 %v8345_v36, %v13320_v23 }
 0x20d   : > { %17100 = vst [vmem:[#allocation96_spill] sm:$0xff] %v13313_v45  ;;  %v1938_v20 = vadd.f32 %v8866_v49, %v13144_v5  ;;  %v8943_v14 = vadd.f32 %v8942_v52, %v8941_v42  ;;  %3702 = vmatprep.mubr.f32.mxu0 %v17105_v58  ;;  %9465 = vmatpush3.msra.mxu0 %v11528_v60  ;;  %17106 = vst [vmem:[#allocation120_spill] sm:$0xff] %v13327_v35  ;;  %v17110_v52 = vld [vmem:[#allocation114_spill] sm:$0xff]  ;;  %v17112_v45 = vld [vmem:[#allocation176_spill] sm:$0xff] }
 0x20e   : > { %v8868_v41 = vpop.f32.mrf.mxu0  ;;  %v8944_v1 = vpop.f32.mrf.mxu1  ;;  %3899 = vmatmul.mubr.f32.gmra.mxu1 %v17095_v33  ;;  %9466 = vmatprep.subr.mxu0 %v16662_v3  ;;  %17107 = vst [vmem:[#allocation134_spill] sm:$0xff] %v13332_v7  ;;  %17108 = vst [vmem:[#allocation142_spill] sm:$0xff] %v13334_v2  ;;  %v8346_v3 = vld [vmem:[%s11662_s17 + $0x220] sm:$0xff] }
 0x20f   : > { %v8869_v5 = vadd.f32 %v8868_v41, %v8867_v26  ;;  %v13336_v49 = vadd.f32 %v8943_v14, %v1931_v9  ;;  %3904 = vmatprep.mubr.f32.mxu1 %v17097_v16  ;;  %9545 = vmatpush3.msra.mxu1 %v17110_v52  ;;  %17111 = vst [vmem:[#allocation148_spill] sm:$0xff] %v13340_v48  ;;  %17114 = vst [vmem:[#allocation154_spill] sm:$0xff] %v13345_v13  ;;  %v17115_v9 = vld [vmem:[#allocation178_spill] sm:$0xff]  ;;  %v8349_v41 = vld [vmem:[%s11662_s17 + $0x238] sm:$0xff]  ;;  %v13366_v16 = vand.u32 4294901760, %v8346_v3 }
 0x210   : > { %v8870_v42 = vpop.f32.mrf.mxu0  ;;  %3704 = vmatmul.mubr.f32.gmra.mxu0 %v17112_v45  ;;  %v8945_v33 = vpop.f32.mrf.mxu1  ;;  %9546 = vmatprep.subr.mxu1 %v17113_v53  ;;  %v13357_v53 = vsub.f32 %v8344_v30, %v13334_v2  ;;  %v13371_v30 = vand.u32 4294901760, %v8349_v41 }
 0x211   : > { %17109 = vst [vmem:[#allocation144_spill] sm:$0xff] %v13336_v49  ;;  %v1945_v26 = vadd.f32 %v8869_v5, %v13157_v57  ;;  %v8946_v14 = vadd.f32 %v8945_v33, %v8944_v1  ;;  %3709 = vmatprep.mubr.f32.mxu0 %v17115_v9  ;;  %9467 = vmatpush3.msra.mxu0 %v16926_v4  ;;  %v17118_v5 = vld [vmem:[#allocation118_spill] sm:$0xff]  ;;  %17120 = vst [vmem:[#allocation171_spill] sm:$0xff] %v13366_v16  ;;  %v17122_v4 = vld [vmem:[#allocation121_spill] sm:$0xff] }
 0x212   : > { %v8871_v49 = vpop.f32.mrf.mxu0  ;;  %v8947_v52 = vpop.f32.mrf.mxu1  ;;  %3906 = vmatmul.mubr.f32.gmra.mxu1 %v17102_v46  ;;  %9468 = vmatprep.subr.mxu0 %v16928_v37  ;;  %17116 = vst [vmem:[#allocation157_spill] sm:$0xff] %v13357_v53  ;;  %v13364_v33 = vsub.f32 %v8347_v59, %v13340_v48  ;;  %v17121_v37 = vld [vmem:[#allocation179_spill] sm:$0xff]  ;;  %17123 = vst [vmem:[#allocation173_spill] sm:$0xff] %v13371_v30  ;;  %v17125_v59 = vand.u32 4294901760, %v13327_v35 }
 0x213   : > { %v8872_v57 = vadd.f32 %v8871_v49, %v8870_v42  ;;  %v13359_v1 = vadd.f32 %v8946_v14, %v1938_v20  ;;  %3911 = vmatprep.mubr.f32.mxu1 %v17105_v58  ;;  %9547 = vmatpush3.msra.mxu1 %v17118_v5  ;;  %v17124_v42 = vld [vmem:[#allocation180_spill] sm:$0xff]  ;;  %v17126_v20 = vand.u32 4294901760, %v13332_v7 }
 0x214   : > { %17119 = vst [vmem:[#allocation170_spill] sm:$0xff] %v13364_v33  ;;  %v8873_v46 = vpop.f32.mrf.mxu0  ;;  %3711 = vmatmul.mubr.f32.gmra.mxu0 %v17121_v37  ;;  %v8948_v36 = vpop.f32.mrf.mxu1  ;;  %9548 = vmatprep.subr.mxu1 %v17122_v4  ;;  %v4090_v14 = vsub.f32 %v13327_v35, %v17125_v59  ;;  %v13395_v59 = vsub.f32 %v8346_v3, %v13366_v16 }
 0x215   : > { %17117 = vst [vmem:[#allocation160_spill] sm:$0xff] %v13359_v1  ;;  %v1952_v58 = vadd.f32 %v8872_v57, %v13170_v63  ;;  %v8949_v49 = vadd.f32 %v8948_v36, %v8947_v52  ;;  %3716 = vmatprep.mubr.f32.mxu0 %v17124_v42  ;;  %9469 = vmatpush3.msra.mxu0 %v16932_v10  ;;  %v8348_v1 = vld [vmem:[%s11662_s17 + $0x230] sm:$0xff]  ;;  %v8351_v36 = vld [vmem:[%s11662_s17 + $0x248] sm:$0xff] }
 0x216   : > { %v8874_v5 = vpop.f32.mrf.mxu0  ;;  %v8950_v60 = vpop.f32.mrf.mxu1  ;;  %3913 = vmatmul.mubr.f32.gmra.mxu1 %v17112_v45  ;;  %9470 = vmatprep.subr.mxu0 %v16935_v6  ;;  %v13385_v63 = vsub.f32 %v13332_v7, %v17126_v20  ;;  %17128 = vst [vmem:[#allocation177_spill] sm:$0xff] %v13395_v59  ;;  %v17129_v6 = vld [vmem:[#allocation181_spill] sm:$0xff]  ;;  %v17130_v7 = vld [vmem:[#allocation130_spill] sm:$0xff]  ;;  %v4091_v52 = vand.u32 4294901760, %v4090_v14 }
 0x217   : > { %v8875_v57 = vadd.f32 %v8874_v5, %v8873_v46  ;;  %v13389_v4 = vadd.f32 %v8949_v49, %v1945_v26  ;;  %3918 = vmatprep.mubr.f32.mxu1 %v17115_v9  ;;  %9471 = vmatpush3.msra.mxu0 %v16936_v51  ;;  %v17131_v5 = vand.u32 4294901760, %v13345_v13  ;;  %v13403_v9 = vsub.f32 %v8349_v41, %v13371_v30  ;;  %v17134_v45 = vld [vmem:[#allocation182_spill] sm:$0xff] }
 0x218   : > { %v8876_v35 = vpop.f32.mrf.mxu0  ;;  %3718 = vmatmul.mubr.f32.gmra.mxu0 %v17129_v6  ;;  %v8951_v20 = vpop.f32.mrf.mxu1  ;;  %9549 = vmatpush3.msra.mxu1 %v17130_v7  ;;  %v13405_v46 = vand.u32 4294901760, %v8348_v1  ;;  %v13410_v7 = vand.u32 4294901760, %v8351_v36  ;;  %v4097_v41 = vand.u32 4294901760, %v13385_v63  ;;  %v17144_v63 = vld [vmem:[#allocation138_spill] sm:$0xff] }
 0x219   : > { %17127 = vst [vmem:[#allocation175_spill] sm:$0xff] %v13389_v4  ;;  %v4105_v26 = vsub.f32 %v13345_v13, %v17131_v5  ;;  %17132 = vst [vmem:[#allocation101_spill] sm:$0xff] %v13403_v9  ;;  %v1959_v49 = vadd.f32 %v8875_v57, %v13183_v62  ;;  %v8952_v3 = vadd.f32 %v8951_v20, %v8950_v60  ;;  %3723 = vmatprep.mubr.f32.mxu0 %v17134_v45  ;;  %v8350_v4 = vld [vmem:[%s11662_s17 + $0x240] sm:$0xff]  ;;  %v8353_v57 = vld [vmem:[%s11662_s17 + $0x258] sm:$0xff] }
 0x21a   : > { %17133 = vst [vmem:[#allocation107_spill] sm:$0xff] %v13405_v46  ;;  %9472 = vmatprep.subr.mxu0 %v16938_v61  ;;  %17135 = vst [vmem:[#allocation124_spill] sm:$0xff] %v13410_v7  ;;  %v8877_v51 = vpop.f32.mrf.mxu0  ;;  %v8953_v5 = vpop.f32.mrf.mxu1  ;;  %3920 = vmatmul.mubr.f32.gmra.mxu1 %v17121_v37  ;;  %v17136_v62 = vand.u32 4294901760, %v13357_v53  ;;  %v17138_v13 = vld [vmem:[#allocation136_spill] sm:$0xff]  ;;  %v17139_v61 = vand.u32 4294901760, %v13364_v33 }
 0x21b   : > { %9473 = vmatpush3.msra.mxu0 %v17038_v50  ;;  %v8878_v20 = vadd.f32 %v8877_v51, %v8876_v35  ;;  %v13422_v14 = vadd.f32 %v8952_v3, %v1952_v58  ;;  %3925 = vmatprep.mubr.f32.mxu1 %v17124_v42  ;;  %v8352_v50 = vld [vmem:[%s11662_s17 + $0x250] sm:$0xff]  ;;  %v17141_v51 = vld [vmem:[#allocation137_spill] sm:$0xff]  ;;  %v4106_v35 = vand.u32 4294901760, %v4105_v26  ;;  %v13437_v42 = vsub.f32 %v8348_v1, %v13405_v46  ;;  %v17146_v58 = vld [vmem:[#allocation10_spill] sm:$0xff] }
 0x21c   : > { %v13419_v60 = vsub.f32 %v13357_v53, %v17136_v62  ;;  %9550 = vmatprep.subr.mxu1 %v17138_v13  ;;  %v13429_v37 = vsub.f32 %v13364_v33, %v17139_v61  ;;  %v8879_v10 = vpop.f32.mrf.mxu0  ;;  %v17140_v62 = vld [vmem:[#allocation183_spill] sm:$0xff]  ;;  %v8954_v53 = vpop.f32.mrf.mxu1  ;;  %v13439_v3 = vand.u32 4294901760, %v8350_v4  ;;  %v13446_v33 = vand.u32 4294901760, %v8353_v57  ;;  %9602 = vmatprep.subr.mxu0 %v17146_v58 }
 0x21d   : > { %17137 = vst [vmem:[#allocation132_spill] sm:$0xff] %v13422_v14  ;;  %3725 = vmatmul.mubr.f32.gmra.mxu0 %v17140_v62  ;;  %9551 = vmatpush3.msra.mxu1 %v17141_v51  ;;  %17142 = vst [vmem:[#allocation140_spill] sm:$0xff] %v13437_v42  ;;  %v1966_v61 = vadd.f32 %v8878_v20, %v13196_v34  ;;  %v8955_v13 = vadd.f32 %v8954_v53, %v8953_v5  ;;  %v8355_v51 = vld [vmem:[%s11662_s17 + $0x268] sm:$0xff]  ;;  %v13452_v34 = vand.u32 4294901760, %v8352_v50 }
 0x21e   : > { %17143 = vst [vmem:[#allocation7_spill] sm:$0xff] %v13439_v3  ;;  %4092 = vmatprep.mubr.f32.mxu0 %v4091_v52  ;;  %9552 = vmatprep.subr.mxu1 %v17144_v63  ;;  %v13444_v14 = vsub.f32 %v8351_v36, %v13410_v7  ;;  %17145 = vst [vmem:[#allocation147_spill] sm:$0xff] %v13446_v33  ;;  %v8880_v26 = vpop.f32.mrf.mxu0  ;;  %v8956_v47 = vpop.f32.mrf.mxu1  ;;  %v4112_v1 = vand.u32 4294901760, %v13419_v60  ;;  %v17149_v36 = vld [vmem:[#allocation141_spill] sm:$0xff]  ;;  %v4121_v5 = vand.u32 4294901760, %v13429_v37  ;;  %v17150_v20 = vand.u32 4294901760, %v13395_v59 }
 0x21f   : > { %3927 = vmatmul.mubr.f32.gmra.mxu1 %v17129_v6  ;;  %17147 = vst [vmem:[#allocation149_spill] sm:$0xff] %v13452_v34  ;;  %v8881_v53 = vadd.f32 %v8880_v26, %v8879_v10  ;;  %v13454_v52 = vadd.f32 %v8955_v13, %v1959_v49  ;;  %v17151_v10 = vand.u32 4294901760, %v13403_v9  ;;  %v13468_v49 = vsub.f32 %v8350_v4, %v13439_v3  ;;  %v8354_v26 = vld [vmem:[%s11662_s17 + $0x260] sm:$0xff]  ;;  %v17156_v4 = vld [vmem:[#allocation14_spill] sm:$0xff] }
 0x220   : > { %3932 = vmatprep.mubr.f32.mxu1 %v17134_v45  ;;  %9553 = vmatpush3.msra.mxu1 %v17149_v36  ;;  %v4126_v6 = vsub.f32 %v13395_v59, %v17150_v20  ;;  %v8994_v60 = vpop.f32.mrf.mxu0  ;;  %v8957_v58 = vpop.f32.mrf.mxu1  ;;  %v13470_v37 = vand.u32 4294901760, %v8355_v51  ;;  %v13477_v63 = vsub.f32 %v8353_v57, %v13446_v33  ;;  %v13483_v59 = vsub.f32 %v8352_v50, %v13452_v34 }
 0x221   : > { %17148 = vst [vmem:[#allocation156_spill] sm:$0xff] %v13454_v52  ;;  %4098 = vmatmul.mubr.f32.vlgmr.msra.gmra.mxu0 %v4097_v41  ;;  %9682 = vmatprep.subr.mxu1 %v17036_v55  ;;  %v4135_v13 = vsub.f32 %v13403_v9, %v17151_v10  ;;  %17152 = vst [vmem:[#allocation162_spill] sm:$0xff] %v13468_v49  ;;  %v1973_v20 = vadd.f32 %v8881_v53, %v13207_v32  ;;  %v17154_v41 = vld [vmem:[#allocation12_spill] sm:$0xff]  ;;  %v13489_v57 = vand.u32 4294901760, %v8354_v26 }
 0x222   : > { %17153 = vst [vmem:[#allocation164_spill] sm:$0xff] %v13470_v37  ;;  %v8958_v36 = vadd.f32 %v8957_v58, %v8956_v47  ;;  %4107 = vmatprep.mubr.f32.mxu0 %v4106_v35  ;;  %9603 = vmatpush3.msra.mxu0 %v17154_v41  ;;  %17155 = vst [vmem:[#allocation166_spill] sm:$0xff] %v13477_v63  ;;  %v8357_v10 = vld [vmem:[%s11662_s17 + $0x278] sm:$0xff]  ;;  %v8995_v9 = vpop.f32.mrf.mxu0  ;;  %v8959_v45 = vpop.f32.mrf.mxu1  ;;  %v4127_v35 = vand.u32 4294901760, %v4126_v6  ;;  %v17159_v58 = vld [vmem:[#allocation17_spill] sm:$0xff] }
 0x223   : > { %3934 = vmatmul.mubr.f32.gmra.mxu1 %v17140_v62  ;;  %9604 = vmatprep.subr.mxu0 %v17156_v4  ;;  %17157 = vst [vmem:[#allocation167_spill] sm:$0xff] %v13483_v59  ;;  %v8996_v32 = vadd.f32 %v8995_v9, %v8994_v60  ;;  %17160 = vst [vmem:[#allocation112_spill] sm:$0xff] %v13489_v57  ;;  %v17161_v62 = vand.u32 4294901760, %v13437_v42  ;;  %v17162_v41 = vld [vmem:[#allocation21_spill] sm:$0xff]  ;;  %v13497_v9 = vsub.f32 %v8355_v51, %v13470_v37  ;;  %v17167_v51 = vld [vmem:[#allocation26_spill] sm:$0xff] }
 0x224   : > { %v13485_v47 = vadd.f32 %v8958_v36, %v1966_v61  ;;  %4553 = vmatprep.mubr.f32.mxu1 %v13306_v27  ;;  %9605 = vmatpush3.msra.mxu0 %v17159_v58  ;;  %v8997_v53 = vpop.f32.mrf.mxu0  ;;  %v8960_v52 = vpop.f32.mrf.mxu1  ;;  %v13499_v61 = vand.u32 4294901760, %v8357_v10  ;;  %v8356_v36 = vld [vmem:[%s11662_s17 + $0x270] sm:$0xff]  ;;  %v4136_v60 = vand.u32 4294901760, %v4135_v13  ;;  %v13516_v13 = vsub.f32 %v8354_v26, %v13489_v57 }
 0x225   : > { %4113 = vmatmul.mubr.f32.gmra.mxu0 %v4112_v1  ;;  %v4141_v4 = vsub.f32 %v13437_v42, %v17161_v62  ;;  %9606 = vmatprep.subr.mxu0 %v17162_v41  ;;  %17163 = vst [vmem:[#allocation128_spill] sm:$0xff] %v13497_v9  ;;  %v8961_v6 = vadd.f32 %v8960_v52, %v8959_v45  ;;  %v17165_v1 = vand.u32 4294901760, %v13444_v14  ;;  %v8359_v42 = vld [vmem:[%s11662_s17 + $0x288] sm:$0xff]  ;;  %v13518_v45 = vand.u32 4294901760, %v8356_v36 }
 0x226   : > { %17158 = vst [vmem:[#allocation169_spill] sm:$0xff] %v13485_v47  ;;  %17164 = vst [vmem:[#allocation24_spill] sm:$0xff] %v13499_v61  ;;  %4122 = vmatprep.mubr.f32.mxu0 %v4121_v5  ;;  %v17166_v47 = vld [vmem:[#allocation23_spill] sm:$0xff]  ;;  %v8998_v41 = vpop.f32.mrf.mxu0  ;;  %v9074_v27 = vpop.f32.mrf.mxu1 }
 0x227   : > { %v4150_v58 = vsub.f32 %v13444_v14, %v17165_v1  ;;  %9607 = vmatpush3.msra.mxu0 %v17166_v47  ;;  %4555 = vmatmul.mubr.f32.vlgmr.msra.gmra.mxu1 %v13311_v15  ;;  %v13511_v52 = vadd.f32 %v8961_v6, %v1973_v20  ;;  %v8999_v5 = vadd.f32 %v8998_v41, %v8997_v53  ;;  %v17171_v20 = vand.u32 4294901760, %v13468_v49  ;;  %v8358_v47 = vld [vmem:[%s11662_s17 + $0x280] sm:$0xff] }
 0x228   : > { %9608 = vmatprep.subr.mxu0 %v17167_v51  ;;  %9683 = vmatpush3.msra.mxu1 %v11197_v12  ;;  %17169 = vst [vmem:[#allocation143_spill] sm:$0xff] %v13516_v13  ;;  %17170 = vst [vmem:[#allocation145_spill] sm:$0xff] %v13518_v45  ;;  %v9000_v1 = vpop.f32.mrf.mxu0  ;;  %v9075_v62 = vpop.f32.mrf.mxu1  ;;  %v4142_v51 = vand.u32 4294901760, %v4141_v4  ;;  %v13526_v6 = vsub.f32 %v8357_v10, %v13499_v61  ;;  %v17175_v10 = vand.u32 4294901760, %v13483_v59 }
 0x229   : > { %17168 = vst [vmem:[#allocation135_spill] sm:$0xff] %v13511_v52  ;;  %4560 = vmatprep.mubr.f32.mxu1 %v13320_v23  ;;  %4128 = vmatmul.mubr.f32.gmra.mxu0 %v4127_v35  ;;  %v4156_v41 = vsub.f32 %v13468_v49, %v17171_v20  ;;  %v9076_v26 = vadd.f32 %v9075_v62, %v9074_v27  ;;  %v4151_v50 = vand.u32 4294901760, %v4150_v58  ;;  %v17173_v35 = vand.u32 4294901760, %v13477_v63 }
 0x22a   : > { %9684 = vmatprep.subr.mxu1 %v16687_v56  ;;  %17172 = vst [vmem:[#allocation152_spill] sm:$0xff] %v13526_v6  ;;  %4137 = vmatprep.mubr.f32.mxu0 %v4136_v60  ;;  %v13532_v52 = vand.u32 4294901760, %v8359_v42  ;;  %v9001_v23 = vpop.f32.mrf.mxu0  ;;  %v9077_v15 = vpop.f32.mrf.mxu1  ;;  %v13540_v27 = vsub.f32 %v13483_v59, %v17175_v10  ;;  %v8361_v60 = vld [vmem:[%s11662_s17 + $0x298] sm:$0xff] }
 0x22b   : > { %9685 = vmatpush3.msra.mxu1 %v11210_v17  ;;  %v4165_v4 = vsub.f32 %v13477_v63, %v17173_v35  ;;  %v9002_v58 = vadd.f32 %v9001_v23, %v9000_v1  ;;  %v13543_v62 = vadd.f32 %v9076_v26, %v8996_v32  ;;  %v13549_v35 = vsub.f32 %v8356_v36, %v13518_v45  ;;  %v17179_v36 = vld [vmem:[#allocation34_spill] sm:$0xff]  ;;  %v17182_v1 = vld [vmem:[#allocation37_spill] sm:$0xff] }
 0x22c   : > { %17174 = vst [vmem:[#allocation155_spill] sm:$0xff] %v13532_v52  ;;  %4562 = vmatmul.mubr.f32.gmra.mxu1 %v13334_v2  ;;  %9686 = vmatprep.subr.mxu1 %v11212_v18  ;;  %v9003_v53 = vpop.f32.mrf.mxu0  ;;  %v9078_v2 = vpop.f32.mrf.mxu1  ;;  %v4157_v63 = vand.u32 4294901760, %v4156_v41  ;;  %v17177_v23 = vand.u32 4294901760, %v13497_v9  ;;  %v13556_v26 = vand.u32 4294901760, %v8358_v47  ;;  %v13562_v41 = vand.u32 4294901760, %v8361_v60 }
 0x22d   : > { %4567 = vmatprep.mubr.f32.mxu1 %v13340_v48  ;;  %9687 = vmatpush3.msra.mxu1 %v11214_v19  ;;  %17176 = vst [vmem:[#allocation158_spill] sm:$0xff] %v13549_v35  ;;  %v9079_v10 = vadd.f32 %v9078_v2, %v9077_v15  ;;  %v4166_v20 = vand.u32 4294901760, %v4165_v4  ;;  %v8360_v48 = vld [vmem:[%s11662_s17 + $0x290] sm:$0xff]  ;;  %v8363_v2 = vld [vmem:[%s11662_s17 + $0x2a8] sm:$0xff] }
 0x22e   : > { %4143 = vmatmul.mubr.f32.gmra.mxu0 %v4142_v51  ;;  %9688 = vmatprep.subr.mxu1 %v17045_v29  ;;  %v4180_v32 = vsub.f32 %v13497_v9, %v17177_v23  ;;  %17178 = vst [vmem:[#allocation159_spill] sm:$0xff] %v13556_v26  ;;  %v13560_v51 = vsub.f32 %v8359_v42, %v13532_v52  ;;  %17181 = vst [vmem:[#allocation172_spill] sm:$0xff] %v13562_v41  ;;  %v9004_v59 = vpop.f32.mrf.mxu0  ;;  %v9080_v49 = vpop.f32.mrf.mxu1  ;;  %v4172_v23 = vand.u32 4294901760, %v13540_v27 }
 0x22f   : > { %4152 = vmatprep.mubr.f32.mxu0 %v4151_v50  ;;  %9609 = vmatpush3.msra.mxu0 %v17179_v36  ;;  %v9005_v15 = vadd.f32 %v9004_v59, %v9003_v53  ;;  %v13569_v50 = vadd.f32 %v9079_v10, %v8999_v5  ;;  %v17183_v42 = vand.u32 4294901760, %v13516_v13  ;;  %v17184_v59 = vand.u32 4294901760, %v13526_v6  ;;  %v17187_v36 = vld [vmem:[#allocation41_spill] sm:$0xff] }
 0x230   : > { %17180 = vst [vmem:[#allocation161_spill] sm:$0xff] %v13560_v51  ;;  %4569 = vmatmul.mubr.f32.gmra.mxu1 %v13366_v16  ;;  %9610 = vmatprep.subr.mxu0 %v17182_v1  ;;  %v8362_v16 = vld [vmem:[%s11662_s17 + $0x2a0] sm:$0xff]  ;;  %v9006_v9 = vpop.f32.mrf.mxu0  ;;  %v9081_v27 = vpop.f32.mrf.mxu1  ;;  %v4181_v1 = vand.u32 4294901760, %v4180_v32  ;;  %v13583_v53 = vsub.f32 %v8358_v47, %v13556_v26  ;;  %v13585_v10 = vand.u32 4294901760, %v8360_v48  ;;  %v13592_v32 = vand.u32 4294901760, %v8363_v2 }
 0x231   : > { %4574 = vmatprep.mubr.f32.mxu1 %v13371_v30  ;;  %9689 = vmatpush3.msra.mxu1 %v17057_v31  ;;  %v4186_v4 = vsub.f32 %v13516_v13, %v17183_v42  ;;  %v4195_v5 = vsub.f32 %v13526_v6, %v17184_v59  ;;  %v9082_v42 = vadd.f32 %v9081_v27, %v9080_v49  ;;  %v8365_v13 = vld [vmem:[%s11662_s17 + $0x2b8] sm:$0xff]  ;;  %v17190_v47 = vld [vmem:[#allocation45_spill] sm:$0xff]  ;;  %v13597_v59 = vand.u32 4294901760, %v8362_v16 }
 0x232   : > { %4158 = vmatmul.mubr.f32.gmra.mxu0 %v4157_v63  ;;  %9690 = vmatprep.subr.mxu1 %v17058_v24  ;;  %17185 = vst [vmem:[#allocation174_spill] sm:$0xff] %v13583_v53  ;;  %17186 = vst [vmem:[#allocation176_spill] sm:$0xff] %v13585_v10  ;;  %v13590_v63 = vsub.f32 %v8361_v60, %v13562_v41  ;;  %v9007_v24 = vpop.f32.mrf.mxu0  ;;  %v9083_v31 = vpop.f32.mrf.mxu1  ;;  %v17192_v60 = vand.u32 4294901760, %v13549_v35 }
 0x233   : > { %4167 = vmatprep.mubr.f32.mxu0 %v4166_v20  ;;  %9611 = vmatpush3.msra.mxu0 %v17187_v36  ;;  %17189 = vst [vmem:[#allocation179_spill] sm:$0xff] %v13592_v32  ;;  %17191 = vst [vmem:[#allocation180_spill] sm:$0xff] %v13597_v59  ;;  %v9008_v49 = vadd.f32 %v9007_v24, %v9006_v9  ;;  %v13599_v20 = vadd.f32 %v9082_v42, %v9002_v58  ;;  %v4187_v27 = vand.u32 4294901760, %v4186_v4  ;;  %v8364_v4 = vld [vmem:[%s11662_s17 + $0x2b0] sm:$0xff]  ;;  %v8367_v24 = vld [vmem:[%s11662_s17 + $0x2c8] sm:$0xff] }
 0x234   : > { %17188 = vst [vmem:[#allocation178_spill] sm:$0xff] %v13590_v63  ;;  %4576 = vmatmul.mubr.f32.gmra.mxu1 %v13405_v46  ;;  %9612 = vmatprep.subr.mxu0 %v17190_v47  ;;  %v4201_v30 = vsub.f32 %v13549_v35, %v17192_v60  ;;  %v9009_v36 = vpop.f32.mrf.mxu0  ;;  %v9084_v46 = vpop.f32.mrf.mxu1  ;;  %v4196_v47 = vand.u32 4294901760, %v4195_v5  ;;  %v13609_v9 = vsub.f32 %v8360_v48, %v13585_v10  ;;  %v13611_v58 = vand.u32 4294901760, %v8365_v13 }
 0x235   : > { %4581 = vmatprep.mubr.f32.mxu1 %v13410_v7  ;;  %9691 = vmatpush3.msra.mxu1 %v17064_v39  ;;  %v9085_v42 = vadd.f32 %v9084_v46, %v9083_v31  ;;  %v17195_v7 = vld [vmem:[#allocation48_spill] sm:$0xff]  ;;  %v17196_v60 = vand.u32 4294901760, %v13560_v51  ;;  %v13620_v35 = vsub.f32 %v8363_v2, %v13592_v32  ;;  %v13626_v31 = vsub.f32 %v8362_v16, %v13597_v59 }
 0x236   : > { %4173 = vmatmul.mubr.f32.gmra.mxu0 %v4172_v23  ;;  %9692 = vmatprep.subr.mxu1 %v16976_v43  ;;  %17193 = vst [vmem:[#allocation181_spill] sm:$0xff] %v13609_v9  ;;  %17194 = vst [vmem:[#allocation182_spill] sm:$0xff] %v13611_v58  ;;  %v9010_v6 = vpop.f32.mrf.mxu0  ;;  %v9086_v48 = vpop.f32.mrf.mxu1  ;;  %v17198_v43 = vld [vmem:[#allocation51_spill] sm:$0xff]  ;;  %v13632_v2 = vand.u32 4294901760, %v8364_v4  ;;  %v17209_v16 = vand.u32 4294901760, %v13609_v9 }
 0x237   : > { %4182 = vmatprep.mubr.f32.mxu0 %v4181_v1  ;;  %9613 = vmatpush3.msra.mxu0 %v17195_v7  ;;  %v4210_v23 = vsub.f32 %v13560_v51, %v17196_v60  ;;  %17197 = vst [vmem:[#allocation183_spill] sm:$0xff] %v13620_v35  ;;  %17199 = vst [vmem:[#allocation184_spill] sm:$0xff] %v13626_v31  ;;  %v9011_v46 = vadd.f32 %v9010_v6, %v9009_v36  ;;  %v4202_v60 = vand.u32 4294901760, %v4201_v30  ;;  %v8366_v36 = vld [vmem:[%s11662_s17 + $0x2c0] sm:$0xff] }
 0x238   : > { %4583 = vmatmul.mubr.f32.gmra.mxu1 %v13439_v3  ;;  %9614 = vmatprep.subr.mxu0 %v17198_v43  ;;  %v13628_v1 = vadd.f32 %v9085_v42, %v9005_v15  ;;  %17200 = vst [vmem:[#allocation185_spill] sm:$0xff] %v13632_v2  ;;  %v9012_v5 = vpop.f32.mrf.mxu0  ;;  %v9087_v7 = vpop.f32.mrf.mxu1  ;;  %v17201_v3 = vand.u32 4294901760, %v13583_v53  ;;  %v13640_v6 = vsub.f32 %v8365_v13, %v13611_v58  ;;  %v13642_v30 = vand.u32 4294901760, %v8367_v24  ;;  %v17206_v13 = vld [vmem:[#allocation61_spill] sm:$0xff] }
 0x239   : > { %4588 = vmatprep.mubr.f32.mxu1 %v13446_v33  ;;  %9693 = vmatpush3.msra.mxu1 %v11283_v38  ;;  %v9088_v15 = vadd.f32 %v9087_v7, %v9086_v48  ;;  %v4211_v42 = vand.u32 4294901760, %v4210_v23  ;;  %v17205_v33 = vand.u32 4294901760, %v13590_v63  ;;  %v8369_v38 = vld [vmem:[%s11662_s17 + $0x2d8] sm:$0xff]  ;;  %v13661_v23 = vand.u32 4294901760, %v8366_v36 }
 0x23a   : > { %4188 = vmatmul.mubr.f32.gmra.mxu0 %v4187_v27  ;;  %v4216_v43 = vsub.f32 %v13583_v53, %v17201_v3  ;;  %9694 = vmatprep.subr.mxu1 %v11289_v40  ;;  %17202 = vst [vmem:[#allocation186_spill] sm:$0xff] %v13640_v6  ;;  %17203 = vst [vmem:[#allocation187_spill] sm:$0xff] %v13642_v30  ;;  %v17204_v27 = vld [vmem:[#allocation55_spill] sm:$0xff]  ;;  %v9013_v51 = vpop.f32.mrf.mxu0  ;;  %v9089_v40 = vpop.f32.mrf.mxu1 }
 0x23b   : > { %4197 = vmatprep.mubr.f32.mxu0 %v4196_v47  ;;  %9615 = vmatpush3.msra.mxu0 %v17204_v27  ;;  %v4225_v3 = vsub.f32 %v13590_v63, %v17205_v33  ;;  %v9014_v7 = vadd.f32 %v9013_v51, %v9012_v5  ;;  %v13654_v47 = vadd.f32 %v9088_v15, %v9008_v49  ;;  %v17211_v27 = vld [vmem:[#allocation64_spill] sm:$0xff]  ;;  %v17214_v49 = vld [vmem:[#allocation70_spill] sm:$0xff] }
 0x23c   : > { %4590 = vmatmul.mubr.f32.gmra.mxu1 %v13452_v34  ;;  %9616 = vmatprep.subr.mxu0 %v17206_v13  ;;  %v13659_v33 = vsub.f32 %v8364_v4, %v13632_v2  ;;  %17208 = vst [vmem:[#allocation189_spill] sm:$0xff] %v13661_v23  ;;  %v9015_v48 = vpop.f32.mrf.mxu0  ;;  %v9090_v53 = vpop.f32.mrf.mxu1  ;;  %v4217_v13 = vand.u32 4294901760, %v4216_v43  ;;  %v4231_v51 = vsub.f32 %v13609_v9, %v17209_v16  ;;  %v8368_v16 = vld [vmem:[%s11662_s17 + $0x2d0] sm:$0xff] }
 0x23d   : > { %4595 = vmatprep.mubr.f32.mxu1 %v13470_v37  ;;  %9695 = vmatpush3.msra.mxu1 %v11302_v44  ;;  %v13669_v5 = vsub.f32 %v8367_v24, %v13642_v30  ;;  %v9091_v4 = vadd.f32 %v9090_v53, %v9089_v40  ;;  %v4226_v15 = vand.u32 4294901760, %v4225_v3  ;;  %v13675_v37 = vand.u32 4294901760, %v8369_v38  ;;  %v8371_v53 = vld [vmem:[%s11662_s17 + $0x2e8] sm:$0xff] }
 0x23e   : > { %17207 = vst [vmem:[#allocation188_spill] sm:$0xff] %v13659_v33  ;;  %4203 = vmatmul.mubr.f32.gmra.mxu0 %v4202_v60  ;;  %9696 = vmatprep.subr.mxu1 %v17075_v21  ;;  %v17212_v60 = vand.u32 4294901760, %v13620_v35  ;;  %v9016_v34 = vpop.f32.mrf.mxu0  ;;  %v9092_v9 = vpop.f32.mrf.mxu1  ;;  %v17215_v24 = vand.u32 4294901760, %v13626_v31 }
 0x23f   : > { %17210 = vst [vmem:[#allocation190_spill] sm:$0xff] %v13669_v5  ;;  %4212 = vmatprep.mubr.f32.mxu0 %v4211_v42  ;;  %9617 = vmatpush3.msra.mxu0 %v17211_v27  ;;  %17213 = vst [vmem:[#allocation191_spill] sm:$0xff] %v13675_v37  ;;  %v9017_v42 = vadd.f32 %v9016_v34, %v9015_v48  ;;  %v13684_v3 = vadd.f32 %v9091_v4, %v9011_v46  ;;  %v17216_v34 = vand.u32 4294901760, %v13640_v6  ;;  %v8373_v48 = vld [vmem:[%s11662_s17 + $0x2f8] sm:$0xff] }
 0x240   : > { %v4240_v43 = vsub.f32 %v13620_v35, %v17212_v60  ;;  %4597 = vmatmul.mubr.f32.gmra.mxu1 %v13489_v57  ;;  %9618 = vmatprep.subr.mxu0 %v17214_v49  ;;  %v4246_v40 = vsub.f32 %v13626_v31, %v17215_v24  ;;  %v13690_v27 = vsub.f32 %v8366_v36, %v13661_v23  ;;  %v9018_v57 = vpop.f32.mrf.mxu0  ;;  %v9093_v49 = vpop.f32.mrf.mxu1  ;;  %v4232_v35 = vand.u32 4294901760, %v4231_v51  ;;  %v17218_v36 = vld [vmem:[#allocation73_spill] sm:$0xff] }
 0x241   : > { %4602 = vmatprep.mubr.f32.mxu1 %v13499_v61  ;;  %9697 = vmatpush3.msra.mxu1 %v17081_v0  ;;  %v4255_v46 = vsub.f32 %v13640_v6, %v17216_v34  ;;  %v13697_v4 = vand.u32 4294901760, %v8368_v16  ;;  %v9094_v24 = vadd.f32 %v9093_v49, %v9092_v9  ;;  %v13703_v51 = vand.u32 4294901760, %v8371_v53  ;;  %v8370_v61 = vld [vmem:[%s11662_s17 + $0x2e0] sm:$0xff]  ;;  %v17220_v6 = vld [vmem:[#allocation76_spill] sm:$0xff] }
 0x242   : > { %4218 = vmatmul.mubr.f32.gmra.mxu0 %v4217_v13  ;;  %9698 = vmatprep.subr.mxu1 %v16996_v22  ;;  %v4241_v60 = vand.u32 4294901760, %v4240_v43  ;;  %v13701_v13 = vsub.f32 %v8369_v38, %v13675_v37  ;;  %v9019_v31 = vpop.f32.mrf.mxu0  ;;  %v9095_v63 = vpop.f32.mrf.mxu1  ;;  %v4247_v34 = vand.u32 4294901760, %v4246_v40  ;;  %v17221_v38 = vand.u32 4294901760, %v13659_v33 }
 0x243   : > { %17217 = vst [vmem:[#allocation192_spill] sm:$0xff] %v13697_v4  ;;  %4227 = vmatprep.mubr.f32.mxu0 %v4226_v15  ;;  %9619 = vmatpush3.msra.mxu0 %v17218_v36  ;;  %17219 = vst [vmem:[#allocation193_spill] sm:$0xff] %v13703_v51  ;;  %v9020_v22 = vadd.f32 %v9019_v31, %v9018_v57  ;;  %v13709_v9 = vadd.f32 %v9094_v24, %v9014_v7  ;;  %v4256_v36 = vand.u32 4294901760, %v4255_v46 }
 0x244   : > { %4604 = vmatmul.mubr.f32.gmra.mxu1 %v13518_v45  ;;  %9620 = vmatprep.subr.mxu0 %v17220_v6  ;;  %v4261_v49 = vsub.f32 %v13659_v33, %v17221_v38  ;;  %v9021_v43 = vpop.f32.mrf.mxu0  ;;  %v9096_v40 = vpop.f32.mrf.mxu1  ;;  %v17222_v57 = vand.u32 4294901760, %v13669_v5  ;;  %v13722_v7 = vsub.f32 %v8368_v16, %v13697_v4  ;;  %v13724_v24 = vand.u32 4294901760, %v8370_v61  ;;  %v17225_v38 = vld [vmem:[#allocation80_spill] sm:$0xff] }
 0x245   : > { %4609 = vmatprep.mubr.f32.mxu1 %v13532_v52  ;;  %9699 = vmatpush3.msra.mxu1 %v17087_v11  ;;  %v9097_v6 = vadd.f32 %v9096_v40, %v9095_v63  ;;  %v13731_v46 = vand.u32 4294901760, %v8373_v48  ;;  %v8372_v52 = vld [vmem:[%s11662_s17 + $0x2f0] sm:$0xff]  ;;  %v17227_v16 = vld [vmem:[#allocation84_spill] sm:$0xff] }
 0x246   : > { %4233 = vmatmul.mubr.f32.gmra.mxu0 %v4232_v35  ;;  %9700 = vmatprep.subr.mxu1 %v17003_v25  ;;  %v4270_v31 = vsub.f32 %v13669_v5, %v17222_v57  ;;  %17223 = vst [vmem:[#allocation194_spill] sm:$0xff] %v13722_v7  ;;  %17224 = vst [vmem:[#allocation195_spill] sm:$0xff] %v13724_v24  ;;  %v13729_v35 = vsub.f32 %v8371_v53, %v13703_v51  ;;  %v9022_v45 = vpop.f32.mrf.mxu0  ;;  %v9098_v33 = vpop.f32.mrf.mxu1  ;;  %v4262_v63 = vand.u32 4294901760, %v4261_v49  ;;  %v17231_v49 = vld [vmem:[#allocation87_spill] sm:$0xff] }
 0x247   : > { %4242 = vmatprep.mubr.f32.mxu0 %v4241_v60  ;;  %9621 = vmatpush3.msra.mxu0 %v17225_v38  ;;  %17226 = vst [vmem:[#allocation196_spill] sm:$0xff] %v13731_v46  ;;  %v9023_v57 = vadd.f32 %v9022_v45, %v9021_v43  ;;  %v13736_v5 = vadd.f32 %v9097_v6, %v9017_v42  ;;  %v17228_v53 = vand.u32 4294901760, %v13690_v27  ;;  %v13748_v6 = vand.u32 4294901760, %v8372_v52 }
 0x248   : > { %4611 = vmatmul.mubr.f32.gmra.mxu1 %v13556_v26  ;;  %9622 = vmatprep.subr.mxu0 %v17227_v16  ;;  %v9024_v40 = vpop.f32.mrf.mxu0  ;;  %v9099_v15 = vpop.f32.mrf.mxu1  ;;  %v4271_v38 = vand.u32 4294901760, %v4270_v31  ;;  %v13746_v45 = vsub.f32 %v8370_v61, %v13724_v24  ;;  %v17232_v43 = vand.u32 4294901760, %v13701_v13  ;;  %v13756_v31 = vsub.f32 %v8373_v48, %v13731_v46  ;;  %v17233_v61 = vld [vmem:[#allocation93_spill] sm:$0xff] }
 0x249   : > { %4616 = vmatprep.mubr.f32.mxu1 %v13562_v41  ;;  %9701 = vmatpush3.msra.mxu1 %v16650_v54  ;;  %v4276_v60 = vsub.f32 %v13690_v27, %v17228_v53  ;;  %17230 = vst [vmem:[#allocation198_spill] sm:$0xff] %v13748_v6  ;;  %v9100_v42 = vadd.f32 %v9099_v15, %v9098_v33  ;;  %v17234_v48 = vand.u32 4294901760, %v13722_v7 }
 0x24a   : > { %4248 = vmatmul.mubr.f32.gmra.mxu0 %v4247_v34  ;;  %9702 = vmatprep.subr.mxu1 %v16653_v28  ;;  %17229 = vst [vmem:[#allocation197_spill] sm:$0xff] %v13746_v45  ;;  %v4285_v53 = vsub.f32 %v13701_v13, %v17232_v43  ;;  %v9025_v41 = vpop.f32.mrf.mxu0  ;;  %v9101_v16 = vpop.f32.mrf.mxu1 }
 0x24b   : > { %4257 = vmatprep.mubr.f32.mxu0 %v4256_v36  ;;  %9623 = vmatpush3.msra.mxu0 %v17231_v49  ;;  %v9026_v26 = vadd.f32 %v9025_v41, %v9024_v40  ;;  %v13760_v33 = vadd.f32 %v9100_v42, %v9020_v22  ;;  %v4277_v43 = vand.u32 4294901760, %v4276_v60  ;;  %v4291_v34 = vsub.f32 %v13722_v7, %v17234_v48  ;;  %v17235_v49 = vld [vmem:[#allocation58_spill] sm:$0xff]  ;;  %v17237_v42 = vld [vmem:[#allocation99_spill] sm:$0xff] }
 0x24c   : > { %4618 = vmatmul.mubr.f32.gmra.mxu1 %v13585_v10  ;;  %9624 = vmatprep.subr.mxu0 %v17233_v61  ;;  %v9027_v36 = vpop.f32.mrf.mxu0  ;;  %v9102_v15 = vpop.f32.mrf.mxu1  ;;  %v13770_v41 = vsub.f32 %v8372_v52, %v13748_v6  ;;  %v4286_v40 = vand.u32 4294901760, %v4285_v53  ;;  %v17239_v7 = vld [vmem:[#allocation103_spill] sm:$0xff] }
 0x24d   : > { %4623 = vmatprep.mubr.f32.mxu1 %v13592_v32  ;;  %9703 = vmatpush3.msra.mxu1 %v16655_v8  ;;  %v9103_v22 = vadd.f32 %v9102_v15, %v9101_v16  ;;  %v4292_v15 = vand.u32 4294901760, %v4291_v34  ;;  %v17245_v34 = vld [vmem:[#allocation109_spill] sm:$0xff] }
 0x24e   : > { %4263 = vmatmul.mubr.f32.gmra.mxu0 %v4262_v63  ;;  %9704 = vmatprep.subr.mxu1 %v17235_v49  ;;  %17236 = vst [vmem:[#allocation199_spill] sm:$0xff] %v13770_v41  ;;  %v17238_v63 = vand.u32 4294901760, %v13729_v35  ;;  %v9028_v32 = vpop.f32.mrf.mxu0  ;;  %v9104_v48 = vpop.f32.mrf.mxu1 }
 0x24f   : > { %4272 = vmatprep.mubr.f32.mxu0 %v4271_v38  ;;  %9625 = vmatpush3.msra.mxu0 %v17237_v42  ;;  %v9029_v10 = vadd.f32 %v9028_v32, %v9027_v36  ;;  %v13779_v52 = vadd.f32 %v9103_v22, %v9023_v57  ;;  %v17240_v38 = vld [vmem:[#allocation63_spill] sm:$0xff]  ;;  %v17243_v57 = vld [vmem:[#allocation106_spill] sm:$0xff]  ;;  %v17244_v36 = vand.u32 4294901760, %v13756_v31 }
 0x250   : > { %v4300_v60 = vsub.f32 %v13729_v35, %v17238_v63  ;;  %4625 = vmatmul.mubr.f32.gmra.mxu1 %v13597_v59  ;;  %9626 = vmatprep.subr.mxu0 %v17239_v7  ;;  %v9030_v16 = vpop.f32.mrf.mxu0  ;;  %v9105_v53 = vpop.f32.mrf.mxu1  ;;  %v17241_v63 = vand.u32 4294901760, %v13746_v45  ;;  %v17242_v42 = vld [vmem:[#allocation67_spill] sm:$0xff]  ;;  %v16291_v59 = vand.u32 4294901760, %v13770_v41 }
 0x251   : > { %4630 = vmatprep.mubr.f32.mxu1 %v13611_v58  ;;  %9705 = vmatpush3.msra.mxu1 %v17240_v38  ;;  %v9106_v7 = vadd.f32 %v9105_v53, %v9104_v48  ;;  %v4315_v22 = vsub.f32 %v13756_v31, %v17244_v36  ;;  %v17246_v48 = vld [vmem:[#allocation71_spill] sm:$0xff] }
 0x252   : > { %4278 = vmatmul.mubr.f32.gmra.mxu0 %v4277_v43  ;;  %v4306_v61 = vsub.f32 %v13746_v45, %v17241_v63  ;;  %9706 = vmatprep.subr.mxu1 %v17242_v42  ;;  %v4301_v32 = vand.u32 4294901760, %v4300_v60  ;;  %v9031_v43 = vpop.f32.mrf.mxu0  ;;  %v9107_v58 = vpop.f32.mrf.mxu1  ;;  %v4321_v36 = vsub.f32 %v13770_v41, %v16291_v59 }
 0x253   : > { %4287 = vmatprep.mubr.f32.mxu0 %v4286_v40  ;;  %9627 = vmatpush3.msra.mxu0 %v17243_v57  ;;  %v9032_v63 = vadd.f32 %v9031_v43, %v9030_v16  ;;  %v13794_v45 = vadd.f32 %v9106_v7, %v9026_v26  ;;  %v17247_v57 = vld [vmem:[#allocation74_spill] sm:$0xff]  ;;  %v17248_v16 = vld [vmem:[#allocation116_spill] sm:$0xff] }
 0x254   : > { %4632 = vmatmul.mubr.f32.gmra.mxu1 %v13632_v2  ;;  %9628 = vmatprep.subr.mxu0 %v17245_v34  ;;  %v9033_v40 = vpop.f32.mrf.mxu0  ;;  %v9108_v60 = vpop.f32.mrf.mxu1  ;;  %v4307_v53 = vand.u32 4294901760, %v4306_v61  ;;  %v4316_v34 = vand.u32 4294901760, %v4315_v22  ;;  %v17249_v43 = vld [vmem:[#allocation122_spill] sm:$0xff]  ;;  %v17250_v61 = vld [vmem:[#allocation123_spill] sm:$0xff]  ;;  %v17251_v22 = vld [vmem:[#allocation77_spill] sm:$0xff] }
 0x255   : > { %4637 = vmatprep.mubr.f32.mxu1 %v13642_v30  ;;  %9707 = vmatpush3.msra.mxu1 %v17246_v48  ;;  %v9109_v2 = vadd.f32 %v9108_v60, %v9107_v58 }
 0x256   : > { %4293 = vmatmul.mubr.f32.gmra.mxu0 %v4292_v15  ;;  %9708 = vmatprep.subr.mxu1 %v17247_v57  ;;  %v9034_v26 = vpop.f32.mrf.mxu0  ;;  %v9110_v7 = vpop.f32.mrf.mxu1 }
 0x257   : > { %4302 = vmatprep.mubr.f32.mxu0 %v4301_v32  ;;  %9629 = vmatpush3.msra.mxu0 %v17248_v16  ;;  %v9035_v15 = vadd.f32 %v9034_v26, %v9033_v40  ;;  %v13805_v30 = vadd.f32 %v9109_v2, %v9029_v10  ;;  %v4322_v32 = vand.u32 4294901760, %v4321_v36  ;;  %v17252_v16 = vld [vmem:[#allocation125_spill] sm:$0xff] }
 0x258   : > { %4639 = vmatmul.mubr.f32.gmra.mxu1 %v13661_v23  ;;  %9630 = vmatprep.subr.mxu0 %v17249_v43  ;;  %v9036_v59 = vpop.f32.mrf.mxu0  ;;  %v9111_v58 = vpop.f32.mrf.mxu1  ;;  %v17253_v10 = vld [vmem:[#allocation129_spill] sm:$0xff] }
 0x259   : > { %4644 = vmatprep.mubr.f32.mxu1 %v13675_v37  ;;  %9631 = vmatpush3.msra.mxu0 %v17250_v61  ;;  %v9112_v60 = vadd.f32 %v9111_v58, %v9110_v7  ;;  %v17255_v7 = vld [vmem:[#allocation86_spill] sm:$0xff]  ;;  %v17256_v58 = vld [vmem:[#allocation120_spill] sm:$0xff] }
 0x25a   : > { %4308 = vmatmul.mubr.f32.gmra.mxu0 %v4307_v53  ;;  %9709 = vmatpush3.msra.mxu1 %v17251_v22  ;;  %v9037_v23 = vpop.f32.mrf.mxu0  ;;  %v9113_v41 = vpop.f32.mrf.mxu1  ;;  %v17254_v53 = vld [vmem:[#allocation81_spill] sm:$0xff] }
 0x25b   : > { %4317 = vmatprep.mubr.f32.mxu0 %v4316_v34  ;;  %9632 = vmatprep.subr.mxu0 %v17252_v16  ;;  %v9038_v2 = vadd.f32 %v9037_v23, %v9036_v59  ;;  %v13813_v40 = vadd.f32 %v9112_v60, %v9032_v63  ;;  %v17257_v16 = vld [vmem:[#allocation90_spill] sm:$0xff]  ;;  %v17258_v59 = vld [vmem:[#allocation15_spill] sm:$0xff] }
 0x25c   : > { %4646 = vmatmul.mubr.f32.gmra.mxu1 %v13697_v4  ;;  %9633 = vmatpush3.msra.mxu0 %v17253_v10  ;;  %v9039_v36 = vpop.f32.mrf.mxu0  ;;  %v9114_v26 = vpop.f32.mrf.mxu1  ;;  %v17260_v10 = vld [vmem:[#allocation134_spill] sm:$0xff]  ;;  %v17262_v4 = vld [vmem:[#allocation19_spill] sm:$0xff] }
 0x25d   : > { %4651 = vmatprep.mubr.f32.mxu1 %v13703_v51  ;;  %9710 = vmatprep.subr.mxu1 %v17254_v53  ;;  %v9115_v34 = vadd.f32 %v9114_v26, %v9113_v41  ;;  %v17261_v51 = vld [vmem:[#allocation154_spill] sm:$0xff] }
 0x25e   : > { %4323 = vmatmul.mubr.f32.gmra.mxu0 %v4322_v32  ;;  %9711 = vmatpush3.msra.mxu1 %v17255_v7  ;;  %v9040_v61 = vpop.f32.mrf.mxu0  ;;  %v9116_v43 = vpop.f32.mrf.mxu1  ;;  %v17259_v32 = vld [vmem:[#allocation95_spill] sm:$0xff] }
 0x25f   : > { %4795 = vmatprep.mubr.f32.mxu0 %v17256_v58  ;;  %9712 = vmatprep.subr.mxu1 %v17257_v16  ;;  %v9041_v23 = vadd.f32 %v9040_v61, %v9039_v36  ;;  %v13822_v63 = vadd.f32 %v9115_v34, %v9035_v15  ;;  %v17263_v15 = vld [vmem:[#allocation20_spill] sm:$0xff]  ;;  %v17264_v34 = vand.u32 4294901760, %v17256_v58  ;;  %v17270_v58 = vand.u32 4294901760, %v17260_v10 }
 0x260   : > { %4653 = vmatmul.mubr.f32.gmra.mxu1 %v13724_v24  ;;  %9762 = vmatprep.subr.mxu0 %v17258_v59  ;;  %v9154_v60 = vpop.f32.mrf.mxu0  ;;  %v9117_v41 = vpop.f32.mrf.mxu1 }
 0x261   : > { %4658 = vmatprep.mubr.f32.mxu1 %v13731_v46  ;;  %9713 = vmatpush3.msra.mxu1 %v17259_v32  ;;  %v9118_v26 = vadd.f32 %v9117_v41, %v9116_v43  ;;  %v17265_v46 = vld [vmem:[#allocation22_spill] sm:$0xff]  ;;  %v17266_v43 = vld [vmem:[#allocation157_spill] sm:$0xff] }
 0x262   : > { %4798 = vmatmul.mubr.f32.vlgmr.msra.gmra.mxu0 %v17260_v10  ;;  %9842 = vmatprep.subr.mxu1 %v17036_v55  ;;  %v9155_v24 = vpop.f32.mrf.mxu0  ;;  %v9119_v59 = vpop.f32.mrf.mxu1  ;;  %v17267_v32 = vld [vmem:[#allocation25_spill] sm:$0xff] }
 0x263   : > { %4804 = vmatprep.mubr.f32.mxu0 %v17261_v51  ;;  %9763 = vmatpush3.msra.mxu0 %v17262_v4  ;;  %v13832_v61 = vadd.f32 %v9118_v26, %v9038_v2  ;;  %v9156_v36 = vadd.f32 %v9155_v24, %v9154_v60  ;;  %v17271_v60 = vld [vmem:[#allocation32_spill] sm:$0xff] }
 0x264   : > { %4660 = vmatmul.mubr.f32.gmra.mxu1 %v13748_v6  ;;  %9764 = vmatprep.subr.mxu0 %v17263_v15  ;;  %v9157_v37 = vpop.f32.mrf.mxu0  ;;  %v9120_v41 = vpop.f32.mrf.mxu1  ;;  %v17268_v6 = vld [vmem:[#allocation170_spill] sm:$0xff]  ;;  %v17269_v15 = vld [vmem:[#allocation28_spill] sm:$0xff] }
 0x265   : > { %5037 = vmatprep.mubr.f32.mxu1 %v17264_v34  ;;  %9765 = vmatpush3.msra.mxu0 %v17265_v46  ;;  %v3046_v4 = vadd.f32 %v9156_v36, %v13543_v62  ;;  %v9121_v55 = vadd.f32 %v9120_v41, %v9119_v59  ;;  %v17273_v59 = vld [vmem:[#allocation177_spill] sm:$0xff]  ;;  %v17289_v46 = vand.u32 4294901760, %v13444_v14 }
 0x266   : > { %4807 = vmatmul.mubr.f32.gmra.mxu0 %v17266_v43  ;;  %9766 = vmatprep.subr.mxu0 %v17267_v32  ;;  %v9158_v2 = vpop.f32.mrf.mxu0  ;;  %v9234_v24 = vpop.f32.mrf.mxu1  ;;  %v17272_v32 = vand.u32 4294901760, %v17261_v51 }
 0x267   : > { %4813 = vmatprep.mubr.f32.mxu0 %v17268_v6  ;;  %9767 = vmatpush3.msra.mxu0 %v17269_v15  ;;  %v13845_v26 = vadd.f32 %v9121_v55, %v9041_v23  ;;  %v9159_v34 = vadd.f32 %v9158_v2, %v9157_v37  ;;  %v17275_v23 = vand.u32 4294901760, %v17266_v43  ;;  %v17276_v2 = vand.u32 4294901760, %v17268_v6  ;;  %v17282_v15 = vld [vmem:[#allocation8_spill] sm:$0xff] }
 0x268   : > { %5041 = vmatmul.mubr.f32.vlgmr.msra.gmra.mxu1 %v17270_v58  ;;  %9768 = vmatprep.subr.mxu0 %v17271_v60  ;;  %v9160_v62 = vpop.f32.mrf.mxu0  ;;  %v9235_v36 = vpop.f32.mrf.mxu1  ;;  %v17274_v58 = vld [vmem:[#allocation101_spill] sm:$0xff]  ;;  %v17279_v6 = vand.u32 4294901760, %v17273_v59 }
 0x269   : > { %9843 = vmatpush3.msra.mxu1 %v11197_v12  ;;  %5048 = vmatprep.mubr.f32.mxu1 %v17272_v32  ;;  %v3055_v41 = vadd.f32 %v9159_v34, %v13569_v50  ;;  %v9236_v10 = vadd.f32 %v9235_v36, %v9234_v24  ;;  %v17277_v24 = vld [vmem:[#allocation140_spill] sm:$0xff]  ;;  %v17281_v60 = vand.u32 4294901760, %v17274_v58 }
 0x26a   : > { %4816 = vmatmul.mubr.f32.gmra.mxu0 %v17273_v59  ;;  %9844 = vmatprep.subr.mxu1 %v16687_v56  ;;  %v9161_v55 = vpop.f32.mrf.mxu0  ;;  %v9237_v37 = vpop.f32.mrf.mxu1 }
 0x26b   : > { %4822 = vmatprep.mubr.f32.mxu0 %v17274_v58  ;;  %9845 = vmatpush3.msra.mxu1 %v11210_v17  ;;  %v9162_v51 = vadd.f32 %v9161_v55, %v9160_v62  ;;  %v13858_v32 = vadd.f32 %v9236_v10, %v3046_v4  ;;  %v17280_v10 = vld [vmem:[#allocation44_spill] sm:$0xff]  ;;  %v17287_v58 = vand.u32 4294901760, %v17277_v24 }
 0x26c   : > { %5052 = vmatmul.mubr.f32.gmra.mxu1 %v17275_v23  ;;  %9846 = vmatprep.subr.mxu1 %v11212_v18  ;;  %v9163_v50 = vpop.f32.mrf.mxu0  ;;  %v9238_v34 = vpop.f32.mrf.mxu1  ;;  %v17278_v23 = vld [vmem:[#allocation40_spill] sm:$0xff] }
 0x26d   : > { %5059 = vmatprep.mubr.f32.mxu1 %v17276_v2  ;;  %9847 = vmatpush3.msra.mxu1 %v11214_v19  ;;  %v3064_v36 = vadd.f32 %v9162_v51, %v13599_v20  ;;  %v9239_v43 = vadd.f32 %v9238_v34, %v9237_v37  ;;  %v17283_v37 = vld [vmem:[#allocation162_spill] sm:$0xff]  ;;  %v17284_v34 = vld [vmem:[#allocation9_spill] sm:$0xff] }
 0x26e   : > { %4825 = vmatmul.mubr.f32.gmra.mxu0 %v17277_v24  ;;  %9848 = vmatprep.subr.mxu1 %v17045_v29  ;;  %v9164_v4 = vpop.f32.mrf.mxu0  ;;  %v9240_v62 = vpop.f32.mrf.mxu1 }
 0x26f   : > { %4831 = vmatprep.mubr.f32.mxu0 %v13444_v14  ;;  %9769 = vmatpush3.msra.mxu0 %v17278_v23  ;;  %v9165_v55 = vadd.f32 %v9164_v4, %v9163_v50  ;;  %v13871_v2 = vadd.f32 %v9239_v43, %v3055_v41  ;;  %v17294_v14 = vand.u32 4294901760, %v17283_v37 }
 0x270   : > { %5063 = vmatmul.mubr.f32.gmra.mxu1 %v17279_v6  ;;  %9770 = vmatprep.subr.mxu0 %v17280_v10  ;;  %v9166_v20 = vpop.f32.mrf.mxu0  ;;  %v9241_v51 = vpop.f32.mrf.mxu1  ;;  %v17285_v6 = vld [vmem:[#allocation166_spill] sm:$0xff]  ;;  %v17286_v10 = vld [vmem:[#allocation47_spill] sm:$0xff] }
 0x271   : > { %5070 = vmatprep.mubr.f32.mxu1 %v17281_v60  ;;  %9849 = vmatpush3.msra.mxu1 %v17282_v15  ;;  %v3073_v23 = vadd.f32 %v9165_v55, %v13628_v1  ;;  %v9242_v59 = vadd.f32 %v9241_v51, %v9240_v62  ;;  %v17288_v60 = vld [vmem:[#allocation50_spill] sm:$0xff]  ;;  %v17290_v62 = vld [vmem:[#allocation167_spill] sm:$0xff]  ;;  %v17291_v51 = vld [vmem:[#allocation13_spill] sm:$0xff] }
 0x272   : > { %4834 = vmatmul.mubr.f32.gmra.mxu0 %v17283_v37  ;;  %9850 = vmatprep.subr.mxu1 %v17284_v34  ;;  %v9167_v41 = vpop.f32.mrf.mxu0  ;;  %v9243_v50 = vpop.f32.mrf.mxu1 }
 0x273   : > { %4840 = vmatprep.mubr.f32.mxu0 %v17285_v6  ;;  %9771 = vmatpush3.msra.mxu0 %v17286_v10  ;;  %v9168_v43 = vadd.f32 %v9167_v41, %v9166_v20  ;;  %v13884_v4 = vadd.f32 %v9242_v59, %v3064_v36 }
 0x274   : > { %5074 = vmatmul.mubr.f32.gmra.mxu1 %v17287_v58  ;;  %9772 = vmatprep.subr.mxu0 %v17288_v60  ;;  %v9169_v1 = vpop.f32.mrf.mxu0  ;;  %v9244_v55 = vpop.f32.mrf.mxu1  ;;  %v17292_v58 = vld [vmem:[#allocation128_spill] sm:$0xff]  ;;  %v17293_v60 = vld [vmem:[#allocation54_spill] sm:$0xff] }
 0x275   : > { %5081 = vmatprep.mubr.f32.mxu1 %v17289_v46  ;;  %9851 = vmatpush3.msra.mxu1 %v17064_v39  ;;  %v3082_v10 = vadd.f32 %v9168_v43, %v13654_v47  ;;  %v9245_v24 = vadd.f32 %v9244_v55, %v9243_v50  ;;  %v17295_v46 = vld [vmem:[#allocation57_spill] sm:$0xff]  ;;  %v17296_v39 = vand.u32 4294901760, %v17285_v6  ;;  %v17298_v50 = vld [vmem:[#allocation143_spill] sm:$0xff]  ;;  %v17299_v55 = vld [vmem:[#allocation18_spill] sm:$0xff]  ;;  %v17302_v6 = vand.u32 4294901760, %v17290_v62 }
 0x276   : > { %4843 = vmatmul.mubr.f32.gmra.mxu0 %v17290_v62  ;;  %9852 = vmatprep.subr.mxu1 %v17291_v51  ;;  %v9170_v36 = vpop.f32.mrf.mxu0  ;;  %v9246_v20 = vpop.f32.mrf.mxu1  ;;  %v17297_v51 = vld [vmem:[#allocation16_spill] sm:$0xff] }
 0x277   : > { %4849 = vmatprep.mubr.f32.mxu0 %v17292_v58  ;;  %9773 = vmatpush3.msra.mxu0 %v17293_v60  ;;  %v9171_v59 = vadd.f32 %v9170_v36, %v9169_v1  ;;  %v13897_v41 = vadd.f32 %v9245_v24, %v3073_v23 }
 0x278   : > { %5085 = vmatmul.mubr.f32.gmra.mxu1 %v17294_v14  ;;  %9774 = vmatprep.subr.mxu0 %v17295_v46  ;;  %v9172_v47 = vpop.f32.mrf.mxu0  ;;  %v9247_v43 = vpop.f32.mrf.mxu1  ;;  %v17300_v14 = vld [vmem:[#allocation152_spill] sm:$0xff] }
 0x279   : > { %5092 = vmatprep.mubr.f32.mxu1 %v17296_v39  ;;  %9853 = vmatpush3.msra.mxu1 %v17297_v51  ;;  %v3091_v60 = vadd.f32 %v9171_v59, %v13684_v3  ;;  %v9248_v37 = vadd.f32 %v9247_v43, %v9246_v20  ;;  %v17301_v46 = vld [vmem:[#allocation60_spill] sm:$0xff]  ;;  %v17303_v39 = vld [vmem:[#allocation66_spill] sm:$0xff]  ;;  %v17304_v51 = vand.u32 4294901760, %v17292_v58  ;;  %v17308_v58 = vand.u32 4294901760, %v17298_v50 }
 0x27a   : > { %4852 = vmatmul.mubr.f32.gmra.mxu0 %v17298_v50  ;;  %9854 = vmatprep.subr.mxu1 %v17299_v55  ;;  %v9173_v23 = vpop.f32.mrf.mxu0  ;;  %v9249_v1 = vpop.f32.mrf.mxu1  ;;  %v17305_v20 = vld [vmem:[#allocation158_spill] sm:$0xff] }
 0x27b   : > { %4858 = vmatprep.mubr.f32.mxu0 %v17300_v14  ;;  %9775 = vmatpush3.msra.mxu0 %v17301_v46  ;;  %v9174_v24 = vadd.f32 %v9173_v23, %v9172_v47  ;;  %v13910_v36 = vadd.f32 %v9248_v37, %v3082_v10  ;;  %v17310_v46 = vand.u32 4294901760, %v17300_v14  ;;  %v17315_v14 = vand.u32 4294901760, %v17305_v20 }
 0x27c   : > { %5096 = vmatmul.mubr.f32.gmra.mxu1 %v17302_v6  ;;  %9776 = vmatprep.subr.mxu0 %v17303_v39  ;;  %v9175_v3 = vpop.f32.mrf.mxu0  ;;  %v9250_v59 = vpop.f32.mrf.mxu1  ;;  %v17306_v6 = vld [vmem:[#allocation161_spill] sm:$0xff] }
 0x27d   : > { %5103 = vmatprep.mubr.f32.mxu1 %v17304_v51  ;;  %9855 = vmatpush3.msra.mxu1 %v11302_v44  ;;  %v3100_v43 = vadd.f32 %v9174_v24, %v13709_v9  ;;  %v9251_v62 = vadd.f32 %v9250_v59, %v9249_v1  ;;  %v17307_v39 = vld [vmem:[#allocation69_spill] sm:$0xff]  ;;  %v17309_v51 = vld [vmem:[#allocation75_spill] sm:$0xff]  ;;  %v17311_v1 = vld [vmem:[#allocation174_spill] sm:$0xff] }
 0x27e   : > { %4861 = vmatmul.mubr.f32.gmra.mxu0 %v17305_v20  ;;  %9856 = vmatprep.subr.mxu1 %v17075_v21  ;;  %v9176_v10 = vpop.f32.mrf.mxu0  ;;  %v9252_v47 = vpop.f32.mrf.mxu1  ;;  %v17312_v59 = vld [vmem:[#allocation35_spill] sm:$0xff] }
 0x27f   : > { %4867 = vmatprep.mubr.f32.mxu0 %v17306_v6  ;;  %9777 = vmatpush3.msra.mxu0 %v17307_v39  ;;  %v9177_v37 = vadd.f32 %v9176_v10, %v9175_v3  ;;  %v13923_v23 = vadd.f32 %v9251_v62, %v3091_v60 }
 0x280   : > { %5107 = vmatmul.mubr.f32.gmra.mxu1 %v17308_v58  ;;  %9778 = vmatprep.subr.mxu0 %v17309_v51  ;;  %v9178_v9 = vpop.f32.mrf.mxu0  ;;  %v9253_v24 = vpop.f32.mrf.mxu1  ;;  %v17313_v58 = vld [vmem:[#allocation178_spill] sm:$0xff]  ;;  %v17314_v51 = vld [vmem:[#allocation79_spill] sm:$0xff] }
 0x281   : > { %5114 = vmatprep.mubr.f32.mxu1 %v17310_v46  ;;  %9857 = vmatpush3.msra.mxu1 %v17081_v0  ;;  %v3109_v39 = vadd.f32 %v9177_v37, %v13736_v5  ;;  %v9254_v50 = vadd.f32 %v9253_v24, %v9252_v47  ;;  %v17316_v46 = vld [vmem:[#allocation83_spill] sm:$0xff]  ;;  %v17317_v0 = vand.u32 4294901760, %v17306_v6  ;;  %v17318_v47 = vld [vmem:[#allocation181_spill] sm:$0xff]  ;;  %v17321_v6 = vand.u32 4294901760, %v17311_v1 }
 0x282   : > { %4870 = vmatmul.mubr.f32.gmra.mxu0 %v17311_v1  ;;  %9858 = vmatprep.subr.mxu1 %v17312_v59  ;;  %v9179_v60 = vpop.f32.mrf.mxu0  ;;  %v9255_v3 = vpop.f32.mrf.mxu1 }
 0x283   : > { %4876 = vmatprep.mubr.f32.mxu0 %v17313_v58  ;;  %9779 = vmatpush3.msra.mxu0 %v17314_v51  ;;  %v9180_v62 = vadd.f32 %v9179_v60, %v9178_v9  ;;  %v13936_v10 = vadd.f32 %v9254_v50, %v3100_v43  ;;  %v17323_v51 = vand.u32 4294901760, %v17313_v58  ;;  %v17327_v58 = vand.u32 4294901760, %v17318_v47 }
 0x284   : > { %5118 = vmatmul.mubr.f32.gmra.mxu1 %v17315_v14  ;;  %9780 = vmatprep.subr.mxu0 %v17316_v46  ;;  %v9181_v5 = vpop.f32.mrf.mxu0  ;;  %v9256_v37 = vpop.f32.mrf.mxu1  ;;  %v17319_v14 = vld [vmem:[#allocation183_spill] sm:$0xff]  ;;  %v17320_v46 = vld [vmem:[#allocation85_spill] sm:$0xff] }
 0x285   : > { %5125 = vmatprep.mubr.f32.mxu1 %v17317_v0  ;;  %9859 = vmatpush3.msra.mxu1 %v17087_v11  ;;  %v3118_v24 = vadd.f32 %v9180_v62, %v13760_v33  ;;  %v9257_v20 = vadd.f32 %v9256_v37, %v9255_v3  ;;  %v17322_v0 = vld [vmem:[#allocation89_spill] sm:$0xff]  ;;  %v17324_v3 = vld [vmem:[#allocation184_spill] sm:$0xff] }
 0x286   : > { %4879 = vmatmul.mubr.f32.gmra.mxu0 %v17318_v47  ;;  %9860 = vmatprep.subr.mxu1 %v17003_v25  ;;  %v9182_v43 = vpop.f32.mrf.mxu0  ;;  %v9258_v9 = vpop.f32.mrf.mxu1 }
 0x287   : > { %4885 = vmatprep.mubr.f32.mxu0 %v17319_v14  ;;  %9781 = vmatpush3.msra.mxu0 %v17320_v46  ;;  %v9183_v50 = vadd.f32 %v9182_v43, %v9181_v5  ;;  %v13949_v60 = vadd.f32 %v9257_v20, %v3109_v39  ;;  %v17329_v46 = vand.u32 4294901760, %v17319_v14  ;;  %v17333_v14 = vand.u32 4294901760, %v17324_v3 }
 0x288   : > { %5129 = vmatmul.mubr.f32.gmra.mxu1 %v17321_v6  ;;  %9782 = vmatprep.subr.mxu0 %v17322_v0  ;;  %v9184_v33 = vpop.f32.mrf.mxu0  ;;  %v9259_v62 = vpop.f32.mrf.mxu1  ;;  %v17325_v6 = vld [vmem:[#allocation186_spill] sm:$0xff]  ;;  %v17326_v0 = vld [vmem:[#allocation92_spill] sm:$0xff] }
 0x289   : > { %5136 = vmatprep.mubr.f32.mxu1 %v17323_v51  ;;  %9861 = vmatpush3.msra.mxu1 %v16650_v54  ;;  %v3127_v37 = vadd.f32 %v9183_v50, %v13779_v52  ;;  %v9260_v1 = vadd.f32 %v9259_v62, %v9258_v9  ;;  %v17328_v51 = vld [vmem:[#allocation98_spill] sm:$0xff]  ;;  %v17330_v9 = vld [vmem:[#allocation188_spill] sm:$0xff] }
 0x28a   : > { %4888 = vmatmul.mubr.f32.gmra.mxu0 %v17324_v3  ;;  %9862 = vmatprep.subr.mxu1 %v16653_v28  ;;  %v9185_v39 = vpop.f32.mrf.mxu0  ;;  %v9261_v5 = vpop.f32.mrf.mxu1 }
 0x28b   : > { %4894 = vmatprep.mubr.f32.mxu0 %v17325_v6  ;;  %9783 = vmatpush3.msra.mxu0 %v17326_v0  ;;  %v9186_v20 = vadd.f32 %v9185_v39, %v9184_v33  ;;  %v13962_v43 = vadd.f32 %v9260_v1, %v3118_v24  ;;  %v17335_v0 = vand.u32 4294901760, %v17325_v6  ;;  %v17337_v6 = vand.u32 4294901760, %v17330_v9 }
 0x28c   : > { %5140 = vmatmul.mubr.f32.gmra.mxu1 %v17327_v58  ;;  %9784 = vmatprep.subr.mxu0 %v17328_v51  ;;  %v9187_v52 = vpop.f32.mrf.mxu0  ;;  %v9262_v50 = vpop.f32.mrf.mxu1  ;;  %v17331_v58 = vld [vmem:[#allocation190_spill] sm:$0xff]  ;;  %v17332_v51 = vld [vmem:[#allocation105_spill] sm:$0xff] }
 0x28d   : > { %5147 = vmatprep.mubr.f32.mxu1 %v17329_v46  ;;  %9863 = vmatpush3.msra.mxu1 %v16655_v8  ;;  %v3136_v62 = vadd.f32 %v9186_v20, %v13794_v45  ;;  %v9263_v47 = vadd.f32 %v9262_v50, %v9261_v5  ;;  %v17334_v46 = vld [vmem:[#allocation108_spill] sm:$0xff]  ;;  %v17336_v50 = vld [vmem:[#allocation111_spill] sm:$0xff] }
 0x28e   : > { %4897 = vmatmul.mubr.f32.gmra.mxu0 %v17330_v9  ;;  %9864 = vmatprep.subr.mxu1 %v17235_v49  ;;  %v9188_v24 = vpop.f32.mrf.mxu0  ;;  %v9264_v33 = vpop.f32.mrf.mxu1 }
 0x28f   : > { %4903 = vmatprep.mubr.f32.mxu0 %v17331_v58  ;;  %9785 = vmatpush3.msra.mxu0 %v17332_v51  ;;  %v9189_v1 = vadd.f32 %v9188_v24, %v9187_v52  ;;  %v13975_v39 = vadd.f32 %v9263_v47, %v3127_v37 }
 0x290   : > { %5151 = vmatmul.mubr.f32.gmra.mxu1 %v17333_v14  ;;  %9786 = vmatprep.subr.mxu0 %v17334_v46  ;;  %v9190_v45 = vpop.f32.mrf.mxu0  ;;  %v9265_v5 = vpop.f32.mrf.mxu1  ;;  %v17339_v14 = vand.u32 4294901760, %v17331_v58  ;;  %v17342_v58 = vand.u32 4294901760, %v13690_v27  ;;  %v17373_v46 = vld [vmem:[#allocation43_spill] sm:$0xff] }
 0x291   : > { %5158 = vmatprep.mubr.f32.mxu1 %v17335_v0  ;;  %9865 = vmatpush3.msra.mxu1 %v17240_v38  ;;  %v3145_v20 = vadd.f32 %v9189_v1, %v13805_v30  ;;  %v9266_v3 = vadd.f32 %v9265_v5, %v9264_v33  ;;  %v17338_v0 = vld [vmem:[#allocation113_spill] sm:$0xff]  ;;  %v17340_v33 = vld [vmem:[#allocation194_spill] sm:$0xff] }
 0x292   : > { %4906 = vmatmul.mubr.f32.gmra.mxu0 %v13690_v27  ;;  %9866 = vmatprep.subr.mxu1 %v17242_v42  ;;  %v9191_v37 = vpop.f32.mrf.mxu0  ;;  %v9267_v52 = vpop.f32.mrf.mxu1 }
 0x293   : > { %4912 = vmatprep.mubr.f32.mxu0 %v13701_v13  ;;  %9787 = vmatpush3.msra.mxu0 %v17336_v50  ;;  %v9192_v47 = vadd.f32 %v9191_v37, %v9190_v45  ;;  %v13988_v24 = vadd.f32 %v9266_v3, %v3136_v62  ;;  %v17343_v3 = vld [vmem:[#allocation126_spill] sm:$0xff]  ;;  %v17345_v50 = vld [vmem:[#allocation127_spill] sm:$0xff] }
 0x294   : > { %5162 = vmatmul.mubr.f32.gmra.mxu1 %v17337_v6  ;;  %9788 = vmatprep.subr.mxu0 %v17338_v0  ;;  %v9193_v30 = vpop.f32.mrf.mxu0  ;;  %v9268_v1 = vpop.f32.mrf.mxu1  ;;  %v17341_v6 = vld [vmem:[#allocation119_spill] sm:$0xff]  ;;  %v17344_v0 = vand.u32 4294901760, %v13701_v13  ;;  %v17348_v13 = vand.u32 4294901760, %v17340_v33 }
 0x295   : > { %5169 = vmatprep.mubr.f32.mxu1 %v17339_v14  ;;  %9867 = vmatpush3.msra.mxu1 %v17246_v48  ;;  %v3154_v5 = vadd.f32 %v9192_v47, %v13813_v40  ;;  %v9269_v9 = vadd.f32 %v9268_v1, %v9267_v52  ;;  %v17346_v52 = vld [vmem:[#allocation197_spill] sm:$0xff] }
 0x296   : > { %4915 = vmatmul.mubr.f32.gmra.mxu0 %v17340_v33  ;;  %9868 = vmatprep.subr.mxu1 %v17247_v57  ;;  %v9194_v62 = vpop.f32.mrf.mxu0  ;;  %v9270_v45 = vpop.f32.mrf.mxu1 }
 0x297   : > { %4921 = vmatprep.mubr.f32.mxu0 %v13729_v35  ;;  %9789 = vmatpush3.msra.mxu0 %v17341_v6  ;;  %v9195_v37 = vadd.f32 %v9194_v62, %v9193_v30  ;;  %v14001_v14 = vadd.f32 %v9269_v9, %v3145_v20  ;;  %v17359_v6 = vld [vmem:[#allocation102_spill] sm:$0xff] }
 0x298   : > { %5173 = vmatmul.mubr.f32.gmra.mxu1 %v17342_v58  ;;  %9790 = vmatprep.subr.mxu0 %v17343_v3  ;;  %v9196_v40 = vpop.f32.mrf.mxu0  ;;  %v9271_v47 = vpop.f32.mrf.mxu1  ;;  %v17347_v58 = vld [vmem:[#allocation131_spill] sm:$0xff]  ;;  %v449_v3 = vlaneseq }
 0x299   : > { %5180 = vmatprep.mubr.f32.mxu1 %v17344_v0  ;;  %9791 = vmatpush3.msra.mxu0 %v17345_v50  ;;  %v3163_v1 = vadd.f32 %v9195_v37, %v13822_v63  ;;  %v9272_v27 = vadd.f32 %v9271_v47, %v9270_v45  ;;  %v17349_v0 = vld [vmem:[#allocation133_spill] sm:$0xff]  ;;  %v17350_v50 = vand.u32 4294901760, %v13729_v35  ;;  %v17351_v45 = vld [vmem:[#allocation199_spill] sm:$0xff]  ;;  %v17353_v35 = vand.u32 4294901760, %v17346_v52 }
 0x29a   : > { %4924 = vmatmul.mubr.f32.gmra.mxu0 %v17346_v52  ;;  %9869 = vmatpush3.msra.mxu1 %v17251_v22  ;;  %v9197_v20 = vpop.f32.mrf.mxu0  ;;  %v9273_v30 = vpop.f32.mrf.mxu1 }
 0x29b   : > { %4930 = vmatprep.mubr.f32.mxu0 %v13756_v31  ;;  %9792 = vmatprep.subr.mxu0 %v17347_v58  ;;  %v9198_v9 = vadd.f32 %v9197_v20, %v9196_v40  ;;  %v14014_v62 = vadd.f32 %v9272_v27, %v3154_v5  ;;  %v17356_v58 = vld [vmem:[#allocation95_spill] sm:$0xff] }
 0x29c   : > { %5184 = vmatmul.mubr.f32.gmra.mxu1 %v17348_v13  ;;  %9793 = vmatpush3.msra.mxu0 %v17349_v0  ;;  %v9199_v63 = vpop.f32.mrf.mxu0  ;;  %v9274_v37 = vpop.f32.mrf.mxu1  ;;  %v17352_v13 = vld [vmem:[#allocation165_spill] sm:$0xff]  ;;  %v17355_v0 = vand.u32 4294901760, %v13756_v31  ;;  %v17360_v31 = vand.u32 4294901760, %v17351_v45 }
 0x29d   : > { %5191 = vmatprep.mubr.f32.mxu1 %v17350_v50  ;;  %9870 = vmatprep.subr.mxu1 %v17254_v53  ;;  %v3172_v47 = vadd.f32 %v9198_v9, %v13832_v61  ;;  %v9275_v33 = vadd.f32 %v9274_v37, %v9273_v30  ;;  %v17354_v50 = vld [vmem:[#allocation5_spill] sm:$0xff]  ;;  %v17357_v30 = vld [vmem:[#allocation168_spill] sm:$0xff]  ;;  %v17358_v37 = vld [vmem:[#allocation27_spill] sm:$0xff] }
 0x29e   : > { %4933 = vmatmul.mubr.f32.gmra.mxu0 %v17351_v45  ;;  %9871 = vmatpush3.msra.mxu1 %v17255_v7  ;;  %v9200_v5 = vpop.f32.mrf.mxu0  ;;  %v9276_v40 = vpop.f32.mrf.mxu1 }
 0x29f   : > { %5372 = vmatprep.mubr.f32.mxu0 %v17352_v13  ;;  %9872 = vmatprep.subr.mxu1 %v17257_v16  ;;  %v9201_v27 = vadd.f32 %v9200_v5, %v9199_v63  ;;  %v14027_v20 = vadd.f32 %v9275_v33, %v3163_v1  ;;  %v17361_v5 = vld [vmem:[#allocation142_spill] sm:$0xff] }
 0x2a0   : > { %5195 = vmatmul.mubr.f32.gmra.mxu1 %v17353_v35  ;;  %9922 = vmatprep.subr.mxu0 %v17354_v50  ;;  %v9314_v61 = vpop.f32.mrf.mxu0  ;;  %v9277_v9 = vpop.f32.mrf.mxu1 }
 0x2a1   : > { %5202 = vmatprep.mubr.f32.mxu1 %v17355_v0  ;;  %9873 = vmatpush3.msra.mxu1 %v17356_v58  ;;  %v3181_v52 = vadd.f32 %v9201_v27, %v13845_v26  ;;  %v9278_v35 = vadd.f32 %v9277_v9, %v9276_v40  ;;  %v14046_v27 = vand.u32 127, %v449_v3 }
 0x2a2   : > { %5374 = vmatmul.mubr.f32.vlgmr.msra.gmra.mxu0 %v17357_v30  ;;  %10002 = vmatprep.subr.mxu1 %v17358_v37  ;;  %v9315_v1 = vpop.f32.mrf.mxu0  ;;  %v9279_v63 = vpop.f32.mrf.mxu1  ;;  %v17363_v37 = vld [vmem:[#allocation148_spill] sm:$0xff] }
 0x2a3   : > { %5379 = vmatprep.mubr.f32.mxu0 %v17359_v6  ;;  %9923 = vmatpush3.msra.mxu0 %v11197_v12  ;;  %v14040_v0 = vadd.f32 %v9278_v35, %v3172_v47  ;;  %v9316_v33 = vadd.f32 %v9315_v1, %v9314_v61  ;;  %17362 = vst [vmem:[#allocation120_spill] sm:$0xff] %v14046_v27  ;;  %v17364_v1 = vld [vmem:[#allocation30_spill] sm:$0xff]  ;;  %vm2185_vm0 = vcmp.eq.s32.totalorder %v14046_v27, 0  ;;  %vm3939_vm1 = vcmp.eq.s32.totalorder %v14046_v27, 1 }
 0x2a4   : > { %5206 = vmatmul.mubr.f32.gmra.mxu1 %v17360_v31  ;;  %9924 = vmatprep.subr.mxu0 %v16687_v56  ;;  %v9317_v26 = vpop.f32.mrf.mxu0  ;;  %v9280_v40 = vpop.f32.mrf.mxu1  ;;  %v17366_v31 = vld [vmem:[#allocation31_spill] sm:$0xff] }
 0x2a5   : > { %5581 = vmatprep.mubr.f32.mxu1 %v17352_v13  ;;  %9925 = vmatpush3.msra.mxu0 %v11210_v17  ;;  %v3622_v45 = vadd.f32 %v9316_v33, %v13858_v32  ;;  %v9281_v9 = vadd.f32 %v9280_v40, %v9279_v63  ;;  %v17365_v32 = vld [vmem:[#allocation171_spill] sm:$0xff]  ;;  %v17367_v40 = vld [vmem:[#allocation173_spill] sm:$0xff] }
 0x2a6   : > { %5381 = vmatmul.mubr.f32.gmra.mxu0 %v17361_v5  ;;  %9926 = vmatprep.subr.mxu0 %v11212_v18  ;;  %v9318_v47 = vpop.f32.mrf.mxu0  ;;  %v9394_v61 = vpop.f32.mrf.mxu1 }
 0x2a7   : > { %5386 = vmatprep.mubr.f32.mxu0 %v17363_v37  ;;  %9927 = vmatpush3.msra.mxu0 %v11214_v19  ;;  %v14053_v13 = vadd.f32 %v9281_v9, %v3181_v52  ;;  %v9319_v35 = vadd.f32 %v9318_v47, %v9317_v26  ;;  %v17368_v52 = vld [vmem:[#allocation33_spill] sm:$0xff] }
 0x2a8   : > { %5583 = vmatmul.mubr.f32.vlgmr.msra.gmra.mxu1 %v17357_v30  ;;  %9928 = vmatprep.subr.mxu0 %v17045_v29  ;;  %v9320_v3 = vpop.f32.mrf.mxu0  ;;  %v9395_v63 = vpop.f32.mrf.mxu1 }
 0x2a9   : > { %10003 = vmatpush3.msra.mxu1 %v17364_v1  ;;  %5588 = vmatprep.mubr.f32.mxu1 %v17359_v6  ;;  %v3629_v33 = vadd.f32 %v9319_v35, %v13871_v2  ;;  %v9396_v30 = vadd.f32 %v9395_v63, %v9394_v61  ;;  %v17369_v6 = vld [vmem:[#allocation36_spill] sm:$0xff]  ;;  %v17371_v2 = vld [vmem:[#allocation115_spill] sm:$0xff] }
 0x2aa   : > { %5388 = vmatmul.mubr.f32.gmra.mxu0 %v17365_v32  ;;  %10004 = vmatprep.subr.mxu1 %v17366_v31  ;;  %v9321_v26 = vpop.f32.mrf.mxu0  ;;  %v9397_v9 = vpop.f32.mrf.mxu1  ;;  %v17370_v31 = vld [vmem:[#allocation39_spill] sm:$0xff]  ;;  %v2188_v61 = vsel %vm2185_vm0, %v17371_v2, 0.0 }
 0x2ab   : > { %5393 = vmatprep.mubr.f32.mxu0 %v17367_v40  ;;  %10005 = vmatpush3.msra.mxu1 %v17368_v52  ;;  %v9322_v47 = vadd.f32 %v9321_v26, %v9320_v3  ;;  %v3831_v1 = vadd.f32 %v9396_v30, %v3622_v45  ;;  %v17372_v63 = vld [vmem:[#allocation107_spill] sm:$0xff] }
 0x2ac   : > { %5590 = vmatmul.mubr.f32.gmra.mxu1 %v17361_v5  ;;  %10006 = vmatprep.subr.mxu1 %v17369_v6  ;;  %v9323_v35 = vpop.f32.mrf.mxu0  ;;  %v9398_v52 = vpop.f32.mrf.mxu1 }
 0x2ad   : > { %5595 = vmatprep.mubr.f32.mxu1 %v17363_v37  ;;  %10007 = vmatpush3.msra.mxu1 %v17370_v31  ;;  %v3636_v5 = vadd.f32 %v9322_v47, %v13884_v4  ;;  %v14076_v3 = vsel %vm3939_vm1, %v3831_v1, %v2188_v61  ;;  %v9399_v45 = vadd.f32 %v9398_v52, %v9397_v9  ;;  %v17375_v37 = vld [vmem:[#allocation124_spill] sm:$0xff]  ;;  %v17376_v4 = vld [vmem:[#allocation53_spill] sm:$0xff]  ;;  %v17378_v1 = vld [vmem:[#allocation7_spill] sm:$0xff] }
 0x2ae   : > { %5395 = vmatmul.mubr.f32.gmra.mxu0 %v17372_v63  ;;  %10008 = vmatprep.subr.mxu1 %v17373_v46  ;;  %17374 = vst [vmem:[#allocation134_spill] sm:$0xff] %v14076_v3  ;;  %v9324_v30 = vpop.f32.mrf.mxu0  ;;  %v9400_v26 = vpop.f32.mrf.mxu1  ;;  %v17377_v46 = vld [vmem:[#allocation139_spill] sm:$0xff]  ;;  %v17379_v61 = vld [vmem:[#allocation56_spill] sm:$0xff] }
 0x2af   : > { %5400 = vmatprep.mubr.f32.mxu0 %v17375_v37  ;;  %9929 = vmatpush3.msra.mxu0 %v17282_v15  ;;  %v9325_v6 = vadd.f32 %v9324_v30, %v9323_v35  ;;  %v3838_v31 = vadd.f32 %v9399_v45, %v3629_v33  ;;  %v2189_v9 = vsel %vm2185_vm0, %v17377_v46, 0.0  ;;  %v17382_v52 = vld [vmem:[#allocation11_spill] sm:$0xff] }
 0x2b0   : > { %5597 = vmatmul.mubr.f32.gmra.mxu1 %v17365_v32  ;;  %9930 = vmatprep.subr.mxu0 %v17284_v34  ;;  %v9326_v47 = vpop.f32.mrf.mxu0  ;;  %v9401_v2 = vpop.f32.mrf.mxu1 }
 0x2b1   : > { %5602 = vmatprep.mubr.f32.mxu1 %v17367_v40  ;;  %10009 = vmatpush3.msra.mxu1 %v17376_v4  ;;  %v3643_v32 = vadd.f32 %v9325_v6, %v13897_v41  ;;  %v14092_v35 = vsel %vm3939_vm1, %v3838_v31, %v2189_v9  ;;  %v9402_v33 = vadd.f32 %v9401_v2, %v9400_v26  ;;  %v17381_v40 = vld [vmem:[#allocation147_spill] sm:$0xff]  ;;  %v17383_v4 = vld [vmem:[#allocation13_spill] sm:$0xff]  ;;  %v17385_v6 = vld [vmem:[#allocation6_spill] sm:$0xff] }
 0x2b2   : > { %5402 = vmatmul.mubr.f32.gmra.mxu0 %v17378_v1  ;;  %10010 = vmatprep.subr.mxu1 %v17379_v61  ;;  %17380 = vst [vmem:[#allocation154_spill] sm:$0xff] %v14092_v35  ;;  %v9327_v45 = vpop.f32.mrf.mxu0  ;;  %v9403_v30 = vpop.f32.mrf.mxu1  ;;  %v17384_v41 = vld [vmem:[#allocation59_spill] sm:$0xff]  ;;  %v2190_v26 = vsel %vm2185_vm0, %v17385_v6, 0.0  ;;  %v17386_v9 = vld [vmem:[#allocation149_spill] sm:$0xff]  ;;  %v17387_v61 = vld [vmem:[#allocation62_spill] sm:$0xff] }
 0x2b3   : > { %5407 = vmatprep.mubr.f32.mxu0 %v17381_v40  ;;  %9931 = vmatpush3.msra.mxu0 %v17382_v52  ;;  %v9328_v46 = vadd.f32 %v9327_v45, %v9326_v47  ;;  %v3845_v3 = vadd.f32 %v9402_v33, %v3636_v5  ;;  %v17390_v33 = vld [vmem:[#allocation16_spill] sm:$0xff] }
 0x2b4   : > { %5604 = vmatmul.mubr.f32.gmra.mxu1 %v17372_v63  ;;  %9932 = vmatprep.subr.mxu0 %v17383_v4  ;;  %v9329_v31 = vpop.f32.mrf.mxu0  ;;  %v9404_v2 = vpop.f32.mrf.mxu1 }
 0x2b5   : > { %5609 = vmatprep.mubr.f32.mxu1 %v17375_v37  ;;  %10011 = vmatpush3.msra.mxu1 %v17384_v41  ;;  %v3650_v63 = vadd.f32 %v9328_v46, %v13910_v36  ;;  %v14108_v47 = vsel %vm3939_vm1, %v3845_v3, %v2190_v26  ;;  %v9405_v5 = vadd.f32 %v9404_v2, %v9403_v30  ;;  %v17389_v37 = vld [vmem:[#allocation164_spill] sm:$0xff]  ;;  %v17391_v36 = vld [vmem:[#allocation65_spill] sm:$0xff]  ;;  %v17392_v46 = vld [vmem:[#allocation146_spill] sm:$0xff] }
 0x2b6   : > { %5409 = vmatmul.mubr.f32.gmra.mxu0 %v17386_v9  ;;  %10012 = vmatprep.subr.mxu1 %v17387_v61  ;;  %17388 = vst [vmem:[#allocation157_spill] sm:$0xff] %v14108_v47  ;;  %v9330_v45 = vpop.f32.mrf.mxu0  ;;  %v9406_v41 = vpop.f32.mrf.mxu1  ;;  %v2191_v3 = vsel %vm2185_vm0, %v17392_v46, 0.0  ;;  %v17393_v26 = vld [vmem:[#allocation112_spill] sm:$0xff] }
 0x2b7   : > { %5414 = vmatprep.mubr.f32.mxu0 %v17389_v37  ;;  %9933 = vmatpush3.msra.mxu0 %v17390_v33  ;;  %v9331_v6 = vadd.f32 %v9330_v45, %v9329_v31  ;;  %v3852_v35 = vadd.f32 %v9405_v5, %v3643_v32  ;;  %v17394_v61 = vld [vmem:[#allocation68_spill] sm:$0xff] }
 0x2b8   : > { %5611 = vmatmul.mubr.f32.gmra.mxu1 %v17378_v1  ;;  %9934 = vmatprep.subr.mxu0 %v17299_v55  ;;  %v9332_v30 = vpop.f32.mrf.mxu0  ;;  %v9407_v2 = vpop.f32.mrf.mxu1 }
 0x2b9   : > { %5616 = vmatprep.mubr.f32.mxu1 %v17381_v40  ;;  %10013 = vmatpush3.msra.mxu1 %v17391_v36  ;;  %v3657_v1 = vadd.f32 %v9331_v6, %v13923_v23  ;;  %v14124_v31 = vsel %vm3939_vm1, %v3852_v35, %v2191_v3  ;;  %v9408_v32 = vadd.f32 %v9407_v2, %v9406_v41  ;;  %v17396_v40 = vld [vmem:[#allocation24_spill] sm:$0xff]  ;;  %v17398_v6 = vld [vmem:[#allocation150_spill] sm:$0xff]  ;;  %v17399_v3 = vld [vmem:[#allocation145_spill] sm:$0xff] }
 0x2ba   : > { %5416 = vmatmul.mubr.f32.gmra.mxu0 %v17393_v26  ;;  %10014 = vmatprep.subr.mxu1 %v17394_v61  ;;  %17395 = vst [vmem:[#allocation170_spill] sm:$0xff] %v14124_v31  ;;  %v9333_v5 = vpop.f32.mrf.mxu0  ;;  %v9409_v45 = vpop.f32.mrf.mxu1  ;;  %v17397_v23 = vld [vmem:[#allocation72_spill] sm:$0xff]  ;;  %v2192_v35 = vsel %vm2185_vm0, %v17398_v6, 0.0  ;;  %v17400_v61 = vld [vmem:[#allocation78_spill] sm:$0xff] }
 0x2bb   : > { %5421 = vmatprep.mubr.f32.mxu0 %v17396_v40  ;;  %9935 = vmatpush3.msra.mxu0 %v11302_v44  ;;  %v9334_v36 = vadd.f32 %v9333_v5, %v9332_v30  ;;  %v3859_v46 = vadd.f32 %v9408_v32, %v3650_v63  ;;  %v17403_v32 = vld [vmem:[#allocation29_spill] sm:$0xff] }
 0x2bc   : > { %5618 = vmatmul.mubr.f32.gmra.mxu1 %v17386_v9  ;;  %9936 = vmatprep.subr.mxu0 %v17075_v21  ;;  %v9335_v41 = vpop.f32.mrf.mxu0  ;;  %v9410_v2 = vpop.f32.mrf.mxu1 }
 0x2bd   : > { %5623 = vmatprep.mubr.f32.mxu1 %v17389_v37  ;;  %10015 = vmatpush3.msra.mxu1 %v17397_v23  ;;  %v3664_v9 = vadd.f32 %v9334_v36, %v13936_v10  ;;  %v14140_v30 = vsel %vm3939_vm1, %v3859_v46, %v2192_v35  ;;  %v9411_v63 = vadd.f32 %v9410_v2, %v9409_v45  ;;  %v17402_v37 = vld [vmem:[#allocation155_spill] sm:$0xff]  ;;  %v17404_v10 = vld [vmem:[#allocation82_spill] sm:$0xff] }
 0x2be   : > { %5423 = vmatmul.mubr.f32.gmra.mxu0 %v17399_v3  ;;  %10016 = vmatprep.subr.mxu1 %v17400_v61  ;;  %17401 = vst [vmem:[#allocation177_spill] sm:$0xff] %v14140_v30  ;;  %v9336_v5 = vpop.f32.mrf.mxu0  ;;  %v9412_v23 = vpop.f32.mrf.mxu1  ;;  %v17405_v36 = vld [vmem:[#allocation151_spill] sm:$0xff]  ;;  %v17407_v61 = vld [vmem:[#allocation88_spill] sm:$0xff] }
 0x2bf   : > { %5428 = vmatprep.mubr.f32.mxu0 %v17402_v37  ;;  %9937 = vmatpush3.msra.mxu0 %v17403_v32  ;;  %v9337_v6 = vadd.f32 %v9336_v5, %v9335_v41  ;;  %v3866_v31 = vadd.f32 %v9411_v63, %v3657_v1  ;;  %v2193_v45 = vsel %vm2185_vm0, %v17405_v36, 0.0  ;;  %v17406_v35 = vld [vmem:[#allocation159_spill] sm:$0xff] }
 0x2c0   : > { %5625 = vmatmul.mubr.f32.gmra.mxu1 %v17393_v26  ;;  %9938 = vmatprep.subr.mxu0 %v17312_v59  ;;  %v9338_v46 = vpop.f32.mrf.mxu0  ;;  %v9413_v2 = vpop.f32.mrf.mxu1 }
 0x2c1   : > { %5630 = vmatprep.mubr.f32.mxu1 %v17396_v40  ;;  %10017 = vmatpush3.msra.mxu1 %v17404_v10  ;;  %v3671_v26 = vadd.f32 %v9337_v6, %v13949_v60  ;;  %v14156_v41 = vsel %vm3939_vm1, %v3866_v31, %v2193_v45  ;;  %v9414_v1 = vadd.f32 %v9413_v2, %v9412_v23  ;;  %v17409_v40 = vld [vmem:[#allocation172_spill] sm:$0xff]  ;;  %v17410_v60 = vld [vmem:[#allocation91_spill] sm:$0xff]  ;;  %v17411_v31 = vld [vmem:[#allocation153_spill] sm:$0xff] }
 0x2c2   : > { %5430 = vmatmul.mubr.f32.gmra.mxu0 %v17406_v35  ;;  %10018 = vmatprep.subr.mxu1 %v17407_v61  ;;  %17408 = vst [vmem:[#allocation101_spill] sm:$0xff] %v14156_v41  ;;  %v9339_v63 = vpop.f32.mrf.mxu0  ;;  %v9415_v5 = vpop.f32.mrf.mxu1  ;;  %v2194_v23 = vsel %vm2185_vm0, %v17411_v31, 0.0  ;;  %v17412_v45 = vld [vmem:[#allocation176_spill] sm:$0xff]  ;;  %v17413_v61 = vld [vmem:[#allocation94_spill] sm:$0xff] }
 0x2c3   : > { %5435 = vmatprep.mubr.f32.mxu0 %v17409_v40  ;;  %9939 = vmatpush3.msra.mxu0 %v17087_v11  ;;  %v9340_v10 = vadd.f32 %v9339_v63, %v9338_v46  ;;  %v3873_v36 = vadd.f32 %v9414_v1, %v3664_v9  ;;  %v17415_v46 = vld [vmem:[#allocation179_spill] sm:$0xff]  ;;  %v8375_v1 = vld [vmem:[%s11662_s17 + $0x308] sm:$0xff]  ;;  %v17419_v41 = vld [vmem:[#allocation100_spill] sm:$0xff] }
 0x2c4   : > { %5632 = vmatmul.mubr.f32.gmra.mxu1 %v17399_v3  ;;  %9940 = vmatprep.subr.mxu0 %v17003_v25  ;;  %v9341_v6 = vpop.f32.mrf.mxu0  ;;  %v9416_v2 = vpop.f32.mrf.mxu1 }
 0x2c5   : > { %5637 = vmatprep.mubr.f32.mxu1 %v17402_v37  ;;  %10019 = vmatpush3.msra.mxu1 %v17410_v60  ;;  %v3678_v3 = vadd.f32 %v9340_v10, %v13962_v43  ;;  %v14172_v9 = vsel %vm3939_vm1, %v3873_v36, %v2194_v23  ;;  %v9417_v37 = vadd.f32 %v9416_v2, %v9415_v5  ;;  %v17416_v43 = vld [vmem:[#allocation97_spill] sm:$0xff]  ;;  %v17417_v5 = vld [vmem:[#allocation163_spill] sm:$0xff]  ;;  %v17418_v2 = vld [vmem:[#allocation180_spill] sm:$0xff] }
 0x2c6   : > { %5437 = vmatmul.mubr.f32.gmra.mxu0 %v17412_v45  ;;  %10020 = vmatprep.subr.mxu1 %v17413_v61  ;;  %17414 = vst [vmem:[#allocation140_spill] sm:$0xff] %v14172_v9  ;;  %v9342_v63 = vpop.f32.mrf.mxu0  ;;  %v9418_v60 = vpop.f32.mrf.mxu1  ;;  %v8374_v10 = vld [vmem:[%s11662_s17 + $0x300] sm:$0xff]  ;;  %v2195_v36 = vsel %vm2185_vm0, %v17417_v5, 0.0 }
 0x2c7   : > { %5442 = vmatprep.mubr.f32.mxu0 %v17415_v46  ;;  %9941 = vmatpush3.msra.mxu0 %v16650_v54  ;;  %v9343_v31 = vadd.f32 %v9342_v63, %v9341_v6  ;;  %v3880_v61 = vadd.f32 %v9417_v37, %v3671_v26  ;;  %v17422_v37 = vld [vmem:[#allocation182_spill] sm:$0xff]  ;;  %v8377_v63 = vld [vmem:[%s11662_s17 + $0x318] sm:$0xff] }
 0x2c8   : > { %5639 = vmatmul.mubr.f32.gmra.mxu1 %v17406_v35  ;;  %9942 = vmatprep.subr.mxu0 %v16653_v28  ;;  %v9344_v23 = vpop.f32.mrf.mxu0  ;;  %v9419_v9 = vpop.f32.mrf.mxu1  ;;  %v14187_v35 = vand.u32 4294901760, %v8375_v1  ;;  %v17452_v28 = vld [vmem:[#allocation193_spill] sm:$0xff] }
 0x2c9   : > { %5644 = vmatprep.mubr.f32.mxu1 %v17409_v40  ;;  %10021 = vmatpush3.msra.mxu1 %v17416_v43  ;;  %v3685_v6 = vadd.f32 %v9343_v31, %v13975_v39  ;;  %v14192_v26 = vsel %vm3939_vm1, %v3880_v61, %v2195_v36  ;;  %v9420_v40 = vadd.f32 %v9419_v9, %v9418_v60  ;;  %v17424_v9 = vld [vmem:[#allocation104_spill] sm:$0xff] }
 0x2ca   : > { %5444 = vmatmul.mubr.f32.gmra.mxu0 %v17418_v2  ;;  %10022 = vmatprep.subr.mxu1 %v17419_v41  ;;  %17420 = vst [vmem:[#allocation8_spill] sm:$0xff] %v14187_v35  ;;  %17421 = vst [vmem:[#allocation162_spill] sm:$0xff] %v14192_v26  ;;  %v9345_v43 = vpop.f32.mrf.mxu0  ;;  %v9421_v5 = vpop.f32.mrf.mxu1  ;;  %v14199_v41 = vand.u32 4294901760, %v8374_v10  ;;  %v17425_v60 = vld [vmem:[#allocation96_spill] sm:$0xff]  ;;  %v17426_v26 = vld [vmem:[#allocation185_spill] sm:$0xff]  ;;  %v14209_v47 = vsub.f32 %v8375_v1, %v14187_v35 }
 0x2cb   : > { %5449 = vmatprep.mubr.f32.mxu0 %v17422_v37  ;;  %9943 = vmatpush3.msra.mxu0 %v16655_v8  ;;  %v9346_v39 = vadd.f32 %v9345_v43, %v9344_v23  ;;  %v3887_v31 = vadd.f32 %v9420_v40, %v3678_v3  ;;  %v2196_v61 = vsel %vm2185_vm0, %v17425_v60, 0.0  ;;  %v14211_v23 = vand.u32 4294901760, %v8377_v63  ;;  %v8376_v3 = vld [vmem:[%s11662_s17 + $0x310] sm:$0xff]  ;;  %v8379_v60 = vld [vmem:[%s11662_s17 + $0x328] sm:$0xff] }
 0x2cc   : > { %5646 = vmatmul.mubr.f32.gmra.mxu1 %v17412_v45  ;;  %9944 = vmatprep.subr.mxu0 %v17235_v49  ;;  %17423 = vst [vmem:[#allocation9_spill] sm:$0xff] %v14199_v41  ;;  %v9347_v36 = vpop.f32.mrf.mxu0  ;;  %v9422_v30 = vpop.f32.mrf.mxu1  ;;  %v17427_v45 = vld [vmem:[#allocation110_spill] sm:$0xff]  ;;  %17428 = vst [vmem:[#allocation166_spill] sm:$0xff] %v14209_v47  ;;  %v17437_v49 = vld [vmem:[#allocation117_spill] sm:$0xff] }
 0x2cd   : > { %5651 = vmatprep.mubr.f32.mxu1 %v17415_v46  ;;  %10023 = vmatpush3.msra.mxu1 %v17424_v9  ;;  %17429 = vst [vmem:[#allocation167_spill] sm:$0xff] %v14211_v23  ;;  %v3692_v46 = vadd.f32 %v9346_v39, %v13988_v24  ;;  %v14217_v40 = vsel %vm3939_vm1, %v3887_v31, %v2196_v61  ;;  %v17431_v9 = vld [vmem:[#allocation187_spill] sm:$0xff]  ;;  %v8378_v31 = vld [vmem:[%s11662_s17 + $0x320] sm:$0xff]  ;;  %v17435_v61 = vld [vmem:[#allocation144_spill] sm:$0xff] }
 0x2ce   : > { %5451 = vmatmul.mubr.f32.gmra.mxu0 %v17426_v26  ;;  %10024 = vmatprep.subr.mxu1 %v17427_v45  ;;  %17430 = vst [vmem:[#allocation128_spill] sm:$0xff] %v14217_v40  ;;  %v9423_v43 = vadd.f32 %v9422_v30, %v9421_v5  ;;  %v9348_v45 = vpop.f32.mrf.mxu0  ;;  %v9424_v51 = vpop.f32.mrf.mxu1  ;;  %v14225_v24 = vsub.f32 %v8374_v10, %v14199_v41  ;;  %v17433_v30 = vld [vmem:[#allocation114_spill] sm:$0xff]  ;;  %v14229_v5 = vand.u32 4294901760, %v8376_v3  ;;  %v2197_v40 = vsel %vm2185_vm0, %v17435_v61, 0.0  ;;  %v17441_v61 = vld [vmem:[#allocation191_spill] sm:$0xff] }
 0x2cf   : > { %5456 = vmatprep.mubr.f32.mxu0 %v17431_v9  ;;  %9945 = vmatpush3.msra.mxu0 %v17240_v38  ;;  %v9349_v1 = vadd.f32 %v9348_v45, %v9347_v36  ;;  %v17436_v38 = vld [vmem:[#allocation189_spill] sm:$0xff]  ;;  %v8381_v36 = vld [vmem:[%s11662_s17 + $0x338] sm:$0xff]  ;;  %v14254_v8 = vand.u32 4294901760, %v8378_v31 }
 0x2d0   : > { %5653 = vmatmul.mubr.f32.gmra.mxu1 %v17418_v2  ;;  %9946 = vmatprep.subr.mxu0 %v17242_v42  ;;  %17432 = vst [vmem:[#allocation143_spill] sm:$0xff] %v14225_v24  ;;  %v3894_v39 = vadd.f32 %v9423_v43, %v3685_v6  ;;  %17434 = vst [vmem:[#allocation152_spill] sm:$0xff] %v14229_v5  ;;  %v9350_v2 = vpop.f32.mrf.mxu0  ;;  %v9425_v42 = vpop.f32.mrf.mxu1  ;;  %v14239_v6 = vsub.f32 %v8377_v63, %v14211_v23 }
 0x2d1   : > { %5658 = vmatprep.mubr.f32.mxu1 %v17422_v37  ;;  %10025 = vmatpush3.msra.mxu1 %v17433_v30  ;;  %v14241_v37 = vand.u32 4294901760, %v8379_v60  ;;  %v3699_v43 = vadd.f32 %v9349_v1, %v14001_v14  ;;  %v9426_v30 = vadd.f32 %v9425_v42, %v9424_v51  ;;  %17442 = vst [vmem:[#allocation178_spill] sm:$0xff] %v14254_v8  ;;  %v14261_v51 = vand.u32 4294901760, %v8381_v36 }
 0x2d2   : > { %5458 = vmatmul.mubr.f32.gmra.mxu0 %v17436_v38  ;;  %10026 = vmatprep.subr.mxu1 %v17437_v49  ;;  %17438 = vst [vmem:[#allocation158_spill] sm:$0xff] %v14239_v6  ;;  %v14247_v45 = vsel %vm3939_vm1, %v3894_v39, %v2197_v40  ;;  %v9351_v49 = vpop.f32.mrf.mxu0  ;;  %v9427_v10 = vpop.f32.mrf.mxu1  ;;  %v17443_v40 = vld [vmem:[#allocation118_spill] sm:$0xff]  ;;  %v14259_v42 = vsub.f32 %v8376_v3, %v14229_v5  ;;  %v8380_v39 = vld [vmem:[%s11662_s17 + $0x330] sm:$0xff] }
 0x2d3   : > { %17439 = vst [vmem:[#allocation161_spill] sm:$0xff] %v14241_v37  ;;  %17440 = vst [vmem:[#allocation174_spill] sm:$0xff] %v14247_v45  ;;  %5463 = vmatprep.mubr.f32.mxu0 %v17441_v61  ;;  %9947 = vmatpush3.msra.mxu0 %v17246_v48  ;;  %v9352_v14 = vadd.f32 %v9351_v49, %v9350_v2  ;;  %v3901_v1 = vadd.f32 %v9426_v30, %v3692_v46  ;;  %v17448_v46 = vld [vmem:[#allocation121_spill] sm:$0xff]  ;;  %v17456_v3 = vld [vmem:[#allocation175_spill] sm:$0xff] }
 0x2d4   : > { %5660 = vmatmul.mubr.f32.gmra.mxu1 %v17426_v26  ;;  %9948 = vmatprep.subr.mxu0 %v17247_v57  ;;  %17444 = vst [vmem:[#allocation181_spill] sm:$0xff] %v14259_v42  ;;  %17445 = vst [vmem:[#allocation183_spill] sm:$0xff] %v14261_v51  ;;  %v17446_v26 = vld [vmem:[#allocation160_spill] sm:$0xff]  ;;  %v9353_v63 = vpop.f32.mrf.mxu0  ;;  %v9428_v2 = vpop.f32.mrf.mxu1  ;;  %v14276_v49 = vsub.f32 %v8379_v60, %v14241_v37  ;;  %v17453_v60 = vand.u32 4294901760, %v14225_v24 }
 0x2d5   : > { %5665 = vmatprep.mubr.f32.mxu1 %v17431_v9  ;;  %10027 = vmatpush3.msra.mxu1 %v17443_v40  ;;  %v2198_v45 = vsel %vm2185_vm0, %v17446_v26, 0.0  ;;  %v17447_v57 = vld [vmem:[#allocation192_spill] sm:$0xff]  ;;  %v17449_v9 = vand.u32 4294901760, %v14209_v47  ;;  %v3706_v40 = vadd.f32 %v9352_v14, %v14014_v62  ;;  %v9429_v48 = vadd.f32 %v9428_v2, %v9427_v10 }
 0x2d6   : > { %5465 = vmatmul.mubr.f32.gmra.mxu0 %v17447_v57  ;;  %10028 = vmatprep.subr.mxu1 %v17448_v46  ;;  %17450 = vst [vmem:[#allocation184_spill] sm:$0xff] %v14276_v49  ;;  %v14281_v26 = vsel %vm3939_vm1, %v3901_v1, %v2198_v45  ;;  %v8383_v46 = vld [vmem:[%s11662_s17 + $0x348] sm:$0xff]  ;;  %v9354_v54 = vpop.f32.mrf.mxu0  ;;  %v14291_v62 = vsub.f32 %v14225_v24, %v17453_v60  ;;  %v14296_v10 = vand.u32 4294901760, %v8380_v39 }
 0x2d7   : > { %v14272_v30 = vsub.f32 %v14209_v47, %v17449_v9  ;;  %17451 = vst [vmem:[#allocation186_spill] sm:$0xff] %v14281_v26  ;;  %5470 = vmatprep.mubr.f32.mxu0 %v17452_v28  ;;  %9949 = vmatpush3.msra.mxu0 %v17251_v22  ;;  %v9430_v9 = vpop.f32.mrf.mxu1  ;;  %v14294_v45 = vsub.f32 %v8378_v31, %v14254_v8  ;;  %v2199_v31 = vsel %vm2185_vm0, %v17456_v3, 0.0  ;;  %v17457_v26 = vld [vmem:[#allocation195_spill] sm:$0xff]  ;;  %v17462_v47 = vld [vmem:[#allocation196_spill] sm:$0xff] }
 0x2d8   : > { %5667 = vmatmul.mubr.f32.gmra.mxu1 %v17436_v38  ;;  %9950 = vmatprep.subr.mxu0 %v17254_v53  ;;  %17454 = vst [vmem:[#allocation188_spill] sm:$0xff] %v14296_v10  ;;  %v9355_v14 = vadd.f32 %v9354_v54, %v9353_v63  ;;  %v3908_v1 = vadd.f32 %v9429_v48, %v3699_v43  ;;  %v9356_v60 = vpop.f32.mrf.mxu0  ;;  %v17458_v48 = vld [vmem:[#allocation130_spill] sm:$0xff]  ;;  %v17459_v43 = vand.u32 4294901760, %v14239_v6 }
 0x2d9   : > { %5672 = vmatprep.mubr.f32.mxu1 %v17441_v61  ;;  %9951 = vmatpush3.msra.mxu0 %v17255_v7  ;;  %v14302_v2 = vsub.f32 %v8381_v36, %v14261_v51  ;;  %v9431_v54 = vpop.f32.mrf.mxu1  ;;  %v14315_v36 = vand.u32 4294901760, %v8383_v46  ;;  %v8382_v7 = vld [vmem:[%s11662_s17 + $0x340] sm:$0xff] }
 0x2da   : > { %5472 = vmatmul.mubr.f32.gmra.mxu0 %v17457_v26  ;;  %10029 = vmatpush3.msra.mxu1 %v17458_v48  ;;  %v14312_v61 = vsub.f32 %v14239_v6, %v17459_v43  ;;  %v3713_v38 = vadd.f32 %v9355_v14, %v14027_v20  ;;  %v14320_v3 = vsel %vm3939_vm1, %v3908_v1, %v2199_v31  ;;  %v5845_v48 = vand.u32 4294901760, %v14272_v30  ;;  %v8385_v43 = vld [vmem:[%s11662_s17 + $0x358] sm:$0xff]  ;;  %v9357_v53 = vpop.f32.mrf.mxu0 }
 0x2db   : > { %17455 = vst [vmem:[#allocation190_spill] sm:$0xff] %v14302_v2  ;;  %17460 = vst [vmem:[#allocation194_spill] sm:$0xff] %v14315_v36  ;;  %v9432_v24 = vadd.f32 %v9431_v54, %v9430_v9  ;;  %5477 = vmatprep.mubr.f32.mxu0 %v17462_v47  ;;  %9952 = vmatprep.subr.mxu0 %v17257_v16  ;;  %v17463_v6 = vld [vmem:[#allocation132_spill] sm:$0xff]  ;;  %v9433_v20 = vpop.f32.mrf.mxu1  ;;  %v5851_v9 = vand.u32 4294901760, %v14291_v62  ;;  %v14335_v1 = vsub.f32 %v8380_v39, %v14296_v10  ;;  %v17466_v16 = vld [vmem:[#allocation198_spill] sm:$0xff] }
 0x2dc   : > { %17461 = vst [vmem:[#allocation197_spill] sm:$0xff] %v14320_v3  ;;  %v2200_v63 = vsel %vm2185_vm0, %v17463_v6, 0.0  ;;  %5674 = vmatmul.mubr.f32.gmra.mxu1 %v17447_v57  ;;  %9953 = vmatpush3.msra.mxu0 %v17356_v58  ;;  %v9358_v30 = vadd.f32 %v9357_v53, %v9356_v60  ;;  %v17464_v54 = vld [vmem:[#allocation136_spill] sm:$0xff]  ;;  %v17465_v6 = vand.u32 4294901760, %v14259_v42  ;;  %v8384_v58 = vld [vmem:[%s11662_s17 + $0x350] sm:$0xff]  ;;  %v17467_v39 = vld [vmem:[#allocation137_spill] sm:$0xff] }
 0x2dd   : > { %v3915_v31 = vadd.f32 %v9432_v24, %v3706_v40  ;;  %5679 = vmatprep.mubr.f32.mxu1 %v17452_v28  ;;  %10030 = vmatprep.subr.mxu1 %v17464_v54  ;;  %v9359_v62 = vpop.f32.mrf.mxu0  ;;  %v9434_v14 = vpop.f32.mrf.mxu1  ;;  %v17468_v53 = vand.u32 4294901760, %v14276_v49  ;;  %v14352_v24 = vsub.f32 %v8383_v46, %v14315_v36  ;;  %v14354_v40 = vand.u32 4294901760, %v8382_v7 }
 0x2de   : > { %v5865_v3 = vsub.f32 %v14259_v42, %v17465_v6  ;;  %5479 = vmatmul.mubr.f32.gmra.mxu0 %v17466_v16  ;;  %10031 = vmatpush3.msra.mxu1 %v17467_v39  ;;  %v14356_v60 = vand.u32 4294901760, %v8385_v43  ;;  %v3720_v54 = vadd.f32 %v9358_v30, %v14040_v0  ;;  %v9435_v57 = vadd.f32 %v9434_v14, %v9433_v20  ;;  %v17473_v42 = vld [vmem:[#allocation138_spill] sm:$0xff]  ;;  %v17478_v30 = vld [vmem:[#allocation141_spill] sm:$0xff] }
 0x2df   : > { %v14349_v28 = vsub.f32 %v14276_v49, %v17468_v53  ;;  %17469 = vst [vmem:[#allocation199_spill] sm:$0xff] %v14352_v24  ;;  %17470 = vst [vmem:[#allocation165_spill] sm:$0xff] %v14354_v40  ;;  %v14361_v6 = vsel %vm3939_vm1, %v3915_v31, %v2200_v63  ;;  %5846 = vmatprep.mubr.f32.mxu0 %v5845_v48  ;;  %v5860_v39 = vand.u32 4294901760, %v14312_v61  ;;  %10032 = vmatprep.subr.mxu1 %v17473_v42  ;;  %v8387_v53 = vld [vmem:[%s11662_s17 + $0x368] sm:$0xff]  ;;  %v17474_v49 = vld [vmem:[#allocation156_spill] sm:$0xff]  ;;  %v9360_v22 = vpop.f32.mrf.mxu0  ;;  %v9436_v25 = vpop.f32.mrf.mxu1 }
 0x2e0   : > { %17471 = vst [vmem:[#allocation5_spill] sm:$0xff] %v14356_v60  ;;  %17472 = vst [vmem:[#allocation168_spill] sm:$0xff] %v14361_v6  ;;  %v2201_v46 = vsel %vm2185_vm0, %v17474_v49, 0.0  ;;  %5681 = vmatmul.mubr.f32.gmra.mxu1 %v17457_v26  ;;  %v17475_v0 = vld [vmem:[#allocation10_spill] sm:$0xff]  ;;  %v17476_v63 = vand.u32 4294901760, %v14294_v45  ;;  %v14377_v42 = vand.u32 4294901760, %v8384_v58  ;;  %v9361_v48 = vadd.f32 %v9360_v22, %v9359_v62 }
 0x2e1   : > { %10082 = vmatprep.subr.mxu0 %v17475_v0  ;;  %v3922_v14 = vadd.f32 %v9435_v57, %v3713_v38  ;;  %5686 = vmatprep.mubr.f32.mxu1 %v17462_v47  ;;  %v5866_v49 = vand.u32 4294901760, %v5865_v3  ;;  %v17479_v26 = vand.u32 4294901760, %v14302_v2  ;;  %v9474_v0 = vpop.f32.mrf.mxu0  ;;  %v14389_v22 = vsub.f32 %v8382_v7, %v14354_v40  ;;  %v8386_v3 = vld [vmem:[%s11662_s17 + $0x360] sm:$0xff]  ;;  %v8389_v7 = vld [vmem:[%s11662_s17 + $0x378] sm:$0xff] }
 0x2e2   : > { %v14374_v20 = vsub.f32 %v14294_v45, %v17476_v63  ;;  %17477 = vst [vmem:[#allocation27_spill] sm:$0xff] %v14377_v42  ;;  %10033 = vmatpush3.msra.mxu1 %v17478_v30  ;;  %5852 = vmatmul.mubr.f32.vlgmr.msra.gmra.mxu0 %v5851_v9  ;;  %v9437_v63 = vpop.f32.mrf.mxu1  ;;  %v14392_v47 = vsub.f32 %v8385_v43, %v14356_v60  ;;  %v14394_v38 = vand.u32 4294901760, %v8387_v53  ;;  %v5875_v30 = vand.u32 4294901760, %v14349_v28  ;;  %v17484_v61 = vld [vmem:[#allocation169_spill] sm:$0xff] }
 0x2e3   : > { %v14384_v31 = vsub.f32 %v14302_v2, %v17479_v26  ;;  %10162 = vmatprep.subr.mxu1 %v17354_v50  ;;  %v3727_v57 = vadd.f32 %v9361_v48, %v14053_v13  ;;  %v14400_v62 = vsel %vm3939_vm1, %v3922_v14, %v2201_v46  ;;  %v9438_v9 = vadd.f32 %v9437_v63, %v9436_v25  ;;  %v17483_v26 = vld [vmem:[#allocation12_spill] sm:$0xff]  ;;  %v9475_v6 = vpop.f32.mrf.mxu0  ;;  %v17485_v13 = vld [vmem:[#allocation14_spill] sm:$0xff]  ;;  %v17488_v14 = vld [vmem:[#allocation17_spill] sm:$0xff] }
 0x2e4   : > { %17480 = vst [vmem:[#allocation102_spill] sm:$0xff] %v14392_v47  ;;  %17481 = vst [vmem:[#allocation142_spill] sm:$0xff] %v14394_v38  ;;  %5861 = vmatprep.mubr.f32.mxu0 %v5860_v39  ;;  %10083 = vmatpush3.msra.mxu0 %v17483_v26  ;;  %v2202_v43 = vsel %vm2185_vm0, %v17484_v61, 0.0  ;;  %v9439_v2 = vpop.f32.mrf.mxu1  ;;  %v17486_v46 = vand.u32 4294901760, %v14335_v1  ;;  %v14416_v28 = vsub.f32 %v8384_v58, %v14377_v42  ;;  %v5881_v61 = vand.u32 4294901760, %v14374_v20 }
 0x2e5   : > { %17482 = vst [vmem:[#allocation148_spill] sm:$0xff] %v14400_v62  ;;  %5688 = vmatmul.mubr.f32.gmra.mxu1 %v17466_v16  ;;  %10084 = vmatprep.subr.mxu0 %v17485_v13  ;;  %v3929_v39 = vadd.f32 %v9438_v9, %v3720_v54  ;;  %v9476_v48 = vadd.f32 %v9475_v6, %v9474_v0  ;;  %v14421_v16 = vand.u32 4294901760, %v8386_v3  ;;  %v9477_v63 = vpop.f32.mrf.mxu0  ;;  %v17490_v13 = vld [vmem:[#allocation21_spill] sm:$0xff]  ;;  %v14431_v20 = vand.u32 4294901760, %v8389_v7  ;;  %v8388_v0 = vld [vmem:[%s11662_s17 + $0x370] sm:$0xff] }
 0x2e6   : > { %v14413_v25 = vsub.f32 %v14335_v1, %v17486_v46  ;;  %17487 = vst [vmem:[#allocation30_spill] sm:$0xff] %v14416_v28  ;;  %6307 = vmatprep.mubr.f32.mxu1 %v14187_v35  ;;  %10085 = vmatpush3.msra.mxu0 %v17488_v14  ;;  %v9440_v26 = vpop.f32.mrf.mxu1  ;;  %v17491_v46 = vand.u32 4294901760, %v14352_v24  ;;  %v14429_v6 = vsub.f32 %v8387_v53, %v14394_v38  ;;  %v5890_v14 = vand.u32 4294901760, %v14384_v31  ;;  %v17496_v54 = vld [vmem:[#allocation135_spill] sm:$0xff] }
 0x2e7   : > { %17489 = vst [vmem:[#allocation171_spill] sm:$0xff] %v14421_v16  ;;  %5867 = vmatmul.mubr.f32.gmra.mxu0 %v5866_v49  ;;  %10086 = vmatprep.subr.mxu0 %v17490_v13  ;;  %17493 = vst [vmem:[#allocation173_spill] sm:$0xff] %v14431_v20  ;;  %v14436_v9 = vsel %vm3939_vm1, %v3929_v39, %v2202_v43  ;;  %v9441_v49 = vadd.f32 %v9440_v26, %v9439_v2  ;;  %v17495_v13 = vld [vmem:[#allocation23_spill] sm:$0xff]  ;;  %v2203_v53 = vsel %vm2185_vm0, %v17496_v54, 0.0  ;;  %v9478_v62 = vpop.f32.mrf.mxu0  ;;  %v17497_v43 = vld [vmem:[#allocation26_spill] sm:$0xff] }
 0x2e8   : > { %v5904_v58 = vsub.f32 %v14352_v24, %v17491_v46  ;;  %17492 = vst [vmem:[#allocation31_spill] sm:$0xff] %v14429_v6  ;;  %17494 = vst [vmem:[#allocation33_spill] sm:$0xff] %v14436_v9  ;;  %5876 = vmatprep.mubr.f32.mxu0 %v5875_v30  ;;  %10087 = vmatpush3.msra.mxu0 %v17495_v13  ;;  %v16341_v46 = vand.u32 4294901760, %v14392_v47  ;;  %v9554_v35 = vpop.f32.mrf.mxu1  ;;  %v5896_v24 = vand.u32 4294901760, %v14413_v25  ;;  %v8391_v30 = vld [vmem:[%s11662_s17 + $0x388] sm:$0xff]  ;;  %v14454_v54 = vand.u32 4294901760, %v8388_v0 }
 0x2e9   : > { %6309 = vmatmul.mubr.f32.vlgmr.msra.gmra.mxu1 %v14199_v41  ;;  %10088 = vmatprep.subr.mxu0 %v17497_v43  ;;  %v3936_v31 = vadd.f32 %v9441_v49, %v3727_v57  ;;  %v9479_v39 = vadd.f32 %v9478_v62, %v9477_v63  ;;  %v14452_v26 = vsub.f32 %v8386_v3, %v14421_v16  ;;  %v9480_v13 = vpop.f32.mrf.mxu0  ;;  %v17500_v2 = vand.u32 4294901760, %v14389_v22 }
 0x2ea   : > { %10163 = vmatpush3.msra.mxu1 %v11197_v12  ;;  %6314 = vmatprep.mubr.f32.mxu1 %v14211_v23  ;;  %17499 = vst [vmem:[#allocation39_spill] sm:$0xff] %v14454_v54  ;;  %v9555_v25 = vpop.f32.mrf.mxu1  ;;  %v5905_v43 = vand.u32 4294901760, %v5904_v58  ;;  %v14462_v63 = vsub.f32 %v8389_v7, %v14431_v20  ;;  %v14472_v58 = vand.u32 4294901760, %v8391_v30  ;;  %v17504_v7 = vand.u32 4294901760, %v14416_v28 }
 0x2eb   : > { %17498 = vst [vmem:[#allocation36_spill] sm:$0xff] %v14452_v26  ;;  %5882 = vmatmul.mubr.f32.gmra.mxu0 %v5881_v61  ;;  %10164 = vmatprep.subr.mxu1 %v16687_v56  ;;  %v5910_v57 = vsub.f32 %v14389_v22, %v17500_v2  ;;  %v14466_v3 = vsel %vm3939_vm1, %v3936_v31, %v2203_v53  ;;  %v8390_v2 = vld [vmem:[%s11662_s17 + $0x380] sm:$0xff]  ;;  %v9481_v9 = vpop.f32.mrf.mxu0 }
 0x2ec   : > { %17501 = vst [vmem:[#allocation115_spill] sm:$0xff] %v14462_v63  ;;  %17502 = vst [vmem:[#allocation107_spill] sm:$0xff] %v14466_v3  ;;  %v9556_v49 = vadd.f32 %v9555_v25, %v9554_v35  ;;  %5891 = vmatprep.mubr.f32.mxu0 %v5890_v14  ;;  %10165 = vmatpush3.msra.mxu1 %v11210_v17  ;;  %v5919_v61 = vsub.f32 %v14392_v47, %v16341_v46  ;;  %v9557_v62 = vpop.f32.mrf.mxu1  ;;  %v8393_v14 = vld [vmem:[%s11662_s17 + $0x398] sm:$0xff] }
 0x2ed   : > { %17503 = vst [vmem:[#allocation43_spill] sm:$0xff] %v14472_v58  ;;  %6316 = vmatmul.mubr.f32.gmra.mxu1 %v14229_v5  ;;  %10166 = vmatprep.subr.mxu1 %v11212_v18  ;;  %v14480_v35 = vsub.f32 %v14416_v28, %v17504_v7  ;;  %v9482_v53 = vadd.f32 %v9481_v9, %v9480_v13  ;;  %v5911_v5 = vand.u32 4294901760, %v5910_v57  ;;  %v17506_v9 = vand.u32 4294901760, %v14429_v6  ;;  %v17511_v13 = vld [vmem:[#allocation37_spill] sm:$0xff] }
 0x2ee   : > { %v14483_v31 = vadd.f32 %v9556_v49, %v9476_v48  ;;  %6321 = vmatprep.mubr.f32.mxu1 %v14241_v37  ;;  %10167 = vmatpush3.msra.mxu1 %v11214_v19  ;;  %v14489_v46 = vsub.f32 %v8388_v0, %v14454_v54  ;;  %v9483_v3 = vpop.f32.mrf.mxu0  ;;  %v9558_v27 = vpop.f32.mrf.mxu1  ;;  %v14496_v49 = vand.u32 4294901760, %v8390_v2  ;;  %v5920_v25 = vand.u32 4294901760, %v5919_v61  ;;  %v17508_v0 = vld [vmem:[#allocation34_spill] sm:$0xff]  ;;  %v8392_v37 = vld [vmem:[%s11662_s17 + $0x390] sm:$0xff] }
 0x2ef   : > { %5897 = vmatmul.mubr.f32.gmra.mxu0 %v5896_v24  ;;  %10168 = vmatprep.subr.mxu1 %v17045_v29  ;;  %v5934_v48 = vsub.f32 %v14429_v6, %v17506_v9  ;;  %v9559_v7 = vadd.f32 %v9558_v27, %v9557_v62  ;;  %v14500_v24 = vsub.f32 %v8391_v30, %v14472_v58  ;;  %v14502_v57 = vand.u32 4294901760, %v8393_v14  ;;  %v8395_v27 = vld [vmem:[%s11662_s17 + $0x3a8] sm:$0xff] }
 0x2f0   : > { %17505 = vst [vmem:[#allocation124_spill] sm:$0xff] %v14489_v46  ;;  %17507 = vst [vmem:[#allocation53_spill] sm:$0xff] %v14496_v49  ;;  %5906 = vmatprep.mubr.f32.mxu0 %v5905_v43  ;;  %10089 = vmatpush3.msra.mxu0 %v17508_v0  ;;  %v9484_v23 = vpop.f32.mrf.mxu0  ;;  %v9560_v41 = vpop.f32.mrf.mxu1  ;;  %v5926_v9 = vand.u32 4294901760, %v14480_v35  ;;  %v17512_v30 = vand.u32 4294901760, %v14452_v26  ;;  %v17516_v0 = vld [vmem:[#allocation41_spill] sm:$0xff] }
 0x2f1   : > { %17509 = vst [vmem:[#allocation139_spill] sm:$0xff] %v14500_v24  ;;  %17510 = vst [vmem:[#allocation7_spill] sm:$0xff] %v14502_v57  ;;  %6323 = vmatmul.mubr.f32.gmra.mxu1 %v14254_v8  ;;  %10090 = vmatprep.subr.mxu0 %v17511_v13  ;;  %v9485_v43 = vadd.f32 %v9484_v23, %v9483_v3  ;;  %v14509_v62 = vadd.f32 %v9559_v7, %v9479_v39  ;;  %v8394_v8 = vld [vmem:[%s11662_s17 + $0x3a0] sm:$0xff]  ;;  %v5935_v13 = vand.u32 4294901760, %v5934_v48 }
 0x2f2   : > { %6328 = vmatprep.mubr.f32.mxu1 %v14261_v51  ;;  %10169 = vmatpush3.msra.mxu1 %v17282_v15  ;;  %v5940_v61 = vsub.f32 %v14452_v26, %v17512_v30  ;;  %v9486_v6 = vpop.f32.mrf.mxu0  ;;  %v9561_v35 = vpop.f32.mrf.mxu1  ;;  %v17513_v23 = vand.u32 4294901760, %v14462_v63  ;;  %v14523_v3 = vsub.f32 %v8390_v2, %v14496_v49  ;;  %v14525_v7 = vand.u32 4294901760, %v8392_v37  ;;  %v8397_v26 = vld [vmem:[%s11662_s17 + $0x3b8] sm:$0xff]  ;;  %v17519_v2 = vld [vmem:[#allocation45_spill] sm:$0xff] }
 0x2f3   : > { %5912 = vmatmul.mubr.f32.gmra.mxu0 %v5911_v5  ;;  %10170 = vmatprep.subr.mxu1 %v17284_v34  ;;  %v9562_v30 = vadd.f32 %v9561_v35, %v9560_v41  ;;  %v14530_v5 = vsub.f32 %v8393_v14, %v14502_v57  ;;  %v14532_v48 = vand.u32 4294901760, %v8395_v27  ;;  %v17521_v14 = vand.u32 4294901760, %v14489_v46 }
 0x2f4   : > { %v5949_v39 = vsub.f32 %v14462_v63, %v17513_v23  ;;  %17514 = vst [vmem:[#allocation56_spill] sm:$0xff] %v14523_v3  ;;  %17515 = vst [vmem:[#allocation147_spill] sm:$0xff] %v14525_v7  ;;  %5921 = vmatprep.mubr.f32.mxu0 %v5920_v25  ;;  %10091 = vmatpush3.msra.mxu0 %v17516_v0  ;;  %v9487_v28 = vpop.f32.mrf.mxu0  ;;  %v9563_v47 = vpop.f32.mrf.mxu1  ;;  %v14537_v23 = vand.u32 4294901760, %v8394_v8  ;;  %v5941_v0 = vand.u32 4294901760, %v5940_v61  ;;  %v8396_v61 = vld [vmem:[%s11662_s17 + $0x3b0] sm:$0xff] }
 0x2f5   : > { %17517 = vst [vmem:[#allocation11_spill] sm:$0xff] %v14530_v5  ;;  %17518 = vst [vmem:[#allocation59_spill] sm:$0xff] %v14532_v48  ;;  %6330 = vmatmul.mubr.f32.gmra.mxu1 %v14296_v10  ;;  %10092 = vmatprep.subr.mxu0 %v17519_v2  ;;  %v9488_v41 = vadd.f32 %v9487_v28, %v9486_v6  ;;  %v14539_v25 = vadd.f32 %v9562_v30, %v9482_v53  ;;  %v14551_v53 = vand.u32 4294901760, %v8397_v26  ;;  %v8399_v28 = vld [vmem:[%s11662_s17 + $0x3c8] sm:$0xff] }
 0x2f6   : > { %17520 = vst [vmem:[#allocation6_spill] sm:$0xff] %v14537_v23  ;;  %6335 = vmatprep.mubr.f32.mxu1 %v14315_v36  ;;  %10171 = vmatpush3.msra.mxu1 %v17382_v52  ;;  %v5955_v35 = vsub.f32 %v14489_v46, %v17521_v14  ;;  %v9489_v51 = vpop.f32.mrf.mxu0  ;;  %v9564_v10 = vpop.f32.mrf.mxu1  ;;  %v5950_v2 = vand.u32 4294901760, %v5949_v39  ;;  %v14549_v6 = vsub.f32 %v8392_v37, %v14525_v7  ;;  %v17524_v36 = vld [vmem:[#allocation48_spill] sm:$0xff]  ;;  %v17525_v14 = vand.u32 4294901760, %v14500_v24 }
 0x2f7   : > { %5927 = vmatmul.mubr.f32.gmra.mxu0 %v5926_v9  ;;  %10172 = vmatprep.subr.mxu1 %v17383_v4  ;;  %17523 = vst [vmem:[#allocation62_spill] sm:$0xff] %v14551_v53  ;;  %v9565_v30 = vadd.f32 %v9564_v10, %v9563_v47  ;;  %v14560_v46 = vsub.f32 %v8395_v27, %v14532_v48  ;;  %v17527_v4 = vld [vmem:[#allocation51_spill] sm:$0xff]  ;;  %v14572_v27 = vand.u32 4294901760, %v8396_v61 }
 0x2f8   : > { %17522 = vst [vmem:[#allocation149_spill] sm:$0xff] %v14549_v6  ;;  %5936 = vmatprep.mubr.f32.mxu0 %v5935_v13  ;;  %10093 = vmatpush3.msra.mxu0 %v17524_v36  ;;  %v5964_v9 = vsub.f32 %v14500_v24, %v17525_v14  ;;  %v9490_v63 = vpop.f32.mrf.mxu0  ;;  %v9566_v37 = vpop.f32.mrf.mxu1  ;;  %v14566_v10 = vsub.f32 %v8394_v8, %v14537_v23  ;;  %v5956_v13 = vand.u32 4294901760, %v5955_v35  ;;  %v17538_v8 = vand.u32 4294901760, %v14549_v6 }
 0x2f9   : > { %17526 = vst [vmem:[#allocation164_spill] sm:$0xff] %v14560_v46  ;;  %6337 = vmatmul.mubr.f32.gmra.mxu1 %v14354_v40  ;;  %10094 = vmatprep.subr.mxu0 %v17527_v4  ;;  %v9491_v36 = vadd.f32 %v9490_v63, %v9489_v51  ;;  %v14568_v47 = vadd.f32 %v9565_v30, %v9485_v43  ;;  %17529 = vst [vmem:[#allocation146_spill] sm:$0xff] %v14572_v27  ;;  %v17530_v40 = vand.u32 4294901760, %v14523_v3  ;;  %v8398_v43 = vld [vmem:[%s11662_s17 + $0x3c0] sm:$0xff] }
 0x2fa   : > { %17528 = vst [vmem:[#allocation65_spill] sm:$0xff] %v14566_v10  ;;  %6342 = vmatprep.mubr.f32.mxu1 %v14356_v60  ;;  %10173 = vmatpush3.msra.mxu1 %v17390_v33  ;;  %v9492_v14 = vpop.f32.mrf.mxu0  ;;  %v9567_v39 = vpop.f32.mrf.mxu1  ;;  %v14580_v51 = vsub.f32 %v8397_v26, %v14551_v53  ;;  %v14582_v63 = vand.u32 4294901760, %v8399_v28  ;;  %v5965_v30 = vand.u32 4294901760, %v5964_v9  ;;  %v17534_v60 = vand.u32 4294901760, %v14530_v5  ;;  %v17535_v26 = vld [vmem:[#allocation61_spill] sm:$0xff]  ;;  %v8401_v33 = vld [vmem:[%s11662_s17 + $0x3d8] sm:$0xff] }
 0x2fb   : > { %5942 = vmatmul.mubr.f32.gmra.mxu0 %v5941_v0  ;;  %v5970_v4 = vsub.f32 %v14523_v3, %v17530_v40  ;;  %10174 = vmatprep.subr.mxu1 %v17299_v55  ;;  %v9568_v35 = vadd.f32 %v9567_v39, %v9566_v37  ;;  %v17533_v0 = vld [vmem:[#allocation55_spill] sm:$0xff]  ;;  %v14601_v9 = vand.u32 4294901760, %v8398_v43  ;;  %v17540_v3 = vld [vmem:[#allocation64_spill] sm:$0xff] }
 0x2fc   : > { %17531 = vst [vmem:[#allocation112_spill] sm:$0xff] %v14580_v51  ;;  %17532 = vst [vmem:[#allocation68_spill] sm:$0xff] %v14582_v63  ;;  %5951 = vmatprep.mubr.f32.mxu0 %v5950_v2  ;;  %10095 = vmatpush3.msra.mxu0 %v17533_v0  ;;  %v5979_v40 = vsub.f32 %v14530_v5, %v17534_v60  ;;  %v9493_v24 = vpop.f32.mrf.mxu0  ;;  %v9569_v55 = vpop.f32.mrf.mxu1  ;;  %v14599_v60 = vsub.f32 %v8396_v61, %v14572_v27 }
 0x2fd   : > { %6344 = vmatmul.mubr.f32.gmra.mxu1 %v14377_v42  ;;  %10096 = vmatprep.subr.mxu0 %v17535_v26  ;;  %v9494_v39 = vadd.f32 %v9493_v24, %v9492_v14  ;;  %v14594_v2 = vadd.f32 %v9568_v35, %v9488_v41  ;;  %17537 = vst [vmem:[#allocation72_spill] sm:$0xff] %v14601_v9  ;;  %v5971_v26 = vand.u32 4294901760, %v5970_v4  ;;  %v17543_v41 = vld [vmem:[#allocation70_spill] sm:$0xff] }
 0x2fe   : > { %6349 = vmatprep.mubr.f32.mxu1 %v14394_v38  ;;  %10175 = vmatpush3.msra.mxu1 %v11302_v44  ;;  %17536 = vst [vmem:[#allocation24_spill] sm:$0xff] %v14599_v60  ;;  %v9495_v37 = vpop.f32.mrf.mxu0  ;;  %v9570_v0 = vpop.f32.mrf.mxu1  ;;  %v5985_v24 = vsub.f32 %v14549_v6, %v17538_v8  ;;  %v14609_v14 = vsub.f32 %v8399_v28, %v14582_v63  ;;  %v5980_v35 = vand.u32 4294901760, %v5979_v40  ;;  %v14615_v38 = vand.u32 4294901760, %v8401_v33  ;;  %v8400_v8 = vld [vmem:[%s11662_s17 + $0x3d0] sm:$0xff] }
 0x2ff   : > { %5957 = vmatmul.mubr.f32.gmra.mxu0 %v5956_v13  ;;  %10176 = vmatprep.subr.mxu1 %v17075_v21  ;;  %v9571_v61 = vadd.f32 %v9570_v0, %v9569_v55  ;;  %v17541_v13 = vand.u32 4294901760, %v14560_v46  ;;  %v17544_v28 = vand.u32 4294901760, %v14566_v10 }
 0x300   : > { %17539 = vst [vmem:[#allocation150_spill] sm:$0xff] %v14609_v14  ;;  %5966 = vmatprep.mubr.f32.mxu0 %v5965_v30  ;;  %10097 = vmatpush3.msra.mxu0 %v17540_v3  ;;  %17542 = vst [vmem:[#allocation145_spill] sm:$0xff] %v14615_v38  ;;  %v9496_v42 = vpop.f32.mrf.mxu0  ;;  %v9572_v6 = vpop.f32.mrf.mxu1  ;;  %v8403_v30 = vld [vmem:[%s11662_s17 + $0x3e8] sm:$0xff] }
 0x301   : > { %v5994_v4 = vsub.f32 %v14560_v46, %v17541_v13  ;;  %6351 = vmatmul.mubr.f32.gmra.mxu1 %v14421_v16  ;;  %10098 = vmatprep.subr.mxu0 %v17543_v41  ;;  %v6000_v55 = vsub.f32 %v14566_v10, %v17544_v28  ;;  %v9497_v40 = vadd.f32 %v9496_v42, %v9495_v37  ;;  %v5986_v46 = vand.u32 4294901760, %v5985_v24  ;;  %v8405_v37 = vld [vmem:[%s11662_s17 + $0x3f8] sm:$0xff] }
 0x302   : > { %v14624_v3 = vadd.f32 %v9571_v61, %v9491_v36  ;;  %6356 = vmatprep.mubr.f32.mxu1 %v14431_v20  ;;  %10177 = vmatpush3.msra.mxu1 %v17403_v32  ;;  %v14630_v13 = vsub.f32 %v8398_v43, %v14601_v9  ;;  %v9498_v16 = vpop.f32.mrf.mxu0  ;;  %v9573_v41 = vpop.f32.mrf.mxu1  ;;  %v17545_v42 = vand.u32 4294901760, %v14580_v51  ;;  %v14637_v61 = vand.u32 4294901760, %v8400_v8  ;;  %v17547_v43 = vld [vmem:[#allocation73_spill] sm:$0xff] }
 0x303   : > { %5972 = vmatmul.mubr.f32.gmra.mxu0 %v5971_v26  ;;  %10178 = vmatprep.subr.mxu1 %v17312_v59  ;;  %v9574_v28 = vadd.f32 %v9573_v41, %v9572_v6  ;;  %v5995_v0 = vand.u32 4294901760, %v5994_v4  ;;  %v14641_v26 = vsub.f32 %v8401_v33, %v14615_v38  ;;  %v14643_v24 = vand.u32 4294901760, %v8403_v30  ;;  %v8402_v20 = vld [vmem:[%s11662_s17 + $0x3e0] sm:$0xff] }
 0x304   : > { %v6009_v36 = vsub.f32 %v14580_v51, %v17545_v42  ;;  %17546 = vst [vmem:[#allocation78_spill] sm:$0xff] %v14637_v61  ;;  %5981 = vmatprep.mubr.f32.mxu0 %v5980_v35  ;;  %10099 = vmatpush3.msra.mxu0 %v17547_v43  ;;  %v9499_v10 = vpop.f32.mrf.mxu0  ;;  %v9575_v5 = vpop.f32.mrf.mxu1  ;;  %v6001_v42 = vand.u32 4294901760, %v6000_v55  ;;  %v17550_v51 = vld [vmem:[#allocation76_spill] sm:$0xff]  ;;  %v17551_v33 = vand.u32 4294901760, %v14599_v60  ;;  %v17561_v32 = vld [vmem:[#allocation49_spill] sm:$0xff] }
 0x305   : > { %17548 = vst [vmem:[#allocation155_spill] sm:$0xff] %v14641_v26  ;;  %17549 = vst [vmem:[#allocation82_spill] sm:$0xff] %v14643_v24  ;;  %6358 = vmatmul.mubr.f32.gmra.mxu1 %v14454_v54  ;;  %10100 = vmatprep.subr.mxu0 %v17550_v51  ;;  %v9500_v59 = vadd.f32 %v9499_v10, %v9498_v16  ;;  %v14649_v6 = vadd.f32 %v9574_v28, %v9494_v39  ;;  %v17552_v51 = vld [vmem:[#allocation42_spill] sm:$0xff]  ;;  %v17553_v16 = vand.u32 4294901760, %v14609_v14  ;;  %v8404_v54 = vld [vmem:[%s11662_s17 + $0x3f0] sm:$0xff] }
 0x306   : > { %6363 = vmatprep.mubr.f32.mxu1 %v14472_v58  ;;  %10179 = vmatpush3.msra.mxu1 %v17087_v11  ;;  %v6015_v35 = vsub.f32 %v14599_v60, %v17551_v33  ;;  %v9501_v41 = vpop.f32.mrf.mxu0  ;;  %v9576_v55 = vpop.f32.mrf.mxu1  ;;  %v6010_v43 = vand.u32 4294901760, %v6009_v36  ;;  %v14662_v39 = vsub.f32 %v8400_v8, %v14637_v61  ;;  %v14664_v28 = vand.u32 4294901760, %v8402_v20  ;;  %v17556_v33 = vld [vmem:[#allocation80_spill] sm:$0xff] }
 0x307   : > { %5987 = vmatmul.mubr.f32.gmra.mxu0 %v5986_v46  ;;  %10180 = vmatprep.subr.mxu1 %v17552_v51  ;;  %v6024_v10 = vsub.f32 %v14609_v14, %v17553_v16  ;;  %v9577_v58 = vadd.f32 %v9576_v55, %v9575_v5  ;;  %v14669_v46 = vsub.f32 %v8403_v30, %v14643_v24  ;;  %v14671_v36 = vand.u32 4294901760, %v8405_v37  ;;  %v17558_v8 = vld [vmem:[#allocation84_spill] sm:$0xff] }
 0x308   : > { %17554 = vst [vmem:[#allocation151_spill] sm:$0xff] %v14662_v39  ;;  %17555 = vst [vmem:[#allocation159_spill] sm:$0xff] %v14664_v28  ;;  %5996 = vmatprep.mubr.f32.mxu0 %v5995_v0  ;;  %10101 = vmatpush3.msra.mxu0 %v17556_v33  ;;  %v9502_v60 = vpop.f32.mrf.mxu0  ;;  %v9578_v51 = vpop.f32.mrf.mxu1  ;;  %v6016_v5 = vand.u32 4294901760, %v6015_v35  ;;  %v17559_v0 = vld [vmem:[#allocation46_spill] sm:$0xff]  ;;  %v17560_v30 = vand.u32 4294901760, %v14630_v13  ;;  %v17564_v35 = vld [vmem:[#allocation87_spill] sm:$0xff] }
 0x309   : > { %17557 = vst [vmem:[#allocation88_spill] sm:$0xff] %v14671_v36  ;;  %6365 = vmatmul.mubr.f32.gmra.mxu1 %v14496_v49  ;;  %10102 = vmatprep.subr.mxu0 %v17558_v8  ;;  %v9503_v16 = vadd.f32 %v9502_v60, %v9501_v41  ;;  %v14676_v14 = vadd.f32 %v9577_v58, %v9497_v40  ;;  %v6025_v11 = vand.u32 4294901760, %v6024_v10  ;;  %v14688_v60 = vand.u32 4294901760, %v8404_v54 }
 0x30a   : > { %6370 = vmatprep.mubr.f32.mxu1 %v14502_v57  ;;  %10181 = vmatpush3.msra.mxu1 %v17559_v0  ;;  %v6030_v55 = vsub.f32 %v14630_v13, %v17560_v30  ;;  %v9504_v33 = vpop.f32.mrf.mxu0  ;;  %v9579_v4 = vpop.f32.mrf.mxu1  ;;  %v14686_v58 = vsub.f32 %v8402_v20, %v14664_v28  ;;  %v17565_v41 = vand.u32 4294901760, %v14641_v26  ;;  %v14696_v10 = vsub.f32 %v8405_v37, %v14671_v36  ;;  %v17566_v20 = vld [vmem:[#allocation93_spill] sm:$0xff] }
 0x30b   : > { %6002 = vmatmul.mubr.f32.gmra.mxu0 %v6001_v42  ;;  %10182 = vmatprep.subr.mxu1 %v17561_v32  ;;  %17563 = vst [vmem:[#allocation91_spill] sm:$0xff] %v14688_v60  ;;  %v9580_v40 = vadd.f32 %v9579_v4, %v9578_v51  ;;  %v17568_v37 = vand.u32 4294901760, %v14662_v39 }
 0x30c   : > { %17562 = vst [vmem:[#allocation172_spill] sm:$0xff] %v14686_v58  ;;  %6011 = vmatprep.mubr.f32.mxu0 %v6010_v43  ;;  %10103 = vmatpush3.msra.mxu0 %v17564_v35  ;;  %v6039_v30 = vsub.f32 %v14641_v26, %v17565_v41  ;;  %v9505_v57 = vpop.f32.mrf.mxu0  ;;  %v9581_v8 = vpop.f32.mrf.mxu1  ;;  %v17567_v43 = vld [vmem:[#allocation52_spill] sm:$0xff]  ;;  %v6031_v41 = vand.u32 4294901760, %v6030_v55  ;;  %v17569_v26 = vld [vmem:[#allocation58_spill] sm:$0xff] }
 0x30d   : > { %6372 = vmatmul.mubr.f32.gmra.mxu1 %v14525_v7  ;;  %10104 = vmatprep.subr.mxu0 %v17566_v20  ;;  %v9506_v49 = vadd.f32 %v9505_v57, %v9504_v33  ;;  %v14700_v4 = vadd.f32 %v9580_v40, %v9500_v59  ;;  %v6045_v42 = vsub.f32 %v14662_v39, %v17568_v37  ;;  %v17571_v40 = vld [vmem:[#allocation99_spill] sm:$0xff] }
 0x30e   : > { %6377 = vmatprep.mubr.f32.mxu1 %v14532_v48  ;;  %10183 = vmatpush3.msra.mxu1 %v17567_v43  ;;  %v9507_v51 = vpop.f32.mrf.mxu0  ;;  %v9582_v35 = vpop.f32.mrf.mxu1  ;;  %v14710_v57 = vsub.f32 %v8404_v54, %v14688_v60  ;;  %v6040_v33 = vand.u32 4294901760, %v6039_v30  ;;  %v17573_v39 = vld [vmem:[#allocation103_spill] sm:$0xff] }
 0x30f   : > { %6017 = vmatmul.mubr.f32.gmra.mxu0 %v6016_v5  ;;  %10184 = vmatprep.subr.mxu1 %v17569_v26  ;;  %v9583_v59 = vadd.f32 %v9582_v35, %v9581_v8  ;;  %v17572_v5 = vand.u32 4294901760, %v14669_v46  ;;  %v6046_v35 = vand.u32 4294901760, %v6045_v42  ;;  %v17576_v20 = vld [vmem:[#allocation67_spill] sm:$0xff]  ;;  %v17579_v42 = vld [vmem:[#allocation109_spill] sm:$0xff] }
 0x310   : > { %17570 = vst [vmem:[#allocation153_spill] sm:$0xff] %v14710_v57  ;;  %6026 = vmatprep.mubr.f32.mxu0 %v6025_v11  ;;  %10105 = vmatpush3.msra.mxu0 %v17571_v40  ;;  %v9508_v48 = vpop.f32.mrf.mxu0  ;;  %v9584_v37 = vpop.f32.mrf.mxu1  ;;  %v17574_v11 = vld [vmem:[#allocation63_spill] sm:$0xff]  ;;  %v17575_v40 = vand.u32 4294901760, %v14686_v58 }
 0x311   : > { %v6054_v55 = vsub.f32 %v14669_v46, %v17572_v5  ;;  %6379 = vmatmul.mubr.f32.gmra.mxu1 %v14537_v23  ;;  %10106 = vmatprep.subr.mxu0 %v17573_v39  ;;  %v9509_v7 = vadd.f32 %v9508_v48, %v9507_v51  ;;  %v14719_v54 = vadd.f32 %v9583_v59, %v9503_v16  ;;  %v16434_v23 = vand.u32 4294901760, %v14710_v57  ;;  %v17577_v16 = vld [vmem:[#allocation106_spill] sm:$0xff] }
 0x312   : > { %6384 = vmatprep.mubr.f32.mxu1 %v14551_v53  ;;  %10185 = vmatpush3.msra.mxu1 %v17574_v11  ;;  %v9510_v8 = vpop.f32.mrf.mxu0  ;;  %v9585_v30 = vpop.f32.mrf.mxu1  ;;  %v6060_v5 = vsub.f32 %v14686_v58, %v17575_v40  ;;  %v17578_v51 = vand.u32 4294901760, %v14696_v10 }
 0x313   : > { %6032 = vmatmul.mubr.f32.gmra.mxu0 %v6031_v41  ;;  %10186 = vmatprep.subr.mxu1 %v17576_v20  ;;  %v9586_v39 = vadd.f32 %v9585_v30, %v9584_v37  ;;  %v6055_v48 = vand.u32 4294901760, %v6054_v55  ;;  %v17580_v37 = vld [vmem:[#allocation71_spill] sm:$0xff] }
 0x314   : > { %6041 = vmatprep.mubr.f32.mxu0 %v6040_v33  ;;  %10107 = vmatpush3.msra.mxu0 %v17577_v16  ;;  %v6069_v59 = vsub.f32 %v14696_v10, %v17578_v51  ;;  %v9511_v41 = vpop.f32.mrf.mxu0  ;;  %v9587_v53 = vpop.f32.mrf.mxu1  ;;  %v6061_v30 = vand.u32 4294901760, %v6060_v5  ;;  %v6075_v16 = vsub.f32 %v14710_v57, %v16434_v23  ;;  %v17581_v51 = vld [vmem:[#allocation74_spill] sm:$0xff]  ;;  %v17584_v5 = vld [vmem:[#allocation123_spill] sm:$0xff] }
 0x315   : > { %6386 = vmatmul.mubr.f32.gmra.mxu1 %v14572_v27  ;;  %10108 = vmatprep.subr.mxu0 %v17579_v42  ;;  %v9512_v40 = vadd.f32 %v9511_v41, %v9510_v8  ;;  %v14734_v58 = vadd.f32 %v9586_v39, %v9506_v49  ;;  %v17582_v8 = vld [vmem:[#allocation116_spill] sm:$0xff]  ;;  %v17583_v41 = vld [vmem:[#allocation122_spill] sm:$0xff] }
 0x316   : > { %6391 = vmatprep.mubr.f32.mxu1 %v14582_v63  ;;  %10187 = vmatpush3.msra.mxu1 %v17580_v37  ;;  %v9513_v33 = vpop.f32.mrf.mxu0  ;;  %v9588_v55 = vpop.f32.mrf.mxu1  ;;  %v6070_v42 = vand.u32 4294901760, %v6069_v59  ;;  %v17585_v59 = vld [vmem:[#allocation77_spill] sm:$0xff] }
 0x317   : > { %6047 = vmatmul.mubr.f32.gmra.mxu0 %v6046_v35  ;;  %10188 = vmatprep.subr.mxu1 %v17581_v51  ;;  %v9589_v27 = vadd.f32 %v9588_v55, %v9587_v53 }
 0x318   : > { %6056 = vmatprep.mubr.f32.mxu0 %v6055_v48  ;;  %10109 = vmatpush3.msra.mxu0 %v17582_v8  ;;  %v9514_v49 = vpop.f32.mrf.mxu0  ;;  %v9590_v39 = vpop.f32.mrf.mxu1  ;;  %v6076_v48 = vand.u32 4294901760, %v6075_v16  ;;  %v17586_v8 = vld [vmem:[#allocation125_spill] sm:$0xff] }
 0x319   : > { %6393 = vmatmul.mubr.f32.gmra.mxu1 %v14601_v9  ;;  %10110 = vmatprep.subr.mxu0 %v17583_v41  ;;  %v9515_v35 = vadd.f32 %v9514_v49, %v9513_v33  ;;  %v14745_v63 = vadd.f32 %v9589_v27, %v9509_v7  ;;  %v17587_v7 = vld [vmem:[#allocation129_spill] sm:$0xff]  ;;  %v17590_v41 = vld [vmem:[#allocation166_spill] sm:$0xff] }
 0x31a   : > { %6398 = vmatprep.mubr.f32.mxu1 %v14615_v38  ;;  %10111 = vmatpush3.msra.mxu0 %v17584_v5  ;;  %v9516_v23 = vpop.f32.mrf.mxu0  ;;  %v9591_v53 = vpop.f32.mrf.mxu1  ;;  %v17591_v5 = vld [vmem:[#allocation90_spill] sm:$0xff]  ;;  %v17601_v38 = vld [vmem:[#allocation25_spill] sm:$0xff] }
 0x31b   : > { %6062 = vmatmul.mubr.f32.gmra.mxu0 %v6061_v30  ;;  %10189 = vmatpush3.msra.mxu1 %v17585_v59  ;;  %v9592_v55 = vadd.f32 %v9591_v53, %v9590_v39  ;;  %v17588_v30 = vld [vmem:[#allocation81_spill] sm:$0xff]  ;;  %v17589_v39 = vld [vmem:[#allocation86_spill] sm:$0xff] }
 0x31c   : > { %6071 = vmatprep.mubr.f32.mxu0 %v6070_v42  ;;  %10112 = vmatprep.subr.mxu0 %v17586_v8  ;;  %v9517_v9 = vpop.f32.mrf.mxu0  ;;  %v9593_v57 = vpop.f32.mrf.mxu1 }
 0x31d   : > { %6400 = vmatmul.mubr.f32.gmra.mxu1 %v14637_v61  ;;  %10113 = vmatpush3.msra.mxu0 %v17587_v7  ;;  %v9518_v27 = vadd.f32 %v9517_v9, %v9516_v23  ;;  %v14753_v33 = vadd.f32 %v9592_v55, %v9512_v40  ;;  %v17592_v23 = vld [vmem:[#allocation15_spill] sm:$0xff] }
 0x31e   : > { %6405 = vmatprep.mubr.f32.mxu1 %v14643_v24  ;;  %10190 = vmatprep.subr.mxu1 %v17588_v30  ;;  %v9519_v16 = vpop.f32.mrf.mxu0  ;;  %v9594_v49 = vpop.f32.mrf.mxu1  ;;  %v17594_v7 = vld [vmem:[#allocation143_spill] sm:$0xff]  ;;  %v17595_v24 = vld [vmem:[#allocation158_spill] sm:$0xff] }
 0x31f   : > { %6077 = vmatmul.mubr.f32.gmra.mxu0 %v6076_v48  ;;  %10191 = vmatpush3.msra.mxu1 %v17589_v39  ;;  %v9595_v42 = vadd.f32 %v9594_v49, %v9593_v57  ;;  %v17593_v48 = vld [vmem:[#allocation95_spill] sm:$0xff] }
 0x320   : > { %6549 = vmatprep.mubr.f32.mxu0 %v17590_v41  ;;  %10192 = vmatprep.subr.mxu1 %v17591_v5  ;;  %v9520_v53 = vpop.f32.mrf.mxu0  ;;  %v9596_v8 = vpop.f32.mrf.mxu1  ;;  %v17596_v61 = vld [vmem:[#allocation19_spill] sm:$0xff] }
 0x321   : > { %6407 = vmatmul.mubr.f32.gmra.mxu1 %v14664_v28  ;;  %10242 = vmatprep.subr.mxu0 %v17592_v23  ;;  %v9521_v9 = vadd.f32 %v9520_v53, %v9519_v16  ;;  %v14762_v40 = vadd.f32 %v9595_v42, %v9515_v35  ;;  %v17597_v35 = vld [vmem:[#allocation20_spill] sm:$0xff]  ;;  %v17598_v53 = vand.u32 4294901760, %v17590_v41  ;;  %v17604_v41 = vand.u32 4294901760, %v17594_v7 }
 0x322   : > { %6412 = vmatprep.mubr.f32.mxu1 %v14671_v36  ;;  %10193 = vmatpush3.msra.mxu1 %v17593_v48  ;;  %v9634_v55 = vpop.f32.mrf.mxu0  ;;  %v9597_v57 = vpop.f32.mrf.mxu1  ;;  %v17599_v36 = vld [vmem:[#allocation22_spill] sm:$0xff] }
 0x323   : > { %6552 = vmatmul.mubr.f32.vlgmr.msra.gmra.mxu0 %v17594_v7  ;;  %10322 = vmatprep.subr.mxu1 %v17354_v50  ;;  %v9598_v49 = vadd.f32 %v9597_v57, %v9596_v8  ;;  %v17600_v8 = vld [vmem:[#allocation181_spill] sm:$0xff] }
 0x324   : > { %6558 = vmatprep.mubr.f32.mxu0 %v17595_v24  ;;  %10243 = vmatpush3.msra.mxu0 %v17596_v61  ;;  %v9635_v28 = vpop.f32.mrf.mxu0  ;;  %v9599_v23 = vpop.f32.mrf.mxu1 }
 0x325   : > { %6414 = vmatmul.mubr.f32.gmra.mxu1 %v14688_v60  ;;  %10244 = vmatprep.subr.mxu0 %v17597_v35  ;;  %v14772_v16 = vadd.f32 %v9598_v49, %v9518_v27  ;;  %v9636_v42 = vadd.f32 %v9635_v28, %v9634_v55  ;;  %v17602_v60 = vld [vmem:[#allocation184_spill] sm:$0xff] }
 0x326   : > { %6791 = vmatprep.mubr.f32.mxu1 %v17598_v53  ;;  %10245 = vmatpush3.msra.mxu0 %v17599_v36  ;;  %v9637_v50 = vpop.f32.mrf.mxu0  ;;  %v9600_v57 = vpop.f32.mrf.mxu1  ;;  %v17603_v35 = vld [vmem:[#allocation28_spill] sm:$0xff]  ;;  %v17607_v53 = vld [vmem:[#allocation190_spill] sm:$0xff] }
 0x327   : > { %6561 = vmatmul.mubr.f32.gmra.mxu0 %v17600_v8  ;;  %10246 = vmatprep.subr.mxu0 %v17601_v38  ;;  %v4800_v61 = vadd.f32 %v9636_v42, %v14483_v31  ;;  %v9601_v48 = vadd.f32 %v9600_v57, %v9599_v23  ;;  %v17605_v55 = vld [vmem:[#allocation32_spill] sm:$0xff]  ;;  %v17606_v38 = vand.u32 4294901760, %v17595_v24  ;;  %v17609_v57 = vand.u32 4294901760, %v17602_v60 }
 0x328   : > { %6567 = vmatprep.mubr.f32.mxu0 %v17602_v60  ;;  %10247 = vmatpush3.msra.mxu0 %v17603_v35  ;;  %v9638_v27 = vpop.f32.mrf.mxu0  ;;  %v9714_v28 = vpop.f32.mrf.mxu1  ;;  %v17610_v35 = vld [vmem:[#allocation199_spill] sm:$0xff]  ;;  %v17612_v60 = vand.u32 4294901760, %v14294_v45 }
 0x329   : > { %6795 = vmatmul.mubr.f32.vlgmr.msra.gmra.mxu1 %v17604_v41  ;;  %10248 = vmatprep.subr.mxu0 %v17605_v55  ;;  %v14785_v36 = vadd.f32 %v9601_v48, %v9521_v9  ;;  %v9639_v49 = vadd.f32 %v9638_v27, %v9637_v50  ;;  %v17614_v55 = vand.u32 4294901760, %v17607_v53 }
 0x32a   : > { %10323 = vmatpush3.msra.mxu1 %v11197_v12  ;;  %6802 = vmatprep.mubr.f32.mxu1 %v17606_v38  ;;  %v9640_v31 = vpop.f32.mrf.mxu0  ;;  %v9715_v23 = vpop.f32.mrf.mxu1  ;;  %v17608_v12 = vand.u32 4294901760, %v17600_v8  ;;  %v17615_v38 = vld [vmem:[#allocation102_spill] sm:$0xff] }
 0x32b   : > { %6570 = vmatmul.mubr.f32.gmra.mxu0 %v14294_v45  ;;  %10324 = vmatprep.subr.mxu1 %v16687_v56  ;;  %v4809_v42 = vadd.f32 %v9639_v49, %v14509_v62  ;;  %v9716_v7 = vadd.f32 %v9715_v23, %v9714_v28  ;;  %v17613_v28 = vld [vmem:[#allocation44_spill] sm:$0xff] }
 0x32c   : > { %6576 = vmatprep.mubr.f32.mxu0 %v17607_v53  ;;  %10325 = vmatpush3.msra.mxu1 %v11210_v17  ;;  %v9641_v9 = vpop.f32.mrf.mxu0  ;;  %v9717_v48 = vpop.f32.mrf.mxu1  ;;  %v17618_v53 = vld [vmem:[#allocation50_spill] sm:$0xff] }
 0x32d   : > { %6806 = vmatmul.mubr.f32.gmra.mxu1 %v17608_v12  ;;  %10326 = vmatprep.subr.mxu1 %v11212_v18  ;;  %v9642_v24 = vadd.f32 %v9641_v9, %v9640_v31  ;;  %v14798_v50 = vadd.f32 %v9716_v7, %v4800_v61  ;;  %v17611_v18 = vld [vmem:[#allocation40_spill] sm:$0xff]  ;;  %v17616_v31 = vld [vmem:[#allocation47_spill] sm:$0xff]  ;;  %v17617_v7 = vand.u32 4294901760, %v14335_v1 }
 0x32e   : > { %6813 = vmatprep.mubr.f32.mxu1 %v17609_v57  ;;  %10327 = vmatpush3.msra.mxu1 %v11214_v19  ;;  %v9643_v56 = vpop.f32.mrf.mxu0  ;;  %v9718_v62 = vpop.f32.mrf.mxu1 }
 0x32f   : > { %6579 = vmatmul.mubr.f32.gmra.mxu0 %v14335_v1  ;;  %10328 = vmatprep.subr.mxu1 %v17045_v29  ;;  %v4818_v17 = vadd.f32 %v9642_v24, %v14539_v25  ;;  %v9719_v8 = vadd.f32 %v9718_v62, %v9717_v48  ;;  %v17619_v48 = vand.u32 4294901760, %v17610_v35  ;;  %v17621_v24 = vld [vmem:[#allocation13_spill] sm:$0xff]  ;;  %v17623_v62 = vld [vmem:[#allocation54_spill] sm:$0xff] }
 0x330   : > { %6585 = vmatprep.mubr.f32.mxu0 %v17610_v35  ;;  %10249 = vmatpush3.msra.mxu0 %v17611_v18  ;;  %v9644_v61 = vpop.f32.mrf.mxu0  ;;  %v9720_v27 = vpop.f32.mrf.mxu1  ;;  %v17624_v35 = vand.u32 4294901760, %v14389_v22  ;;  %v17625_v18 = vld [vmem:[#allocation57_spill] sm:$0xff] }
 0x331   : > { %6817 = vmatmul.mubr.f32.gmra.mxu1 %v17612_v60  ;;  %10250 = vmatprep.subr.mxu0 %v17613_v28  ;;  %v9645_v19 = vadd.f32 %v9644_v61, %v9643_v56  ;;  %v14811_v41 = vadd.f32 %v9719_v8, %v4809_v42  ;;  %v17622_v56 = vld [vmem:[#allocation31_spill] sm:$0xff]  ;;  %v17627_v60 = vld [vmem:[#allocation16_spill] sm:$0xff] }
 0x332   : > { %6824 = vmatprep.mubr.f32.mxu1 %v17614_v55  ;;  %10329 = vmatpush3.msra.mxu1 %v17282_v15  ;;  %v9646_v29 = vpop.f32.mrf.mxu0  ;;  %v9721_v25 = vpop.f32.mrf.mxu1  ;;  %v17628_v28 = vld [vmem:[#allocation36_spill] sm:$0xff]  ;;  %v17629_v55 = vld [vmem:[#allocation18_spill] sm:$0xff] }
 0x333   : > { %6588 = vmatmul.mubr.f32.gmra.mxu0 %v14389_v22  ;;  %10330 = vmatprep.subr.mxu1 %v17284_v34  ;;  %v4827_v49 = vadd.f32 %v9645_v19, %v14568_v47  ;;  %v9722_v45 = vadd.f32 %v9721_v25, %v9720_v27  ;;  %v17620_v47 = vld [vmem:[#allocation30_spill] sm:$0xff]  ;;  %v17626_v27 = vand.u32 4294901760, %v17615_v38  ;;  %v17630_v25 = vld [vmem:[#allocation115_spill] sm:$0xff] }
 0x334   : > { %6594 = vmatprep.mubr.f32.mxu0 %v17615_v38  ;;  %10251 = vmatpush3.msra.mxu0 %v17616_v31  ;;  %v9647_v23 = vpop.f32.mrf.mxu0  ;;  %v9723_v42 = vpop.f32.mrf.mxu1  ;;  %v17632_v38 = vand.u32 4294901760, %v17620_v47 }
 0x335   : > { %6828 = vmatmul.mubr.f32.gmra.mxu1 %v17617_v7  ;;  %10252 = vmatprep.subr.mxu0 %v17618_v53  ;;  %v9648_v15 = vadd.f32 %v9647_v23, %v9646_v29  ;;  %v14824_v9 = vadd.f32 %v9722_v45, %v4818_v17  ;;  %v17631_v45 = vld [vmem:[#allocation60_spill] sm:$0xff]  ;;  %v17633_v23 = vld [vmem:[#allocation66_spill] sm:$0xff]  ;;  %v17634_v53 = vand.u32 4294901760, %v17622_v56 }
 0x336   : > { %6835 = vmatprep.mubr.f32.mxu1 %v17619_v48  ;;  %10331 = vmatpush3.msra.mxu1 %v17382_v52  ;;  %v9649_v34 = vpop.f32.mrf.mxu0  ;;  %v9724_v12 = vpop.f32.mrf.mxu1 }
 0x337   : > { %6597 = vmatmul.mubr.f32.gmra.mxu0 %v17620_v47  ;;  %10332 = vmatprep.subr.mxu1 %v17621_v24  ;;  %v4836_v57 = vadd.f32 %v9648_v15, %v14594_v2  ;;  %v9725_v1 = vadd.f32 %v9724_v12, %v9723_v42  ;;  %v17635_v15 = vld [vmem:[#allocation124_spill] sm:$0xff]  ;;  %v17636_v12 = vld [vmem:[#allocation139_spill] sm:$0xff]  ;;  %v17637_v24 = vld [vmem:[#allocation69_spill] sm:$0xff] }
 0x338   : > { %6603 = vmatprep.mubr.f32.mxu0 %v17622_v56  ;;  %10253 = vmatpush3.msra.mxu0 %v17623_v62  ;;  %v9650_v17 = vpop.f32.mrf.mxu0  ;;  %v9726_v8 = vpop.f32.mrf.mxu1  ;;  %v17638_v56 = vand.u32 4294901760, %v17628_v28  ;;  %v17639_v62 = vld [vmem:[#allocation75_spill] sm:$0xff] }
 0x339   : > { %6839 = vmatmul.mubr.f32.gmra.mxu1 %v17624_v35  ;;  %10254 = vmatprep.subr.mxu0 %v17625_v18  ;;  %v9651_v52 = vadd.f32 %v9650_v17, %v9649_v34  ;;  %v14837_v61 = vadd.f32 %v9725_v1, %v4827_v49  ;;  %v17642_v35 = vld [vmem:[#allocation56_spill] sm:$0xff] }
 0x33a   : > { %6846 = vmatprep.mubr.f32.mxu1 %v17626_v27  ;;  %10333 = vmatpush3.msra.mxu1 %v17627_v60  ;;  %v9652_v2 = vpop.f32.mrf.mxu0  ;;  %v9727_v19 = vpop.f32.mrf.mxu1 }
 0x33b   : > { %6606 = vmatmul.mubr.f32.gmra.mxu0 %v17628_v28  ;;  %10334 = vmatprep.subr.mxu1 %v17629_v55  ;;  %v4845_v29 = vadd.f32 %v9651_v52, %v14624_v3  ;;  %v9728_v22 = vadd.f32 %v9727_v19, %v9726_v8  ;;  %v17640_v8 = vand.u32 4294901760, %v17630_v25  ;;  %v17643_v52 = vld [vmem:[#allocation35_spill] sm:$0xff] }
 0x33c   : > { %6612 = vmatprep.mubr.f32.mxu0 %v17630_v25  ;;  %10255 = vmatpush3.msra.mxu0 %v17631_v45  ;;  %v9653_v49 = vpop.f32.mrf.mxu0  ;;  %v9729_v31 = vpop.f32.mrf.mxu1  ;;  %v17645_v28 = vld [vmem:[#allocation79_spill] sm:$0xff] }
 0x33d   : > { %6850 = vmatmul.mubr.f32.gmra.mxu1 %v17632_v38  ;;  %10256 = vmatprep.subr.mxu0 %v17633_v23  ;;  %v9654_v42 = vadd.f32 %v9653_v49, %v9652_v2  ;;  %v14850_v7 = vadd.f32 %v9728_v22, %v4836_v57  ;;  %v17644_v2 = vld [vmem:[#allocation11_spill] sm:$0xff]  ;;  %v17648_v49 = vand.u32 4294901760, %v17636_v12  ;;  %v17650_v38 = vld [vmem:[#allocation149_spill] sm:$0xff] }
 0x33e   : > { %6857 = vmatprep.mubr.f32.mxu1 %v17634_v53  ;;  %10335 = vmatpush3.msra.mxu1 %v11302_v44  ;;  %v9655_v3 = vpop.f32.mrf.mxu0  ;;  %v9730_v48 = vpop.f32.mrf.mxu1  ;;  %v17647_v22 = vld [vmem:[#allocation83_spill] sm:$0xff] }
 0x33f   : > { %6615 = vmatmul.mubr.f32.gmra.mxu0 %v17635_v15  ;;  %10336 = vmatprep.subr.mxu1 %v17075_v21  ;;  %v4854_v34 = vadd.f32 %v9654_v42, %v14649_v6  ;;  %v9731_v47 = vadd.f32 %v9730_v48, %v9729_v31  ;;  %v17641_v21 = vld [vmem:[#allocation29_spill] sm:$0xff]  ;;  %v17649_v31 = vld [vmem:[#allocation38_spill] sm:$0xff] }
 0x340   : > { %6621 = vmatprep.mubr.f32.mxu0 %v17636_v12  ;;  %10257 = vmatpush3.msra.mxu0 %v17637_v24  ;;  %v9656_v57 = vpop.f32.mrf.mxu0  ;;  %v9732_v1 = vpop.f32.mrf.mxu1  ;;  %v17651_v42 = vld [vmem:[#allocation42_spill] sm:$0xff]  ;;  %v17653_v48 = vld [vmem:[#allocation85_spill] sm:$0xff]  ;;  %v17654_v12 = vand.u32 4294901760, %v17642_v35 }
 0x341   : > { %6861 = vmatmul.mubr.f32.gmra.mxu1 %v17638_v56  ;;  %10258 = vmatprep.subr.mxu0 %v17639_v62  ;;  %v9657_v44 = vadd.f32 %v9656_v57, %v9655_v3  ;;  %v14863_v17 = vadd.f32 %v9731_v47, %v4845_v29  ;;  %v17646_v29 = vand.u32 4294901760, %v17635_v15  ;;  %v17652_v15 = vld [vmem:[#allocation164_spill] sm:$0xff]  ;;  %v17655_v24 = vld [vmem:[#allocation89_spill] sm:$0xff]  ;;  %v17656_v56 = vand.u32 4294901760, %v17644_v2 }
 0x342   : > { %6868 = vmatprep.mubr.f32.mxu1 %v17640_v8  ;;  %10337 = vmatpush3.msra.mxu1 %v17641_v21  ;;  %v9658_v6 = vpop.f32.mrf.mxu0  ;;  %v9733_v18 = vpop.f32.mrf.mxu1  ;;  %v17657_v62 = vld [vmem:[#allocation65_spill] sm:$0xff] }
 0x343   : > { %6624 = vmatmul.mubr.f32.gmra.mxu0 %v17642_v35  ;;  %10338 = vmatprep.subr.mxu1 %v17643_v52  ;;  %v4863_v27 = vadd.f32 %v9657_v44, %v14676_v14  ;;  %v9734_v60 = vadd.f32 %v9733_v18, %v9732_v1  ;;  %v17659_v35 = vld [vmem:[#allocation92_spill] sm:$0xff] }
 0x344   : > { %6630 = vmatprep.mubr.f32.mxu0 %v17644_v2  ;;  %10259 = vmatpush3.msra.mxu0 %v17645_v28  ;;  %v9659_v19 = vpop.f32.mrf.mxu0  ;;  %v9735_v55 = vpop.f32.mrf.mxu1  ;;  %v17662_v28 = vand.u32 4294901760, %v17652_v15 }
 0x345   : > { %6872 = vmatmul.mubr.f32.gmra.mxu1 %v17646_v29  ;;  %10260 = vmatprep.subr.mxu0 %v17647_v22  ;;  %v9660_v25 = vadd.f32 %v9659_v19, %v9658_v6  ;;  %v14876_v45 = vadd.f32 %v9734_v60, %v4854_v34  ;;  %v17658_v6 = vld [vmem:[#allocation112_spill] sm:$0xff]  ;;  %v17661_v60 = vld [vmem:[#allocation98_spill] sm:$0xff] }
 0x346   : > { %6879 = vmatprep.mubr.f32.mxu1 %v17648_v49  ;;  %10339 = vmatpush3.msra.mxu1 %v17649_v31  ;;  %v9661_v14 = vpop.f32.mrf.mxu0  ;;  %v9736_v23 = vpop.f32.mrf.mxu1  ;;  %v17664_v22 = vld [vmem:[#allocation150_spill] sm:$0xff] }
 0x347   : > { %6633 = vmatmul.mubr.f32.gmra.mxu0 %v17650_v38  ;;  %10340 = vmatprep.subr.mxu1 %v17651_v42  ;;  %v4872_v53 = vadd.f32 %v9660_v25, %v14700_v4  ;;  %v9737_v3 = vadd.f32 %v9736_v23, %v9735_v55  ;;  %v17665_v25 = vld [vmem:[#allocation105_spill] sm:$0xff]  ;;  %v17668_v42 = vand.u32 4294901760, %v17658_v6 }
 0x348   : > { %6639 = vmatprep.mubr.f32.mxu0 %v17652_v15  ;;  %10261 = vmatpush3.msra.mxu0 %v17653_v48  ;;  %v9662_v34 = vpop.f32.mrf.mxu0  ;;  %v9738_v47 = vpop.f32.mrf.mxu1  ;;  %v17669_v15 = vld [vmem:[#allocation155_spill] sm:$0xff] }
 0x349   : > { %6883 = vmatmul.mubr.f32.gmra.mxu1 %v17654_v12  ;;  %10262 = vmatprep.subr.mxu0 %v17655_v24  ;;  %v9663_v57 = vadd.f32 %v9662_v34, %v9661_v14  ;;  %v14889_v1 = vadd.f32 %v9737_v3, %v4863_v27  ;;  %v17660_v27 = vand.u32 4294901760, %v17650_v38  ;;  %v17666_v14 = vand.u32 4294901760, %v17657_v62  ;;  %v17667_v38 = vld [vmem:[#allocation108_spill] sm:$0xff]  ;;  %v17670_v48 = vld [vmem:[#allocation111_spill] sm:$0xff]  ;;  %v17672_v24 = vld [vmem:[#allocation113_spill] sm:$0xff] }
 0x34a   : > { %6890 = vmatprep.mubr.f32.mxu1 %v17656_v56  ;;  %10341 = vmatpush3.msra.mxu1 %v17559_v0  ;;  %v9664_v4 = vpop.f32.mrf.mxu0  ;;  %v9739_v44 = vpop.f32.mrf.mxu1  ;;  %v17673_v56 = vand.u32 4294901760, %v17664_v22 }
 0x34b   : > { %6642 = vmatmul.mubr.f32.gmra.mxu0 %v17657_v62  ;;  %10342 = vmatprep.subr.mxu1 %v17561_v32  ;;  %v4881_v8 = vadd.f32 %v9663_v57, %v14719_v54  ;;  %v9740_v21 = vadd.f32 %v9739_v44, %v9738_v47  ;;  %v17663_v54 = vld [vmem:[#allocation24_spill] sm:$0xff] }
 0x34c   : > { %6648 = vmatprep.mubr.f32.mxu0 %v17658_v6  ;;  %10263 = vmatpush3.msra.mxu0 %v17659_v35  ;;  %v9665_v18 = vpop.f32.mrf.mxu0  ;;  %v9741_v52 = vpop.f32.mrf.mxu1  ;;  %v17671_v12 = vand.u32 4294901760, %v17663_v54  ;;  %v17676_v35 = vand.u32 4294901760, %v14630_v13 }
 0x34d   : > { %6894 = vmatmul.mubr.f32.gmra.mxu1 %v17660_v27  ;;  %10264 = vmatprep.subr.mxu0 %v17661_v60  ;;  %v9666_v0 = vadd.f32 %v9665_v18, %v9664_v4  ;;  %v14902_v2 = vadd.f32 %v9740_v21, %v4872_v53  ;;  %v17677_v18 = vld [vmem:[#allocation126_spill] sm:$0xff]  ;;  %v17678_v27 = vand.u32 4294901760, %v17669_v15  ;;  %v17680_v60 = vld [vmem:[#allocation172_spill] sm:$0xff] }
 0x34e   : > { %6901 = vmatprep.mubr.f32.mxu1 %v17662_v28  ;;  %10343 = vmatpush3.msra.mxu1 %v17567_v43  ;;  %v9667_v32 = vpop.f32.mrf.mxu0  ;;  %v9742_v19 = vpop.f32.mrf.mxu1 }
 0x34f   : > { %6651 = vmatmul.mubr.f32.gmra.mxu0 %v17663_v54  ;;  %10344 = vmatprep.subr.mxu1 %v17569_v26  ;;  %v4890_v55 = vadd.f32 %v9666_v0, %v14734_v58  ;;  %v9743_v29 = vadd.f32 %v9742_v19, %v9741_v52 }
 0x350   : > { %6657 = vmatprep.mubr.f32.mxu0 %v17664_v22  ;;  %10265 = vmatpush3.msra.mxu0 %v17665_v25  ;;  %v9668_v49 = vpop.f32.mrf.mxu0  ;;  %v9744_v31 = vpop.f32.mrf.mxu1 }
 0x351   : > { %6905 = vmatmul.mubr.f32.gmra.mxu1 %v17666_v14  ;;  %10266 = vmatprep.subr.mxu0 %v17667_v38  ;;  %v9669_v43 = vadd.f32 %v9668_v49, %v9667_v32  ;;  %v14915_v23 = vadd.f32 %v9743_v29, %v4881_v8  ;;  %v17675_v8 = vld [vmem:[#allocation119_spill] sm:$0xff]  ;;  %v17683_v29 = vld [vmem:[#allocation133_spill] sm:$0xff]  ;;  %v17684_v49 = vand.u32 4294901760, %v14669_v46 }
 0x352   : > { %6912 = vmatprep.mubr.f32.mxu1 %v17668_v42  ;;  %10345 = vmatpush3.msra.mxu1 %v17574_v11  ;;  %v9670_v26 = vpop.f32.mrf.mxu0  ;;  %v9745_v58 = vpop.f32.mrf.mxu1  ;;  %v17681_v32 = vld [vmem:[#allocation131_spill] sm:$0xff] }
 0x353   : > { %6660 = vmatmul.mubr.f32.gmra.mxu0 %v14630_v13  ;;  %10346 = vmatprep.subr.mxu1 %v17576_v20  ;;  %v4899_v53 = vadd.f32 %v9669_v43, %v14745_v63  ;;  %v9746_v3 = vadd.f32 %v9745_v58, %v9744_v31  ;;  %v17674_v20 = vld [vmem:[#allocation151_spill] sm:$0xff]  ;;  %v17686_v43 = vld [vmem:[#allocation8_spill] sm:$0xff] }
 0x354   : > { %6666 = vmatprep.mubr.f32.mxu0 %v17669_v15  ;;  %10267 = vmatpush3.msra.mxu0 %v17670_v48  ;;  %v9671_v34 = vpop.f32.mrf.mxu0  ;;  %v9747_v47 = vpop.f32.mrf.mxu1 }
 0x355   : > { %6916 = vmatmul.mubr.f32.gmra.mxu1 %v17671_v12  ;;  %10268 = vmatprep.subr.mxu0 %v17672_v24  ;;  %v9672_v11 = vadd.f32 %v9671_v34, %v9670_v26  ;;  %v14928_v57 = vadd.f32 %v9746_v3, %v4890_v55  ;;  %v17682_v55 = vand.u32 4294901760, %v17674_v20  ;;  %v17689_v3 = vld [vmem:[#allocation95_spill] sm:$0xff] }
 0x356   : > { %6923 = vmatprep.mubr.f32.mxu1 %v17673_v56  ;;  %10347 = vmatpush3.msra.mxu1 %v17580_v37  ;;  %v9673_v63 = vpop.f32.mrf.mxu0  ;;  %v9748_v4 = vpop.f32.mrf.mxu1  ;;  %v17691_v34 = vld [vmem:[#allocation167_spill] sm:$0xff] }
 0x357   : > { %6669 = vmatmul.mubr.f32.gmra.mxu0 %v17674_v20  ;;  %10348 = vmatprep.subr.mxu1 %v17581_v51  ;;  %v4908_v62 = vadd.f32 %v9672_v11, %v14753_v33  ;;  %v9749_v44 = vadd.f32 %v9748_v4, %v9747_v47  ;;  %v17679_v51 = vld [vmem:[#allocation127_spill] sm:$0xff] }
 0x358   : > { %6675 = vmatprep.mubr.f32.mxu0 %v14669_v46  ;;  %10269 = vmatpush3.msra.mxu0 %v17675_v8  ;;  %v9674_v21 = vpop.f32.mrf.mxu0  ;;  %v9750_v6 = vpop.f32.mrf.mxu1  ;;  %v17687_v46 = vand.u32 4294901760, %v17680_v60 }
 0x359   : > { %6927 = vmatmul.mubr.f32.gmra.mxu1 %v17676_v35  ;;  %10270 = vmatprep.subr.mxu0 %v17677_v18  ;;  %v9675_v37 = vadd.f32 %v9674_v21, %v9673_v63  ;;  %v14941_v52 = vadd.f32 %v9749_v44, %v4899_v53  ;;  %v17688_v53 = vand.u32 4294901760, %v14696_v10  ;;  %v17693_v63 = vld [vmem:[#allocation152_spill] sm:$0xff]  ;;  %v17695_v18 = vld [vmem:[#allocation178_spill] sm:$0xff] }
 0x35a   : > { %6934 = vmatprep.mubr.f32.mxu1 %v17678_v27  ;;  %10271 = vmatpush3.msra.mxu0 %v17679_v51  ;;  %v9676_v33 = vpop.f32.mrf.mxu0  ;;  %v9751_v0 = vpop.f32.mrf.mxu1 }
 0x35b   : > { %6678 = vmatmul.mubr.f32.gmra.mxu0 %v17680_v60  ;;  %10349 = vmatpush3.msra.mxu1 %v17585_v59  ;;  %v4917_v28 = vadd.f32 %v9675_v37, %v14762_v40  ;;  %v9752_v13 = vadd.f32 %v9751_v0, %v9750_v6  ;;  %v17685_v40 = vld [vmem:[#allocation153_spill] sm:$0xff]  ;;  %v17697_v60 = vld [vmem:[#allocation120_spill] sm:$0xff] }
 0x35c   : > { %6684 = vmatprep.mubr.f32.mxu0 %v14696_v10  ;;  %10272 = vmatprep.subr.mxu0 %v17681_v32  ;;  %v9677_v54 = vpop.f32.mrf.mxu0  ;;  %v9753_v19 = vpop.f32.mrf.mxu1  ;;  %v17692_v24 = vand.u32 4294901760, %v17685_v40  ;;  %vm5693_vm2 = vcmp.eq.s32.totalorder %v17697_v60, 2  ;;  %vm7447_vm3 = vcmp.eq.s32.totalorder %v17697_v60, 3 }
 0x35d   : > { %6938 = vmatmul.mubr.f32.gmra.mxu1 %v17682_v55  ;;  %10273 = vmatpush3.msra.mxu0 %v17683_v29  ;;  %v9678_v22 = vadd.f32 %v9677_v54, %v9676_v33  ;;  %v14954_v25 = vadd.f32 %v9752_v13, %v4908_v62  ;;  %v17694_v62 = vld [vmem:[#allocation161_spill] sm:$0xff]  ;;  %v17698_v54 = vld [vmem:[#allocation188_spill] sm:$0xff] }
 0x35e   : > { %6945 = vmatprep.mubr.f32.mxu1 %v17684_v49  ;;  %10350 = vmatprep.subr.mxu1 %v17588_v30  ;;  %v9679_v59 = vpop.f32.mrf.mxu0  ;;  %v9754_v31 = vpop.f32.mrf.mxu1  ;;  %v17700_v49 = vld [vmem:[#allocation194_spill] sm:$0xff] }
 0x35f   : > { %6687 = vmatmul.mubr.f32.gmra.mxu0 %v17685_v40  ;;  %10351 = vmatpush3.msra.mxu1 %v17589_v39  ;;  %v4926_v14 = vadd.f32 %v9678_v22, %v14772_v16  ;;  %v9755_v38 = vadd.f32 %v9754_v31, %v9753_v19  ;;  %v17690_v16 = vld [vmem:[#allocation9_spill] sm:$0xff] }
 0x360   : > { %7126 = vmatprep.mubr.f32.mxu0 %v17686_v43  ;;  %10352 = vmatprep.subr.mxu1 %v17591_v5  ;;  %v9680_v42 = vpop.f32.mrf.mxu0  ;;  %v9756_v26 = vpop.f32.mrf.mxu1 }
 0x361   : > { %6949 = vmatmul.mubr.f32.gmra.mxu1 %v17687_v46  ;;  %v9681_v58 = vadd.f32 %v9680_v42, %v9679_v59  ;;  %v14966_v30 = vadd.f32 %v9755_v38, %v4917_v28 }
 0x362   : > { %6956 = vmatprep.mubr.f32.mxu1 %v17688_v53  ;;  %10353 = vmatpush3.msra.mxu1 %v17689_v3  ;;  %v9794_v39 = vpop.f32.mrf.mxu0  ;;  %v9757_v15 = vpop.f32.mrf.mxu1  ;;  %v17703_v53 = vld [vmem:[#allocation5_spill] sm:$0xff] }
 0x363   : > { %7128 = vmatmul.mubr.f32.vlgmr.msra.gmra.mxu0 %v17690_v16  ;;  %v4935_v48 = vadd.f32 %v9681_v58, %v14785_v36  ;;  %v9758_v5 = vadd.f32 %v9757_v15, %v9756_v26  ;;  %v17702_v26 = vld [vmem:[#allocation154_spill] sm:$0xff] }
 0x364   : > { %7133 = vmatprep.mubr.f32.mxu0 %v17691_v34  ;;  %v9795_v47 = vpop.f32.mrf.mxu0  ;;  %v9759_v12 = vpop.f32.mrf.mxu1 }
 0x365   : > { %6960 = vmatmul.mubr.f32.gmra.mxu1 %v17692_v24  ;;  %v14976_v11 = vadd.f32 %v9758_v5, %v4926_v14  ;;  %v9796_v10 = vadd.f32 %v9795_v47, %v9794_v39  ;;  %v17704_v5 = vld [vmem:[#allocation27_spill] sm:$0xff]  ;;  %v17705_v47 = vld [vmem:[#allocation157_spill] sm:$0xff] }
 0x366   : > { %7335 = vmatprep.mubr.f32.mxu1 %v17686_v43  ;;  %v9797_v56 = vpop.f32.mrf.mxu0  ;;  %v9760_v20 = vpop.f32.mrf.mxu1  ;;  %v17701_v43 = vld [vmem:[#allocation165_spill] sm:$0xff] }
 0x367   : > { %7135 = vmatmul.mubr.f32.gmra.mxu0 %v17693_v63  ;;  %v5376_v4 = vadd.f32 %v9796_v10, %v14798_v50  ;;  %v9761_v36 = vadd.f32 %v9760_v20, %v9759_v12  ;;  %v17696_v50 = vld [vmem:[#allocation183_spill] sm:$0xff]  ;;  %v17706_v10 = vld [vmem:[#allocation142_spill] sm:$0xff] }
 0x368   : > { %7140 = vmatprep.mubr.f32.mxu0 %v17694_v62  ;;  %v9798_v44 = vpop.f32.mrf.mxu0  ;;  %v9874_v8 = vpop.f32.mrf.mxu1 }
 0x369   : > { %7337 = vmatmul.mubr.f32.vlgmr.msra.gmra.mxu1 %v17690_v16  ;;  %v14983_v21 = vadd.f32 %v9761_v36, %v4935_v48  ;;  %v9799_v6 = vadd.f32 %v9798_v44, %v9797_v56 }
 0x36a   : > { %7342 = vmatprep.mubr.f32.mxu1 %v17691_v34  ;;  %v9800_v35 = vpop.f32.mrf.mxu0  ;;  %v9875_v37 = vpop.f32.mrf.mxu1 }
 0x36b   : > { %7142 = vmatmul.mubr.f32.gmra.mxu0 %v17695_v18  ;;  %v5383_v27 = vadd.f32 %v9799_v6, %v14811_v41  ;;  %v9876_v51 = vadd.f32 %v9875_v37, %v9874_v8  ;;  %v17699_v41 = vld [vmem:[#allocation134_spill] sm:$0xff] }
 0x36c   : > { %7147 = vmatprep.mubr.f32.mxu0 %v17696_v50  ;;  %v9801_v33 = vpop.f32.mrf.mxu0  ;;  %v9877_v0 = vpop.f32.mrf.mxu1  ;;  %v17708_v8 = vld [vmem:[#allocation170_spill] sm:$0xff] }
 0x36d   : > { %7344 = vmatmul.mubr.f32.gmra.mxu1 %v17693_v63  ;;  %v9802_v28 = vadd.f32 %v9801_v33, %v9800_v35  ;;  %v5585_v13 = vadd.f32 %v9876_v51, %v5376_v4 }
 0x36e   : > { %7349 = vmatprep.mubr.f32.mxu1 %v17694_v62  ;;  %v9803_v32 = vpop.f32.mrf.mxu0  ;;  %v9878_v19 = vpop.f32.mrf.mxu1  ;;  %v17707_v62 = vld [vmem:[#allocation171_spill] sm:$0xff] }
 0x36f   : > { %7149 = vmatmul.mubr.f32.gmra.mxu0 %v17698_v54  ;;  %v5390_v55 = vadd.f32 %v9802_v28, %v14824_v9  ;;  %v14997_v29 = vsel %vm5693_vm2, %v5585_v13, %v17699_v41  ;;  %v9879_v22 = vadd.f32 %v9878_v19, %v9877_v0  ;;  %v17710_v0 = vld [vmem:[#allocation39_spill] sm:$0xff]  ;;  %v17711_v13 = vld [vmem:[#allocation177_spill] sm:$0xff] }
 0x370   : > { %7154 = vmatprep.mubr.f32.mxu0 %v17700_v49  ;;  %v9804_v59 = vpop.f32.mrf.mxu0  ;;  %v9880_v40 = vpop.f32.mrf.mxu1  ;;  %v17712_v19 = vld [vmem:[#allocation43_spill] sm:$0xff] }
 0x371   : > { %7351 = vmatmul.mubr.f32.gmra.mxu1 %v17695_v18  ;;  %v9805_v31 = vadd.f32 %v9804_v59, %v9803_v32  ;;  %v5592_v14 = vadd.f32 %v9879_v22, %v5383_v27  ;;  %v17709_v18 = vld [vmem:[#allocation173_spill] sm:$0xff] }
 0x372   : > { %7356 = vmatprep.mubr.f32.mxu1 %v17696_v50  ;;  %v9806_v38 = vpop.f32.mrf.mxu0  ;;  %v9881_v9 = vpop.f32.mrf.mxu1 }
 0x373   : > { %7156 = vmatmul.mubr.f32.gmra.mxu0 %v17701_v43  ;;  %v5397_v42 = vadd.f32 %v9805_v31, %v14837_v61  ;;  %v15007_v46 = vsel %vm5693_vm2, %v5592_v14, %v17702_v26  ;;  %v9882_v58 = vadd.f32 %v9881_v9, %v9880_v40  ;;  %v17713_v40 = vld [vmem:[#allocation53_spill] sm:$0xff]  ;;  %v17715_v9 = vld [vmem:[#allocation7_spill] sm:$0xff] }
 0x374   : > { %7161 = vmatprep.mubr.f32.mxu0 %v17703_v53  ;;  %v9807_v3 = vpop.f32.mrf.mxu0  ;;  %v9883_v39 = vpop.f32.mrf.mxu1  ;;  %v17714_v14 = vld [vmem:[#allocation101_spill] sm:$0xff] }
 0x375   : > { %7358 = vmatmul.mubr.f32.gmra.mxu1 %v17698_v54  ;;  %v9808_v16 = vadd.f32 %v9807_v3, %v9806_v38  ;;  %v5599_v15 = vadd.f32 %v9882_v58, %v5390_v55 }
 0x376   : > { %7363 = vmatprep.mubr.f32.mxu1 %v17700_v49  ;;  %v9809_v48 = vpop.f32.mrf.mxu0  ;;  %v9884_v61 = vpop.f32.mrf.mxu1 }
 0x377   : > { %7163 = vmatmul.mubr.f32.gmra.mxu0 %v17704_v5  ;;  %v5404_v34 = vadd.f32 %v9808_v16, %v14850_v7  ;;  %v15017_v12 = vsel %vm5693_vm2, %v5599_v15, %v17705_v47  ;;  %v9885_v24 = vadd.f32 %v9884_v61, %v9883_v39  ;;  %v17716_v39 = vld [vmem:[#allocation147_spill] sm:$0xff]  ;;  %v17717_v15 = vld [vmem:[#allocation140_spill] sm:$0xff] }
 0x378   : > { %7168 = vmatprep.mubr.f32.mxu0 %v17706_v10  ;;  %v9810_v56 = vpop.f32.mrf.mxu0  ;;  %v9886_v63 = vpop.f32.mrf.mxu1  ;;  %v17718_v61 = vld [vmem:[#allocation59_spill] sm:$0xff] }
 0x379   : > { %7365 = vmatmul.mubr.f32.gmra.mxu1 %v17701_v43  ;;  %v9811_v20 = vadd.f32 %v9810_v56, %v9809_v48  ;;  %v5606_v4 = vadd.f32 %v9885_v24, %v5397_v42 }
 0x37a   : > { %7370 = vmatprep.mubr.f32.mxu1 %v17703_v53  ;;  %v9812_v36 = vpop.f32.mrf.mxu0  ;;  %v9887_v7 = vpop.f32.mrf.mxu1 }
 0x37b   : > { %7170 = vmatmul.mubr.f32.gmra.mxu0 %v17707_v62  ;;  %v5411_v44 = vadd.f32 %v9811_v20, %v14863_v17  ;;  %v15027_v6 = vsel %vm5693_vm2, %v5606_v4, %v17708_v8  ;;  %v9888_v35 = vadd.f32 %v9887_v7, %v9886_v63  ;;  %v17719_v63 = vld [vmem:[#allocation6_spill] sm:$0xff] }
 0x37c   : > { %7175 = vmatprep.mubr.f32.mxu0 %v17709_v18  ;;  %v9813_v37 = vpop.f32.mrf.mxu0  ;;  %v9889_v27 = vpop.f32.mrf.mxu1  ;;  %v17720_v4 = vld [vmem:[#allocation162_spill] sm:$0xff] }
 0x37d   : > { %7372 = vmatmul.mubr.f32.gmra.mxu1 %v17704_v5  ;;  %v9814_v51 = vadd.f32 %v9813_v37, %v9812_v36  ;;  %v5613_v50 = vadd.f32 %v9888_v35, %v5404_v34  ;;  %v17722_v7 = vld [vmem:[#allocation62_spill] sm:$0xff] }
 0x37e   : > { %7377 = vmatprep.mubr.f32.mxu1 %v17706_v10  ;;  %v9815_v33 = vpop.f32.mrf.mxu0  ;;  %v9890_v17 = vpop.f32.mrf.mxu1 }
 0x37f   : > { %7177 = vmatmul.mubr.f32.gmra.mxu0 %v17710_v0  ;;  %v5418_v28 = vadd.f32 %v9814_v51, %v14876_v45  ;;  %v15037_v32 = vsel %vm5693_vm2, %v5613_v50, %v17711_v13  ;;  %v9891_v54 = vadd.f32 %v9890_v17, %v9889_v27  ;;  %v17723_v27 = vld [vmem:[#allocation146_spill] sm:$0xff]  ;;  %v17724_v50 = vld [vmem:[#allocation128_spill] sm:$0xff] }
 0x380   : > { %7182 = vmatprep.mubr.f32.mxu0 %v17712_v19  ;;  %v9816_v55 = vpop.f32.mrf.mxu0  ;;  %v9892_v41 = vpop.f32.mrf.mxu1  ;;  %v17726_v17 = vld [vmem:[#allocation68_spill] sm:$0xff] }
 0x381   : > { %7379 = vmatmul.mubr.f32.gmra.mxu1 %v17707_v62  ;;  %v9817_v22 = vadd.f32 %v9816_v55, %v9815_v33  ;;  %v5620_v49 = vadd.f32 %v9891_v54, %v5411_v44 }
 0x382   : > { %7384 = vmatprep.mubr.f32.mxu1 %v17709_v18  ;;  %v9818_v59 = vpop.f32.mrf.mxu0  ;;  %v9893_v45 = vpop.f32.mrf.mxu1 }
 0x383   : > { %7184 = vmatmul.mubr.f32.gmra.mxu0 %v17713_v40  ;;  %v5425_v31 = vadd.f32 %v9817_v22, %v14889_v1  ;;  %v15047_v38 = vsel %vm5693_vm2, %v5620_v49, %v17714_v14  ;;  %v9894_v43 = vadd.f32 %v9893_v45, %v9892_v41  ;;  %v17727_v41 = vld [vmem:[#allocation72_spill] sm:$0xff]  ;;  %v17728_v49 = vld [vmem:[#allocation174_spill] sm:$0xff]  ;;  %v17730_v45 = vld [vmem:[#allocation145_spill] sm:$0xff] }
 0x384   : > { %7189 = vmatprep.mubr.f32.mxu0 %v17715_v9  ;;  %v9819_v42 = vpop.f32.mrf.mxu0  ;;  %v9895_v26 = vpop.f32.mrf.mxu1 }
 0x385   : > { %7386 = vmatmul.mubr.f32.gmra.mxu1 %v17710_v0  ;;  %v9820_v58 = vadd.f32 %v9819_v42, %v9818_v59  ;;  %v5627_v53 = vadd.f32 %v9894_v43, %v5418_v28 }
 0x386   : > { %7391 = vmatprep.mubr.f32.mxu1 %v17712_v19  ;;  %v9821_v3 = vpop.f32.mrf.mxu0  ;;  %v9896_v1 = vpop.f32.mrf.mxu1 }
 0x387   : > { %7191 = vmatmul.mubr.f32.gmra.mxu0 %v17716_v39  ;;  %v5432_v16 = vadd.f32 %v9820_v58, %v14902_v2  ;;  %v15057_v48 = vsel %vm5693_vm2, %v5627_v53, %v17717_v15  ;;  %v9897_v5 = vadd.f32 %v9896_v1, %v9895_v26  ;;  %v17731_v26 = vld [vmem:[#allocation78_spill] sm:$0xff] }
 0x388   : > { %7196 = vmatprep.mubr.f32.mxu0 %v17718_v61  ;;  %v9822_v34 = vpop.f32.mrf.mxu0  ;;  %v9898_v47 = vpop.f32.mrf.mxu1  ;;  %v17732_v53 = vld [vmem:[#allocation186_spill] sm:$0xff] }
 0x389   : > { %7393 = vmatmul.mubr.f32.gmra.mxu1 %v17713_v40  ;;  %v9823_v24 = vadd.f32 %v9822_v34, %v9821_v3  ;;  %v5634_v10 = vadd.f32 %v9897_v5, %v5425_v31  ;;  %v17734_v1 = vld [vmem:[#allocation82_spill] sm:$0xff] }
 0x38a   : > { %7398 = vmatprep.mubr.f32.mxu1 %v17715_v9  ;;  %v9824_v56 = vpop.f32.mrf.mxu0  ;;  %v9899_v2 = vpop.f32.mrf.mxu1 }
 0x38b   : > { %7198 = vmatmul.mubr.f32.gmra.mxu0 %v17719_v63  ;;  %v5439_v20 = vadd.f32 %v9823_v24, %v14915_v23  ;;  %v15067_v36 = vsel %vm5693_vm2, %v5634_v10, %v17720_v4  ;;  %v9900_v62 = vadd.f32 %v9899_v2, %v9898_v47  ;;  %v17735_v47 = vld [vmem:[#allocation159_spill] sm:$0xff]  ;;  %v17736_v10 = vld [vmem:[#allocation197_spill] sm:$0xff]  ;;  %v17738_v2 = vld [vmem:[#allocation88_spill] sm:$0xff] }
 0x38c   : > { %17721 = vst [vmem:[#allocation176_spill] sm:$0xff] %v15067_v36  ;;  %7203 = vmatprep.mubr.f32.mxu0 %v17722_v7  ;;  %v9825_v44 = vpop.f32.mrf.mxu0  ;;  %v9901_v8 = vpop.f32.mrf.mxu1 }
 0x38d   : > { %7400 = vmatmul.mubr.f32.gmra.mxu1 %v17716_v39  ;;  %v9826_v35 = vadd.f32 %v9825_v44, %v9824_v56  ;;  %v5641_v18 = vadd.f32 %v9900_v62, %v5432_v16 }
 0x38e   : > { %7405 = vmatprep.mubr.f32.mxu1 %v17718_v61  ;;  %v9827_v37 = vpop.f32.mrf.mxu0  ;;  %v9902_v23 = vpop.f32.mrf.mxu1 }
 0x38f   : > { %7205 = vmatmul.mubr.f32.gmra.mxu0 %v17723_v27  ;;  %v5446_v51 = vadd.f32 %v9826_v35, %v14928_v57  ;;  %v15077_v33 = vsel %vm5693_vm2, %v5641_v18, %v17724_v50  ;;  %v9903_v0 = vadd.f32 %v9902_v23, %v9901_v8  ;;  %v17739_v8 = vld [vmem:[#allocation91_spill] sm:$0xff]  ;;  %v17740_v18 = vld [vmem:[#allocation168_spill] sm:$0xff] }
 0x390   : > { %17725 = vst [vmem:[#allocation94_spill] sm:$0xff] %v15077_v33  ;;  %7210 = vmatprep.mubr.f32.mxu0 %v17726_v17  ;;  %v9828_v28 = vpop.f32.mrf.mxu0  ;;  %v9904_v13 = vpop.f32.mrf.mxu1 }
 0x391   : > { %7407 = vmatmul.mubr.f32.gmra.mxu1 %v17719_v63  ;;  %v9829_v54 = vadd.f32 %v9828_v28, %v9827_v37  ;;  %v5648_v19 = vadd.f32 %v9903_v0, %v5439_v20 }
 0x392   : > { %7412 = vmatprep.mubr.f32.mxu1 %v17722_v7  ;;  %v9830_v55 = vpop.f32.mrf.mxu0  ;;  %v9905_v57 = vpop.f32.mrf.mxu1 }
 0x393   : > { %7212 = vmatmul.mubr.f32.gmra.mxu0 %v17727_v41  ;;  %v5453_v22 = vadd.f32 %v9829_v54, %v14941_v52  ;;  %v15087_v59 = vsel %vm5693_vm2, %v5648_v19, %v17728_v49  ;;  %v9906_v40 = vadd.f32 %v9905_v57, %v9904_v13  ;;  %v17742_v54 = vld [vmem:[#allocation148_spill] sm:$0xff] }
 0x394   : > { %17729 = vst [vmem:[#allocation179_spill] sm:$0xff] %v15087_v59  ;;  %7217 = vmatprep.mubr.f32.mxu0 %v17730_v45  ;;  %v9831_v31 = vpop.f32.mrf.mxu0  ;;  %v9907_v14 = vpop.f32.mrf.mxu1 }
 0x395   : > { %7414 = vmatmul.mubr.f32.gmra.mxu1 %v17723_v27  ;;  %v9832_v43 = vadd.f32 %v9831_v31, %v9830_v55  ;;  %v5655_v9 = vadd.f32 %v9906_v40, %v5446_v51 }
 0x396   : > { %7419 = vmatprep.mubr.f32.mxu1 %v17726_v17  ;;  %v9833_v42 = vpop.f32.mrf.mxu0  ;;  %v9908_v52 = vpop.f32.mrf.mxu1 }
 0x397   : > { %7219 = vmatmul.mubr.f32.gmra.mxu0 %v17731_v26  ;;  %v5460_v58 = vadd.f32 %v9832_v43, %v14954_v25  ;;  %v15097_v3 = vsel %vm5693_vm2, %v5655_v9, %v17732_v53  ;;  %v9909_v39 = vadd.f32 %v9908_v52, %v9907_v14 }
 0x398   : > { %17733 = vst [vmem:[#allocation97_spill] sm:$0xff] %v15097_v3  ;;  %7224 = vmatprep.mubr.f32.mxu0 %v17734_v1  ;;  %v9834_v16 = vpop.f32.mrf.mxu0  ;;  %v9910_v15 = vpop.f32.mrf.mxu1 }
 0x399   : > { %7421 = vmatmul.mubr.f32.gmra.mxu1 %v17727_v41  ;;  %v9835_v5 = vadd.f32 %v9834_v16, %v9833_v42  ;;  %v5662_v61 = vadd.f32 %v9909_v39, %v5453_v22 }
 0x39a   : > { %7426 = vmatprep.mubr.f32.mxu1 %v17730_v45  ;;  %v9836_v34 = vpop.f32.mrf.mxu0  ;;  %v9911_v25 = vpop.f32.mrf.mxu1  ;;  %v17744_v45 = vld [vmem:[#allocation33_spill] sm:$0xff] }
 0x39b   : > { %7226 = vmatmul.mubr.f32.gmra.mxu0 %v17735_v47  ;;  %v5467_v24 = vadd.f32 %v9835_v5, %v14966_v30  ;;  %v15107_v56 = vsel %vm5693_vm2, %v5662_v61, %v17736_v10  ;;  %v9912_v63 = vadd.f32 %v9911_v25, %v9910_v15 }
 0x39c   : > { %17737 = vst [vmem:[#allocation163_spill] sm:$0xff] %v15107_v56  ;;  %7231 = vmatprep.mubr.f32.mxu0 %v17738_v2  ;;  %v9837_v20 = vpop.f32.mrf.mxu0  ;;  %v9913_v4 = vpop.f32.mrf.mxu1 }
 0x39d   : > { %7428 = vmatmul.mubr.f32.gmra.mxu1 %v17731_v26  ;;  %v9838_v62 = vadd.f32 %v9837_v20, %v9836_v34  ;;  %v5669_v7 = vadd.f32 %v9912_v63, %v5460_v58  ;;  %v17746_v58 = vld [vmem:[#allocation107_spill] sm:$0xff] }
 0x39e   : > { %7433 = vmatprep.mubr.f32.mxu1 %v17734_v1  ;;  %v9839_v44 = vpop.f32.mrf.mxu0  ;;  %v9914_v30 = vpop.f32.mrf.mxu1 }
 0x39f   : > { %7233 = vmatmul.mubr.f32.gmra.mxu0 %v17739_v8  ;;  %v5474_v35 = vadd.f32 %v9838_v62, %v14976_v11  ;;  %v15117_v37 = vsel %vm5693_vm2, %v5669_v7, %v17740_v18  ;;  %v9915_v27 = vadd.f32 %v9914_v30, %v9913_v4 }
 0x3a0   : > { %17741 = vst [vmem:[#allocation180_spill] sm:$0xff] %v15117_v37  ;;  %v9840_v23 = vpop.f32.mrf.mxu0  ;;  %v9916_v51 = vpop.f32.mrf.mxu1 }
 0x3a1   : > { %7435 = vmatmul.mubr.f32.gmra.mxu1 %v17735_v47  ;;  %v9841_v50 = vadd.f32 %v9840_v23, %v9839_v44  ;;  %v5676_v0 = vadd.f32 %v9915_v27, %v5467_v24 }
 0x3a2   : > { %7440 = vmatprep.mubr.f32.mxu1 %v17738_v2  ;;  %v9954_v17 = vpop.f32.mrf.mxu0  ;;  %v9917_v28 = vpop.f32.mrf.mxu1 }
 0x3a3   : > { %v5481_v13 = vadd.f32 %v9841_v50, %v14983_v21  ;;  %v15125_v11 = vsel %vm5693_vm2, %v5676_v0, %v17742_v54  ;;  %v9918_v19 = vadd.f32 %v9917_v28, %v9916_v51 }
 0x3a4   : > { %17743 = vst [vmem:[#allocation100_spill] sm:$0xff] %v15125_v11  ;;  %v9955_v55 = vpop.f32.mrf.mxu0 }
 0x3a5   : > { %v9919_v41 = vpop.f32.mrf.mxu1  ;;  %7442 = vmatmul.mubr.f32.gmra.mxu1 %v17739_v8  ;;  %v5683_v57 = vadd.f32 %v9918_v19, %v5474_v35  ;;  %v9956_v22 = vadd.f32 %v9955_v55, %v9954_v17 }
 0x3a7   : > { %v9957_v49 = vpop.f32.mrf.mxu0  ;;  %v9920_v40 = vpop.f32.mrf.mxu1  ;;  %v15131_v31 = vsel %vm5693_vm2, %v5683_v57, %v17744_v45 }
 0x3a8   : > { %17745 = vst [vmem:[#allocation182_spill] sm:$0xff] %v15131_v31  ;;  %v9921_v21 = vadd.f32 %v9920_v40, %v9919_v41 }
 0x3a9   : > { %v9958_v14 = vpop.f32.mrf.mxu0  ;;  %v10034_v43 = vpop.f32.mrf.mxu1 }
 0x3aa   : > { %v5690_v9 = vadd.f32 %v9921_v21, %v5481_v13  ;;  %v9959_v42 = vadd.f32 %v9958_v14, %v9957_v49 }
 0x3ab   : > { %v9960_v26 = vpop.f32.mrf.mxu0  ;;  %v10035_v52 = vpop.f32.mrf.mxu1 }
 0x3ac   : > { %v15136_v53 = vsel %vm5693_vm2, %v5690_v9, %v17746_v58  ;;  %v10036_v39 = vadd.f32 %v10035_v52, %v10034_v43 }
 0x3ad   : > { %17747 = vst [vmem:[#allocation104_spill] sm:$0xff] %v15136_v53  ;;  %v9961_v1 = vpop.f32.mrf.mxu0  ;;  %v10037_v16 = vpop.f32.mrf.mxu1 }
 0x3ae   : > { %v9962_v15 = vadd.f32 %v9961_v1, %v9960_v26  ;;  %v15138_v5 = vadd.f32 %v10036_v39, %v9956_v22 }
 0x3af   : > { %v9963_v61 = vpop.f32.mrf.mxu0  ;;  %v10038_v34 = vpop.f32.mrf.mxu1 }
 0x3b0   : > { %v10039_v47 = vadd.f32 %v10038_v34, %v10037_v16 }
 0x3b1   : > { %v9964_v25 = vpop.f32.mrf.mxu0  ;;  %v10040_v24 = vpop.f32.mrf.mxu1 }
 0x3b2   : > { %v9965_v10 = vadd.f32 %v9964_v25, %v9963_v61  ;;  %v15140_v63 = vadd.f32 %v10039_v47, %v9959_v42 }
 0x3b3   : > { %v9966_v2 = vpop.f32.mrf.mxu0  ;;  %v10041_v20 = vpop.f32.mrf.mxu1 }
 0x3b4   : > { %v10042_v4 = vadd.f32 %v10041_v20, %v10040_v24 }
 0x3b5   : > { %v9967_v62 = vpop.f32.mrf.mxu0  ;;  %v10043_v7 = vpop.f32.mrf.mxu1 }
 0x3b6   : > { %v9968_v44 = vadd.f32 %v9967_v62, %v9966_v2  ;;  %v15142_v8 = vadd.f32 %v10042_v4, %v9962_v15 }
 0x3b7   : > { %v9969_v30 = vpop.f32.mrf.mxu0  ;;  %v10044_v35 = vpop.f32.mrf.mxu1 }
 0x3b8   : > { %v10045_v18 = vadd.f32 %v10044_v35, %v10043_v7 }
 0x3b9   : > { %v9970_v27 = vpop.f32.mrf.mxu0  ;;  %v10046_v23 = vpop.f32.mrf.mxu1 }
 0x3ba   : > { %v9971_v51 = vadd.f32 %v9970_v27, %v9969_v30  ;;  %v15144_v50 = vadd.f32 %v10045_v18, %v9965_v10 }
 0x3bb   : > { %v9972_v0 = vpop.f32.mrf.mxu0  ;;  %v10047_v17 = vpop.f32.mrf.mxu1 }
 0x3bc   : > { %v10048_v28 = vadd.f32 %v10047_v17, %v10046_v23 }
 0x3bd   : > { %v9973_v13 = vpop.f32.mrf.mxu0  ;;  %v10049_v54 = vpop.f32.mrf.mxu1 }
 0x3be   : > { %v9974_v19 = vadd.f32 %v9973_v13, %v9972_v0  ;;  %v15146_v55 = vadd.f32 %v10048_v28, %v9968_v44 }
 0x3bf   : > { %v9975_v41 = vpop.f32.mrf.mxu0  ;;  %v10050_v57 = vpop.f32.mrf.mxu1 }
 0x3c0   : > { %v10051_v22 = vadd.f32 %v10050_v57, %v10049_v54 }
 0x3c1   : > { %v9976_v49 = vpop.f32.mrf.mxu0  ;;  %v10052_v40 = vpop.f32.mrf.mxu1 }
 0x3c2   : > { %v9977_v45 = vadd.f32 %v9976_v49, %v9975_v41  ;;  %v15148_v21 = vadd.f32 %v10051_v22, %v9971_v51 }
 0x3c3   : > { %v9978_v14 = vpop.f32.mrf.mxu0  ;;  %v10053_v43 = vpop.f32.mrf.mxu1 }
 0x3c4   : > { %v10054_v9 = vadd.f32 %v10053_v43, %v10052_v40 }
 0x3c5   : > { %v9979_v42 = vpop.f32.mrf.mxu0  ;;  %v10055_v26 = vpop.f32.mrf.mxu1 }
 0x3c6   : > { %v9980_v52 = vadd.f32 %v9979_v42, %v9978_v14  ;;  %v15150_v58 = vadd.f32 %v10054_v9, %v9974_v19 }
 0x3c7   : > { %v9981_v39 = vpop.f32.mrf.mxu0  ;;  %v10056_v1 = vpop.f32.mrf.mxu1 }
 0x3c8   : > { %v10057_v16 = vadd.f32 %v10056_v1, %v10055_v26 }
 0x3c9   : > { %v9982_v15 = vpop.f32.mrf.mxu0  ;;  %v10058_v61 = vpop.f32.mrf.mxu1 }
 0x3ca   : > { %v9983_v34 = vadd.f32 %v9982_v15, %v9981_v39  ;;  %v15152_v47 = vadd.f32 %v10057_v16, %v9977_v45 }
 0x3cb   : > { %v9984_v25 = vpop.f32.mrf.mxu0  ;;  %v10059_v24 = vpop.f32.mrf.mxu1 }
 0x3cc   : > { %v10060_v10 = vadd.f32 %v10059_v24, %v10058_v61 }
 0x3cd   : > { %v9985_v2 = vpop.f32.mrf.mxu0  ;;  %v10061_v20 = vpop.f32.mrf.mxu1 }
 0x3ce   : > { %v9986_v4 = vadd.f32 %v9985_v2, %v9984_v25  ;;  %v15154_v62 = vadd.f32 %v10060_v10, %v9980_v52 }
 0x3cf   : > { %v9987_v7 = vpop.f32.mrf.mxu0  ;;  %v10062_v44 = vpop.f32.mrf.mxu1 }
 0x3d0   : > { %v10063_v30 = vadd.f32 %v10062_v44, %v10061_v20 }
 0x3d1   : > { %v9988_v35 = vpop.f32.mrf.mxu0  ;;  %v10064_v18 = vpop.f32.mrf.mxu1 }
 0x3d2   : > { %v9989_v27 = vadd.f32 %v9988_v35, %v9987_v7  ;;  %v15156_v23 = vadd.f32 %v10063_v30, %v9983_v34 }
 0x3d3   : > { %v9990_v51 = vpop.f32.mrf.mxu0  ;;  %v10065_v0 = vpop.f32.mrf.mxu1 }
 0x3d4   : > { %17748 = vst [vmem:[#allocation96_spill] sm:$0xff] %v15156_v23  ;;  %v10066_v17 = vadd.f32 %v10065_v0, %v10064_v18 }
 0x3d5   : > { %v9991_v28 = vpop.f32.mrf.mxu0  ;;  %v10067_v13 = vpop.f32.mrf.mxu1 }
 0x3d6   : > { %v9992_v54 = vadd.f32 %v9991_v28, %v9990_v51  ;;  %v15158_v19 = vadd.f32 %v10066_v17, %v9986_v4 }
 0x3d7   : > { %v9993_v41 = vpop.f32.mrf.mxu0  ;;  %v10068_v57 = vpop.f32.mrf.mxu1 }
 0x3d8   : > { %17749 = vst [vmem:[#allocation185_spill] sm:$0xff] %v15158_v19  ;;  %v10069_v22 = vadd.f32 %v10068_v57, %v10067_v13 }
 0x3d9   : > { %v9994_v49 = vpop.f32.mrf.mxu0  ;;  %v10070_v40 = vpop.f32.mrf.mxu1 }
 0x3da   : > { %v9995_v45 = vadd.f32 %v9994_v49, %v9993_v41  ;;  %v15160_v14 = vadd.f32 %v10069_v22, %v9989_v27 }
 0x3db   : > { %v9996_v43 = vpop.f32.mrf.mxu0  ;;  %v10071_v9 = vpop.f32.mrf.mxu1 }
 0x3dc   : > { %17750 = vst [vmem:[#allocation110_spill] sm:$0xff] %v15160_v14  ;;  %v10072_v42 = vadd.f32 %v10071_v9, %v10070_v40 }
 0x3dd   : > { %v9997_v26 = vpop.f32.mrf.mxu0  ;;  %v10073_v52 = vpop.f32.mrf.mxu1 }
 0x3de   : > { %v9998_v39 = vadd.f32 %v9997_v26, %v9996_v43  ;;  %v15162_v1 = vadd.f32 %v10072_v42, %v9992_v54 }
 0x3df   : > { %v9999_v16 = vpop.f32.mrf.mxu0  ;;  %v10074_v15 = vpop.f32.mrf.mxu1 }
 0x3e0   : > { %17751 = vst [vmem:[#allocation187_spill] sm:$0xff] %v15162_v1  ;;  %v10075_v61 = vadd.f32 %v10074_v15, %v10073_v52 }
 0x3e1   : > { %v10000_v34 = vpop.f32.mrf.mxu0  ;;  %v10076_v25 = vpop.f32.mrf.mxu1 }
 0x3e2   : > { %v10001_v24 = vadd.f32 %v10000_v34, %v9999_v16  ;;  %v15164_v10 = vadd.f32 %v10075_v61, %v9995_v45 }
 0x3e3   : > { %v15166_v2 = vpop.f32.mrf.mxu0  ;;  %v10077_v20 = vpop.f32.mrf.mxu1 }
 0x3e4   : > { %17752 = vst [vmem:[#allocation114_spill] sm:$0xff] %v15164_v10  ;;  %v10078_v4 = vadd.f32 %v10077_v20, %v10076_v25 }
 0x3e5   : > { %v15168_v7 = vpop.f32.mrf.mxu0  ;;  %v10079_v44 = vpop.f32.mrf.mxu1 }
 0x3e6   : > { %v15170_v30 = vadd.f32 %v10078_v4, %v9998_v39 }
 0x3e7   : > { %v10117_v35 = vpop.f32.mrf.mxu0  ;;  %v10080_v18 = vpop.f32.mrf.mxu1 }
 0x3e8   : > { %17753 = vst [vmem:[#allocation144_spill] sm:$0xff] %v15170_v30  ;;  %v10081_v27 = vadd.f32 %v10080_v18, %v10079_v44 }
 0x3e9   : > { %v10118_v51 = vpop.f32.mrf.mxu0  ;;  %v15172_v0 = vpop.f32.mrf.mxu1 }
 0x3ea   : > { %v15174_v17 = vadd.f32 %v10081_v27, %v10001_v24  ;;  %v10119_v28 = vadd.f32 %v10118_v51, %v10117_v35 }
 0x3eb   : > { %v15176_v13 = vpop.f32.mrf.mxu0  ;;  %v15178_v54 = vpop.f32.mrf.mxu1 }
 0x3ec   : > { %17754 = vst [vmem:[#allocation189_spill] sm:$0xff] %v15174_v17  ;;  %v6563_v41 = vadd.f32 %v10119_v28, %v15140_v63 }
 0x3ed   : > { %v15181_v57 = vpop.f32.mrf.mxu0  ;;  %v10197_v22 = vpop.f32.mrf.mxu1 }
 0x3ef   : > { %v10123_v49 = vpop.f32.mrf.mxu0  ;;  %v10198_v40 = vpop.f32.mrf.mxu1 }
 0x3f0   : > { %v10199_v45 = vadd.f32 %v10198_v40, %v10197_v22 }
 0x3f1   : > { %v10124_v43 = vpop.f32.mrf.mxu0  ;;  %v15183_v9 = vpop.f32.mrf.mxu1 }
 0x3f2   : > { %v10125_v42 = vadd.f32 %v10124_v43, %v10123_v49  ;;  %v15185_v26 = vadd.f32 %v10199_v45, %v6563_v41 }
 0x3f3   : > { %v15187_v52 = vpop.f32.mrf.mxu0  ;;  %v15189_v39 = vpop.f32.mrf.mxu1 }
 0x3f4   : > { %v6581_v16 = vadd.f32 %v10125_v42, %v15144_v50 }
 0x3f5   : > { %v15192_v15 = vpop.f32.mrf.mxu0  ;;  %v10203_v63 = vpop.f32.mrf.mxu1 }
 0x3f7   : > { %v15194_v61 = vpop.f32.mrf.mxu0  ;;  %v10204_v34 = vpop.f32.mrf.mxu1 }
 0x3f8   : > { %v10205_v25 = vadd.f32 %v10204_v34, %v10203_v63 }
 0x3f9   : > { %v15196_v24 = vpop.f32.mrf.mxu0  ;;  %v15198_v20 = vpop.f32.mrf.mxu1 }
 0x3fa   : > { %v15200_v4 = vadd.f32 %v10205_v25, %v6581_v16 }
 0x3fb   : > { %v15202_v44 = vpop.f32.mrf.mxu0  ;;  %v15204_v35 = vpop.f32.mrf.mxu1 }
 0x3fd   : > { %v15206_v18 = vpop.f32.mrf.mxu0  ;;  %v15208_v50 = vpop.f32.mrf.mxu1 }
 0x3ff   : > { %v15210_v27 = vpop.f32.mrf.mxu0  ;;  %v15212_v51 = vpop.f32.mrf.mxu1 }
 0x401   : > { %v15214_v28 = vpop.f32.mrf.mxu0  ;;  %v15216_v41 = vpop.f32.mrf.mxu1 }
 0x403   : > { %v15218_v22 = vpop.f32.mrf.mxu0  ;;  %v15220_v49 = vpop.f32.mrf.mxu1 }
 0x405   : > { %v15222_v40 = vpop.f32.mrf.mxu0  ;;  %v15224_v45 = vpop.f32.mrf.mxu1 }
 0x407   : > { %v15226_v43 = vpop.f32.mrf.mxu0  ;;  %v15228_v42 = vpop.f32.mrf.mxu1 }
 0x409   : > { %v15230_v16 = vpop.f32.mrf.mxu0  ;;  %v15232_v63 = vpop.f32.mrf.mxu1 }
 0x40b   : > { %v15234_v34 = vpop.f32.mrf.mxu0  ;;  %v15236_v25 = vpop.f32.mrf.mxu1 }
 0x40c   : > { %17755 = vst [vmem:[#allocation117_spill] sm:$0xff] %v15234_v34 }
 0x40d   : > { %v15238_v53 = vpop.f32.mrf.mxu0  ;;  %v15240_v31 = vpop.f32.mrf.mxu1 }
 0x40e   : > { %17756 = vst [vmem:[#allocation191_spill] sm:$0xff] %v15238_v53 }
 0x40f   : > { %v15242_v11 = vpop.f32.mrf.mxu0  ;;  %v15244_v17 = vpop.f32.mrf.mxu1 }
 0x410   : > { %17757 = vst [vmem:[#allocation118_spill] sm:$0xff] %v15242_v11  ;;  %17758 = vst [vmem:[#allocation160_spill] sm:$0xff] %v15244_v17 }
 0x411   : > { %v15246_v37 = vpop.f32.mrf.mxu0  ;;  %v15248_v30 = vpop.f32.mrf.mxu1 }
 0x412   : > { %17759 = vst [vmem:[#allocation192_spill] sm:$0xff] %v15246_v37  ;;  %17760 = vst [vmem:[#allocation121_spill] sm:$0xff] %v15248_v30 }
 0x413   : > { %v15250_v56 = vpop.f32.mrf.mxu0  ;;  %v15252_v3 = vpop.f32.mrf.mxu1 }
 0x414   : > { %17761 = vst [vmem:[#allocation193_spill] sm:$0xff] %v15250_v56  ;;  %17762 = vst [vmem:[#allocation175_spill] sm:$0xff] %v15252_v3 }
 0x415   : > { %v15254_v10 = vpop.f32.mrf.mxu0  ;;  %v15256_v59 = vpop.f32.mrf.mxu1 }
 0x416   : > { %17763 = vst [vmem:[#allocation195_spill] sm:$0xff] %v15254_v10  ;;  %17764 = vst [vmem:[#allocation130_spill] sm:$0xff] %v15256_v59 }
 0x417   : > { %v15258_v1 = vpop.f32.mrf.mxu0  ;;  %v15260_v14 = vpop.f32.mrf.mxu1 }
 0x418   : > { %17765 = vst [vmem:[#allocation196_spill] sm:$0xff] %v15258_v1  ;;  %17766 = vst [vmem:[#allocation132_spill] sm:$0xff] %v15260_v14 }
 0x419   : > { %v15262_v33 = vpop.f32.mrf.mxu0  ;;  %v15264_v19 = vpop.f32.mrf.mxu1 }
 0x41a   : > { %17767 = vst [vmem:[#allocation136_spill] sm:$0xff] %v15262_v33  ;;  %17768 = vst [vmem:[#allocation198_spill] sm:$0xff] %v15264_v19 }
 0x41b   : > { %v15266_v11 = vpop.f32.mrf.mxu0  ;;  %v15268_v37 = vpop.f32.mrf.mxu1 }
 0x41c   : > { %17769 = vst [vmem:[#allocation137_spill] sm:$0xff] %v15266_v11  ;;  %17770 = vst [vmem:[#allocation138_spill] sm:$0xff] %v15268_v37  ;;  %v10116_v11 = vadd.f32 %v15168_v7, %v15166_v2 }
 0x41d   : > { %v15270_v30 = vpop.f32.mrf.mxu0  ;;  %v15272_v56 = vpop.f32.mrf.mxu1 }
 0x41e   : > { %17771 = vst [vmem:[#allocation156_spill] sm:$0xff] %v15270_v30  ;;  %17772 = vst [vmem:[#allocation10_spill] sm:$0xff] %v15272_v56  ;;  %v10196_v56 = vadd.f32 %v15178_v54, %v15172_v0  ;;  %v10202_v54 = vadd.f32 %v15189_v39, %v15183_v9  ;;  %v10128_v9 = vadd.f32 %v15192_v15, %v15187_v52 }
 0x41f   : > { %v15274_v3 = vpop.f32.mrf.mxu0  ;;  %v15276_v10 = vpop.f32.mrf.mxu1  ;;  %v10131_v15 = vadd.f32 %v15196_v24, %v15194_v61  ;;  %v10211_v61 = vadd.f32 %v15212_v51, %v15208_v50 }
 0x420   : > { %17773 = vst [vmem:[#allocation141_spill] sm:$0xff] %v15274_v3  ;;  %17774 = vst [vmem:[#allocation12_spill] sm:$0xff] %v15276_v10  ;;  %v6554_v10 = vadd.f32 %v10116_v11, %v15138_v5  ;;  %v6590_v52 = vadd.f32 %v10128_v9, %v15146_v55 }
 0x421   : > { %v15278_v59 = vpop.f32.mrf.mxu0  ;;  %v15280_v1 = vpop.f32.mrf.mxu1 }
 0x422   : > { %17775 = vst [vmem:[#allocation169_spill] sm:$0xff] %v15278_v59  ;;  %17776 = vst [vmem:[#allocation14_spill] sm:$0xff] %v15280_v1  ;;  %v6797_v53 = vadd.f32 %v10196_v56, %v6554_v10  ;;  %v15301_v56 = vld [vmem:[%s15712_s2] ss:$0 sm:$0xff] }
 0x423   : > { %v10274_v14 = vpop.f32.mrf.mxu0  ;;  %v15282_v33 = vpop.f32.mrf.mxu1 }
 0x424   : > { %17777 = vst [vmem:[#allocation17_spill] sm:$0xff] %v15282_v33  ;;  %v10122_v33 = vadd.f32 %v15181_v57, %v15176_v13 }
 0x425   : > { %v10275_v19 = vpop.f32.mrf.mxu0  ;;  %v15286_v37 = vpop.f32.mrf.mxu1 }
 0x426   : > { %17778 = vst [vmem:[#allocation21_spill] sm:$0xff] %v15286_v37  ;;  %v10276_v59 = vadd.f32 %v10275_v19, %v10274_v14  ;;  %v6572_v5 = vadd.f32 %v10122_v33, %v15142_v8 }
 0x427   : > { %v10277_v30 = vpop.f32.mrf.mxu0  ;;  %v15290_v3 = vpop.f32.mrf.mxu1 }
 0x428   : > { %v7130_v7 = vadd.f32 %v10276_v59, %v6797_v53  ;;  %v6819_v13 = vadd.f32 %v10202_v54, %v6572_v5 }
 0x429   : > { %v10278_v36 = vpop.f32.mrf.mxu0  ;;  %v10354_v1 = vpop.f32.mrf.mxu1 }
 0x42a   : > { %v10279_v23 = vadd.f32 %v10278_v36, %v10277_v30 }
 0x42b   : > { %v10280_v34 = vpop.f32.mrf.mxu0  ;;  %v10355_v2 = vpop.f32.mrf.mxu1 }
 0x42c   : > { %v10356_v37 = vadd.f32 %v10355_v2, %v10354_v1  ;;  %v7137_v36 = vadd.f32 %v10279_v23, %v15185_v26 }
 0x42d   : > { %v10281_v17 = vpop.f32.mrf.mxu0  ;;  %v10357_v0 = vpop.f32.mrf.mxu1 }
 0x42e   : > { %v7339_v11 = vadd.f32 %v10356_v37, %v7130_v7  ;;  %v10282_v59 = vadd.f32 %v10281_v17, %v10280_v34 }
 0x42f   : > { %v10283_v19 = vpop.f32.mrf.mxu0  ;;  %v10358_v14 = vpop.f32.mrf.mxu1 }
 0x430   : > { %v7450_v53 = vsel %vm7447_vm3, %v7339_v11, %v14997_v29  ;;  %v10359_v1 = vadd.f32 %v10358_v14, %v10357_v0  ;;  %v7144_v2 = vadd.f32 %v10282_v59, %v6819_v13  ;;  %v10208_v0 = vadd.f32 %v15204_v35, %v15198_v20 }
 0x431   : > { %v7473_v10 = vadd.f32 %v15301_v56, %v7450_v53  ;;  %v10284_v37 = vpop.f32.mrf.mxu0  ;;  %v10360_v30 = vpop.f32.mrf.mxu1 }
 0x432   : > { %v7346_v57 = vadd.f32 %v10359_v1, %v7137_v36  ;;  %v10285_v23 = vadd.f32 %v10284_v37, %v10283_v19  ;;  %v6841_v55 = vadd.f32 %v10208_v0, %v6590_v52  ;;  %v6599_v1 = vadd.f32 %v10131_v15, %v15148_v21 }
 0x433   : > { %v8407_v33 = vmul.f32 -1.442695, %v7473_v10  ;;  %v10286_v8 = vpop.f32.mrf.mxu0  ;;  %v10361_v39 = vpop.f32.mrf.mxu1  ;;  %v10214_v21 = vadd.f32 %v15220_v49, %v15216_v41  ;;  %v10140_v52 = vadd.f32 %v15222_v40, %v15218_v22  ;;  %v10220_v22 = vadd.f32 %v15236_v25, %v15232_v63 }
 0x434   : > { %v7451_v17 = vsel %vm7447_vm3, %v7346_v57, %v15007_v46  ;;  %v10362_v29 = vadd.f32 %v10361_v39, %v10360_v30  ;;  %v7151_v46 = vadd.f32 %v10285_v23, %v15200_v4  ;;  %v10134_v4 = vadd.f32 %v15206_v18, %v15202_v44 }
 0x435   : > { %10618 = vpow2.f32 %v8407_v33  ;;  %v7474_v26 = vadd.f32 %v15301_v56, %v7451_v17  ;;  %v10287_v34 = vpop.f32.mrf.mxu0  ;;  %v10363_v7 = vpop.f32.mrf.mxu1  ;;  %v10137_v39 = vadd.f32 %v15214_v28, %v15210_v27  ;;  %v10217_v27 = vadd.f32 %v15228_v42, %v15224_v45 }
 0x436   : > { %v7353_v54 = vadd.f32 %v10362_v29, %v7144_v2  ;;  %v10288_v14 = vadd.f32 %v10287_v34, %v10286_v8  ;;  %v6852_v8 = vadd.f32 %v10211_v61, %v6599_v1  ;;  %v6608_v18 = vadd.f32 %v10134_v4, %v15150_v58 }
 0x437   : > { %v8408_v11 = vmul.f32 -1.442695, %v7474_v26  ;;  %v10289_v5 = vpop.f32.mrf.mxu0  ;;  %v10364_v19 = vpop.f32.mrf.mxu1 }
 0x438   : > { %v7452_v36 = vsel %vm7447_vm3, %v7353_v54, %v15017_v12  ;;  %v10365_v59 = vadd.f32 %v10364_v19, %v10363_v7  ;;  %v7158_v12 = vadd.f32 %v10288_v14, %v6841_v55  ;;  %v6863_v58 = vadd.f32 %v10214_v21, %v6608_v18 }
 0x439   : > { %10620 = vpow2.f32 %v8408_v11  ;;  %v7475_v20 = vadd.f32 %v15301_v56, %v7452_v36  ;;  %v10290_v35 = vpop.f32.mrf.mxu0  ;;  %v10366_v53 = vpop.f32.mrf.mxu1  ;;  %v6617_v54 = vadd.f32 %v10137_v39, %v15152_v47 }
 0x43a   : > { %v7360_v24 = vadd.f32 %v10365_v59, %v7151_v46  ;;  %v10291_v13 = vadd.f32 %v10290_v35, %v10289_v5  ;;  %v6626_v35 = vadd.f32 %v10140_v52, %v15154_v62 }
 0x43b   : > { %v8409_v10 = vmul.f32 -1.442695, %v7475_v20  ;;  %v10292_v37 = vpop.f32.mrf.mxu0  ;;  %v10367_v30 = vpop.f32.mrf.mxu1  ;;  %v6874_v20 = vadd.f32 %v10217_v27, %v6617_v54  ;;  %v17788_v54 = vld [vmem:[#allocation185_spill] sm:$0xff] }
 0x43c   : > { %v7453_v57 = vsel %vm7447_vm3, %v7360_v24, %v15027_v6  ;;  %v10368_v9 = vadd.f32 %v10367_v30, %v10366_v53  ;;  %v7165_v6 = vadd.f32 %v10291_v13, %v6852_v8  ;;  %v10143_v53 = vadd.f32 %v15230_v16, %v15226_v43  ;;  %v17779_v43 = vld [vmem:[#allocation160_spill] sm:$0xff] }
 0x43d   : > { %10622 = vpow2.f32 %v8409_v10  ;;  %v7476_v33 = vadd.f32 %v15301_v56, %v7453_v57  ;;  %v10293_v50 = vpop.f32.mrf.mxu0  ;;  %v10369_v51 = vpop.f32.mrf.mxu1  ;;  %v10223_v16 = vadd.f32 %v17779_v43, %v15240_v31  ;;  %v17780_v57 = vld [vmem:[#allocation96_spill] sm:$0xff] }
 0x43e   : > { %v7367_v44 = vadd.f32 %v10368_v9, %v7158_v12  ;;  %v10294_v29 = vadd.f32 %v10293_v50, %v10292_v37  ;;  %v6885_v12 = vadd.f32 %v10220_v22, %v6626_v35  ;;  %v6635_v9 = vadd.f32 %v10143_v53, %v17780_v57  ;;  %v17782_v50 = vld [vmem:[#allocation191_spill] sm:$0xff]  ;;  %v17785_v31 = vld [vmem:[#allocation192_spill] sm:$0xff]  ;;  %v17794_v35 = vld [vmem:[#allocation130_spill] sm:$0xff] }
 0x43f   : > { %v8410_v2 = vmul.f32 -1.442695, %v7476_v33  ;;  %v10295_v23 = vpop.f32.mrf.mxu0  ;;  %v10370_v17 = vpop.f32.mrf.mxu1  ;;  %v17781_v33 = vld [vmem:[#allocation117_spill] sm:$0xff]  ;;  %v17793_v22 = vld [vmem:[#allocation136_spill] sm:$0xff] }
 0x440   : > { %v7454_v26 = vsel %vm7447_vm3, %v7367_v44, %v15037_v32  ;;  %v10371_v34 = vadd.f32 %v10370_v17, %v10369_v51  ;;  %v7172_v19 = vadd.f32 %v10294_v29, %v6863_v58  ;;  %v10146_v51 = vadd.f32 %v17782_v50, %v17781_v33  ;;  %v17787_v58 = vld [vmem:[#allocation175_spill] sm:$0xff]  ;;  %v17795_v53 = vld [vmem:[#allocation132_spill] sm:$0xff] }
 0x441   : > { %10624 = vpow2.f32 %v8410_v2  ;;  %v7477_v7 = vadd.f32 %v15301_v56, %v7454_v26  ;;  %v10296_v41 = vpop.f32.mrf.mxu0  ;;  %v10372_v49 = vpop.f32.mrf.mxu1  ;;  %v17783_v2 = vld [vmem:[#allocation176_spill] sm:$0xff]  ;;  %v17798_v33 = vld [vmem:[#allocation179_spill] sm:$0xff] }
 0x442   : > { %v10619_v0 = vpop.eup %10618  ;;  %v7374_v28 = vadd.f32 %v10371_v34, %v7165_v6  ;;  %v10297_v46 = vadd.f32 %v10296_v41, %v10295_v23  ;;  %v17784_v6 = vld [vmem:[#allocation118_spill] sm:$0xff]  ;;  %v6644_v52 = vadd.f32 %v10146_v51, %v17788_v54 }
 0x443   : > { %v8411_v15 = vmul.f32 -1.442695, %v7477_v7  ;;  %v10298_v11 = vpop.f32.mrf.mxu0  ;;  %v10373_v32 = vpop.f32.mrf.mxu1  ;;  %v7537_v5 = vadd.f32 1.0, %v10619_v0  ;;  %v10149_v29 = vadd.f32 %v17785_v31, %v17784_v6  ;;  %v17786_v0 = vld [vmem:[#allocation121_spill] sm:$0xff]  ;;  %v17801_v6 = vld [vmem:[#allocation138_spill] sm:$0xff] }
 0x444   : > { %v7455_v14 = vsel %vm7447_vm3, %v7374_v28, %v15047_v38  ;;  %v10374_v36 = vadd.f32 %v10373_v32, %v10372_v49  ;;  %v7179_v1 = vadd.f32 %v10297_v46, %v6874_v20  ;;  %v6896_v49 = vadd.f32 %v10223_v16, %v6635_v9  ;;  %v17792_v20 = vld [vmem:[#allocation196_spill] sm:$0xff] }
 0x445   : > { %10626 = vpow2.f32 %v8411_v15  ;;  %v7478_v45 = vadd.f32 %v15301_v56, %v7455_v14  ;;  %v10299_v42 = vpop.f32.mrf.mxu0  ;;  %v10375_v59 = vpop.f32.mrf.mxu1  ;;  %v10226_v27 = vadd.f32 %v17787_v58, %v17786_v0  ;;  %v17789_v15 = vld [vmem:[#allocation193_spill] sm:$0xff] }
 0x446   : > { %v10621_v47 = vpop.eup %10620  ;;  %v7381_v40 = vadd.f32 %v10374_v36, %v7172_v19  ;;  %10628 = vrcp.f32 %v7537_v5  ;;  %v10300_v4 = vadd.f32 %v10299_v42, %v10298_v11  ;;  %v17790_v11 = vld [vmem:[#allocation195_spill] sm:$0xff]  ;;  %v17791_v42 = vld [vmem:[#allocation94_spill] sm:$0xff] }
 0x447   : > { %v8412_v55 = vmul.f32 -1.442695, %v7478_v45  ;;  %v10301_v38 = vpop.f32.mrf.mxu0  ;;  %v10376_v61 = vpop.f32.mrf.mxu1  ;;  %v7538_v24 = vadd.f32 1.0, %v10621_v47  ;;  %v10152_v32 = vadd.f32 %v17790_v11, %v17789_v15  ;;  %v17804_v15 = vld [vmem:[#allocation97_spill] sm:$0xff] }
 0x448   : > { %v7456_v10 = vsel %vm7447_vm3, %v7381_v40, %v15057_v48  ;;  %v10377_v37 = vadd.f32 %v10376_v61, %v10375_v59  ;;  %v7186_v18 = vadd.f32 %v10300_v4, %v6885_v12  ;;  %v10155_v40 = vadd.f32 %v17793_v22, %v17792_v20  ;;  %v17796_v4 = vld [vmem:[#allocation110_spill] sm:$0xff]  ;;  %v17807_v22 = vld [vmem:[#allocation141_spill] sm:$0xff] }
 0x449   : > { %10630 = vpow2.f32 %v8412_v55  ;;  %v7479_v63 = vadd.f32 %v15301_v56, %v7456_v10  ;;  %v10302_v25 = vpop.f32.mrf.mxu0  ;;  %v10378_v30 = vpop.f32.mrf.mxu1  ;;  %v10229_v55 = vadd.f32 %v17795_v53, %v17794_v35  ;;  %v6653_v10 = vadd.f32 %v10149_v29, %v17796_v4 }
 0x44a   : > { %v10623_v62 = vpop.eup %10622  ;;  %v7388_v13 = vadd.f32 %v10377_v37, %v7179_v1  ;;  %10632 = vrcp.f32 %v7538_v24  ;;  %v10303_v39 = vadd.f32 %v10302_v25, %v10301_v38  ;;  %v6907_v37 = vadd.f32 %v10226_v27, %v6644_v52 }
 0x44b   : > { %v8413_v8 = vmul.f32 -1.442695, %v7479_v63  ;;  %v10304_v48 = vpop.f32.mrf.mxu0  ;;  %v10379_v21 = vpop.f32.mrf.mxu1  ;;  %v7539_v44 = vadd.f32 1.0, %v10623_v62 }
 0x44c   : > { %v7457_v23 = vsel %vm7447_vm3, %v7388_v13, %v17783_v2  ;;  %v10380_v17 = vadd.f32 %v10379_v21, %v10378_v30  ;;  %v7193_v36 = vadd.f32 %v10303_v39, %v6896_v49  ;;  %v17797_v30 = vld [vmem:[#allocation187_spill] sm:$0xff] }
 0x44d   : > { %10634 = vpow2.f32 %v8413_v8  ;;  %v7480_v26 = vadd.f32 %v15301_v56, %v7457_v23  ;;  %v10305_v34 = vpop.f32.mrf.mxu0  ;;  %v10381_v7 = vpop.f32.mrf.mxu1  ;;  %v6662_v62 = vadd.f32 %v10152_v32, %v17797_v30 }
 0x44e   : > { %v10625_v41 = vpop.eup %10624  ;;  %v7395_v28 = vadd.f32 %v10380_v17, %v7186_v18  ;;  %10636 = vrcp.f32 %v7539_v44  ;;  %v10306_v45 = vadd.f32 %v10305_v34, %v10304_v48  ;;  %v17799_v48 = vld [vmem:[#allocation114_spill] sm:$0xff]  ;;  %v6918_v44 = vadd.f32 %v10229_v55, %v6653_v10 }
 0x44f   : > { %v8414_v5 = vmul.f32 -1.442695, %v7480_v26  ;;  %v10307_v19 = vpop.f32.mrf.mxu0  ;;  %v10382_v46 = vpop.f32.mrf.mxu1  ;;  %v7540_v14 = vadd.f32 1.0, %v10625_v41  ;;  %v6671_v21 = vadd.f32 %v10155_v40, %v17799_v48  ;;  %v17800_v17 = vld [vmem:[#allocation198_spill] sm:$0xff]  ;;  %v17803_v41 = vld [vmem:[#allocation156_spill] sm:$0xff]  ;;  %v17808_v40 = vld [vmem:[#allocation169_spill] sm:$0xff] }
 0x450   : > { %v7458_v59 = vsel %vm7447_vm3, %v7395_v28, %v17791_v42  ;;  %v10383_v47 = vadd.f32 %v10382_v46, %v10381_v7  ;;  %v7200_v9 = vadd.f32 %v10306_v45, %v6907_v37  ;;  %v10232_v31 = vadd.f32 %v17801_v6, %v17800_v17  ;;  %v17802_v7 = vld [vmem:[#allocation137_spill] sm:$0xff]  ;;  %v17806_v46 = vld [vmem:[#allocation12_spill] sm:$0xff] }
 0x451   : > { %10638 = vpow2.f32 %v8414_v5  ;;  %v7481_v38 = vadd.f32 %v15301_v56, %v7458_v59  ;;  %v10308_v61 = vpop.f32.mrf.mxu0  ;;  %v10384_v24 = vpop.f32.mrf.mxu1  ;;  %v10158_v49 = vadd.f32 %v17803_v41, %v17802_v7  ;;  %v10161_v35 = vadd.f32 %v17808_v40, %v17807_v22  ;;  %v17814_v41 = vld [vmem:[#allocation21_spill] sm:$0xff] }
 0x452   : > { %v10627_v1 = vpop.eup %10626  ;;  %v7402_v63 = vadd.f32 %v10383_v47, %v7193_v36  ;;  %10640 = vrcp.f32 %v7540_v14  ;;  %v10309_v43 = vadd.f32 %v10308_v61, %v10307_v19  ;;  %v17805_v19 = vld [vmem:[#allocation10_spill] sm:$0xff]  ;;  %v6929_v20 = vadd.f32 %v10232_v31, %v6662_v62 }
 0x453   : > { %v10629_v25 = vpop.eup %10628  ;;  %v8415_v12 = vmul.f32 -1.442695, %v7481_v38  ;;  %v10310_v16 = vpop.f32.mrf.mxu0  ;;  %v7541_v57 = vadd.f32 1.0, %v10627_v1  ;;  %v10235_v14 = vadd.f32 %v17806_v46, %v17805_v19 }
 0x454   : > { %v10385_v13 = vpop.f32.mrf.mxu1  ;;  %v7459_v50 = vsel %vm7447_vm3, %v7402_v63, %v17798_v33  ;;  %v7585_v8 = vmul.f32 1.25, %v10629_v25  ;;  %v7207_v0 = vadd.f32 %v10309_v43, %v6918_v44  ;;  %v17809_v63 = vld [vmem:[#allocation163_spill] sm:$0xff]  ;;  %v17810_v33 = vld [vmem:[#allocation14_spill] sm:$0xff] }
 0x455   : > { %v10386_v51 = vadd.f32 %v10385_v13, %v10384_v24  ;;  %10642 = vpow2.f32 %v8415_v12  ;;  %v7482_v18 = vadd.f32 %v15301_v56, %v7459_v50  ;;  %v10311_v39 = vpop.f32.mrf.mxu0  ;;  %v6940_v12 = vadd.f32 %v10235_v14, %v6671_v21  ;;  %v17811_v50 = vld [vmem:[#allocation17_spill] sm:$0xff]  ;;  %v17812_v21 = vld [vmem:[#allocation144_spill] sm:$0xff] }
 0x456   : > { %v10387_v2 = vpop.f32.mrf.mxu1  ;;  %v10631_v23 = vpop.eup %10630  ;;  %v8423_v26 = vadd.f32 -0.125, %v7585_v8  ;;  %10644 = vrcp.f32 %v7541_v57  ;;  %v10312_v52 = vadd.f32 %v10311_v39, %v10310_v16 }
 0x457   : > { %v7409_v29 = vadd.f32 %v10386_v51, %v7200_v9  ;;  %v10633_v34 = vpop.eup %10632  ;;  %v8416_v58 = vmul.f32 -1.442695, %v7482_v18  ;;  %v10313_v27 = vpop.f32.mrf.mxu0  ;;  %v7542_v54 = vadd.f32 1.0, %v10631_v23  ;;  %v10238_v51 = vadd.f32 %v17811_v50, %v17810_v33 }
 0x458   : > { %v10388_v28 = vpop.f32.mrf.mxu1  ;;  %v7634_v5 = vsel %vm7617_vm4, %v8423_v26, 0.0  ;;  %7618 = vst.msk [vmem:[%s15405_s15] sm:$0xff] %vm7617_vm4, %v8423_v26  ;;  %v7586_v59 = vmul.f32 1.25, %v10633_v34  ;;  %v7214_v37 = vadd.f32 %v10312_v52, %v6929_v20  ;;  %v6680_v18 = vadd.f32 %v10158_v49, %v17812_v21  ;;  %v17815_v52 = vld [vmem:[#allocation189_spill] sm:$0xff] }
 0x459   : > { %v7460_v11 = vsel %vm7447_vm3, %v7409_v29, %v17804_v15  ;;  %v10389_v32 = vadd.f32 %v10388_v28, %v10387_v2  ;;  %10646 = vpow2.f32 %v8416_v58  ;;  %v10314_v45 = vpop.f32.mrf.mxu0  ;;  %7635 = vadd.xlane.f32.xlu0 %v7634_v5  ;;  %v17813_v29 = vld [vmem:[#allocation180_spill] sm:$0xff]  ;;  %v6689_v15 = vadd.f32 %v10161_v35, %v17815_v52 }
 0x45a   : > { %v7483_v36 = vadd.f32 %v15301_v56, %v7460_v11  ;;  %v10390_v42 = vpop.f32.mrf.mxu1  ;;  %v10635_v47 = vpop.eup %10634  ;;  %10648 = vrcp.f32 %v7542_v54  ;;  %v10315_v61 = vadd.f32 %v10314_v45, %v10313_v27  ;;  %v8424_v4 = vadd.f32 -0.125, %v7586_v59 }
 0x45b   : > { %v7416_v53 = vadd.f32 %v10389_v32, %v7207_v0  ;;  %v10637_v55 = vpop.eup %10636  ;;  %v10316_v24 = vpop.f32.mrf.mxu0  ;;  %v7543_v10 = vadd.f32 1.0, %v10635_v47  ;;  %v10241_v0 = vadd.f32 %v15290_v3, %v17814_v41  ;;  %v6951_v11 = vadd.f32 %v10238_v51, %v6680_v18  ;;  %v17818_v51 = vld [vmem:[#allocation104_spill] sm:$0xff] }
 0x45c   : > { %v8417_v38 = vmul.f32 -1.442695, %v7483_v36  ;;  %v10391_v1 = vpop.f32.mrf.mxu1  ;;  %v7587_v62 = vmul.f32 1.25, %v10637_v55  ;;  %7619 = vst.msk [vmem:[%s15405_s15 + $0x8] sm:$0xff] %vm7617_vm4, %v8424_v4  ;;  %v7637_v13 = vsel %vm7617_vm4, %v8424_v4, 0.0  ;;  %v7221_v39 = vadd.f32 %v10315_v61, %v6940_v12 }
 0x45d   : > { %v7461_v25 = vsel %vm7447_vm3, %v7416_v53, %v17809_v63  ;;  %v10392_v30 = vadd.f32 %v10391_v1, %v10390_v42  ;;  %v10317_v16 = vpop.f32.mrf.mxu0  ;;  %7638 = vadd.xlane.f32.xlu0 %v7637_v13  ;;  %v17816_v42 = vld [vmem:[#allocation100_spill] sm:$0xff]  ;;  %v6962_v22 = vadd.f32 %v10241_v0, %v6689_v15  ;;  %v17817_v63 = vld [vmem:[#allocation182_spill] sm:$0xff] }
 0x45e   : > { %10650 = vpow2.f32 %v8417_v38  ;;  %v7484_v43 = vadd.f32 %v15301_v56, %v7461_v25  ;;  %v10393_v57 = vpop.f32.mrf.mxu1  ;;  %v10639_v9 = vpop.eup %10638  ;;  %v8425_v48 = vadd.f32 -0.125, %v7587_v62  ;;  %v10318_v31 = vadd.f32 %v10317_v16, %v10316_v24 }
 0x45f   : > { %v7423_v8 = vadd.f32 %v10392_v30, %v7214_v37  ;;  %10652 = vrcp.f32 %v7543_v10  ;;  %v10641_v44 = vpop.eup %10640  ;;  %v10319_v23 = vpop.f32.mrf.mxu0  ;;  %v7544_v6 = vadd.f32 1.0, %v10639_v9 }
 0x460   : > { %v8418_v2 = vmul.f32 -1.442695, %v7484_v43  ;;  %v10394_v17 = vpop.f32.mrf.mxu1  ;;  %v7640_v7 = vsel %vm7617_vm4, %v8425_v48, 0.0  ;;  %7620 = vst.msk [vmem:[%s15405_s15 + $0x10] sm:$0xff] %vm7617_vm4, %v8425_v48  ;;  %v7588_v28 = vmul.f32 1.25, %v10641_v44  ;;  %v7228_v45 = vadd.f32 %v10318_v31, %v6951_v11 }
 0x461   : > { %v7462_v26 = vsel %vm7447_vm3, %v7423_v8, %v17813_v29  ;;  %v10395_v34 = vadd.f32 %v10394_v17, %v10393_v57  ;;  %v10320_v58 = vpop.f32.mrf.mxu0  ;;  %7641 = vadd.xlane.f32.xlu1 %v7640_v7 }
 0x462   : > { %10654 = vpow2.f32 %v8418_v2  ;;  %v7485_v49 = vadd.f32 %v15301_v56, %v7462_v26  ;;  %v10396_v27 = vpop.f32.mrf.mxu1  ;;  %v10643_v54 = vpop.eup %10642  ;;  %v10321_v46 = vadd.f32 %v10320_v58, %v10319_v23  ;;  %v8426_v36 = vadd.f32 -0.125, %v7588_v28 }
 0x463   : > { %v7430_v32 = vadd.f32 %v10395_v34, %v7221_v39  ;;  %10656 = vrcp.f32 %v7544_v6  ;;  %v10645_v5 = vpop.eup %10644  ;;  %v7545_v3 = vadd.f32 1.0, %v10643_v54 }
 0x464   : > { %v8419_v19 = vmul.f32 -1.442695, %v7485_v49  ;;  %v10397_v14 = vpop.f32.mrf.mxu1  ;;  %v7589_v20 = vmul.f32 1.25, %v10645_v5  ;;  %7621 = vst.msk [vmem:[%s15405_s15 + $0x18] sm:$0xff] %vm7617_vm4, %v8426_v36  ;;  %v7643_v35 = vsel %vm7617_vm4, %v8426_v36, 0.0  ;;  %v7235_v1 = vadd.f32 %v10321_v46, %v6962_v22 }
 0x465   : > { %v7463_v59 = vsel %vm7447_vm3, %v7430_v32, %v17816_v42  ;;  %v10398_v47 = vadd.f32 %v10397_v14, %v10396_v27  ;;  %7644 = vadd.xlane.f32.xlu1 %v7643_v35 }
 0x466   : > { %10658 = vpow2.f32 %v8419_v19  ;;  %v7486_v40 = vadd.f32 %v15301_v56, %v7463_v59  ;;  %v10399_v53 = vpop.f32.mrf.mxu1  ;;  %v10647_v55 = vpop.eup %10646  ;;  %v8427_v61 = vadd.f32 -0.125, %v7589_v20 }
 0x467   : > { %v7437_v38 = vadd.f32 %v10398_v47, %v7228_v45  ;;  %10660 = vrcp.f32 %v7545_v3  ;;  %v10649_v24 = vpop.eup %10648  ;;  %v7546_v37 = vadd.f32 1.0, %v10647_v55 }
 0x468   : > { %v8420_v4 = vmul.f32 -1.442695, %v7486_v40  ;;  %v10400_v10 = vpop.f32.mrf.mxu1  ;;  %7622 = vst.msk [vmem:[%s15405_s15 + $0x20] sm:$0xff] %vm7617_vm4, %v8427_v61  ;;  %v7646_v62 = vsel %vm7617_vm4, %v8427_v61, 0.0  ;;  %v7590_v12 = vmul.f32 1.25, %v10649_v24 }
 0x469   : > { %v7464_v25 = vsel %vm7447_vm3, %v7437_v38, %v17817_v63  ;;  %v10401_v30 = vadd.f32 %v10400_v10, %v10399_v53  ;;  %7647 = vadd.xlane.f32.xlu0 %v7646_v62 }
 0x46a   : > { %10662 = vpow2.f32 %v8420_v4  ;;  %v7487_v43 = vadd.f32 %v15301_v56, %v7464_v25  ;;  %v8428_v57 = vadd.f32 -0.125, %v7590_v12 }
 0x46b   : > { %v10651_v16 = vpop.eup %10650  ;;  %v7444_v13 = vadd.f32 %v10401_v30, %v7235_v1  ;;  %10664 = vrcp.f32 %v7546_v37 }
 0x46c   : > { %v10653_v9 = vpop.eup %10652  ;;  %v8421_v33 = vmul.f32 -1.442695, %v7487_v43  ;;  %v7547_v50 = vadd.f32 1.0, %v10651_v16  ;;  %7623 = vst.msk [vmem:[%s15405_s15 + $0x28] sm:$0xff] %vm7617_vm4, %v8428_v57  ;;  %v7649_v48 = vsel %vm7617_vm4, %v8428_v57, 0.0 }
 0x46d   : > { %v7465_v8 = vsel %vm7447_vm3, %v7444_v13, %v17818_v51  ;;  %v7591_v44 = vmul.f32 1.25, %v10653_v9  ;;  %7650 = vadd.xlane.f32.xlu1 %v7649_v48 }
 0x46e   : > { %10666 = vpow2.f32 %v8421_v33  ;;  %v7488_v21 = vadd.f32 %v15301_v56, %v7465_v8 }
 0x46f   : > { %v10655_v18 = vpop.eup %10654  ;;  %v8429_v39 = vadd.f32 -0.125, %v7591_v44  ;;  %10668 = vrcp.f32 %v7547_v50 }
 0x470   : > { %v10657_v2 = vpop.eup %10656  ;;  %v8422_v23 = vmul.f32 -1.442695, %v7488_v21  ;;  %v7548_v17 = vadd.f32 1.0, %v10655_v18 }
 0x471   : > { %7624 = vst.msk [vmem:[%s15405_s15 + $0x30] sm:$0xff] %vm7617_vm4, %v8429_v39  ;;  %v7652_v60 = vsel %vm7617_vm4, %v8429_v39, 0.0  ;;  %v7592_v6 = vmul.f32 1.25, %v10657_v2 }
 0x472   : > { %10670 = vpow2.f32 %v8422_v23  ;;  %7653 = vadd.xlane.f32.xlu0 %v7652_v60 }
 0x473   : > { %v10659_v31 = vpop.eup %10658  ;;  %v8430_v29 = vadd.f32 -0.125, %v7592_v6  ;;  %10672 = vrcp.f32 %v7548_v17 }
 0x474   : > { %v10661_v56 = vpop.eup %10660  ;;  %v7549_v26 = vadd.f32 1.0, %v10659_v31 }
 0x475   : > { %7625 = vst.msk [vmem:[%s15405_s15 + $0x38] sm:$0xff] %vm7617_vm4, %v8430_v29  ;;  %v7655_v34 = vsel %vm7617_vm4, %v8430_v29, 0.0  ;;  %v7593_v7 = vmul.f32 1.25, %v10661_v56 }
 0x476   : > { %7656 = vadd.xlane.f32.xlu1 %v7655_v34  ;;  %10674 = vrcp.f32 %v7549_v26 }
 0x477   : > { %v10663_v41 = vpop.eup %10662  ;;  %v8431_v0 = vadd.f32 -0.125, %v7593_v7 }
 0x478   : > { %v10665_v49 = vpop.eup %10664  ;;  %v7550_v58 = vadd.f32 1.0, %v10663_v41 }
 0x479   : > { %7626 = vst.msk [vmem:[%s15405_s15 + $0x40] sm:$0xff] %vm7617_vm4, %v8431_v0  ;;  %v7658_v27 = vsel %vm7617_vm4, %v8431_v0, 0.0  ;;  %v7594_v28 = vmul.f32 1.25, %v10665_v49 }
 0x47a   : > { %7659 = vadd.xlane.f32.xlu0 %v7658_v27  ;;  %10676 = vrcp.f32 %v7550_v58 }
 0x47b   : > { %v10667_v54 = vpop.eup %10666  ;;  %v8432_v52 = vadd.f32 -0.125, %v7594_v28 }
 0x47c   : > { %v10669_v15 = vpop.eup %10668  ;;  %v7551_v11 = vadd.f32 1.0, %v10667_v54 }
 0x47d   : > { %7627 = vst.msk [vmem:[%s15405_s15 + $0x48] sm:$0xff] %vm7617_vm4, %v8432_v52  ;;  %v7661_v32 = vsel %vm7617_vm4, %v8432_v52, 0.0  ;;  %v7595_v5 = vmul.f32 1.25, %v10669_v15 }
 0x47e   : > { %7662 = vadd.xlane.f32.xlu1 %v7661_v32  ;;  %10678 = vrcp.f32 %v7551_v11 }
 0x47f   : > { %v10671_v19 = vpop.eup %10670  ;;  %v8433_v46 = vadd.f32 -0.125, %v7595_v5 }
 0x480   : > { %v10673_v14 = vpop.eup %10672  ;;  %v7552_v36 = vadd.f32 1.0, %v10671_v19 }
 0x481   : > { %7628 = vst.msk [vmem:[%s15405_s15 + $0x50] sm:$0xff] %vm7617_vm4, %v8433_v46  ;;  %v7664_v3 = vsel %vm7617_vm4, %v8433_v46, 0.0  ;;  %v7596_v45 = vmul.f32 1.25, %v10673_v14 }
 0x482   : > { %7665 = vadd.xlane.f32.xlu0 %v7664_v3  ;;  %10680 = vrcp.f32 %v7552_v36 }
 0x483   : > { %v10675_v42 = vpop.eup %10674  ;;  %v8434_v59 = vadd.f32 -0.125, %v7596_v45 }
 0x484   : > { %v7597_v47 = vmul.f32 1.25, %v10675_v42 }
 0x485   : > { %7629 = vst.msk [vmem:[%s15405_s15 + $0x58] sm:$0xff] %vm7617_vm4, %v8434_v59  ;;  %v7667_v20 = vsel %vm7617_vm4, %v8434_v59, 0.0 }
 0x486   : > { %7668 = vadd.xlane.f32.xlu1 %v7667_v20  ;;  %v8435_v22 = vadd.f32 -0.125, %v7597_v47 }
 0x487   : > { %v10677_v40 = vpop.eup %10676 }
 0x488   : > { %7630 = vst.msk [vmem:[%s15405_s15 + $0x60] sm:$0xff] %vm7617_vm4, %v8435_v22  ;;  %v7670_v35 = vsel %vm7617_vm4, %v8435_v22, 0.0  ;;  %v7598_v53 = vmul.f32 1.25, %v10677_v40 }
 0x489   : > { %7671 = vadd.xlane.f32.xlu0 %v7670_v35 }
 0x48a   : > { %v8436_v55 = vadd.f32 -0.125, %v7598_v53 }
 0x48b   : > { %v10679_v38 = vpop.eup %10678 }
 0x48c   : > { %7631 = vst.msk [vmem:[%s15405_s15 + $0x68] sm:$0xff] %vm7617_vm4, %v8436_v55  ;;  %v7673_v61 = vsel %vm7617_vm4, %v8436_v55, 0.0  ;;  %v7599_v24 = vmul.f32 1.25, %v10679_v38 }
 0x48d   : > { %7674 = vadd.xlane.f32.xlu1 %v7673_v61 }
 0x48e   : > { %v8437_v1 = vadd.f32 -0.125, %v7599_v24 }
 0x48f   : > { %v10681_v4 = vpop.eup %10680 }
 0x490   : > { %7632 = vst.msk [vmem:[%s15405_s15 + $0x70] sm:$0xff] %vm7617_vm4, %v8437_v1  ;;  %v7676_v10 = vsel %vm7617_vm4, %v8437_v1, 0.0  ;;  %v7600_v37 = vmul.f32 1.25, %v10681_v4 }
 0x491   : > { %7677 = vadd.xlane.f32.xlu0 %v7676_v10 }
 0x492   : > { %v8438_v63 = vadd.f32 -0.125, %v7600_v37 }
 0x494   : > { %7633 = vst.msk [vmem:[%s15405_s15 + $0x78] sm:$0xff] %vm7617_vm4, %v8438_v63  ;;  %v7679_v25 = vsel %vm7617_vm4, %v8438_v63, 0.0 }
 0x495   : > { %7680 = vadd.xlane.f32.xlu1 %v7679_v25 }
 0x4e2   : > { %v7636_v30 = vpop.xlane.xlu0 %7635 }
 0x4e3   : > { %v7682_v62 = vmul.f32 0.25, %v7636_v30 }
 0x4e5   : > { %7699 = vst.msk [vmem:[%s15486_s24] sm:$0xff] %vm7698_vm5, %v7682_v62 }
 0x4e6   : > { %v7639_v12 = vpop.xlane.xlu0 %7638 }
 0x4e7   : > { %v7683_v43 = vmul.f32 0.25, %v7639_v12 }
 0x4e9   : > { %7700 = vst.msk [vmem:[%s15486_s24 + $0x8] sm:$0xff] %vm7698_vm5, %v7683_v43 }
 0x4ea   : > { %v7642_v16 = vpop.xlane.xlu1 %7641 }
 0x4eb   : > { %v7684_v13 = vmul.f32 0.25, %v7642_v16 }
 0x4ed   : > { %7701 = vst.msk [vmem:[%s15486_s24 + $0x10] sm:$0xff] %vm7698_vm5, %v7684_v13 }
 0x4ee   : > { %v7645_v57 = vpop.xlane.xlu1 %7644 }
 0x4ef   : > { %v7685_v9 = vmul.f32 0.25, %v7645_v57 }
 0x4f1   : > { %7702 = vst.msk [vmem:[%s15486_s24 + $0x18] sm:$0xff] %vm7698_vm5, %v7685_v9 }
 0x4f2   : > { %v7648_v33 = vpop.xlane.xlu0 %7647 }
 0x4f3   : > { %v7686_v50 = vmul.f32 0.25, %v7648_v33 }
 0x4f5   : > { %7703 = vst.msk [vmem:[%s15486_s24 + $0x20] sm:$0xff] %vm7698_vm5, %v7686_v50 }
 0x4f6   : > { %v7651_v51 = vpop.xlane.xlu1 %7650 }
 0x4f7   : > { %v7687_v8 = vmul.f32 0.25, %v7651_v51 }
 0x4f9   : > { %7704 = vst.msk [vmem:[%s15486_s24 + $0x28] sm:$0xff] %vm7698_vm5, %v7687_v8 }
 0x4fb   : > { %v7654_v48 = vpop.xlane.xlu0 %7653 }
 0x4fc   : > { %v7688_v44 = vmul.f32 0.25, %v7654_v48 }
 0x4fe   : > { %7705 = vst.msk [vmem:[%s15486_s24 + $0x30] sm:$0xff] %vm7698_vm5, %v7688_v44 }
 0x4ff   : > { %v7657_v21 = vpop.xlane.xlu1 %7656 }
 0x500   : > { %v7689_v18 = vmul.f32 0.25, %v7657_v21 }
 0x502   : > { %7706 = vst.msk [vmem:[%s15486_s24 + $0x38] sm:$0xff] %vm7698_vm5, %v7689_v18 }
 0x503   : > { %v7660_v39 = vpop.xlane.xlu0 %7659 }
 0x504   : > { %v7690_v2 = vmul.f32 0.25, %v7660_v39 }
 0x506   : > { %7707 = vst.msk [vmem:[%s15486_s24 + $0x40] sm:$0xff] %vm7698_vm5, %v7690_v2 }
 0x507   : > { %v7663_v23 = vpop.xlane.xlu1 %7662 }
 0x508   : > { %v7691_v17 = vmul.f32 0.25, %v7663_v23 }
 0x50a   : > { %7708 = vst.msk [vmem:[%s15486_s24 + $0x48] sm:$0xff] %vm7698_vm5, %v7691_v17 }
 0x50b   : > { %v7666_v60 = vpop.xlane.xlu0 %7665 }
 0x50c   : > { %v7692_v6 = vmul.f32 0.25, %v7666_v60 }
 0x50e   : > { %7709 = vst.msk [vmem:[%s15486_s24 + $0x50] sm:$0xff] %vm7698_vm5, %v7692_v6 }
 0x50f   : > { %v7669_v31 = vpop.xlane.xlu1 %7668 }
 0x510   : > { %v7693_v29 = vmul.f32 0.25, %v7669_v31 }
 0x512   : > { %7710 = vst.msk [vmem:[%s15486_s24 + $0x58] sm:$0xff] %vm7698_vm5, %v7693_v29  ;;  %v7672_v56 = vpop.xlane.xlu0 %7671 }
 0x513   : > { %v7694_v26 = vmul.f32 0.25, %v7672_v56 }
 0x515   : > { %7711 = vst.msk [vmem:[%s15486_s24 + $0x60] sm:$0xff] %vm7698_vm5, %v7694_v26 }
 0x516   : > { %v7675_v34 = vpop.xlane.xlu1 %7674 }
 0x517   : > { %v7695_v7 = vmul.f32 0.25, %v7675_v34 }
 0x519   : > { %7712 = vst.msk [vmem:[%s15486_s24 + $0x68] sm:$0xff] %vm7698_vm5, %v7695_v7 }
 0x51a   : > { %v7678_v41 = vpop.xlane.xlu0 %7677 }
 0x51b   : > { %v7696_v0 = vmul.f32 0.25, %v7678_v41 }
 0x51d   : > { %7713 = vst.msk [vmem:[%s15486_s24 + $0x70] sm:$0xff] %vm7698_vm5, %v7696_v0  ;;  %7725 = sbr.rel (!%p10954_p5) target bundleno = 1355 (0x54b), region = 66 }
 0x51e   : > { %v7681_v49 = vpop.xlane.xlu1 %7680 }
 0x51f   : > { %v7697_v58 = vmul.f32 0.25, %v7681_v49 }
 0x521   : > { %7714 = vst.msk [vmem:[%s15486_s24 + $0x78] sm:$0xff] %vm7698_vm5, %v7697_v58 }
 0x522   : > { %s17835_s28 = smov (!%p7728_p4, %s7727_s28), 16 }
 0x523   : > { %s8442_s9 = sshll.u32 %s17835_s28, 7 }
 0x524   : > { %p8445_p6 = scmp.eq.s32.totalorder %s8442_s9, 0 }
 0x525   : > { %s15533_s27 = sshrl.u32 (!%p8445_p6), %s17835_s28, 4 }
 0x526   : > { %7736 = sbr.rel (%p8445_p6) target bundleno = 1355 (0x54b), region = 70  ;;  %p8446_p7 = scmp.le.s32.totalorder (!%p8445_p6), %s15533_s27, 0 }
 0x52b   : > { %8205 = sbr.rel (%p8446_p7) target bundleno = 1338 (0x53a), region = 250  ;;  %s17819_s5 = smov (!%p8446_p7), %s15527_s6 }
 0x52c   : > { %s17820_s7 = smov (!%p8446_p7), %s15405_s15  ;;  %s15542_s8 = smov (!%p8446_p7), 0  }
 0x52d   : > { %s15544_s10 = smov (!%p8446_p7), 0  }
 0x530 LB: >> { %v7829_v27 = vld [vmem:[%s10840_s7] sm:$0xff]  ;;  %v7831_v28 = vld [vmem:[%s10840_s7 + $0x8] sm:$0xff]  ;;  %v7833_v54 = vld [vmem:[%s10840_s7 + $0x10] sm:$0xff]  ;;  %s7861_s11 = sadd.s32 1, %s10844_s8  ;;  %s7823_s10 = sadd.s32 1, %s10848_s10   ;;  %s10848_s10 = sphi %s15544_s10, %s7823_s10   ;;  %s10844_s8 = sphi %s15542_s8, %s17821_s8   ;;  %s10840_s7 = sphi %s17820_s7, %s7866_s7   ;;  %s10836_s5 = sphi %s17819_s5, %s7867_s5  }
 0x531   : >> { %7830 = vst [vmem:[%s10836_s5] sm:$0xff] %v7829_v27  ;;  %7832 = vst [vmem:[%s10836_s5 + $0x8] sm:$0xff] %v7831_v28  ;;  %v7835_v52 = vld [vmem:[%s10840_s7 + $0x18] sm:$0xff]  ;;  %v7837_v15 = vld [vmem:[%s10840_s7 + $0x20] sm:$0xff]  ;;  %p7862_p8 = scmp.ge.s32.totalorder %s7861_s11, %s15533_s27  ;;  %p7822_p9 = scmp.ge.s32.totalorder %s7823_s10, %s15533_s27 }
 0x532   : >> { %7834 = vst [vmem:[%s10836_s5 + $0x10] sm:$0xff] %v7833_v54  ;;  %v7839_v11 = vld [vmem:[%s10840_s7 + $0x28] sm:$0xff]  ;;  %7836 = vst [vmem:[%s10836_s5 + $0x18] sm:$0xff] %v7835_v52  ;;  %v7841_v32 = vld [vmem:[%s10840_s7 + $0x30] sm:$0xff] }
 0x533   : >> { %7838 = vst [vmem:[%s10836_s5 + $0x20] sm:$0xff] %v7837_v15  ;;  %7840 = vst [vmem:[%s10836_s5 + $0x28] sm:$0xff] %v7839_v11  ;;  %v7843_v5 = vld [vmem:[%s10840_s7 + $0x38] sm:$0xff]  ;;  %v7845_v19 = vld [vmem:[%s10840_s7 + $0x40] sm:$0xff]  ;;  %s17837_s11 = smov (%p7862_p8, %s7861_s11), 0 }
 0x534   : >> { %7842 = vst [vmem:[%s10836_s5 + $0x30] sm:$0xff] %v7841_v32  ;;  %7844 = vst [vmem:[%s10836_s5 + $0x38] sm:$0xff] %v7843_v5  ;;  %v7847_v46 = vld [vmem:[%s10840_s7 + $0x48] sm:$0xff]  ;;  %v7849_v14 = vld [vmem:[%s10840_s7 + $0x50] sm:$0xff]  ;;  %s8447_s12 = sshll.u32 %s17837_s11, 7  ;;  %s17821_s8 = smov %s17837_s11 }
 0x535   : >> { %7846 = vst [vmem:[%s10836_s5 + $0x40] sm:$0xff] %v7845_v19  ;;  %v7851_v36 = vld [vmem:[%s10840_s7 + $0x58] sm:$0xff]  ;;  %7848 = vst [vmem:[%s10836_s5 + $0x48] sm:$0xff] %v7847_v46  ;;  %v7853_v3 = vld [vmem:[%s10840_s7 + $0x60] sm:$0xff]  ;;  %7825 = sbr.rel (!%p7822_p9) target bundleno = 1328 (0x530), region = 256 }
 0x536   : >> { %7850 = vst [vmem:[%s10836_s5 + $0x50] sm:$0xff] %v7849_v14  ;;  %7852 = vst [vmem:[%s10836_s5 + $0x58] sm:$0xff] %v7851_v36  ;;  %v7855_v45 = vld [vmem:[%s10840_s7 + $0x68] sm:$0xff]  ;;  %v7857_v42 = vld [vmem:[%s10840_s7 + $0x70] sm:$0xff] }
 0x537   : >> { %7854 = vst [vmem:[%s10836_s5 + $0x60] sm:$0xff] %v7853_v3  ;;  %7856 = vst [vmem:[%s10836_s5 + $0x68] sm:$0xff] %v7855_v45  ;;  %v7859_v59 = vld [vmem:[%s10840_s7 + $0x78] sm:$0xff]  ;;  %s7866_s7 = scalar_lea.vmem %s15405_s15, %s8447_s12 [#allocation3]  }
 0x538   : >> { %7858 = vst [vmem:[%s10836_s5 + $0x70] sm:$0xff] %v7857_v42  ;;  %7860 = vst [vmem:[%s10836_s5 + $0x78] sm:$0xff] %v7859_v59  ;;  %s7867_s5 = scalar_lea.vmem %s15527_s6, %s8447_s12  }
 0x53a PF: > { %s15602_s13 = sand.u32 15, %s17835_s28   ;;  %s8477_s17 = sshll.u32 %s15533_s27, 7 }
 0x53b   : > { %s7872_s14 = scalar_lea.vmem %s15405_s15, %s8477_s17 [#allocation3]   ;;  %s7874_s20 = scalar_lea.vmem %s15527_s6, %s8477_s17  }
 0x53c   : > { %p8452_p10 = scmp.le.s32.totalorder %s15602_s13, 0 }
 0x53d   : > { %s10850_s21 = smov (!%p8452_p10), %s7874_s20   ;;  %s10854_s25 = smov (!%p8452_p10), %s7872_s14  }
 0x53e   : > { %8219 = sbr.rel (%p8452_p10) target bundleno = 1355 (0x54b), region = 261  ;;  %s10858_s26 = smov (!%p8452_p10), 0  }
 0x53f   : > { %s10862_s29 = smov (!%p8452_p10), 0  }
 0x543 LB: >> { %v7884_v47 = vld [vmem:[%s10856_s25] sm:$0xff]  ;;  %s7886_s28 = sadd.s32 1, %s10860_s26  ;;  %s7878_s29 = sadd.s32 1, %s10864_s29   ;;  %s10864_s29 = sphi %s10862_s29, %s7878_s29   ;;  %s10860_s26 = sphi %s10858_s26, %s10859_s26   ;;  %s10856_s25 = sphi %s10854_s25, %s7891_s25   ;;  %s10852_s21 = sphi %s10850_s21, %s7892_s21  }
 0x544   : >> { %7885 = vst [vmem:[%s10852_s21] sm:$0xff] %v7884_v47  ;;  %p7887_p11 = scmp.ge.s32.totalorder %s7886_s28, %s15602_s13  ;;  %p7877_p12 = scmp.ge.s32.totalorder %s7878_s29, %s15602_s13 }
 0x546   : >> { %s17839_s28 = smov (%p7887_p11, %s7886_s28), 0  ;;  %7880 = sbr.rel (!%p7877_p12) target bundleno = 1347 (0x543), region = 267 }
 0x547   : >> { %s8453_s15 = sshll.u32 %s17839_s28, 3  ;;  %s10859_s26 = smov %s17839_s28  }
 0x548   : >> { %s7891_s25 = scalar_lea.vmem %s7872_s14, %s8453_s15 [#allocation3]   ;;  %s7892_s21 = scalar_lea.vmem %s7874_s20, %s8453_s15  }
 0x54b PF: > { %7898 = sbr.rel (!%p10954_p5) target bundleno = 1401 (0x579), region = 118  ;;  %s8455_s30 = sshll.u32 (%p10954_p5), %s10939_s18, 4 }
 0x54c   : > { %s8479_s6 = sshll.u32 (%p10954_p5), %s10939_s18, 7  ;;  %s7900_s9 = ssub.s32 (%p10954_p5), 38, %s8455_s30 }
 0x54d   : > { %s15617_s7 = scalar_lea.vmem (%p10954_p5), %s15714_s4, %s8479_s6   ;;  %p7901_p13 = scmp.lt.s32.totalorder (%p10954_p5), %s7900_s9, 16 }
 0x550   : > { %s17841_s9 = smov (!%p7901_p13, %s7900_s9), 16 }
 0x551   : > { %s8456_s8 = sshll.u32 %s17841_s9, 7 }
 0x552   : > { %p8459_p0 = scmp.eq.s32.totalorder %s8456_s8, 0 }
 0x553   : > { %s15623_s23 = sshrl.u32 (!%p8459_p0), %s17841_s9, 4 }
 0x554   : > { %7909 = sbr.rel (%p8459_p0) target bundleno = 1401 (0x579), region = 122  ;;  %p8460_p5 = scmp.le.s32.totalorder (!%p8459_p0), %s15623_s23, 0 }
 0x559   : > { %8233 = sbr.rel (%p8460_p5) target bundleno = 1384 (0x568), region = 272  ;;  %s17822_s18 = smov (!%p8460_p5), %s15617_s7 }
 0x55a   : > { %s17823_s10 = smov (!%p8460_p5), %s15486_s24  ;;  %s15632_s11 = smov (!%p8460_p5), 0  }
 0x55b   : > { %s15634_s12 = smov (!%p8460_p5), 0  }
 0x55e LB: >> { %v8002_v20 = vld [vmem:[%s10872_s10] sm:$0xff]  ;;  %v8004_v22 = vld [vmem:[%s10872_s10 + $0x8] sm:$0xff]  ;;  %v8006_v40 = vld [vmem:[%s10872_s10 + $0x10] sm:$0xff]  ;;  %s8034_s13 = sadd.s32 1, %s10876_s11  ;;  %s7996_s12 = sadd.s32 1, %s10880_s12   ;;  %s10880_s12 = sphi %s15634_s12, %s7996_s12   ;;  %s10876_s11 = sphi %s15632_s11, %s17824_s11   ;;  %s10872_s10 = sphi %s17823_s10, %s8039_s10   ;;  %s10868_s18 = sphi %s17822_s18, %s8040_s18  }
 0x55f   : >> { %8003 = vst [vmem:[%s10868_s18] sm:$0xff] %v8002_v20  ;;  %8005 = vst [vmem:[%s10868_s18 + $0x8] sm:$0xff] %v8004_v22  ;;  %v8008_v35 = vld [vmem:[%s10872_s10 + $0x18] sm:$0xff]  ;;  %v8010_v53 = vld [vmem:[%s10872_s10 + $0x20] sm:$0xff]  ;;  %p8035_p1 = scmp.ge.s32.totalorder %s8034_s13, %s15623_s23  ;;  %p7995_p2 = scmp.ge.s32.totalorder %s7996_s12, %s15623_s23 }
 0x560   : >> { %8007 = vst [vmem:[%s10868_s18 + $0x10] sm:$0xff] %v8006_v40  ;;  %v8012_v55 = vld [vmem:[%s10872_s10 + $0x28] sm:$0xff]  ;;  %8009 = vst [vmem:[%s10868_s18 + $0x18] sm:$0xff] %v8008_v35  ;;  %v8014_v38 = vld [vmem:[%s10872_s10 + $0x30] sm:$0xff] }
 0x561   : >> { %8011 = vst [vmem:[%s10868_s18 + $0x20] sm:$0xff] %v8010_v53  ;;  %8013 = vst [vmem:[%s10868_s18 + $0x28] sm:$0xff] %v8012_v55  ;;  %v8016_v61 = vld [vmem:[%s10872_s10 + $0x38] sm:$0xff]  ;;  %v8018_v24 = vld [vmem:[%s10872_s10 + $0x40] sm:$0xff]  ;;  %s17843_s13 = smov (%p8035_p1, %s8034_s13), 0 }
 0x562   : >> { %8015 = vst [vmem:[%s10868_s18 + $0x30] sm:$0xff] %v8014_v38  ;;  %8017 = vst [vmem:[%s10868_s18 + $0x38] sm:$0xff] %v8016_v61  ;;  %v8020_v1 = vld [vmem:[%s10872_s10 + $0x48] sm:$0xff]  ;;  %v8022_v4 = vld [vmem:[%s10872_s10 + $0x50] sm:$0xff]  ;;  %s8461_s17 = sshll.u32 %s17843_s13, 7  ;;  %s17824_s11 = smov %s17843_s13 }
 0x563   : >> { %8019 = vst [vmem:[%s10868_s18 + $0x40] sm:$0xff] %v8018_v24  ;;  %v8024_v10 = vld [vmem:[%s10872_s10 + $0x58] sm:$0xff]  ;;  %8021 = vst [vmem:[%s10868_s18 + $0x48] sm:$0xff] %v8020_v1  ;;  %v8026_v37 = vld [vmem:[%s10872_s10 + $0x60] sm:$0xff]  ;;  %7998 = sbr.rel (!%p7995_p2) target bundleno = 1374 (0x55e), region = 278 }
 0x564   : >> { %8023 = vst [vmem:[%s10868_s18 + $0x50] sm:$0xff] %v8022_v4  ;;  %8025 = vst [vmem:[%s10868_s18 + $0x58] sm:$0xff] %v8024_v10  ;;  %v8028_v63 = vld [vmem:[%s10872_s10 + $0x68] sm:$0xff]  ;;  %v8030_v25 = vld [vmem:[%s10872_s10 + $0x70] sm:$0xff] }
 0x565   : >> { %8027 = vst [vmem:[%s10868_s18 + $0x60] sm:$0xff] %v8026_v37  ;;  %8029 = vst [vmem:[%s10868_s18 + $0x68] sm:$0xff] %v8028_v63  ;;  %v8032_v30 = vld [vmem:[%s10872_s10 + $0x78] sm:$0xff]  ;;  %s8039_s10 = scalar_lea.vmem %s15486_s24, %s8461_s17 [#allocation4]  }
 0x566   : >> { %8031 = vst [vmem:[%s10868_s18 + $0x70] sm:$0xff] %v8030_v25  ;;  %8033 = vst [vmem:[%s10868_s18 + $0x78] sm:$0xff] %v8032_v30  ;;  %s8040_s18 = scalar_lea.vmem %s15617_s7, %s8461_s17  }
 0x568 PF: > { %s15692_s14 = sand.u32 15, %s17841_s9   ;;  %s8480_s20 = sshll.u32 %s15623_s23, 7 }
 0x569   : > { %s8045_s21 = scalar_lea.vmem %s15486_s24, %s8480_s20 [#allocation4]   ;;  %s8047_s25 = scalar_lea.vmem %s15617_s7, %s8480_s20  }
 0x56a   : > { %p8466_p3 = scmp.le.s32.totalorder %s15692_s14, 0 }
 0x56b   : > { %s10882_s26 = smov (!%p8466_p3), %s8047_s25   ;;  %s10886_s29 = smov (!%p8466_p3), %s8045_s21  }
 0x56c   : > { %8247 = sbr.rel (%p8466_p3) target bundleno = 1401 (0x579), region = 283  ;;  %s10890_s28 = smov (!%p8466_p3), 0  }
 0x56d   : > { %s10894_s15 = smov (!%p8466_p3), 0  }
 0x571 LB: >> { %v8057_v62 = vld [vmem:[%s10888_s29] sm:$0xff]  ;;  %s8059_s30 = sadd.s32 1, %s10892_s28  ;;  %s8051_s15 = sadd.s32 1, %s10896_s15   ;;  %s10896_s15 = sphi %s10894_s15, %s8051_s15   ;;  %s10892_s28 = sphi %s10890_s28, %s10891_s28   ;;  %s10888_s29 = sphi %s10886_s29, %s8064_s29   ;;  %s10884_s26 = sphi %s10882_s26, %s8065_s26  }
 0x572   : >> { %8058 = vst [vmem:[%s10884_s26] sm:$0xff] %v8057_v62  ;;  %p8060_p4 = scmp.ge.s32.totalorder %s8059_s30, %s15692_s14  ;;  %p8050_p6 = scmp.ge.s32.totalorder %s8051_s15, %s15692_s14 }
 0x574   : >> { %s17845_s30 = smov (%p8060_p4, %s8059_s30), 0  ;;  %8053 = sbr.rel (!%p8050_p6) target bundleno = 1393 (0x571), region = 289 }
 0x575   : >> { %s8467_s24 = sshll.u32 %s17845_s30, 3  ;;  %s10891_s28 = smov %s17845_s30  }
 0x576   : >> { %s8064_s29 = scalar_lea.vmem %s8045_s21, %s8467_s24 [#allocation4]   ;;  %s8065_s26 = scalar_lea.vmem %s8047_s25, %s8467_s24  }
 0x579 PF: > { %p12_p7 = scmp.ge.s32.totalorder %s10942_s19, 5   ;;  %s17825_s15 = smov %s10796_s16 }
 0x57a   : > { %s17826_s16 = smov %s10952_s22  ;;  %s17827_s17 = smov %s10942_s19 }
 0x57b   :  { %14 = sbr.rel (!%p12_p7) target bundleno = 2 (0x2), region = 300 }

</bundles_post_ra>
